<compile_context>
chip_gen: v5e
topology: v5e:2x2
jax: 0.10.0
libtpu: 0.0.40
codegen_flags: <defaults>
</compile_context>

<pallas_src>
import functools

import jax
import jax.numpy as jnp
from jax.experimental import pallas as pl
from jax.experimental.pallas import tpu as pltpu


def _layernorm(v, gamma, beta, eps=1e-5):
    mu = jnp.mean(v, axis=-1, keepdims=True)
    var = jnp.mean((v - mu) ** 2, axis=-1, keepdims=True)
    return (v - mu) * jax.lax.rsqrt(var + eps) * gamma + beta


def block_kernel(x_ref, wqkv_ref, wo_ref, wf1_ref, wf2_ref, pv_ref, bf1_ref,
                 o_ref, *, heads_num, seq_len):
    M, C = x_ref.shape                       # M = Bblk * T rows
    T = seq_len
    Bblk = M // T
    hs = C // heads_num
    HB = heads_num * Bblk                    # einsum batch = heads x sequences

    # packed small params: rows = [bo, g1, b1, g2, b2, bf2]
    bo  = pv_ref[0:1, :]
    g1  = pv_ref[1:2, :]
    b1  = pv_ref[2:3, :]
    g2  = pv_ref[3:4, :]
    b2  = pv_ref[4:5, :]
    bf2 = pv_ref[5:6, :]
    bf1 = bf1_ref[...]                       # (1, 4C) f32

    # ------------------- self-attention branch -------------------
    xln = _layernorm(x_ref[...].astype(jnp.float32), g1, b1)      # (M, C) f32

    # fused QKV projection: one (M, C) @ (C, 3C) MXU matmul, bf16 in / f32 acc.
    # The attention scale is pre-folded into the Q columns of wqkv.
    qkv = jnp.dot(xln.astype(jnp.bfloat16), wqkv_ref[...],
                  preferred_element_type=jnp.float32)              # (M, 3C) f32

    # Stack all heads into the einsum batch dim: (heads*Bblk, T, hs), bf16.
    # Slices/reshapes stay in f32 (8-row aligned tiles); one cast per tensor.
    def stack_heads(base):
        return jnp.concatenate(
            [qkv[:, base + h * hs: base + (h + 1) * hs].reshape(Bblk, T, hs)
             for h in range(heads_num)], axis=0).astype(jnp.bfloat16)

    q = stack_heads(0)                        # (HB, T, hs) bf16 (pre-scaled)
    k = stack_heads(C)
    v = stack_heads(2 * C)

    row = jax.lax.broadcasted_iota(jnp.int32, (1, T, T), 1)
    col = jax.lax.broadcasted_iota(jnp.int32, (1, T, T), 2)
    causal = col <= row                       # (1, T, T) lower-triangular

    # ONE batched score einsum / softmax / PV einsum for all heads+sequences.
    s = jnp.einsum("bqd,bkd->bqk", q, k,
                   preferred_element_type=jnp.float32)             # (HB, T, T)
    s = jnp.where(causal, s, -1e30)
    s = s - jnp.max(s, axis=-1, keepdims=True)
    p = jnp.exp(s)
    p = p * pl.reciprocal(jnp.sum(p, axis=-1, keepdims=True), approx=True)

    ah = jnp.einsum("bqk,bkd->bqd", p.astype(jnp.bfloat16), v,
                    preferred_element_type=jnp.float32)            # (HB, T, hs)

    # Reassemble heads along lanes -> ONE (M, C) @ (C, C) projection matmul.
    ah_cat = jnp.concatenate(
        [ah[h * Bblk:(h + 1) * Bblk].reshape(M, hs) for h in range(heads_num)],
        axis=-1).astype(jnp.bfloat16)                              # (M, C) bf16
    sa = jnp.dot(ah_cat, wo_ref[...], preferred_element_type=jnp.float32)

    # first residual (+ proj bias); re-read x from VMEM (don't keep it live).
    x1 = x_ref[...].astype(jnp.float32) + sa + bo

    # ------------------- feed-forward branch -------------------
    x1ln = _layernorm(x1, g2, b2)
    h1 = jnp.dot(x1ln.astype(jnp.bfloat16), wf1_ref[...],
                 preferred_element_type=jnp.float32) + bf1
    h1 = jnp.maximum(h1, 0.0)                 # ReLU (f32)
    ff = jnp.dot(h1.astype(jnp.bfloat16), wf2_ref[...],
                 preferred_element_type=jnp.float32) + bf2

    o_ref[...] = (x1 + ff).astype(o_ref.dtype)   # second residual


def _num_tensorcores():
    """TensorCores per chip: 2 on v7x (feed both via the parallel axis), else 1."""
    try:
        kind = jax.devices()[0].device_kind.lower().replace(" ", "")
        if "v7" in kind or "7x" in kind:
            return 2
    except Exception:
        pass
    return 1


def _choose_batch_block(B, T, num_cores):
    """Pick Bblk (sequences per grid step) with a tiny cost model.

    Goals (per review): minimize padded work, keep M = Bblk*T near/above 128
    rows (MXU sublane fill), keep >= num_cores steps so v7x's two TCs are both
    fed, and prefer fewer steps (~0.35us fixed overhead per step).
    """
    best_key, best_bblk = None, 1
    for bblk in range(1, B + 1):
        m = bblk * T
        if m > max(512, T):
            continue                      # keep VMEM / live ranges bounded
        steps = pl.cdiv(B, bblk)
        if steps > 1 and m % 8 != 0:
            continue                      # block second-minor must be 8-aligned
        serial_steps = pl.cdiv(steps, num_cores)
        # per-step cost ~ rows of work (underfilled steps cost like 128 rows)
        # plus a fixed per-step overhead expressed in row-equivalents.
        cost = serial_steps * (max(m, 128) + 32)
        waste = steps * bblk - B          # padded (dead) batches: tie-breaker
        key = (cost, waste, steps)
        if best_key is None or key < best_key:
            best_key, best_bblk = key, bblk
    return best_bblk


def block_forward(x, params, heads_num):
    B, T, C = x.shape
    H = 4 * C

    num_cores = _num_tensorcores()
    Bblk = _choose_batch_block(B, T, num_cores)
    Bpad = pl.cdiv(B, Bblk) * Bblk
    if Bpad != B:
        x = jnp.pad(x, ((0, Bpad - B), (0, 0), (0, 0)))
    xr = x.reshape(Bpad * T, C)               # rows = (batch, time) flattened
    M = Bblk * T

    # fused / packed parameters (weights bf16 for the MXU, vectors f32).
    # The attention scale (C**-0.5, PyTorch scales by embd_size) is folded
    # into the Q columns of the fused QKV weight -> no in-kernel multiply.
    scale = float(C) ** -0.5
    wqkv = jnp.concatenate(
        [params["wq"] * scale, params["wk"], params["wv"]],
        axis=1).astype(jnp.bfloat16)
    wo = params["wo"].astype(jnp.bfloat16)
    wf1 = params["wf1"].astype(jnp.bfloat16)
    wf2 = params["wf2"].astype(jnp.bfloat16)
    pvec = jnp.concatenate(
        [params["bo"], params["g1"], params["b1"],
         params["g2"], params["b2"], params["bf2"]], axis=0).astype(jnp.float32)
    bf1 = params["bf1"].astype(jnp.float32)

    kernel = functools.partial(block_kernel, heads_num=heads_num, seq_len=T)
    full = lambda shape: pl.BlockSpec(shape, lambda i: (0, 0))

    out = pl.pallas_call(
        kernel,
        out_shape=jax.ShapeDtypeStruct((Bpad * T, C), x.dtype),
        grid_spec=pltpu.PrefetchScalarGridSpec(
            num_scalar_prefetch=0,
            grid=(Bpad // Bblk,),
            in_specs=[
                pl.BlockSpec((M, C), lambda i: (i, 0)),   # x rows (Bblk seqs)
                full((C, 3 * C)),   # fused W_{q,k,v} (Q columns pre-scaled)
                full((C, C)),       # proj weight
                full((C, H)),       # ffwd W1
                full((H, C)),       # ffwd W2
                full((6, C)),       # packed [bo, g1, b1, g2, b2, bf2]
                full((1, H)),       # ffwd b1
            ],
            out_specs=pl.BlockSpec((M, C), lambda i: (i, 0)),
        ),
        compiler_params=pltpu.CompilerParams(
            dimension_semantics=("parallel",),
            vmem_limit_bytes=32 * 1024 * 1024,
        ),
    )(xr, wqkv, wo, wf1, wf2, pvec, bf1)

    return out.reshape(Bpad, T, C)[:B]


def block_reference(x, params, heads_num):
    """Pure-JAX f32 reference mirroring the PyTorch forward (eval mode)."""
    x = x.astype(jnp.float32)
    B, T, C = x.shape
    hs = C // heads_num
    xln = _layernorm(x, params["g1"][0], params["b1"][0])
    q = xln @ params["wq"]
    k = xln @ params["wk"]
    v = xln @ params["wv"]
    mask = jnp.tril(jnp.ones((T, T), dtype=bool))
    outs = []
    for h in range(heads_num):
        qh, kh, vh = (a[..., h * hs:(h + 1) * hs] for a in (q, k, v))
        wei = jnp.einsum("btd,bsd->bts", qh, kh) * (C ** -0.5)
        wei = jnp.where(mask, wei, -jnp.inf)
        wei = jax.nn.softmax(wei, axis=-1)
        outs.append(jnp.einsum("bts,bsd->btd", wei, vh))
    sa = jnp.concatenate(outs, axis=-1) @ params["wo"] + params["bo"][0]
    x1 = x + sa
    x1ln = _layernorm(x1, params["g2"][0], params["b2"][0])
    ff = jnp.maximum(x1ln @ params["wf1"] + params["bf1"][0], 0.0) @ params["wf2"] + params["bf2"][0]
    return x1 + ff


def init_params(key, embd_size):
    C, H = embd_size, 4 * embd_size
    ks = jax.random.split(key, 8)
    n = lambda k, shape, scale: (jax.random.normal(k, shape, jnp.float32) * scale)
    return {
        "wq": n(ks[0], (C, C), 0.05), "wk": n(ks[1], (C, C), 0.05),
        "wv": n(ks[2], (C, C), 0.05), "wo": n(ks[3], (C, C), 0.05),
        "bo": jnp.zeros((1, C), jnp.float32),
        "g1": jnp.ones((1, C), jnp.float32), "b1": jnp.zeros((1, C), jnp.float32),
        "g2": jnp.ones((1, C), jnp.float32), "b2": jnp.zeros((1, C), jnp.float32),
        "wf1": n(ks[4], (C, H), 0.05), "bf1": n(ks[5], (1, H), 0.02),
        "wf2": n(ks[6], (H, C), 0.05), "bf2": n(ks[7], (1, C), 0.02),
    }


if __name__ == "__main__":
    # block_size = T = 8, embd_size = 32, 4 heads (head_size = 8)
    # B = 20: zero batch padding with the new Bblk selection (20 on v5e/v6e,
    # 10 on v7x so both TensorCores get a grid step).
    B, T, C, HEADS = 20, 8, 32, 4
    key = jax.random.PRNGKey(0)
    k_x, k_p = jax.random.split(key)
    x = jax.random.normal(k_x, (B, T, C), jnp.float32)
    params = init_params(k_p, C)

    out = jax.block_until_ready(block_forward(x, params, HEADS))
    ref = block_reference(x, params, HEADS)

    assert out.shape == (B, T, C)
    # bf16 MXU inputs (f32 accumulation) + approx softmax reciprocal ->
    # compare against the f32 reference with a covering tolerance.
    assert jnp.allclose(out, ref, atol=2e-2, rtol=2e-2), (
        "mismatch vs reference: max abs err = "
        f"{float(jnp.max(jnp.abs(out - ref)))}")
    print("KERNEL_OK")
</pallas_src>

<mosaic_0001>
module attributes {stable_mosaic.version = 11 : i64} {
  func.func @block_kernel(%arg0: i32, %arg1: memref<160x32xf32, #tpu.memory_space<vmem>>, %arg2: memref<32x96xbf16, #tpu.memory_space<vmem>>, %arg3: memref<32x32xbf16, #tpu.memory_space<vmem>>, %arg4: memref<32x128xbf16, #tpu.memory_space<vmem>>, %arg5: memref<128x32xbf16, #tpu.memory_space<vmem>>, %arg6: memref<6x32xf32, #tpu.memory_space<vmem>>, %arg7: memref<1x128xf32, #tpu.memory_space<vmem>>, %arg8: memref<160x32xf32, #tpu.memory_space<vmem>>) attributes {dimension_semantics = [#tpu.dimension_semantics<parallel>], iteration_bounds = array<i64: 1>, scalar_prefetch = 0 : i64, scratch_operands = 0 : i64, tpu.core_type = #tpu.core_type<tc>, window_params = [{transform_indices = @transform_0, window_bounds = array<i64: 160, 32>}, {pipeline_mode = #tpu.pipeline_mode<synchronous>, transform_indices = @transform_1, window_bounds = array<i64: 32, 96>}, {pipeline_mode = #tpu.pipeline_mode<synchronous>, transform_indices = @transform_2, window_bounds = array<i64: 32, 32>}, {pipeline_mode = #tpu.pipeline_mode<synchronous>, transform_indices = @transform_3, window_bounds = array<i64: 32, 128>}, {pipeline_mode = #tpu.pipeline_mode<synchronous>, transform_indices = @transform_4, window_bounds = array<i64: 128, 32>}, {pipeline_mode = #tpu.pipeline_mode<synchronous>, transform_indices = @transform_5, window_bounds = array<i64: 6, 32>}, {pipeline_mode = #tpu.pipeline_mode<synchronous>, transform_indices = @transform_6, window_bounds = array<i64: 1, 128>}, {transform_indices = @transform_7, window_bounds = array<i64: 160, 32>}]} {
    %c0 = arith.constant 0 : index
    %c0_0 = arith.constant 0 : index
    %0 = vector.load %arg6[%c0, %c0_0] : memref<6x32xf32, #tpu.memory_space<vmem>>, vector<1x32xf32>
    %c1 = arith.constant 1 : index
    %c0_1 = arith.constant 0 : index
    %1 = vector.load %arg6[%c1, %c0_1] : memref<6x32xf32, #tpu.memory_space<vmem>>, vector<1x32xf32>
    %c2 = arith.constant 2 : index
    %c0_2 = arith.constant 0 : index
    %2 = vector.load %arg6[%c2, %c0_2] : memref<6x32xf32, #tpu.memory_space<vmem>>, vector<1x32xf32>
    %c3 = arith.constant 3 : index
    %c0_3 = arith.constant 0 : index
    %3 = vector.load %arg6[%c3, %c0_3] : memref<6x32xf32, #tpu.memory_space<vmem>>, vector<1x32xf32>
    %c4 = arith.constant 4 : index
    %c0_4 = arith.constant 0 : index
    %4 = vector.load %arg6[%c4, %c0_4] : memref<6x32xf32, #tpu.memory_space<vmem>>, vector<1x32xf32>
    %c5 = arith.constant 5 : index
    %c0_5 = arith.constant 0 : index
    %5 = vector.load %arg6[%c5, %c0_5] : memref<6x32xf32, #tpu.memory_space<vmem>>, vector<1x32xf32>
    %c0_6 = arith.constant 0 : index
    %c0_7 = arith.constant 0 : index
    %6 = vector.load %arg7[%c0_6, %c0_7] : memref<1x128xf32, #tpu.memory_space<vmem>>, vector<1x128xf32>
    %c0_8 = arith.constant 0 : index
    %c0_9 = arith.constant 0 : index
    %7 = vector.load %arg1[%c0_8, %c0_9] : memref<160x32xf32, #tpu.memory_space<vmem>>, vector<160x32xf32>
    %cst = arith.constant dense<0.000000e+00> : vector<160xf32>
    %8 = vector.multi_reduction <add>, %7, %cst [1] : vector<160x32xf32> to vector<160xf32>
    %9 = vector.shape_cast %8 : vector<160xf32> to vector<160x1xf32>
    %cst_10 = arith.constant 3.200000e+01 : f32
    %10 = vector.broadcast %cst_10 : f32 to vector<160x1xf32>
    %11 = arith.divf %9, %10 : vector<160x1xf32>
    %12 = vector.broadcast %11 : vector<160x1xf32> to vector<160x32xf32>
    %13 = arith.subf %7, %12 : vector<160x32xf32>
    %14 = arith.mulf %13, %13 : vector<160x32xf32>
    %cst_11 = arith.constant dense<0.000000e+00> : vector<160xf32>
    %15 = vector.multi_reduction <add>, %14, %cst_11 [1] : vector<160x32xf32> to vector<160xf32>
    %16 = vector.shape_cast %15 : vector<160xf32> to vector<160x1xf32>
    %cst_12 = arith.constant 3.200000e+01 : f32
    %17 = vector.broadcast %cst_12 : f32 to vector<160x1xf32>
    %18 = arith.divf %16, %17 : vector<160x1xf32>
    %19 = vector.broadcast %11 : vector<160x1xf32> to vector<160x32xf32>
    %20 = arith.subf %7, %19 : vector<160x32xf32>
    %cst_13 = arith.constant 9.99999974E-6 : f32
    %21 = vector.broadcast %cst_13 : f32 to vector<160x1xf32>
    %22 = arith.addf %18, %21 : vector<160x1xf32>
    %23 = math.rsqrt %22 : vector<160x1xf32>
    %24 = vector.broadcast %23 : vector<160x1xf32> to vector<160x32xf32>
    %25 = arith.mulf %20, %24 : vector<160x32xf32>
    %26 = vector.broadcast %1 : vector<1x32xf32> to vector<160x32xf32>
    %27 = arith.mulf %25, %26 : vector<160x32xf32>
    %28 = vector.broadcast %2 : vector<1x32xf32> to vector<160x32xf32>
    %29 = arith.addf %27, %28 : vector<160x32xf32>
    %30 = arith.truncf %29 : vector<160x32xf32> to vector<160x32xbf16>
    %c0_14 = arith.constant 0 : index
    %c0_15 = arith.constant 0 : index
    %31 = vector.load %arg2[%c0_14, %c0_15] : memref<32x96xbf16, #tpu.memory_space<vmem>>, vector<32x96xbf16>
    %cst_16 = arith.constant dense<0.000000e+00> : vector<160x96xf32>
    %32 = tpu.matmul %30, %31, %cst_16 {dimension_numbers = #tpu.dot_dimension_numbers<[1], [0], [0], [1], [0, 0, 1, 1], [], []>} : vector<160x32xbf16>, vector<32x96xbf16>, vector<160x96xf32> -> vector<160x96xf32>
    %33 = vector.extract_strided_slice %32 {offsets = [0, 0], sizes = [160, 8], strides = [1, 1]} : vector<160x96xf32> to vector<160x8xf32>
    %34 = vector.shape_cast %33 : vector<160x8xf32> to vector<20x8x8xf32>
    %35 = vector.extract_strided_slice %32 {offsets = [0, 8], sizes = [160, 8], strides = [1, 1]} : vector<160x96xf32> to vector<160x8xf32>
    %36 = vector.shape_cast %35 : vector<160x8xf32> to vector<20x8x8xf32>
    %37 = vector.extract_strided_slice %32 {offsets = [0, 16], sizes = [160, 8], strides = [1, 1]} : vector<160x96xf32> to vector<160x8xf32>
    %38 = vector.shape_cast %37 : vector<160x8xf32> to vector<20x8x8xf32>
    %39 = vector.extract_strided_slice %32 {offsets = [0, 24], sizes = [160, 8], strides = [1, 1]} : vector<160x96xf32> to vector<160x8xf32>
    %40 = vector.shape_cast %39 : vector<160x8xf32> to vector<20x8x8xf32>
    %41 = tpu.concatenate %34, %36, %38, %40 in 0 : vector<20x8x8xf32>, vector<20x8x8xf32>, vector<20x8x8xf32>, vector<20x8x8xf32> -> vector<80x8x8xf32>
    %42 = arith.truncf %41 : vector<80x8x8xf32> to vector<80x8x8xbf16>
    %43 = vector.extract_strided_slice %32 {offsets = [0, 32], sizes = [160, 8], strides = [1, 1]} : vector<160x96xf32> to vector<160x8xf32>
    %44 = vector.shape_cast %43 : vector<160x8xf32> to vector<20x8x8xf32>
    %45 = vector.extract_strided_slice %32 {offsets = [0, 40], sizes = [160, 8], strides = [1, 1]} : vector<160x96xf32> to vector<160x8xf32>
    %46 = vector.shape_cast %45 : vector<160x8xf32> to vector<20x8x8xf32>
    %47 = vector.extract_strided_slice %32 {offsets = [0, 48], sizes = [160, 8], strides = [1, 1]} : vector<160x96xf32> to vector<160x8xf32>
    %48 = vector.shape_cast %47 : vector<160x8xf32> to vector<20x8x8xf32>
    %49 = vector.extract_strided_slice %32 {offsets = [0, 56], sizes = [160, 8], strides = [1, 1]} : vector<160x96xf32> to vector<160x8xf32>
    %50 = vector.shape_cast %49 : vector<160x8xf32> to vector<20x8x8xf32>
    %51 = tpu.concatenate %44, %46, %48, %50 in 0 : vector<20x8x8xf32>, vector<20x8x8xf32>, vector<20x8x8xf32>, vector<20x8x8xf32> -> vector<80x8x8xf32>
    %52 = arith.truncf %51 : vector<80x8x8xf32> to vector<80x8x8xbf16>
    %53 = vector.extract_strided_slice %32 {offsets = [0, 64], sizes = [160, 8], strides = [1, 1]} : vector<160x96xf32> to vector<160x8xf32>
    %54 = vector.shape_cast %53 : vector<160x8xf32> to vector<20x8x8xf32>
    %55 = vector.extract_strided_slice %32 {offsets = [0, 72], sizes = [160, 8], strides = [1, 1]} : vector<160x96xf32> to vector<160x8xf32>
    %56 = vector.shape_cast %55 : vector<160x8xf32> to vector<20x8x8xf32>
    %57 = vector.extract_strided_slice %32 {offsets = [0, 80], sizes = [160, 8], strides = [1, 1]} : vector<160x96xf32> to vector<160x8xf32>
    %58 = vector.shape_cast %57 : vector<160x8xf32> to vector<20x8x8xf32>
    %59 = vector.extract_strided_slice %32 {offsets = [0, 88], sizes = [160, 8], strides = [1, 1]} : vector<160x96xf32> to vector<160x8xf32>
    %60 = vector.shape_cast %59 : vector<160x8xf32> to vector<20x8x8xf32>
    %61 = tpu.concatenate %54, %56, %58, %60 in 0 : vector<20x8x8xf32>, vector<20x8x8xf32>, vector<20x8x8xf32>, vector<20x8x8xf32> -> vector<80x8x8xf32>
    %62 = arith.truncf %61 : vector<80x8x8xf32> to vector<80x8x8xbf16>
    %63 = tpu.iota {dimensions = array<i32: 1>} : vector<1x8x8xi32>
    %64 = tpu.iota {dimensions = array<i32: 2>} : vector<1x8x8xi32>
    %65 = arith.cmpi sle, %64, %63 : vector<1x8x8xi32>
    "tpu.trace_start"() <{level = 10 : i32, message = "bqd,bkd->bqk"}> : () -> ()
    %cst_17 = arith.constant dense<0.000000e+00> : vector<80x8x8xf32>
    %66 = tpu.matmul %42, %52, %cst_17 {dimension_numbers = #tpu.dot_dimension_numbers<[2], [2], [1], [1], [0, 0, 0, 1, 1, 1], [0], [0]>} : vector<80x8x8xbf16>, vector<80x8x8xbf16>, vector<80x8x8xf32> -> vector<80x8x8xf32>
    %cst_18 = arith.constant -1.000000e+30 : f32
    "tpu.trace_stop"() : () -> ()
    %67 = vector.shape_cast %65 : vector<1x8x8xi1> to vector<1x8x8xi1>
    %68 = vector.broadcast %67 : vector<1x8x8xi1> to vector<80x8x8xi1>
    %69 = vector.broadcast %cst_18 : f32 to vector<80x8x8xf32>
    %70 = arith.select %68, %66, %69 : vector<80x8x8xi1>, vector<80x8x8xf32>
    %cst_19 = arith.constant dense<0xFF800000> : vector<80x8xf32>
    %71 = vector.multi_reduction <maximumf>, %70, %cst_19 [2] : vector<80x8x8xf32> to vector<80x8xf32>
    %72 = vector.shape_cast %71 : vector<80x8xf32> to vector<80x8x1xf32>
    %73 = vector.broadcast %72 : vector<80x8x1xf32> to vector<80x8x8xf32>
    %74 = arith.subf %70, %73 : vector<80x8x8xf32>
    %75 = math.exp %74 : vector<80x8x8xf32>
    %cst_20 = arith.constant dense<0.000000e+00> : vector<80x8xf32>
    %76 = vector.multi_reduction <add>, %75, %cst_20 [2] : vector<80x8x8xf32> to vector<80x8xf32>
    %77 = vector.shape_cast %76 : vector<80x8xf32> to vector<80x8x1xf32>
    %78 = tpu.reciprocal %77 {approx = true} : vector<80x8x1xf32> -> vector<80x8x1xf32>
    %79 = vector.broadcast %78 : vector<80x8x1xf32> to vector<80x8x8xf32>
    %80 = arith.mulf %75, %79 : vector<80x8x8xf32>
    %81 = arith.truncf %80 : vector<80x8x8xf32> to vector<80x8x8xbf16>
    "tpu.trace_start"() <{level = 10 : i32, message = "bqk,bkd->bqd"}> : () -> ()
    %cst_21 = arith.constant dense<0.000000e+00> : vector<80x8x8xf32>
    %82 = tpu.matmul %81, %62, %cst_21 {dimension_numbers = #tpu.dot_dimension_numbers<[2], [1], [1], [2], [0, 0, 0, 1, 1, 2], [0], [0]>} : vector<80x8x8xbf16>, vector<80x8x8xbf16>, vector<80x8x8xf32> -> vector<80x8x8xf32>
    "tpu.trace_stop"() : () -> ()
    %83 = vector.extract_strided_slice %82 {offsets = [0, 0, 0], sizes = [20, 8, 8], strides = [1, 1, 1]} : vector<80x8x8xf32> to vector<20x8x8xf32>
    %84 = vector.shape_cast %83 : vector<20x8x8xf32> to vector<160x8xf32>
    %85 = vector.extract_strided_slice %82 {offsets = [20, 0, 0], sizes = [20, 8, 8], strides = [1, 1, 1]} : vector<80x8x8xf32> to vector<20x8x8xf32>
    %86 = vector.shape_cast %85 : vector<20x8x8xf32> to vector<160x8xf32>
    %87 = vector.extract_strided_slice %82 {offsets = [40, 0, 0], sizes = [20, 8, 8], strides = [1, 1, 1]} : vector<80x8x8xf32> to vector<20x8x8xf32>
    %88 = vector.shape_cast %87 : vector<20x8x8xf32> to vector<160x8xf32>
    %89 = vector.extract_strided_slice %82 {offsets = [60, 0, 0], sizes = [20, 8, 8], strides = [1, 1, 1]} : vector<80x8x8xf32> to vector<20x8x8xf32>
    %90 = vector.shape_cast %89 : vector<20x8x8xf32> to vector<160x8xf32>
    %91 = tpu.concatenate %84, %86, %88, %90 in 1 : vector<160x8xf32>, vector<160x8xf32>, vector<160x8xf32>, vector<160x8xf32> -> vector<160x32xf32>
    %92 = arith.truncf %91 : vector<160x32xf32> to vector<160x32xbf16>
    %c0_22 = arith.constant 0 : index
    %c0_23 = arith.constant 0 : index
    %93 = vector.load %arg3[%c0_22, %c0_23] : memref<32x32xbf16, #tpu.memory_space<vmem>>, vector<32x32xbf16>
    %cst_24 = arith.constant dense<0.000000e+00> : vector<160x32xf32>
    %94 = tpu.matmul %92, %93, %cst_24 {dimension_numbers = #tpu.dot_dimension_numbers<[1], [0], [0], [1], [0, 0, 1, 1], [], []>} : vector<160x32xbf16>, vector<32x32xbf16>, vector<160x32xf32> -> vector<160x32xf32>
    %c0_25 = arith.constant 0 : index
    %c0_26 = arith.constant 0 : index
    %95 = vector.load %arg1[%c0_25, %c0_26] : memref<160x32xf32, #tpu.memory_space<vmem>>, vector<160x32xf32>
    %96 = arith.addf %95, %94 : vector<160x32xf32>
    %97 = vector.broadcast %0 : vector<1x32xf32> to vector<160x32xf32>
    %98 = arith.addf %96, %97 : vector<160x32xf32>
    %cst_27 = arith.constant dense<0.000000e+00> : vector<160xf32>
    %99 = vector.multi_reduction <add>, %98, %cst_27 [1] : vector<160x32xf32> to vector<160xf32>
    %100 = vector.shape_cast %99 : vector<160xf32> to vector<160x1xf32>
    %cst_28 = arith.constant 3.200000e+01 : f32
    %101 = vector.broadcast %cst_28 : f32 to vector<160x1xf32>
    %102 = arith.divf %100, %101 : vector<160x1xf32>
    %103 = vector.broadcast %102 : vector<160x1xf32> to vector<160x32xf32>
    %104 = arith.subf %98, %103 : vector<160x32xf32>
    %105 = arith.mulf %104, %104 : vector<160x32xf32>
    %cst_29 = arith.constant dense<0.000000e+00> : vector<160xf32>
    %106 = vector.multi_reduction <add>, %105, %cst_29 [1] : vector<160x32xf32> to vector<160xf32>
    %107 = vector.shape_cast %106 : vector<160xf32> to vector<160x1xf32>
    %cst_30 = arith.constant 3.200000e+01 : f32
    %108 = vector.broadcast %cst_30 : f32 to vector<160x1xf32>
    %109 = arith.divf %107, %108 : vector<160x1xf32>
    %110 = vector.broadcast %102 : vector<160x1xf32> to vector<160x32xf32>
    %111 = arith.subf %98, %110 : vector<160x32xf32>
    %cst_31 = arith.constant 9.99999974E-6 : f32
    %112 = vector.broadcast %cst_31 : f32 to vector<160x1xf32>
    %113 = arith.addf %109, %112 : vector<160x1xf32>
    %114 = math.rsqrt %113 : vector<160x1xf32>
    %115 = vector.broadcast %114 : vector<160x1xf32> to vector<160x32xf32>
    %116 = arith.mulf %111, %115 : vector<160x32xf32>
    %117 = vector.broadcast %3 : vector<1x32xf32> to vector<160x32xf32>
    %118 = arith.mulf %116, %117 : vector<160x32xf32>
    %119 = vector.broadcast %4 : vector<1x32xf32> to vector<160x32xf32>
    %120 = arith.addf %118, %119 : vector<160x32xf32>
    %121 = arith.truncf %120 : vector<160x32xf32> to vector<160x32xbf16>
    %c0_32 = arith.constant 0 : index
    %c0_33 = arith.constant 0 : index
    %122 = vector.load %arg4[%c0_32, %c0_33] : memref<32x128xbf16, #tpu.memory_space<vmem>>, vector<32x128xbf16>
    %cst_34 = arith.constant dense<0.000000e+00> : vector<160x128xf32>
    %123 = tpu.matmul %121, %122, %cst_34 {dimension_numbers = #tpu.dot_dimension_numbers<[1], [0], [0], [1], [0, 0, 1, 1], [], []>} : vector<160x32xbf16>, vector<32x128xbf16>, vector<160x128xf32> -> vector<160x128xf32>
    %124 = vector.broadcast %6 : vector<1x128xf32> to vector<160x128xf32>
    %125 = arith.addf %123, %124 : vector<160x128xf32>
    %cst_35 = arith.constant 0.000000e+00 : f32
    %126 = vector.broadcast %cst_35 : f32 to vector<160x128xf32>
    %127 = arith.maximumf %125, %126 : vector<160x128xf32>
    %128 = arith.truncf %127 : vector<160x128xf32> to vector<160x128xbf16>
    %c0_36 = arith.constant 0 : index
    %c0_37 = arith.constant 0 : index
    %129 = vector.load %arg5[%c0_36, %c0_37] : memref<128x32xbf16, #tpu.memory_space<vmem>>, vector<128x32xbf16>
    %cst_38 = arith.constant dense<0.000000e+00> : vector<160x32xf32>
    %130 = tpu.matmul %128, %129, %cst_38 {dimension_numbers = #tpu.dot_dimension_numbers<[1], [0], [0], [1], [0, 0, 1, 1], [], []>} : vector<160x128xbf16>, vector<128x32xbf16>, vector<160x32xf32> -> vector<160x32xf32>
    %131 = vector.broadcast %5 : vector<1x32xf32> to vector<160x32xf32>
    %132 = arith.addf %130, %131 : vector<160x32xf32>
    %133 = arith.addf %98, %132 : vector<160x32xf32>
    %c0_39 = arith.constant 0 : index
    %c0_40 = arith.constant 0 : index
    %134 = vector.load %arg8[%c0_39, %c0_40] : memref<160x32xf32, #tpu.memory_space<vmem>>, vector<160x32xf32>
    tpu.vector_store %arg8[%c0_39, %c0_40], %133 {strides = array<i32>} : memref<160x32xf32, #tpu.memory_space<vmem>>, vector<160x32xf32>,
    return
  }
  func.func @transform_0(%arg0: i32) -> (i32, i32) {
    %c0_i32 = arith.constant 0 : i32
    %c0_i32_0 = arith.constant 0 : i32
    return %arg0, %c0_i32 : i32, i32
  }
  func.func @transform_1(%arg0: i32) -> (i32, i32) {
    %c0_i32 = arith.constant 0 : i32
    %c0_i32_0 = arith.constant 0 : i32
    %c0_i32_1 = arith.constant 0 : i32
    return %c0_i32, %c0_i32_0 : i32, i32
  }
  func.func @transform_2(%arg0: i32) -> (i32, i32) {
    %c0_i32 = arith.constant 0 : i32
    %c0_i32_0 = arith.constant 0 : i32
    %c0_i32_1 = arith.constant 0 : i32
    return %c0_i32, %c0_i32_0 : i32, i32
  }
  func.func @transform_3(%arg0: i32) -> (i32, i32) {
    %c0_i32 = arith.constant 0 : i32
    %c0_i32_0 = arith.constant 0 : i32
    %c0_i32_1 = arith.constant 0 : i32
    return %c0_i32, %c0_i32_0 : i32, i32
  }
  func.func @transform_4(%arg0: i32) -> (i32, i32) {
    %c0_i32 = arith.constant 0 : i32
    %c0_i32_0 = arith.constant 0 : i32
    %c0_i32_1 = arith.constant 0 : i32
    return %c0_i32, %c0_i32_0 : i32, i32
  }
  func.func @transform_5(%arg0: i32) -> (i32, i32) {
    %c0_i32 = arith.constant 0 : i32
    %c0_i32_0 = arith.constant 0 : i32
    %c0_i32_1 = arith.constant 0 : i32
    return %c0_i32, %c0_i32_0 : i32, i32
  }
  func.func @transform_6(%arg0: i32) -> (i32, i32) {
    %c0_i32 = arith.constant 0 : i32
    %c0_i32_0 = arith.constant 0 : i32
    %c0_i32_1 = arith.constant 0 : i32
    return %c0_i32, %c0_i32_0 : i32, i32
  }
  func.func @transform_7(%arg0: i32) -> (i32, i32) {
    %c0_i32 = arith.constant 0 : i32
    %c0_i32_0 = arith.constant 0 : i32
    return %arg0, %c0_i32 : i32, i32
  }
}

</mosaic_0001>

<bundles_post_ra>
// kernel: tpu_custom_call.1
= control target key start
LH: loop header
LB: loop body
LE: loop exit
PB: predicated region body
PF: predicated region fallthrough
CT: control target
= control target key end

     0   :  { %vm12485_vm0 = vcmask 261120   ;;  %v7844_v40 = vmov 32.0   ;;  %s7845_s25 = smov 96   ;;  %s7846_s26 = smov 112   ;;  %s12475_s0 = inlined_call_operand.vmem [shape: f32[160,32], index: 0, kind: input, shape index: {}]   ;;  %s12476_s5 = inlined_call_operand.vmem [shape: f32[6,32], index: 5, kind: input, shape index: {}]   ;;  %s12477_s1 = inlined_call_operand.vmem [shape: bf16[32,96], index: 1, kind: input, shape index: {}]   ;;  %s12478_s2 = inlined_call_operand.vmem [shape: bf16[32,32], index: 2, kind: input, shape index: {}]   ;;  %s12479_s3 = inlined_call_operand.vmem [shape: bf16[32,128], index: 3, kind: input, shape index: {}]   ;;  %s12480_s6 = inlined_call_operand.vmem [shape: f32[1,128], index: 6, kind: input, shape index: {}]   ;;  %s12481_s4 = inlined_call_operand.vmem [shape: bf16[128,32], index: 4, kind: input, shape index: {}]   ;;  %s12482_s7 = inlined_call_operand.vmem [shape: f32[160,32], index: 7, kind: output, shape index: {}]  }
   0x1   :  { %v7896_v0 = vld [vmem:[%s12475_s0 + $0x10] sm:$0xff]  ;;  %v7901_v1 = vld [vmem:[%s12475_s0] sm:$0xff]  ;;  %v7917_v6 = vld [vmem:[%s12475_s0 + $0x18] sm:$0xff]  ;;  %7442 = vrcp.f32 %v7844_v40  ;;  %s7847_s27 = smov 64   ;;  %s7848_s28 = smov 104  }
   0x2   :  { %v61_v2 = vsel %vm12485_vm0, %v7896_v0, 0.0  ;;  %v55_v3 = vsel %vm12485_vm0, %v7901_v1, 0.0  ;;  %v7910_v4 = vld [vmem:[%s12475_s0 + $0x30] sm:$0xff]  ;;  %v7922_v7 = vld [vmem:[%s12475_s0 + $0x8] sm:$0xff]  ;;  %v7927_v8 = vld [vmem:[%s12475_s0 + $0x58] sm:$0xff]  ;;  %v64_v9 = vsel %vm12485_vm0, %v7917_v6, 0.0 }
   0x3   :  { %62 = vadd.xlane.f32.xlu1 %v61_v2  ;;  %56 = vadd.xlane.f32.xlu0 %v55_v3  ;;  %v73_v5 = vsel %vm12485_vm0, %v7910_v4, 0.0  ;;  %v58_v10 = vsel %vm12485_vm0, %v7922_v7, 0.0  ;;  %v88_v11 = vsel %vm12485_vm0, %v7927_v8, 0.0  ;;  %v7938_v12 = vld [vmem:[%s12475_s0 + $0x28] sm:$0xff]  ;;  %v7943_v13 = vld [vmem:[%s12475_s0 + $0x20] sm:$0xff]  ;;  %v7959_v18 = vld [vmem:[%s12475_s0 + $0x38] sm:$0xff] }
   0x4   :  { %74 = vadd.xlane.f32.xlu2 %v73_v5  ;;  %v7948_v14 = vld [vmem:[%s12475_s0 + $0x60] sm:$0xff]  ;;  %v70_v15 = vsel %vm12485_vm0, %v7938_v12, 0.0  ;;  %v67_v16 = vsel %vm12485_vm0, %v7943_v13, 0.0  ;;  %v7964_v19 = vld [vmem:[%s12475_s0 + $0x48] sm:$0xff]  ;;  %v7969_v20 = vld [vmem:[%s12475_s0 + $0x78] sm:$0xff]  ;;  %v76_v21 = vsel %vm12485_vm0, %v7959_v18, 0.0 }
   0x5   :  { %v91_v17 = vsel %vm12485_vm0, %v7948_v14, 0.0  ;;  %v82_v22 = vsel %vm12485_vm0, %v7964_v19, 0.0  ;;  %v100_v23 = vsel %vm12485_vm0, %v7969_v20, 0.0  ;;  %v7980_v24 = vld [vmem:[%s12475_s0 + $0x40] sm:$0xff]  ;;  %v7985_v25 = vld [vmem:[%s12475_s0 + $0x50] sm:$0xff]  ;;  %v8001_v30 = vld [vmem:[%s12475_s0 + $0x68] sm:$0xff] }
   0x6   :  { %v7990_v26 = vld [vmem:[%s12475_s0 + $0x80] sm:$0xff]  ;;  %v79_v27 = vsel %vm12485_vm0, %v7980_v24, 0.0  ;;  %v85_v28 = vsel %vm12485_vm0, %v7985_v25, 0.0  ;;  %v8006_v31 = vld [vmem:[%s12475_s0 + $0x70] sm:$0xff]  ;;  %v94_v32 = vsel %vm12485_vm0, %v8001_v30, 0.0  ;;  %v8015_v34 = vld [vmem:[%s12475_s0 + $0x88] sm:$0xff] }
   0x7   :  { %v103_v29 = vsel %vm12485_vm0, %v7990_v26, 0.0  ;;  %v97_v33 = vsel %vm12485_vm0, %v8006_v31, 0.0  ;;  %v8020_v35 = vld [vmem:[%s12475_s0 + $0x98] sm:$0xff]  ;;  %v106_v36 = vsel %vm12485_vm0, %v8015_v34, 0.0  ;;  %v8029_v38 = vld [vmem:[%s12475_s0 + $0x90] sm:$0xff]  ;;  %v7443_v41 = vpop.eup %7442  ;;  %s7849_s29 = smov 120  }
   0x8   :  { %v112_v37 = vsel %vm12485_vm0, %v8020_v35, 0.0  ;;  %v109_v39 = vsel %vm12485_vm0, %v8029_v38, 0.0  ;;  %v116_v42 = vmul.f32 32.0, %v7443_v41  ;;  %vm120_vm1 = vweird.f32 %v7443_v41  ;;  %s7850_s30 = smov 8   ;;  %s7851_s8 = smov 24  }
   0x9   :  { %s7852_s9 = smov 16  }
   0xa   :  { %v117_v43 = vsub.f32 1.0, %v116_v42 }
   0xb   :  { %65 = vadd.xlane.f32.xlu1 %v64_v9  ;;  %59 = vadd.xlane.f32.xlu0 %v58_v10 }
   0xc   :  { %89 = vadd.xlane.f32.xlu2 %v88_v11  ;;  %v118_v44 = vmul.f32 %v7443_v41, %v117_v43 }
   0xe   :  { %v119_v45 = vadd.f32 %v7443_v41, %v118_v44 }
  0x10   :  { %v8033_v46 = vsel %vm120_vm1, %v7443_v41, %v119_v45 }
  0x11   :  { %12595 = vst [vmem:[#allocation2_spill] sm:$0xff] %v8033_v46 }
  0x13   :  { %71 = vadd.xlane.f32.xlu1 %v70_v15  ;;  %68 = vadd.xlane.f32.xlu0 %v67_v16 }
  0x14   :  { %92 = vadd.xlane.f32.xlu2 %v91_v17 }
  0x1b   :  { %77 = vadd.xlane.f32.xlu0 %v76_v21  ;;  %83 = vadd.xlane.f32.xlu1 %v82_v22 }
  0x1c   :  { %101 = vadd.xlane.f32.xlu2 %v100_v23 }
  0x23   :  { %80 = vadd.xlane.f32.xlu0 %v79_v27  ;;  %86 = vadd.xlane.f32.xlu1 %v85_v28 }
  0x24   :  { %104 = vadd.xlane.f32.xlu2 %v103_v29 }
  0x2b   :  { %95 = vadd.xlane.f32.xlu0 %v94_v32  ;;  %98 = vadd.xlane.f32.xlu1 %v97_v33 }
  0x33   :  { %107 = vadd.xlane.f32.xlu0 %v106_v36  ;;  %113 = vadd.xlane.f32.xlu1 %v112_v37 }
  0x3b   :  { %110 = vadd.xlane.f32.xlu0 %v109_v39 }
  0x76   :  { %v63_v47 = vpop.xlane.xlu1 %62  ;;  %v57_v48 = vpop.xlane.xlu0 %56 }
  0x77   :  { %v124_v49 = vmul.f32 %v8033_v46, %v63_v47  ;;  %v122_v50 = vmul.f32 %v8033_v46, %v57_v48  ;;  %v75_v51 = vpop.xlane.xlu2 %74 }
  0x78   :  { %v128_v10 = vmul.f32 %v8033_v46, %v75_v51 }
  0x79   :  { %v8038_v52 = vsub.f32 %v7896_v0, %v124_v49  ;;  %v8041_v53 = vsub.f32 %v7901_v1, %v122_v50 }
  0x7a   :  { %v8070_v17 = vsub.f32 %v7910_v4, %v128_v10 }
  0x7b   :  { %v164_v54 = vmul.f32 %v8038_v52, %v8038_v52  ;;  %v162_v55 = vmul.f32 %v8041_v53, %v8041_v53 }
  0x7c   :  { %v168_v4 = vmul.f32 %v8070_v17, %v8070_v17 }
  0x7d   :  { %v188_v56 = vsel %vm12485_vm0, %v164_v54, 0.0  ;;  %v182_v57 = vsel %vm12485_vm0, %v162_v55, 0.0 }
  0x7e   :  { %189 = vadd.xlane.f32.xlu1 %v188_v56  ;;  %v66_v58 = vpop.xlane.xlu1 %65  ;;  %183 = vadd.xlane.f32.xlu2 %v182_v57  ;;  %v60_v59 = vpop.xlane.xlu0 %59  ;;  %v200_v39 = vsel %vm12485_vm0, %v168_v4, 0.0 }
  0x7f   :  { %v125_v60 = vmul.f32 %v8033_v46, %v66_v58  ;;  %v123_v61 = vmul.f32 %v8033_v46, %v60_v59  ;;  %v90_v62 = vpop.xlane.xlu2 %89 }
  0x80   :  { %v133_v28 = vmul.f32 %v8033_v46, %v90_v62 }
  0x81   :  { %v8052_v63 = vsub.f32 %v7922_v7, %v123_v61  ;;  %v8055_v0 = vsub.f32 %v7917_v6, %v125_v60 }
  0x82   :  { %v8089_v37 = vsub.f32 %v7927_v8, %v133_v28 }
  0x83   :  { %v163_v1 = vmul.f32 %v8052_v63, %v8052_v63  ;;  %v165_v9 = vmul.f32 %v8055_v0, %v8055_v0 }
  0x84   :  { %v173_v47 = vmul.f32 %v8089_v37, %v8089_v37 }
  0x85   :  { %v185_v2 = vsel %vm12485_vm0, %v163_v1, 0.0  ;;  %v191_v16 = vsel %vm12485_vm0, %v165_v9, 0.0 }
  0x86   :  { %v72_v3 = vpop.xlane.xlu1 %71  ;;  %186 = vadd.xlane.f32.xlu2 %v185_v2  ;;  %v69_v5 = vpop.xlane.xlu0 %68  ;;  %v215_v51 = vsel %vm12485_vm0, %v173_v47, 0.0 }
  0x87   :  { %v127_v11 = vmul.f32 %v8033_v46, %v72_v3  ;;  %v93_v7 = vpop.xlane.xlu2 %92  ;;  %v126_v6 = vmul.f32 %v8033_v46, %v69_v5 }
  0x88   :  { %v134_v45 = vmul.f32 %v8033_v46, %v93_v7 }
  0x89   :  { %v8065_v15 = vsub.f32 %v7938_v12, %v127_v11  ;;  %v8075_v22 = vsub.f32 %v7943_v13, %v126_v6 }
  0x8a   :  { %v8110_v50 = vsub.f32 %v7948_v14, %v134_v45  ;;  %v7111_v45 = vld [vmem:[%s12477_s1 + $0x8] sm:$0xff] }
  0x8b   :  { %v167_v21 = vmul.f32 %v8065_v15, %v8065_v15  ;;  %v166_v13 = vmul.f32 %v8075_v22, %v8075_v22  ;;  %606 = vmatpush.bf16.msra.mxu0 %v7111_v45  ;;  %7124 = vmatpush.bf16.msra.mxu1 %v7111_v45 }
  0x8d   :  { %v197_v23 = vsel %vm12485_vm0, %v167_v21, 0.0  ;;  %v194_v42 = vsel %vm12485_vm0, %v166_v13, 0.0 }
  0x8e   :  { %198 = vadd.xlane.f32.xlu0 %v197_v23  ;;  %192 = vadd.xlane.f32.xlu2 %v191_v16  ;;  %v78_v27 = vpop.xlane.xlu0 %77  ;;  %v84_v12 = vpop.xlane.xlu1 %83 }
  0x8f   :  { %v129_v29 = vmul.f32 %v8033_v46, %v78_v27  ;;  %v131_v32 = vmul.f32 %v8033_v46, %v84_v12  ;;  %v102_v36 = vpop.xlane.xlu2 %101 }
  0x90   :  { %v137_v14 = vmul.f32 %v8033_v46, %v102_v36 }
  0x91   :  { %v8084_v33 = vsub.f32 %v7959_v18, %v129_v29  ;;  %v8095_v41 = vsub.f32 %v7964_v19, %v131_v32 }
  0x92   :  { %v8132_v3 = vsub.f32 %v7969_v20, %v137_v14 }
  0x93   :  { %v169_v40 = vmul.f32 %v8084_v33, %v8084_v33  ;;  %v171_v19 = vmul.f32 %v8095_v41, %v8095_v41 }
  0x94   :  { %v177_v16 = vmul.f32 %v8132_v3, %v8132_v3 }
  0x95   :  { %v203_v18 = vsel %vm12485_vm0, %v169_v40, 0.0  ;;  %v209_v56 = vsel %vm12485_vm0, %v171_v19, 0.0  ;;  %v7110_v19 = vld [vmem:[%s12477_s1] sm:$0xff] }
  0x96   :  { %201 = vadd.xlane.f32.xlu0 %v200_v39  ;;  %195 = vadd.xlane.f32.xlu2 %v194_v42  ;;  %v81_v43 = vpop.xlane.xlu0 %80  ;;  %v87_v44 = vpop.xlane.xlu1 %86  ;;  %v227_v12 = vsel %vm12485_vm0, %v177_v16, 0.0 }
  0x97   :  { %204 = vadd.xlane.f32.xlu1 %v203_v18  ;;  %v130_v8 = vmul.f32 %v8033_v46, %v81_v43  ;;  %v132_v48 = vmul.f32 %v8033_v46, %v87_v44  ;;  %v105_v57 = vpop.xlane.xlu2 %104  ;;  %607 = vmatpush.bf16.msra.mxu0 %v7110_v19 }
  0x98   :  { %v138_v61 = vmul.f32 %v8033_v46, %v105_v57  ;;  %7125 = vmatpush.bf16.msra.mxu1 %v7110_v19 }
  0x99   :  { %v8107_v49 = vsub.f32 %v7980_v24, %v130_v8  ;;  %v8116_v55 = vsub.f32 %v7985_v25, %v132_v48  ;;  %v174_v25 = vmul.f32 %v8110_v50, %v8110_v50 }
  0x9a   :  { %v8135_v5 = vsub.f32 %v7990_v26, %v138_v61 }
  0x9b   :  { %v170_v54 = vmul.f32 %v8107_v49, %v8107_v49  ;;  %v172_v1 = vmul.f32 %v8116_v55, %v8116_v55  ;;  %v218_v9 = vsel %vm12485_vm0, %v174_v25, 0.0 }
  0x9c   :  { %v178_v21 = vmul.f32 %v8135_v5, %v8135_v5 }
  0x9d   :  { %v206_v58 = vsel %vm12485_vm0, %v170_v54, 0.0  ;;  %v212_v7 = vsel %vm12485_vm0, %v172_v1, 0.0 }
  0x9e   :  { %216 = vadd.xlane.f32.xlu2 %v215_v51  ;;  %207 = vadd.xlane.f32.xlu0 %v206_v58  ;;  %v96_v24 = vpop.xlane.xlu0 %95  ;;  %v99_v59 = vpop.xlane.xlu1 %98  ;;  %v230_v28 = vsel %vm12485_vm0, %v178_v21, 0.0 }
  0x9f   :  { %210 = vadd.xlane.f32.xlu1 %v209_v56  ;;  %v135_v60 = vmul.f32 %v8033_v46, %v96_v24  ;;  %v136_v62 = vmul.f32 %v8033_v46, %v99_v59 }
  0xa1   :  { %v8129_v2 = vsub.f32 %v8001_v30, %v135_v60  ;;  %v8141_v11 = vsub.f32 %v8006_v31, %v136_v62 }
  0xa3   :  { %12596 = vst [vmem:[#allocation3_spill] sm:$0xff] %v8129_v2  ;;  %v175_v10 = vmul.f32 %v8129_v2, %v8129_v2  ;;  %v176_v23 = vmul.f32 %v8141_v11, %v8141_v11 }
  0xa5   :  { %v221_v6 = vsel %vm12485_vm0, %v175_v10, 0.0  ;;  %v224_v4 = vsel %vm12485_vm0, %v176_v23, 0.0 }
  0xa6   :  { %219 = vadd.xlane.f32.xlu2 %v218_v9  ;;  %222 = vadd.xlane.f32.xlu0 %v221_v6  ;;  %v108_v30 = vpop.xlane.xlu0 %107  ;;  %v114_v20 = vpop.xlane.xlu1 %113 }
  0xa7   :  { %213 = vadd.xlane.f32.xlu1 %v212_v7  ;;  %v141_v26 = vmul.f32 %v8033_v46, %v114_v20  ;;  %v139_v31 = vmul.f32 %v8033_v46, %v108_v30 }
  0xa9   :  { %v8154_v27 = vsub.f32 %v8020_v35, %v141_v26  ;;  %v8159_v29 = vsub.f32 %v8015_v34, %v139_v31 }
  0xab   :  { %12597 = vst [vmem:[#allocation4_spill] sm:$0xff] %v8154_v27  ;;  %v181_v36 = vmul.f32 %v8154_v27, %v8154_v27  ;;  %v179_v35 = vmul.f32 %v8159_v29, %v8159_v29 }
  0xad   :  { %v239_v34 = vsel %vm12485_vm0, %v181_v36, 0.0  ;;  %v233_v42 = vsel %vm12485_vm0, %v179_v35, 0.0 }
  0xae   :  { %228 = vadd.xlane.f32.xlu2 %v227_v12  ;;  %231 = vadd.xlane.f32.xlu0 %v230_v28  ;;  %v111_v32 = vpop.xlane.xlu0 %110 }
  0xaf   :  { %225 = vadd.xlane.f32.xlu1 %v224_v4  ;;  %v140_v13 = vmul.f32 %v8033_v46, %v111_v32 }
  0xb1   :  { %v8168_v39 = vsub.f32 %v8029_v38, %v140_v13 }
  0xb3   :  { %v180_v40 = vmul.f32 %v8168_v39, %v8168_v39 }
  0xb5   :  { %v236_v18 = vsel %vm12485_vm0, %v180_v40, 0.0 }
  0xb6   :  { %240 = vadd.xlane.f32.xlu0 %v239_v34  ;;  %237 = vadd.xlane.f32.xlu2 %v236_v18 }
  0xb7   :  { %234 = vadd.xlane.f32.xlu1 %v233_v42 }
  0xf1   :  { %v190_v43 = vpop.xlane.xlu1 %189  ;;  %v184_v44 = vpop.xlane.xlu2 %183 }
  0xf2   :  { %v244_v38 = vmul.f32 %v190_v43, %v8033_v46  ;;  %v242_v8 = vmul.f32 %v184_v44, %v8033_v46 }
  0xf4   :  { %v264_v47 = vadd.f32 1e-05, %v244_v38  ;;  %v262_v48 = vadd.f32 1e-05, %v242_v8 }
  0xf6   :  { %7444 = vrsqrt.f32 %v264_v47  ;;  %vm308_vm2 = vweird.f32 %v264_v47  ;;  %vm288_vm5 = vweird.f32 %v262_v48 }
  0xf7   :  { %7446 = vrsqrt.f32 %v262_v48 }
  0xf9   :  { %v187_v51 = vpop.xlane.xlu2 %186 }
  0xfa   :  { %v243_v54 = vmul.f32 %v187_v51, %v8033_v46 }
  0xfc   :  { %v8184_v56 = vpop.eup %7444  ;;  %v263_v57 = vadd.f32 1e-05, %v243_v54 }
  0xfd   :  { %v7447_v58 = vpop.eup %7446  ;;  %v303_v24 = vmul.f32 %v8184_v56, %v264_v47  ;;  %vm309_vm4 = vweird.f32 %v8184_v56 }
  0xfe   :  { %v283_v59 = vmul.f32 %v7447_v58, %v262_v48  ;;  %7448 = vrsqrt.f32 %v263_v57  ;;  %vm289_vm3 = vweird.f32 %v7447_v58  ;;  %vm298_vm8 = vweird.f32 %v263_v57  ;;  %vm8216_vm9 = vmor %vm308_vm2, %vm309_vm4 }
  0xff   :  { %v304_v14 = vmul.f32 %v8184_v56, %v303_v24  ;;  %vm8203_vm7 = vmor %vm288_vm5, %vm289_vm3 }
 0x100   :  { %v284_v60 = vmul.f32 %v7447_v58, %v283_v59 }
 0x101   :  { %v193_v61 = vpop.xlane.xlu2 %192  ;;  %v199_v25 = vpop.xlane.xlu0 %198  ;;  %v305_v10 = vmul.f32 0.5, %v304_v14  ;;  %v8241_v14 = vld [vmem:[%s12476_s5 + $0x1] ss:$0 sm:$0xff] }
 0x102   :  { %v285_v62 = vmul.f32 0.5, %v284_v60  ;;  %v245_v1 = vmul.f32 %v193_v61, %v8033_v46  ;;  %v247_v9 = vmul.f32 %v199_v25, %v8033_v46 }
 0x103   :  { %v306_v16 = vsub.f32 1.5, %v305_v10 }
 0x104   :  { %v7449_v7 = vpop.eup %7448  ;;  %v8190_v6 = vadd.f32 1e-05, %v245_v1  ;;  %v8192_v30 = vadd.f32 1e-05, %v247_v9  ;;  %v286_v20 = vsub.f32 1.5, %v285_v62 }
 0x105   :  { %v293_v26 = vmul.f32 %v7449_v7, %v263_v57  ;;  %v307_v36 = vmul.f32 %v8184_v56, %v306_v16  ;;  %vm299_vm6 = vweird.f32 %v7449_v7  ;;  %v8256_v16 = vld [vmem:[%s12476_s5 + $0x2] ss:$0 sm:$0xff] }
 0x106   :  { %7450 = vrsqrt.f32 %v8190_v6  ;;  %v287_v31 = vmul.f32 %v7447_v58, %v286_v20  ;;  %vm300_vm10 = vmor %vm298_vm8, %vm299_vm6  ;;  %vm318_vm11 = vweird.f32 %v8190_v6  ;;  %vm338_vm13 = vweird.f32 %v8192_v30 }
 0x107   :  { %v294_v21 = vmul.f32 %v7449_v7, %v293_v26  ;;  %7452 = vrsqrt.f32 %v8192_v30  ;;  %v311_v47 = vsel %vm8216_vm9, %v8184_v56, %v307_v36 }
 0x108   :  { %v291_v38 = vsel %vm8203_vm7, %v7447_v58, %v287_v31 }
 0x109   :  { %v295_v23 = vmul.f32 0.5, %v294_v21  ;;  %v196_v12 = vpop.xlane.xlu2 %195  ;;  %v202_v28 = vpop.xlane.xlu0 %201  ;;  %v482_v24 = vmul.f32 %v291_v38, %v8041_v53  ;;  %v484_v53 = vmul.f32 %v311_v47, %v8038_v52 }
 0x10a   :  { %v246_v4 = vmul.f32 %v196_v12, %v8033_v46  ;;  %v205_v32 = vpop.xlane.xlu1 %204  ;;  %v248_v13 = vmul.f32 %v202_v28, %v8033_v46 }
 0x10b   :  { %v296_v35 = vsub.f32 1.5, %v295_v23  ;;  %v249_v34 = vmul.f32 %v205_v32, %v8033_v46  ;;  %v503_v26 = vmul.f32 %v8241_v14, %v482_v24 }
 0x10c   :  { %v8201_v40 = vpop.eup %7450  ;;  %v8207_v18 = vadd.f32 1e-05, %v246_v4  ;;  %v8209_v43 = vadd.f32 1e-05, %v248_v13 }
 0x10d   :  { %v8211_v44 = vpop.eup %7452  ;;  %v297_v8 = vmul.f32 %v7449_v7, %v296_v35  ;;  %v313_v48 = vmul.f32 %v8201_v40, %v8190_v6  ;;  %v8224_v19 = vadd.f32 1e-05, %v249_v34  ;;  %vm319_vm12 = vweird.f32 %v8201_v40 }
 0x10e   :  { %v333_v51 = vmul.f32 %v8211_v44, %v8192_v30  ;;  %7454 = vrsqrt.f32 %v8207_v18  ;;  %v505_v35 = vmul.f32 %v8241_v14, %v484_v53  ;;  %v524_v45 = vadd.f32 %v8256_v16, %v503_v26  ;;  %vm8298_vm1 = vmor %vm318_vm11, %vm319_vm12 }
 0x10f   :  { %v301_v54 = vsel %vm300_vm10, %v7449_v7, %v297_v8  ;;  %v314_v57 = vmul.f32 %v8201_v40, %v313_v48  ;;  %7456 = vrsqrt.f32 %v8224_v19  ;;  %vm339_vm14 = vweird.f32 %v8211_v44 }
 0x110   :  { %v334_v58 = vmul.f32 %v8211_v44, %v333_v51  ;;  %7458 = vrsqrt.f32 %v8209_v43  ;;  %v483_v59 = vmul.f32 %v301_v54, %v8052_v63  ;;  %vm328_vm15 = vweird.f32 %v8207_v18  ;;  %vm8325_vm4 = vmor %vm338_vm13, %vm339_vm14 }
 0x111   :  { %v315_v60 = vmul.f32 0.5, %v314_v57  ;;  %v217_v56 = vpop.xlane.xlu2 %216  ;;  %v208_v61 = vpop.xlane.xlu0 %207  ;;  %vm358_vm2 = vweird.f32 %v8224_v19  ;;  %vm348_vm6 = vweird.f32 %v8209_v43 }
 0x112   :  { %v253_v25 = vmul.f32 %v217_v56, %v8033_v46  ;;  %v211_v62 = vpop.xlane.xlu1 %210  ;;  %v250_v1 = vmul.f32 %v208_v61, %v8033_v46  ;;  %v504_v9 = vmul.f32 %v8241_v14, %v483_v59  ;;  %v335_v7 = vmul.f32 0.5, %v334_v58 }
 0x113   :  { %v251_v10 = vmul.f32 %v211_v62, %v8033_v46  ;;  %v316_v31 = vsub.f32 1.5, %v315_v60  ;;  %v8290_v60 = vadd.f32 %v8256_v16, %v505_v35 }
 0x114   :  { %v8248_v63 = vpop.eup %7454  ;;  %v8250_v20 = vadd.f32 1e-05, %v253_v25  ;;  %v8264_v52 = vadd.f32 1e-05, %v250_v1  ;;  %v525_v32 = vadd.f32 %v8256_v16, %v504_v9  ;;  %v336_v34 = vsub.f32 1.5, %v335_v7 }
 0x115   :  { %v8258_v21 = vpop.eup %7456  ;;  %v323_v23 = vmul.f32 %v8248_v63, %v8207_v18  ;;  %v8262_v12 = vadd.f32 1e-05, %v251_v10  ;;  %v317_v38 = vmul.f32 %v8201_v40, %v316_v31  ;;  %vm329_vm3 = vweird.f32 %v8248_v63 }
 0x116   :  { %v8266_v28 = vpop.eup %7458  ;;  %v353_v4 = vmul.f32 %v8258_v21, %v8224_v19  ;;  %7460 = vrsqrt.f32 %v8250_v20  ;;  %v544_v57 = vpack.c.bf16 %v525_v32, %v524_v45  ;;  %v337_v25 = vmul.f32 %v8211_v44, %v336_v34  ;;  %vm8364_vm11 = vmor %vm328_vm15, %vm329_vm3 }
 0x117   :  { %v324_v13 = vmul.f32 %v8248_v63, %v323_v23  ;;  %v343_v36 = vmul.f32 %v8266_v28, %v8209_v43  ;;  %7462 = vrsqrt.f32 %v8262_v12  ;;  %v321_v9 = vsel %vm8298_vm1, %v8201_v40, %v317_v38 }
 0x118   :  { %v354_v42 = vmul.f32 %v8258_v21, %v353_v4  ;;  %7464 = vrsqrt.f32 %v8264_v52  ;;  %6872 = vmatmul.msk.bf16.vlgmr.msra.gmra.mxu0 %vm12485_vm0, %v544_v57  ;;  %vm359_vm5 = vweird.f32 %v8258_v21  ;;  %vm349_vm7 = vweird.f32 %v8266_v28 }
 0x119   :  { %v325_v8 = vmul.f32 0.5, %v324_v13  ;;  %v344_v48 = vmul.f32 %v8266_v28, %v343_v36  ;;  %v220_v51 = vpop.xlane.xlu2 %219  ;;  %v223_v47 = vpop.xlane.xlu0 %222  ;;  %v341_v13 = vsel %vm8325_vm4, %v8211_v44, %v337_v25  ;;  %v485_v35 = vmul.f32 %v321_v9, %v8055_v0  ;;  %vm8378_vm12 = vmor %vm358_vm2, %vm359_vm5 }
 0x11a   :  { %v355_v54 = vmul.f32 0.5, %v354_v42  ;;  %v254_v58 = vmul.f32 %v220_v51, %v8033_v46  ;;  %v214_v24 = vpop.xlane.xlu1 %213  ;;  %v255_v31 = vmul.f32 %v223_v47, %v8033_v46  ;;  %vm398_vm8 = vweird.f32 %v8250_v20  ;;  %vm8412_vm15 = vmor %vm348_vm6, %vm349_vm7 }
 0x11b   :  { %v252_v59 = vmul.f32 %v214_v24, %v8033_v46  ;;  %v326_v62 = vsub.f32 1.5, %v325_v8  ;;  %v345_v6 = vmul.f32 0.5, %v344_v48  ;;  %vm368_vm9 = vweird.f32 %v8264_v52 }
 0x11c   :  { %v8292_v56 = vpop.eup %7460  ;;  %v8305_v1 = vadd.f32 1e-05, %v254_v58  ;;  %v356_v7 = vsub.f32 1.5, %v355_v54  ;;  %v8352_v51 = vadd.f32 1e-05, %v255_v31  ;;  %vm378_vm10 = vweird.f32 %v8262_v12 }
 0x11d   :  { %v393_v10 = vmul.f32 %v8292_v56, %v8250_v20  ;;  %v8313_v53 = vpop.eup %7462  ;;  %v8316_v26 = vadd.f32 1e-05, %v252_v59  ;;  %v8339_v30 = vmul.f32 %v8248_v63, %v326_v62  ;;  %v346_v34 = vsub.f32 1.5, %v345_v6 }
 0x11e   :  { %7466 = vrsqrt.f32 %v8305_v1  ;;  %v8319_v23 = vpop.eup %7464  ;;  %v373_v32 = vmul.f32 %v8313_v53, %v8262_v12  ;;  %v8348_v44 = vmul.f32 %v8258_v21, %v356_v7  ;;  %v8372_v9 = vmul.f32 %v341_v13, %v8065_v15 }
 0x11f   :  { %v394_v4 = vmul.f32 %v8292_v56, %v393_v10  ;;  %v363_v36 = vmul.f32 %v8319_v23, %v8264_v52  ;;  %7468 = vrsqrt.f32 %v8316_v26  ;;  %v8383_v18 = vmul.f32 %v8266_v28, %v346_v34 }
 0x120   :  { %v374_v45 = vmul.f32 %v8313_v53, %v373_v32  ;;  %7470 = vrsqrt.f32 %v8352_v51  ;;  %vm399_vm13 = vweird.f32 %v8292_v56  ;;  %vm379_vm14 = vweird.f32 %v8313_v53 }
 0x121   :  { %v395_v42 = vmul.f32 0.5, %v394_v4  ;;  %v229_v38 = vpop.xlane.xlu2 %228  ;;  %v232_v8 = vpop.xlane.xlu0 %231  ;;  %v364_v48 = vmul.f32 %v8319_v23, %v363_v36  ;;  %vm369_vm1 = vweird.f32 %v8319_v23  ;;  %vm408_vm2 = vweird.f32 %v8305_v1  ;;  %vm8435_vm3 = vmor %vm398_vm8, %vm399_vm13 }
 0x122   :  { %v257_v0 = vmul.f32 %v229_v38, %v8033_v46  ;;  %v226_v47 = vpop.xlane.xlu1 %225  ;;  %v375_v57 = vmul.f32 0.5, %v374_v45  ;;  %v258_v24 = vmul.f32 %v232_v8, %v8033_v46  ;;  %vm418_vm5 = vweird.f32 %v8352_v51  ;;  %vm8457_vm7 = vmor %vm378_vm10, %vm379_vm14 }
 0x123   :  { %v396_v54 = vsub.f32 1.5, %v395_v42  ;;  %v256_v58 = vmul.f32 %v226_v47, %v8033_v46  ;;  %v365_v25 = vmul.f32 0.5, %v364_v48  ;;  %vm388_vm6 = vweird.f32 %v8316_v26  ;;  %vm8474_vm8 = vmor %vm368_vm9, %vm369_vm1 }
 0x124   :  { %v8358_v59 = vpop.eup %7466  ;;  %v8369_v62 = vadd.f32 1e-05, %v257_v0  ;;  %v376_v10 = vsub.f32 1.5, %v375_v57  ;;  %v8406_v13 = vadd.f32 1e-05, %v258_v24  ;;  %v12630_v36 = vsel %vm8378_vm12, %v8258_v21, %v8348_v44 }
 0x125   :  { %v403_v7 = vmul.f32 %v8358_v59, %v8305_v1  ;;  %v8397_v31 = vadd.f32 1e-05, %v256_v58  ;;  %v8399_v40 = vpop.eup %7468  ;;  %v8402_v4 = vmul.f32 %v8292_v56, %v396_v54  ;;  %v366_v34 = vsub.f32 1.5, %v365_v25 }
 0x126   :  { %7472 = vrsqrt.f32 %v8369_v62  ;;  %v383_v42 = vmul.f32 %v8399_v40, %v8316_v26  ;;  %v8425_v38 = vmul.f32 %v8313_v53, %v376_v10  ;;  %v8429_v48 = vpop.eup %7470  ;;  %vm409_vm4 = vweird.f32 %v8358_v59 }
 0x127   :  { %v404_v32 = vmul.f32 %v8358_v59, %v403_v7  ;;  %7474 = vrsqrt.f32 %v8397_v31  ;;  %v506_v54 = vmul.f32 %v8241_v14, %v485_v35  ;;  %v413_v20 = vmul.f32 %v8429_v48, %v8352_v51  ;;  %vm8514_vm1 = vmor %vm408_vm2, %vm409_vm4 }
 0x128   :  { %7476 = vrsqrt.f32 %v8406_v13  ;;  %v384_v47 = vmul.f32 %v8399_v40, %v383_v42  ;;  %v8462_v7 = vmul.f32 %v8319_v23, %v366_v34  ;;  %vm389_vm10 = vweird.f32 %v8399_v40 }
 0x129   :  { %v405_v43 = vmul.f32 0.5, %v404_v32  ;;  %v238_v8 = vpop.xlane.xlu2 %237  ;;  %v527_v42 = vadd.f32 %v8256_v16, %v506_v54  ;;  %v414_v34 = vmul.f32 %v8429_v48, %v413_v20  ;;  %vm438_vm13 = vweird.f32 %v8369_v62  ;;  %vm8533_vm4 = vmor %vm388_vm6, %vm389_vm10 }
 0x12a   :  { %v235_v57 = vpop.xlane.xlu1 %234  ;;  %v385_v32 = vmul.f32 0.5, %v384_v47  ;;  %v241_v47 = vpop.xlane.xlu0 %240  ;;  %vm428_vm9 = vweird.f32 %v8397_v31  ;;  %vm448_vm14 = vweird.f32 %v8406_v13 }
 0x12b   :  { %v406_v24 = vsub.f32 1.5, %v405_v43  ;;  %v259_v25 = vmul.f32 %v235_v57, %v8033_v46  ;;  %v260_v43 = vmul.f32 %v238_v8, %v8033_v46  ;;  %v545_v57 = vpack.c.bf16 %v527_v42, %v8290_v60 }
 0x12c   :  { %v8451_v10 = vpop.eup %7472  ;;  %v386_v58 = vsub.f32 1.5, %v385_v32  ;;  %v415_v20 = vmul.f32 0.5, %v414_v34  ;;  %v371_v60 = vsel %vm8474_vm8, %v8319_v23, %v8462_v7  ;;  %vm419_vm8 = vweird.f32 %v8429_v48 }
 0x12d   :  { %v433_v8 = vmul.f32 %v8451_v10, %v8369_v62  ;;  %v8483_v54 = vpop.eup %7474  ;;  %v8486_v52 = vadd.f32 1e-05, %v259_v25  ;;  %v8488_v19 = vadd.f32 1e-05, %v260_v43  ;;  %v8493_v15 = vmul.f32 %v8358_v59, %v406_v24  ;;  %6873 = vmatmul.msk.bf16.gmra.mxu0 %vm12485_vm0, %v545_v57  ;;  %vm8550_vm0 = vmor %vm418_vm5, %vm419_vm8 }
 0x12e   :  { %v8490_v45 = vpop.eup %7476  ;;  %v423_v2 = vmul.f32 %v8483_v54, %v8397_v31  ;;  %v261_v24 = vmul.f32 %v241_v47, %v8033_v46  ;;  %v416_v32 = vsub.f32 1.5, %v415_v20  ;;  %v8519_v7 = vmul.f32 %v8399_v40, %v386_v58 }
 0x12f   :  { %v434_v27 = vmul.f32 %v8451_v10, %v433_v8  ;;  %v443_v25 = vmul.f32 %v8490_v45, %v8406_v13  ;;  %7478 = vrsqrt.f32 %v8486_v52  ;;  %vm439_vm2 = vweird.f32 %v8451_v10 }
 0x130   :  { %v424_v43 = vmul.f32 %v8483_v54, %v423_v2  ;;  %7480 = vrsqrt.f32 %v8488_v19  ;;  %v411_v2 = vsel %vm8514_vm1, %v8358_v59, %v8493_v15  ;;  %v8538_v12 = vmul.f32 %v8429_v48, %v416_v32 }
 0x131   :  { %v435_v42 = vmul.f32 0.5, %v434_v27  ;;  %v444_v57 = vmul.f32 %v8490_v45, %v443_v25  ;;  %v8540_v8 = vadd.f32 1e-05, %v261_v24  ;;  %v12622_v47 = vsel %vm8364_vm11, %v8248_v63, %v8339_v30  ;;  %vm8563_vm11 = vmor %vm438_vm13, %vm439_vm2 }
 0x132   :  { %v425_v1 = vmul.f32 0.5, %v424_v43  ;;  %v486_v20 = vmul.f32 %v12622_v47, %v8075_v22  ;;  %vm429_vm6 = vweird.f32 %v8483_v54  ;;  %vm449_vm10 = vweird.f32 %v8490_v45 }
 0x133   :  { %v436_v27 = vsub.f32 1.5, %v435_v42  ;;  %v445_v34 = vmul.f32 0.5, %v444_v57  ;;  %v391_v61 = vsel %vm8533_vm4, %v8399_v40, %v8519_v7  ;;  %7482 = vrsqrt.f32 %v8540_v8  ;;  %vm430_vm13 = vmor %vm428_vm9, %vm429_vm6 }
 0x134   :  { %v426_v32 = vsub.f32 1.5, %v425_v1  ;;  %v507_v30 = vmul.f32 %v8241_v14, %v486_v20  ;;  %vm458_vm5 = vweird.f32 %v8486_v52  ;;  %v508_v62 = vmul.f32 %v8241_v14, %v8372_v9 }
 0x135   :  { %v437_v25 = vmul.f32 %v8451_v10, %v436_v27  ;;  %v446_v63 = vsub.f32 1.5, %v445_v34  ;;  %v7479_v51 = vpop.eup %7478  ;;  %v421_v43 = vsel %vm8550_vm0, %v8429_v48, %v8538_v12  ;;  %vm468_vm8 = vweird.f32 %v8488_v19 }
 0x136   :  { %v427_v42 = vmul.f32 %v8483_v54, %v426_v32  ;;  %v7481_v40 = vpop.eup %7480  ;;  %v453_v7 = vmul.f32 %v7479_v51, %v8486_v52  ;;  %vm478_vm2 = vweird.f32 %v8540_v8  ;;  %v528_v34 = vadd.f32 %v8256_v16, %v507_v30 }
 0x137   :  { %v441_v24 = vsel %vm8563_vm11, %v8451_v10, %v437_v25  ;;  %v12627_v10 = vsel %vm8412_vm15, %v8266_v28, %v8383_v18  ;;  %v463_v27 = vmul.f32 %v7481_v40, %v8488_v19  ;;  %v447_v1 = vmul.f32 %v8490_v45, %v446_v63  ;;  %vm8601_vm15 = vmor %vm448_vm14, %vm449_vm10 }
 0x138   :  { %v488_v9 = vmul.f32 %v12627_v10, %v8070_v17  ;;  %v431_v57 = vsel %vm430_vm13, %v8483_v54, %v427_v42  ;;  %v497_v31 = vmul.f32 %v441_v24, %v8132_v3  ;;  %v454_v58 = vmul.f32 %v7479_v51, %v453_v7 }
 0x139   :  { %v496_v47 = vmul.f32 %v431_v57, %v8141_v11  ;;  %v464_v28 = vmul.f32 %v7481_v40, %v463_v27  ;;  %v529_v18 = vadd.f32 %v8256_v16, %v508_v62  ;;  %v489_v11 = vmul.f32 %v12630_v36, %v8084_v33  ;;  %v7483_v54 = vpop.eup %7482 }
 0x13a   :  { %v518_v3 = vmul.f32 %v8241_v14, %v497_v31  ;;  %v455_v20 = vmul.f32 0.5, %v454_v58  ;;  %vm459_vm9 = vweird.f32 %v7479_v51  ;;  %v490_v25 = vmul.f32 %v371_v60, %v8107_v49 }
 0x13b   :  { %v517_v13 = vmul.f32 %v8241_v14, %v496_v47  ;;  %v465_v32 = vmul.f32 0.5, %v464_v28  ;;  %vm469_vm14 = vweird.f32 %v7481_v40  ;;  %v473_v22 = vmul.f32 %v7483_v54, %v8540_v8  ;;  %vm460_vm6 = vmor %vm458_vm5, %vm459_vm9 }
 0x13c   :  { %v539_v63 = vadd.f32 %v8256_v16, %v518_v3  ;;  %v451_v6 = vsel %vm8601_vm15, %v8490_v45, %v447_v1  ;;  %v456_v30 = vsub.f32 1.5, %v455_v20  ;;  %v546_v21 = vpack.c.bf16 %v529_v18, %v528_v34  ;;  %vm8630_vm12 = vmor %vm468_vm8, %vm469_vm14 }
 0x13d   :  { %v538_v33 = vadd.f32 %v8256_v16, %v517_v13  ;;  %v466_v44 = vsub.f32 1.5, %v465_v32  ;;  %v474_v24 = vmul.f32 %v7483_v54, %v473_v22  ;;  %v509_v42 = vmul.f32 %v8241_v14, %v488_v9 }
 0x13e   :  { %v12631_v49 = vsel %vm8457_vm7, %v8313_v53, %v8425_v38  ;;  %v457_v62 = vmul.f32 %v7479_v51, %v456_v30  ;;  %vm12634_vm4 = vcmask 261120   ;;  %v510_v10 = vmul.f32 %v8241_v14, %v489_v11 }
 0x13f   :  { %v491_v60 = vmul.f32 %v12631_v49, %v8095_v41  ;;  %6874 = vmatmul.msk.bf16.gmra.mxu0 %vm12634_vm4, %v546_v21  ;;  %v551_v7 = vpack.c.bf16 %v539_v63, %v538_v33  ;;  %v511_v9 = vmul.f32 %v8241_v14, %v490_v25  ;;  %v467_v53 = vmul.f32 %v7481_v40, %v466_v44  ;;  %vm12635_vm10 = vmmov %vm12634_vm4 }
 0x140   :  { %v475_v41 = vmul.f32 0.5, %v474_v24  ;;  %vm479_vm7 = vweird.f32 %v7483_v54  ;;  %v461_v38 = vsel %vm460_vm6, %v7479_v51, %v457_v62  ;;  %v492_v57 = vmul.f32 %v391_v61, %v8116_v55  ;;  %v12639_v61 = vld [vmem:[#allocation3_spill] sm:$0xff]  ;;  %vm12641_vm0 = vmmov %vm12634_vm4 }
 0x141   :  { %v512_v19 = vmul.f32 %v8241_v14, %v491_v60  ;;  %6879 = vmatmul.msk.bf16.vlgmr.msra.gmra.mxu1 %vm12635_vm10, %v551_v7  ;;  %v532_v35 = vadd.f32 %v8256_v16, %v511_v9  ;;  %v12636_v27 = vsel %vm8435_vm3, %v8292_v56, %v8402_v4  ;;  %v471_v31 = vsel %vm8630_vm12, %v7481_v40, %v467_v53  ;;  %vm8656_vm11 = vmor %vm478_vm2, %vm479_vm7 }
 0x142   :  { %v493_v52 = vmul.f32 %v12636_v27, %v8089_v37  ;;  %v476_v1 = vsub.f32 1.5, %v475_v41  ;;  %v499_v58 = vmul.f32 %v461_v38, %v8159_v29  ;;  %v500_v55 = vmul.f32 %v471_v31, %v8168_v39  ;;  %vm12642_vm3 = vmmov %vm12641_vm0 }
 0x143   :  { %v533_v51 = vadd.f32 %v8256_v16, %v512_v19  ;;  %v513_v0 = vmul.f32 %v8241_v14, %v492_v57  ;;  %v494_v29 = vmul.f32 %v411_v2, %v8110_v50  ;;  %v498_v4 = vmul.f32 %v451_v6, %v8135_v5  ;;  %v12640_v2 = vld [vmem:[#allocation4_spill] sm:$0xff]  ;;  %vm12643_vm1 = vmmov %vm12641_vm0 }
 0x144   :  { %v514_v37 = vmul.f32 %v8241_v14, %v493_v52  ;;  %v477_v56 = vmul.f32 %v7483_v54, %v476_v1  ;;  %v495_v39 = vmul.f32 %v421_v43, %v12639_v61  ;;  %v521_v40 = vmul.f32 %v8241_v14, %v500_v55  ;;  %vm12644_vm5 = vmmov %vm12641_vm0 }
 0x145   :  { %v548_v8 = vpack.c.bf16 %v533_v51, %v532_v35  ;;  %v534_v47 = vadd.f32 %v8256_v16, %v513_v0  ;;  %v515_v59 = vmul.f32 %v8241_v14, %v494_v29  ;;  %v520_v5 = vmul.f32 %v8241_v14, %v499_v58  ;;  %vm12645_vm13 = vmmov %vm12641_vm0 }
 0x146   :  { %v535_v23 = vadd.f32 %v8256_v16, %v514_v37  ;;  %v481_v50 = vsel %vm8656_vm11, %v7483_v54, %v477_v56  ;;  %v516_v15 = vmul.f32 %v8241_v14, %v495_v39  ;;  %v542_v48 = vadd.f32 %v8256_v16, %v521_v40  ;;  %vm12646_vm8 = vmmov %vm12641_vm0 }
 0x147   :  { %v501_v26 = vmul.f32 %v481_v50, %v12640_v2  ;;  %v536_v43 = vadd.f32 %v8256_v16, %v515_v59  ;;  %v530_v28 = vadd.f32 %v8256_v16, %v509_v42  ;;  %v531_v18 = vadd.f32 %v8256_v16, %v510_v10  ;;  %vm13011_vm4 = vmmov %vm12641_vm0 }
 0x148   :  { %v549_v12 = vpack.c.bf16 %v535_v23, %v534_v47  ;;  %v537_v17 = vadd.f32 %v8256_v16, %v516_v15  ;;  %v519_v3 = vmul.f32 %v8241_v14, %v498_v4  ;;  %v541_v54 = vadd.f32 %v8256_v16, %v520_v5  ;;  %vm13014_vm6 = vmmov %vm12641_vm0 }
 0x149   :  { %v522_v36 = vmul.f32 %v8241_v14, %v501_v26  ;;  %v547_v13 = vpack.c.bf16 %v531_v18, %v530_v28  ;;  %vm949_vm2 = vcmask 64512   ;;  %vm3912_vm9 = vcmask 1043456   ;;  %vm13017_vm7 = vmmov %vm12641_vm0 }
 0x14a   :  { %v550_v11 = vpack.c.bf16 %v537_v17, %v536_v43  ;;  %v540_v25 = vadd.f32 %v8256_v16, %v519_v3  ;;  %vm5848_vm14 = vcmask 130048   ;;  %vm5869_vm12 = vcmask 195584   ;;  %vm13020_vm10 = vmmov %vm12641_vm0 }
 0x14b   :  { %v543_v20 = vadd.f32 %v8256_v16, %v522_v36  ;;  %vm13023_vm11 = vmmov %vm12641_vm0 }
 0x14c   :  { %v552_v22 = vpack.c.bf16 %v541_v54, %v540_v25 }
 0x14d   :  { %v553_v32 = vpack.c.bf16 %v543_v20, %v542_v48 }
 0x14f   :  { %6875 = vmatmul.msk.bf16.gmra.mxu0 %vm12641_vm0, %v547_v13 }
 0x151   :  { %6880 = vmatmul.msk.bf16.gmra.mxu1 %vm12642_vm3, %v552_v22  ;;  %vm13028_vm3 = vmmov %vm12641_vm0 }
 0x15f   :  { %6876 = vmatmul.msk.bf16.gmra.mxu0 %vm12643_vm1, %v548_v8  ;;  %vm13029_vm1 = vmmov %vm12641_vm0 }
 0x161   :  { %6881 = vmatmul.msk.bf16.gmra.mxu1 %vm12644_vm5, %v553_v32  ;;  %vm13032_vm5 = vmmov %vm12641_vm0 }
 0x16f   :  { %6877 = vmatmul.msk.bf16.gmra.mxu0 %vm12645_vm13, %v549_v12  ;;  %vm13033_vm13 = vmmov %vm12641_vm0 }
 0x17f   :  { %6878 = vmatmul.msk.bf16.gmra.mxu0 %vm12646_vm8, %v550_v11  ;;  %vm13034_vm8 = vmmov %vm12641_vm0 }
 0x195   :  { %v609_v14 = vpop.f32.mrf.mxu0 }
 0x196   :  { %v8701_v63 = vpack.c.bf16 %v609_v14, %v609_v14 }
 0x198   :  { %v945_v6 = vunpack.c.l.b16 %v8701_v63 }
 0x19a   :  { %v946_v16 = vpack.c.b16 %v945_v6, %v945_v6 }
 0x19c   :  { %947 = vrot.lane.b32.xlu1 %v946_v16, %s7845_s25 }
 0x19d   :  { %v611_v30 = vpop.f32.mrf.mxu0 }
 0x19e   :  { %v7155_v53 = vpack.i.bf16 %v611_v30, %v609_v14  ;;  %v8724_v19 = vpack.c.bf16 %v611_v30, %v611_v30 }
 0x1a0   :  { %v970_v35 = vunpack.c.l.b16 %v8724_v19 }
 0x1a2   :  { %v971_v31 = vpack.c.b16 %v970_v35, %v970_v35 }
 0x1aa   :  { %v614_v62 = vpop.f32.mrf.mxu0 }
 0x1ab   :  { %v8716_v7 = vpack.c.bf16 %v614_v62, %v614_v62 }
 0x1ad   :  { %v994_v41 = vunpack.c.l.b16 %v8716_v7 }
 0x1af   :  { %v995_v38 = vpack.c.b16 %v994_v41, %v994_v41 }
 0x1b2   :  { %v616_v57 = vpop.f32.mrf.mxu0 }
 0x1b3   :  { %v8739_v55 = vpack.c.bf16 %v616_v57, %v616_v57  ;;  %v7165_v8 = vpack.i.bf16 %v616_v57, %v614_v62 }
 0x1b5   :  { %v1018_v56 = vunpack.c.l.b16 %v8739_v55 }
 0x1b7   :  { %v1019_v4 = vpack.c.b16 %v1018_v56, %v1018_v56 }
 0x1bc   :  { %v619_v0 = vpop.f32.mrf.mxu0 }
 0x1bd   :  { %v8786_v28 = vpack.c.bf16 %v619_v0, %v619_v0 }
 0x1be   :  { %v644_v21 = vpop.f32.mrf.mxu1 }
 0x1bf   :  { %v8705_v33 = vpack.c.bf16 %v644_v21, %v644_v21  ;;  %v1042_v13 = vunpack.c.l.b16 %v8786_v28 }
 0x1c1   :  { %v1282_v44 = vunpack.c.l.b16 %v8705_v33  ;;  %v1043_v32 = vpack.c.b16 %v1042_v13, %v1042_v13 }
 0x1c3   :  { %v8708_v24 = vpack.c.b16 %v1282_v44, %v1282_v44 }
 0x1c4   :  { %v621_v61 = vpop.f32.mrf.mxu0 }
 0x1c5   :  { %12647 = vst [vmem:[#allocation3_spill] sm:$0xff] %v8708_v24  ;;  %1284 = vrot.lane.b32.xlu2 %v8708_v24, %s7845_s25  ;;  %v8758_v59 = vpack.i.bf16 %v621_v61, %v619_v0  ;;  %v8760_v50 = vpack.c.bf16 %v621_v61, %v621_v61 }
 0x1c6   :  { %v646_v42 = vpop.f32.mrf.mxu1 }
 0x1c7   :  { %v7150_v49 = vpack.i.bf16 %v646_v42, %v644_v21  ;;  %v8712_v60 = vpack.c.bf16 %v646_v42, %v646_v42  ;;  %v1066_v5 = vunpack.c.l.b16 %v8760_v50 }
 0x1c9   :  { %7151 = vrot.lane.b32.xlu1 %v7150_v49, %s7846_s26  ;;  %v1306_v45 = vunpack.c.l.b16 %v8712_v60  ;;  %v1067_v15 = vpack.c.b16 %v1066_v5, %v1066_v5 }
 0x1cb   :  { %v8718_v10 = vpack.c.b16 %v1306_v45, %v1306_v45 }
 0x1cc   :  { %v624_v23 = vpop.f32.mrf.mxu0 }
 0x1cd   :  { %12648 = vst [vmem:[#allocation4_spill] sm:$0xff] %v8718_v10  ;;  %1308 = vrot.lane.b32.xlu0 %v8718_v10, %s7845_s25  ;;  %3907 = vrot.lane.b32.xlu2 %v946_v16, %s7847_s27  ;;  %v8781_v17 = vpack.c.bf16 %v624_v23, %v624_v23 }
 0x1ce   :  { %v649_v9 = vpop.f32.mrf.mxu1 }
 0x1cf   :  { %v8730_v52 = vpack.c.bf16 %v649_v9, %v649_v9  ;;  %v1090_v18 = vunpack.c.l.b16 %v8781_v17 }
 0x1d1   :  { %7156 = vrot.lane.b32.xlu1 %v7155_v53, %s7848_s28  ;;  %v1330_v34 = vunpack.c.l.b16 %v8730_v52  ;;  %v1091_v20 = vpack.c.b16 %v1090_v18, %v1090_v18 }
 0x1d3   :  { %v8744_v29 = vpack.c.b16 %v1330_v34, %v1330_v34 }
 0x1d4   :  { %v626_v26 = vpop.f32.mrf.mxu0 }
 0x1d5   :  { %996 = vrot.lane.b32.xlu0 %v995_v38, %s7845_s25  ;;  %7136 = vrot.lane.b32.xlu2 %v7155_v53, %s7849_s29  ;;  %12650 = vst [vmem:[#allocation6_spill] sm:$0xff] %v8744_v29  ;;  %v7225_v42 = vpack.i.bf16 %v626_v26, %v624_v23 }
 0x1d6   :  { %v651_v27 = vpop.f32.mrf.mxu1 }
 0x1d7   :  { %v8732_v1 = vpack.c.bf16 %v651_v27, %v651_v27  ;;  %v7170_v47 = vpack.i.bf16 %v651_v27, %v649_v9 }
 0x1d9   :  { %3929 = vrot.lane.b32.xlu1 %v971_v31, %s7847_s27  ;;  %v1354_v58 = vunpack.c.l.b16 %v8732_v1 }
 0x1db   :  { %v8736_v51 = vpack.c.b16 %v1354_v58, %v1354_v58 }
 0x1dc   :  { %v8778_v43 = vpop.f32.mrf.mxu0 }
 0x1dd   :  { %12649 = vst [vmem:[#allocation5_spill] sm:$0xff] %v8736_v51  ;;  %7141 = vrot.lane.b32.xlu2 %v7150_v49, %s7849_s29  ;;  %1356 = vrot.lane.b32.xlu0 %v8736_v51, %s7845_s25  ;;  %v8795_v54 = vpack.c.bf16 %v8778_v43, %v8778_v43 }
 0x1de   :  { %v654_v37 = vpop.f32.mrf.mxu1 }
 0x1df   :  { %v8801_v25 = vpack.c.bf16 %v654_v37, %v654_v37  ;;  %v1138_v22 = vunpack.c.l.b16 %v8795_v54 }
 0x1e1   :  { %1332 = vrot.lane.b32.xlu1 %v8744_v29, %s7845_s25  ;;  %v1139_v6 = vpack.c.b16 %v1138_v22, %v1138_v22  ;;  %v1378_v16 = vunpack.c.l.b16 %v8801_v25 }
 0x1e3   :  { %v8814_v21 = vpack.c.b16 %v1378_v16, %v1378_v16 }
 0x1e4   :  { %v8789_v3 = vpop.f32.mrf.mxu0 }
 0x1e5   :  { %7146 = vrot.lane.b32.xlu2 %v7155_v53, %s7846_s26  ;;  %3971 = vrot.lane.b32.xlu0 %v1019_v4, %s7847_s27  ;;  %12652 = vst [vmem:[#allocation8_spill] sm:$0xff] %v8814_v21 }
 0x1e6   :  { %v656_v39 = vpop.f32.mrf.mxu1 }
 0x1e7   :  { %v8752_v40 = vpack.i.bf16 %v656_v39, %v654_v37  ;;  %v8767_v2 = vpack.c.bf16 %v656_v39, %v656_v39 }
 0x1e9   :  { %7166 = vrot.lane.b32.xlu1 %v7165_v8, %s7849_s29  ;;  %v1402_v48 = vunpack.c.l.b16 %v8767_v2 }
 0x1eb   :  { %v8773_v12 = vpack.c.b16 %v1402_v48, %v1402_v48 }
 0x1ec   :  { %v8805_v14 = vpop.f32.mrf.mxu0 }
 0x1ed   :  { %7161 = vrot.lane.b32.xlu2 %v7150_v49, %s7848_s28  ;;  %7201 = vrot.lane.b32.xlu0 %v8752_v40, %s7849_s29  ;;  %12651 = vst [vmem:[#allocation7_spill] sm:$0xff] %v8773_v12  ;;  %v8820_v44 = vpack.c.bf16 %v8805_v14, %v8805_v14 }
 0x1ef   :  { %v1186_v9 = vunpack.c.l.b16 %v8820_v44 }
 0x1f1   :  { %7171 = vrot.lane.b32.xlu1 %v7170_v47, %s7849_s29  ;;  %v8833_v41 = vpack.c.b16 %v1186_v9, %v1186_v9 }
 0x1f4   :  { %v8824_v49 = vpop.f32.mrf.mxu0 }
 0x1f5   :  { %972 = vrot.lane.b32.xlu2 %v971_v31, %s7845_s25  ;;  %7206 = vrot.lane.b32.xlu0 %v8758_v59, %s7846_s26  ;;  %v8841_v35 = vpack.c.bf16 %v8824_v49, %v8824_v49 }
 0x1f7   :  { %v1210_v58 = vunpack.c.l.b16 %v8841_v35 }
 0x1f9   :  { %7176 = vrot.lane.b32.xlu1 %v7165_v8, %s7846_s26  ;;  %v1211_v37 = vpack.c.b16 %v1210_v58, %v1210_v58 }
 0x1fc   :  { %v8846_v57 = vpop.f32.mrf.mxu0 }
 0x1fd   :  { %3950 = vrot.lane.b32.xlu2 %v995_v38, %s7847_s27  ;;  %1068 = vrot.lane.b32.xlu0 %v1067_v15, %s7845_s25  ;;  %v8837_v38 = vpack.c.bf16 %v8789_v3, %v8789_v3  ;;  %v8856_v34 = vpack.c.bf16 %v8846_v57, %v8846_v57  ;;  %v7265_v48 = vpack.i.bf16 %v8846_v57, %v8805_v14 }
 0x1ff   :  { %v1162_v31 = vunpack.c.l.b16 %v8837_v38 }
 0x201   :  { %7181 = vrot.lane.b32.xlu1 %v7170_v47, %s7846_s26  ;;  %v8858_v0 = vpack.c.b16 %v1162_v31, %v1162_v31 }
 0x205   :  { %1020 = vrot.lane.b32.xlu2 %v1019_v4, %s7845_s25  ;;  %1404 = vrot.lane.b32.xlu0 %v8773_v12, %s7845_s25  ;;  %v1234_v4 = vunpack.c.l.b16 %v8856_v34 }
 0x207   :  { %v8870_v39 = vpack.c.b16 %v1234_v4, %v1234_v4 }
 0x209   :  { %7186 = vrot.lane.b32.xlu1 %v7165_v8, %s7848_s28  ;;  %v8864_v8 = vpop.f32.mrf.mxu0 }
 0x20d   :  { %7196 = vrot.lane.b32.xlu2 %v8758_v59, %s7849_s29  ;;  %4013 = vrot.lane.b32.xlu0 %v1067_v15, %s7847_s27 }
 0x20e   :  { %v948_v36 = vpop.permute.xlu1 %947 }
 0x20f   :  { %v954_v11 = vsel %vm949_vm2, %v948_v36, 0 }
 0x210   :  { %963 = vmatpush.bf16.xpose.msrb.mxu1 %v954_v11 }
 0x211   :  { %7191 = vrot.lane.b32.xlu1 %v7170_v47, %s7848_s28 }
 0x215   :  { %7221 = vrot.lane.b32.xlu2 %v8752_v40, %s7848_s28  ;;  %4034 = vrot.lane.b32.xlu0 %v1091_v20, %s7847_s27 }
 0x217   :  { %6882 = vmatmul.msk.bf16.vlgmr.msrb.gmra.mxu1 %vm949_vm2, %v8701_v63  ;;  %v8822_v63 = vpack.c.bf16 %v626_v26, %v626_v26 }
 0x219   :  { %1044 = vrot.lane.b32.xlu1 %v1043_v32, %s7845_s25  ;;  %v1114_v45 = vunpack.c.l.b16 %v8822_v63 }
 0x21b   :  { %v1115_v53 = vpack.c.b16 %v1114_v45, %v1114_v45  ;;  %v7270_v45 = vpack.i.bf16 %v8824_v49, %v8864_v8 }
 0x21d   :  { %1092 = vrot.lane.b32.xlu2 %v1091_v20, %s7845_s25  ;;  %1140 = vrot.lane.b32.xlu0 %v1139_v6, %s7845_s25 }
 0x21f   :  { %v8812_v30 = vpop.permute.xlu2 %1284 }
 0x221   :  { %1380 = vrot.lane.b32.xlu1 %v8814_v21, %s7845_s25 }
 0x225   :  { %7226 = vrot.lane.b32.xlu2 %v7225_v42, %s7849_s29  ;;  %4076 = vrot.lane.b32.xlu0 %v1139_v6, %s7847_s27 }
 0x227   :  { %v8828_v62 = vpop.permute.xlu2 %3907 }
 0x228   :  { %12653 = vst [vmem:[#allocation9_spill] sm:$0xff] %v8828_v62 }
 0x229   :  { %3992 = vrot.lane.b32.xlu1 %v1043_v32, %s7847_s27 }
 0x22d   :  { %4055 = vrot.lane.b32.xlu2 %v1115_v53, %s7847_s27  ;;  %4118 = vrot.lane.b32.xlu0 %v8833_v41, %s7847_s27 }
 0x22f   :  { %v8848_v27 = vpop.permute.xlu2 %7136 }
 0x230   :  { %v7138_v36 = vunpack.i.l.bf16 %v8848_v27 }
 0x231   :  { %7211 = vrot.lane.b32.xlu1 %v8752_v40, %s7846_s26  ;;  %v8874_v40 = vpack.c.bf16 %v8864_v8, %v8864_v8 }
 0x232   :  { %v8899_v22 = vpack.c.bf16 %v7138_v36, %v7138_v36 }
 0x233   :  { %v1258_v15 = vunpack.c.l.b16 %v8874_v40 }
 0x234   :  { %v1426_v4 = vunpack.c.l.b16 %v8899_v22 }
 0x235   :  { %1164 = vrot.lane.b32.xlu2 %v8858_v0, %s7845_s25  ;;  %1212 = vrot.lane.b32.xlu0 %v1211_v37, %s7845_s25  ;;  %v8889_v18 = vpack.c.b16 %v1258_v15, %v1258_v15 }
 0x237   :  { %v7142_v56 = vpop.permute.xlu2 %7141 }
 0x238   :  { %v7143_v47 = vunpack.i.l.bf16 %v7142_v56  ;;  %v7144_v31 = vunpack.i.h.bf16 %v7142_v56 }
 0x239   :  { %7216 = vrot.lane.b32.xlu1 %v8758_v59, %s7848_s28 }
 0x23a   :  { %v8883_v59 = vpack.c.bf16 %v7143_v47, %v7143_v47  ;;  %v8920_v36 = vpack.c.bf16 %v7144_v31, %v7144_v31 }
 0x23b   :  { %v8868_v61 = vpop.permute.xlu1 %7151 }
 0x23c   :  { %v1762_v32 = vunpack.c.l.b16 %v8883_v59  ;;  %v7153_v58 = vunpack.i.l.bf16 %v8868_v61  ;;  %v7154_v46 = vunpack.i.h.bf16 %v8868_v61 }
 0x23d   :  { %4139 = vrot.lane.b32.xlu2 %v1211_v37, %s7847_s27  ;;  %4160 = vrot.lane.b32.xlu0 %v8870_v39, %s7847_s27 }
 0x23e   :  { %v8907_v9 = vpack.c.b16 %v1762_v32, %v1762_v32  ;;  %v8922_v56 = vpack.c.bf16 %v7153_v58, %v7153_v58  ;;  %v8926_v32 = vpack.c.b16 %v1426_v4, %v1426_v4  ;;  %v1786_v4 = vunpack.c.l.b16 %v8920_v36 }
 0x23f   :  { %v7147_v23 = vpop.permute.xlu2 %7146  ;;  %v8879_v5 = vpop.permute.xlu0 %1308 }
 0x240   :  { %v7148_v11 = vunpack.i.l.bf16 %v7147_v23  ;;  %12656 = vst [vmem:[#allocation12_spill] sm:$0xff] %v8907_v9 }
 0x241   :  { %7231 = vrot.lane.b32.xlu1 %v7225_v42, %s7846_s26  ;;  %12657 = vst [vmem:[#allocation13_spill] sm:$0xff] %v8926_v32 }
 0x242   :  { %v8901_v6 = vpack.c.bf16 %v7148_v11, %v7148_v11 }
 0x243   :  { %v8885_v26 = vpop.permute.xlu1 %7156 }
 0x244   :  { %12654 = vst [vmem:[#allocation10_spill] sm:$0xff] %v8901_v6  ;;  %v1906_v47 = vunpack.c.l.b16 %v8901_v6  ;;  %v7158_v31 = vunpack.i.l.bf16 %v8885_v26 }
 0x245   :  { %7266 = vrot.lane.b32.xlu2 %v7265_v48, %s7849_s29  ;;  %1260 = vrot.lane.b32.xlu0 %v8889_v18, %s7845_s25 }
 0x247   :  { %v8895_v20 = vpop.permute.xlu2 %7161  ;;  %v997_v13 = vpop.permute.xlu0 %996 }
 0x248   :  { %v1002_v48 = vsel %vm949_vm2, %v997_v13, 0  ;;  %v7149_v13 = vunpack.i.h.bf16 %v7147_v23 }
 0x249   :  { %7236 = vrot.lane.b32.xlu1 %v7225_v42, %s7848_s28 }
 0x24b   :  { %v8903_v16 = vpop.permute.xlu1 %3929 }
 0x24c   :  { %12655 = vst [vmem:[#allocation11_spill] sm:$0xff] %v8903_v16 }
 0x24d   :  { %7271 = vrot.lane.b32.xlu2 %v7270_v45, %s7849_s29  ;;  %1764 = vrot.lane.b32.xlu0 %v8907_v9, %s7845_s25  ;;  %v8928_v45 = vpack.c.b16 %v1906_v47, %v1906_v47  ;;  %v2242_v47 = vunpack.c.l.b16 %v8922_v56 }
 0x24f   :  { %v973_v42 = vpop.permute.xlu2 %972  ;;  %v8913_v37 = vpop.permute.xlu0 %1356  ;;  %12658 = vst [vmem:[#allocation14_spill] sm:$0xff] %v8928_v45  ;;  %v8954_v23 = vpack.c.b16 %v2242_v47, %v2242_v47 }
 0x250   :  { %v978_v15 = vsel %vm949_vm2, %v973_v42, 0 }
 0x251   :  { %987 = vmatpush.bf16.xpose.msra.mxu1 %v978_v15  ;;  %1116 = vrot.lane.b32.xlu1 %v1115_v53, %s7845_s25  ;;  %v7240_v53 = vpack.i.bf16 %v8789_v3, %v8778_v43  ;;  %v8946_v15 = vpack.c.bf16 %v7149_v13, %v7149_v13  ;;  %v8952_v3 = vpack.c.b16 %v1786_v4, %v1786_v4 }
 0x252   :  { %12663 = vst [vmem:[#allocation19_spill] sm:$0xff] %v8954_v23 }
 0x253   :  { %v8924_v11 = vpop.permute.xlu1 %1332  ;;  %12662 = vst [vmem:[#allocation18_spill] sm:$0xff] %v8952_v3 }
 0x255   :  { %1428 = vrot.lane.b32.xlu2 %v8926_v32, %s7845_s25  ;;  %1908 = vrot.lane.b32.xlu0 %v8928_v45, %s7845_s25 }
 0x257   :  { %v8937_v58 = vpop.permute.xlu2 %3950  ;;  %v8939_v42 = vpop.permute.xlu0 %3971 }
 0x258   :  { %12659 = vst [vmem:[#allocation15_spill] sm:$0xff] %v8937_v58  ;;  %6883 = vmatmul.msk.bf16.vlgmr.msra.gmra.mxu1 %vm949_vm2, %v8724_v19  ;;  %v7139_v19 = vunpack.i.h.bf16 %v8848_v27 }
 0x259   :  { %1011 = vmatpush.bf16.xpose.msrb.mxu1 %v1002_v48  ;;  %12660 = vst [vmem:[#allocation16_spill] sm:$0xff] %v8939_v42  ;;  %7241 = vrot.lane.b32.xlu1 %v7240_v53, %s7849_s29  ;;  %v8948_v48 = vpack.c.bf16 %v7158_v31, %v7158_v31  ;;  %v1930_v31 = vunpack.c.l.b16 %v8946_v15 }
 0x25a   :  { %v8968_v9 = vpack.c.bf16 %v7139_v19, %v7139_v19 }
 0x25b   :  { %12661 = vst [vmem:[#allocation17_spill] sm:$0xff] %v8948_v48  ;;  %v8950_v43 = vpop.permute.xlu1 %7166  ;;  %v2386_v4 = vunpack.c.l.b16 %v8948_v48  ;;  %v8974_v27 = vpack.c.b16 %v1930_v31, %v1930_v31 }
 0x25c   :  { %v1450_v31 = vunpack.c.l.b16 %v8968_v9 }
 0x25d   :  { %1788 = vrot.lane.b32.xlu2 %v8952_v3, %s7845_s25  ;;  %2244 = vrot.lane.b32.xlu0 %v8954_v23, %s7845_s25  ;;  %v8970_v3 = vpack.c.bf16 %v7154_v46, %v7154_v46  ;;  %12665 = vst [vmem:[#allocation21_spill] sm:$0xff] %v8974_v27  ;;  %v8976_v61 = vpack.c.b16 %v2386_v4, %v2386_v4 }
 0x25e   :  { %v9001_v12 = vpack.c.b16 %v1450_v31, %v1450_v31 }
 0x25f   :  { %v1021_v13 = vpop.permute.xlu2 %1020  ;;  %v8962_v45 = vpop.permute.xlu0 %7201  ;;  %12664 = vst [vmem:[#allocation20_spill] sm:$0xff] %v8970_v3  ;;  %v2266_v21 = vunpack.c.l.b16 %v8970_v3 }
 0x260   :  { %v1026_v47 = vsel %vm949_vm2, %v1021_v13, 0  ;;  %12666 = vst [vmem:[#allocation22_spill] sm:$0xff] %v8976_v61  ;;  %v7159_v13 = vunpack.i.h.bf16 %v8885_v26 }
 0x261   :  { %7246 = vrot.lane.b32.xlu1 %v7240_v53, %s7846_s26  ;;  %1035 = vmatpush.bf16.xpose.msra.mxu1 %v1026_v47  ;;  %v7164_v47 = vunpack.i.h.bf16 %v8895_v20  ;;  %12670 = vst [vmem:[#allocation26_spill] sm:$0xff] %v9001_v12 }
 0x262   :  { %v8993_v4 = vpack.c.bf16 %v7159_v13, %v7159_v13 }
 0x263   :  { %v8972_v23 = vpop.permute.xlu1 %7171 }
 0x264   :  { %12667 = vst [vmem:[#allocation23_spill] sm:$0xff] %v8993_v4  ;;  %v2410_v13 = vunpack.c.l.b16 %v8993_v4 }
 0x265   :  { %1932 = vrot.lane.b32.xlu2 %v8974_v27, %s7845_s25  ;;  %2388 = vrot.lane.b32.xlu0 %v8976_v61, %s7845_s25  ;;  %v8995_v61 = vpack.c.bf16 %v7164_v47, %v7164_v47  ;;  %v8999_v27 = vpack.c.b16 %v2266_v21, %v2266_v21 }
 0x267   :  { %v8984_v19 = vpop.permute.xlu2 %7196  ;;  %v8986_v46 = vpop.permute.xlu0 %7206  ;;  %12668 = vst [vmem:[#allocation24_spill] sm:$0xff] %v8995_v61  ;;  %v2746_v47 = vunpack.c.l.b16 %v8995_v61 }
 0x268   :  { %6884 = vmatmul.msk.bf16.vlgmr.msrb.gmra.mxu1 %vm949_vm2, %v8716_v7  ;;  %12669 = vst [vmem:[#allocation25_spill] sm:$0xff] %v8999_v27  ;;  %v7173_v7 = vunpack.i.l.bf16 %v8972_v23 }
 0x269   :  { %7251 = vrot.lane.b32.xlu1 %v7240_v53, %s7848_s28  ;;  %v9021_v10 = vpack.c.b16 %v2746_v47, %v2746_v47 }
 0x26a   :  { %v9015_v31 = vpack.c.bf16 %v7173_v7, %v7173_v7 }
 0x26b   :  { %v8997_v26 = vpop.permute.xlu1 %7176  ;;  %12672 = vst [vmem:[#allocation28_spill] sm:$0xff] %v9021_v10 }
 0x26d   :  { %2268 = vrot.lane.b32.xlu2 %v8999_v27, %s7845_s25  ;;  %1452 = vrot.lane.b32.xlu0 %v9001_v12, %s7845_s25  ;;  %v9019_v12 = vpack.c.b16 %v2410_v13, %v2410_v13 }
 0x26f   :  { %v9008_v32 = vpop.permute.xlu2 %7221  ;;  %v1069_v53 = vpop.permute.xlu0 %1068  ;;  %12671 = vst [vmem:[#allocation27_spill] sm:$0xff] %v9019_v12 }
 0x270   :  { %v1074_v21 = vsel %vm949_vm2, %v1069_v53, 0  ;;  %v7178_v53 = vunpack.i.l.bf16 %v8997_v26 }
 0x271   :  { %4097 = vrot.lane.b32.xlu1 %v8858_v0, %s7847_s27  ;;  %1083 = vmatpush.bf16.xpose.msra.mxu3 %v1074_v21  ;;  %v1810_v0 = vunpack.c.l.b16 %v9015_v31 }
 0x272   :  { %v9037_v7 = vpack.c.bf16 %v7178_v53, %v7178_v53 }
 0x273   :  { %v9017_v27 = vpop.permute.xlu1 %7181  ;;  %v9041_v47 = vpack.c.b16 %v1810_v0, %v1810_v0 }
 0x274   :  { %v7183_v21 = vunpack.i.l.bf16 %v9017_v27 }
 0x275   :  { %2412 = vrot.lane.b32.xlu2 %v9019_v12, %s7845_s25  ;;  %2748 = vrot.lane.b32.xlu0 %v9021_v10, %s7845_s25  ;;  %12673 = vst [vmem:[#allocation29_spill] sm:$0xff] %v9041_v47 }
 0x276   :  { %v9054_v53 = vpack.c.bf16 %v7183_v21, %v7183_v21 }
 0x277   :  { %v1093_v24 = vpop.permute.xlu2 %1092  ;;  %v9028_v61 = vpop.permute.xlu0 %1404 }
 0x278   :  { %6885 = vmatmul.msk.bf16.vlgmr.msra.gmra.mxu1 %vm949_vm2, %v8739_v55  ;;  %6887 = vmatmul.msk.bf16.vlgmr.msra.gmra.mxu3 %vm949_vm2, %v8760_v50  ;;  %v7255_v50 = vpack.i.bf16 %v8824_v49, %v8805_v14  ;;  %12675 = vst [vmem:[#allocation31_spill] sm:$0xff] %v9054_v53  ;;  %v2290_v21 = vunpack.c.l.b16 %v9054_v53 }
 0x279   :  { %1188 = vrot.lane.b32.xlu1 %v8833_v41, %s7845_s25  ;;  %v1954_v41 = vunpack.c.l.b16 %v9037_v7 }
 0x27b   :  { %v9039_v13 = vpop.permute.xlu1 %7186  ;;  %v9056_v12 = vpack.c.b16 %v1954_v41, %v1954_v41 }
 0x27d   :  { %1812 = vrot.lane.b32.xlu0 %v9041_v47, %s7845_s25  ;;  %12676 = vst [vmem:[#allocation32_spill] sm:$0xff] %v9056_v12  ;;  %v7174_v47 = vunpack.i.h.bf16 %v8972_v23  ;;  %v9077_v23 = vpack.c.b16 %v2290_v21, %v2290_v21 }
 0x27f   :  { %v9046_v10 = vpop.permute.xlu2 %7226  ;;  %v9048_v55 = vpop.permute.xlu0 %4013  ;;  %v9071_v41 = vpack.c.bf16 %v7174_v47, %v7174_v47  ;;  %12681 = vst [vmem:[#allocation37_spill] sm:$0xff] %v9077_v23  ;;  %v7179_v47 = vunpack.i.h.bf16 %v8997_v26 }
 0x280   :  { %12674 = vst [vmem:[#allocation30_spill] sm:$0xff] %v9048_v55  ;;  %v7188_v55 = vunpack.i.l.bf16 %v9039_v13 }
 0x281   :  { %7256 = vrot.lane.b32.xlu1 %v7255_v50, %s7846_s26 }
 0x283   :  { %v7192_v0 = vpop.permute.xlu1 %7191 }
 0x284   :  { %v7193_v42 = vunpack.i.l.bf16 %v7192_v0 }
 0x285   :  { %1956 = vrot.lane.b32.xlu0 %v9056_v12, %s7845_s25  ;;  %v9075_v12 = vpack.c.bf16 %v7188_v55, %v7188_v55  ;;  %v7169_v55 = vunpack.i.h.bf16 %v8950_v43 }
 0x286   :  { %v9061_v62 = vpack.c.bf16 %v7193_v42, %v7193_v42 }
 0x287   :  { %v9064_v14 = vpop.permute.xlu2 %4055  ;;  %v9066_v49 = vpop.permute.xlu0 %4034  ;;  %v9096_v26 = vpack.c.bf16 %v7169_v55, %v7169_v55  ;;  %v7275_v55 = vpack.i.bf16 %v8864_v8, %v8846_v57 }
 0x288   :  { %12677 = vst [vmem:[#allocation33_spill] sm:$0xff] %v9061_v62  ;;  %v2770_v16 = vunpack.c.l.b16 %v9061_v62 }
 0x289   :  { %12678 = vst [vmem:[#allocation34_spill] sm:$0xff] %v9064_v14  ;;  %7261 = vrot.lane.b32.xlu1 %v7255_v50, %s7848_s28  ;;  %v1098_v14 = vsel %vm949_vm2, %v1093_v24, 0  ;;  %v9092_v24 = vpack.c.bf16 %v7179_v47, %v7179_v47  ;;  %v7194_v47 = vunpack.i.h.bf16 %v7192_v0 }
 0x28a   :  { %12679 = vst [vmem:[#allocation35_spill] sm:$0xff] %v9066_v49  ;;  %v9073_v48 = vpack.c.b16 %v2770_v16, %v2770_v16  ;;  %v1834_v16 = vunpack.c.l.b16 %v9071_v41 }
 0x28b   :  { %v1045_v42 = vpop.permute.xlu1 %1044  ;;  %12682 = vst [vmem:[#allocation38_spill] sm:$0xff] %v9092_v24  ;;  %v9127_v0 = vpack.c.bf16 %v7194_v47, %v7194_v47 }
 0x28c   :  { %12680 = vst [vmem:[#allocation36_spill] sm:$0xff] %v9073_v48  ;;  %v1050_v29 = vsel %vm949_vm2, %v1045_v42, 0  ;;  %2772 = vrot.lane.b32.xlu2 %v9073_v48, %s7845_s25  ;;  %v2434_v42 = vunpack.c.l.b16 %v9075_v12 }
 0x28d   :  { %2292 = vrot.lane.b32.xlu0 %v9077_v23, %s7845_s25  ;;  %1059 = vmatpush.bf16.xpose.msrb.mxu1 %v1050_v29  ;;  %v9094_v29 = vpack.c.b16 %v1834_v16, %v1834_v16  ;;  %12689 = vst [vmem:[#allocation45_spill] sm:$0xff] %v9127_v0  ;;  %v2794_v47 = vunpack.c.l.b16 %v9127_v0 }
 0x28e   :  { %v9100_v48 = vpack.c.b16 %v2434_v42, %v2434_v42 }
 0x28f   :  { %v1165_v50 = vpop.permute.xlu2 %1164  ;;  %v1141_v21 = vpop.permute.xlu0 %1140  ;;  %12683 = vst [vmem:[#allocation39_spill] sm:$0xff] %v9094_v29 }
 0x290   :  { %v1146_v62 = vsel %vm949_vm2, %v1141_v21, 0  ;;  %12684 = vst [vmem:[#allocation40_spill] sm:$0xff] %v9100_v48  ;;  %v1170_v23 = vsel %vm949_vm2, %v1165_v50, 0  ;;  %v1498_v50 = vunpack.c.l.b16 %v9096_v26 }
 0x291   :  { %1236 = vrot.lane.b32.xlu1 %v8870_v39, %s7845_s25  ;;  %1155 = vmatpush.bf16.xpose.msrb.mxu3 %v1146_v62  ;;  %v7184_v62 = vunpack.i.h.bf16 %v9017_v27  ;;  %v1978_v39 = vunpack.c.l.b16 %v9092_v24 }
 0x292   :  { %v9131_v57 = vpack.c.b16 %v1498_v50, %v1498_v50 }
 0x293   :  { %v9125_v27 = vpack.c.b16 %v1978_v39, %v1978_v39 }
 0x294   :  { %1836 = vrot.lane.b32.xlu2 %v9094_v29, %s7845_s25  ;;  %6886 = vmatmul.msk.bf16.vlgmr.msrb.gmra.mxu1 %vm949_vm2, %v8786_v28  ;;  %v9111_v16 = vpop.f32.mrf.mxu1  ;;  %v9123_v28 = vpack.c.bf16 %v7184_v62, %v7184_v62  ;;  %12691 = vst [vmem:[#allocation47_spill] sm:$0xff] %v9131_v57  ;;  %v7203_v62 = vunpack.i.l.bf16 %v8962_v45 }
 0x295   :  { %1107 = vmatpush.bf16.xpose.msra.mxu1 %v1098_v14  ;;  %v9098_v14 = vpop.permute.xlu1 %1380  ;;  %2436 = vrot.lane.b32.xlu0 %v9100_v48, %s7845_s25  ;;  %12688 = vst [vmem:[#allocation44_spill] sm:$0xff] %v9125_v27 }
 0x296   :  { %12687 = vst [vmem:[#allocation43_spill] sm:$0xff] %v9123_v28  ;;  %v2314_v8 = vunpack.c.l.b16 %v9123_v28 }
 0x297   :  { %v9116_v21 = vpop.permute.xlu2 %4139  ;;  %v9118_v42 = vpop.permute.xlu0 %4076 }
 0x298   :  { %12685 = vst [vmem:[#allocation41_spill] sm:$0xff] %v9116_v21  ;;  %6890 = vmatmul.msk.bf16.vlgmr.msrb.gmra.mxu3 %vm949_vm2, %v8795_v54  ;;  %v7189_v54 = vunpack.i.h.bf16 %v9039_v13  ;;  %v9151_v13 = vpack.c.bf16 %v7203_v62, %v7203_v62 }
 0x299   :  { %12686 = vst [vmem:[#allocation42_spill] sm:$0xff] %v9118_v42  ;;  %7276 = vrot.lane.b32.xlu1 %v7275_v55, %s7846_s26  ;;  %v9153_v42 = vpack.c.b16 %v2794_v47, %v2794_v47 }
 0x29a   :  { %v9144_v50 = vpack.c.bf16 %v7189_v54, %v7189_v54  ;;  %v1858_v62 = vunpack.c.l.b16 %v9151_v13 }
 0x29b   :  { %12695 = vst [vmem:[#allocation51_spill] sm:$0xff] %v9153_v42 }
 0x29c   :  { %1980 = vrot.lane.b32.xlu2 %v9125_v27, %s7845_s25  ;;  %v967_v39 = vpop.f32.mrf.mxu1  ;;  %12693 = vst [vmem:[#allocation49_spill] sm:$0xff] %v9144_v50  ;;  %v9148_v27 = vpack.c.b16 %v2314_v8, %v2314_v8  ;;  %v2458_v54 = vunpack.c.l.b16 %v9144_v50 }
 0x29d   :  { %1179 = vmatpush.bf16.xpose.msrb.mxu1 %v1170_v23  ;;  %v9129_v23 = vpop.permute.xlu1 %3992  ;;  %1500 = vrot.lane.b32.xlu0 %v9131_v57, %s7845_s25  ;;  %v7163_v57 = vunpack.i.l.bf16 %v8895_v20  ;;  %v7208_v20 = vunpack.i.l.bf16 %v8986_v46 }
 0x29e   :  { %12690 = vst [vmem:[#allocation46_spill] sm:$0xff] %v9129_v23  ;;  %v9179_v23 = vpack.c.b16 %v1858_v62, %v1858_v62 }
 0x29f   :  { %v9141_v48 = vpop.permute.xlu0 %4118  ;;  %v9146_v29 = vpop.permute.xlu2 %7266  ;;  %12694 = vst [vmem:[#allocation50_spill] sm:$0xff] %v9148_v27  ;;  %v9163_v8 = vpack.c.bf16 %v7163_v57, %v7163_v57  ;;  %v7168_v57 = vunpack.i.l.bf16 %v8950_v43 }
 0x2a0   :  { %12692 = vst [vmem:[#allocation48_spill] sm:$0xff] %v9141_v48 }
 0x2a1   :  { %7281 = vrot.lane.b32.xlu1 %v7275_v55, %s7848_s28  ;;  %v7204_v55 = vunpack.i.h.bf16 %v8962_v45  ;;  %12696 = vst [vmem:[#allocation52_spill] sm:$0xff] %v9163_v8  ;;  %v9174_v45 = vpack.c.b16 %v2458_v54, %v2458_v54  ;;  %v9190_v43 = vpack.c.bf16 %v7168_v57, %v7168_v57  ;;  %v7198_v57 = vunpack.i.l.bf16 %v8984_v19 }
 0x2a2   :  { %12699 = vst [vmem:[#allocation55_spill] sm:$0xff] %v9179_v23 }
 0x2a3   :  { %12697 = vst [vmem:[#allocation53_spill] sm:$0xff] %v9174_v45 }
 0x2a4   :  { %2316 = vrot.lane.b32.xlu2 %v9148_v27, %s7845_s25  ;;  %6888 = vmatmul.msk.bf16.vlgmr.msra.gmra.mxu1 %vm949_vm2, %v8781_v17  ;;  %v1290_v17 = vsel %vm949_vm2, %v8812_v30, 0  ;;  %v9177_v27 = vpack.c.bf16 %v7208_v20, %v7208_v20  ;;  %v7209_v30 = vunpack.i.h.bf16 %v8986_v46 }
 0x2a5   :  { %v7212_v21 = vpop.permute.xlu1 %7211  ;;  %2796 = vrot.lane.b32.xlu0 %v9153_v42, %s7845_s25  ;;  %v9172_v42 = vpack.c.bf16 %v7204_v55, %v7204_v55 }
 0x2a6   :  { %12698 = vst [vmem:[#allocation54_spill] sm:$0xff] %v9177_v27  ;;  %v7213_v55 = vunpack.i.l.bf16 %v7212_v21  ;;  %v2002_v20 = vunpack.c.l.b16 %v9177_v27  ;;  %v9203_v46 = vpack.c.bf16 %v7209_v30, %v7209_v30 }
 0x2a7   :  { %v1213_v39 = vpop.permute.xlu0 %1212  ;;  %v9182_v0 = vpop.permute.xlu2 %7271 }
 0x2a8   :  { %v1218_v47 = vsel %vm949_vm2, %v1213_v39, 0  ;;  %v2722_v39 = vunpack.c.l.b16 %v9163_v8  ;;  %12702 = vst [vmem:[#allocation58_spill] sm:$0xff] %v9203_v46 }
 0x2a9   :  { %4181 = vrot.lane.b32.xlu1 %v8889_v18, %s7847_s27  ;;  %1227 = vmatpush.bf16.xpose.msra.mxu3 %v1218_v47  ;;  %v1882_v18 = vunpack.c.l.b16 %v9172_v42  ;;  %v1362_v47 = vsel %vm949_vm2, %v8913_v37, 0  ;;  %v1474_v37 = vunpack.c.l.b16 %v9190_v43 }
 0x2aa   :  { %v9192_v54 = vpack.c.b16 %v2722_v39, %v2722_v39  ;;  %v9208_v39 = vpack.c.bf16 %v7213_v55, %v7213_v55  ;;  %v9222_v55 = vpack.c.bf16 %v7198_v57, %v7198_v57 }
 0x2ac   :  { %2460 = vrot.lane.b32.xlu2 %v9174_v45, %s7845_s25  ;;  %12700 = vst [vmem:[#allocation56_spill] sm:$0xff] %v9192_v54 }
 0x2ad   :  { %v7217_v48 = vpop.permute.xlu1 %7216  ;;  %1860 = vrot.lane.b32.xlu0 %v9179_v23, %s7845_s25  ;;  %v9212_v23 = vpack.c.b16 %v2002_v20, %v2002_v20  ;;  %v9224_v20 = vpack.c.b16 %v1474_v37, %v1474_v37  ;;  %v1522_v37 = vunpack.c.l.b16 %v9222_v55 }
 0x2ae   :  { %v7219_v50 = vunpack.i.h.bf16 %v7217_v48 }
 0x2af   :  { %v9195_v62 = vpop.permute.xlu0 %4160  ;;  %12704 = vst [vmem:[#allocation60_spill] sm:$0xff] %v9212_v23  ;;  %v1429_v30 = vpop.permute.xlu2 %1428 }
 0x2b0   :  { %12701 = vst [vmem:[#allocation57_spill] sm:$0xff] %v9195_v62  ;;  %6893 = vmatmul.msk.bf16.vlgmr.msra.gmra.mxu3 %vm949_vm2, %v8841_v35  ;;  %v7214_v35 = vunpack.i.h.bf16 %v7212_v21  ;;  %v1434_v4 = vsel %vm949_vm2, %v1429_v30, 0  ;;  %v7199_v30 = vunpack.i.h.bf16 %v8984_v19 }
 0x2b1   :  { %1299 = vmatpush.bf16.xpose.msrb.mxu3 %v1290_v17  ;;  %2724 = vrot.lane.b32.xlu1 %v9192_v54, %s7845_s25  ;;  %v9205_v17 = vpack.c.b16 %v1882_v18, %v1882_v18  ;;  %v2026_v18 = vunpack.c.l.b16 %v9203_v46  ;;  %12705 = vst [vmem:[#allocation61_spill] sm:$0xff] %v9224_v20  ;;  %v2338_v54 = vunpack.c.l.b16 %v9208_v39 }
 0x2b3   :  { %12703 = vst [vmem:[#allocation59_spill] sm:$0xff] %v9205_v17  ;;  %v9239_v57 = vpack.c.b16 %v2338_v54, %v2338_v54 }
 0x2b4   :  { %6891 = vmatmul.msk.bf16.vlgmr.msrb.gmra.mxu1 %vm949_vm2, %v8837_v38  ;;  %1884 = vrot.lane.b32.xlu2 %v9205_v17, %s7845_s25  ;;  %v9231_v38 = vpack.c.bf16 %v7214_v35, %v7214_v35  ;;  %v9233_v17 = vpack.c.b16 %v2026_v18, %v2026_v18  ;;  %v7223_v18 = vunpack.i.l.bf16 %v9008_v32 }
 0x2b5   :  { %v9210_v45 = vpop.permute.xlu1 %7231  ;;  %2004 = vrot.lane.b32.xlu0 %v9212_v23, %s7845_s25  ;;  %12709 = vst [vmem:[#allocation65_spill] sm:$0xff] %v9239_v57 }
 0x2b6   :  { %12706 = vst [vmem:[#allocation62_spill] sm:$0xff] %v9231_v38  ;;  %v2362_v35 = vunpack.c.l.b16 %v9231_v38 }
 0x2b7   :  { %v9227_v62 = vpop.permute.xlu0 %1260  ;;  %12707 = vst [vmem:[#allocation63_spill] sm:$0xff] %v9233_v17  ;;  %v9251_v51 = vpop.permute.xlu2 %1788 }
 0x2b9   :  { %1371 = vmatpush.bf16.xpose.msra.mxu3 %v1362_v47  ;;  %v7218_v47 = vunpack.i.l.bf16 %v7217_v48  ;;  %1476 = vrot.lane.b32.xlu1 %v9224_v20, %s7845_s25  ;;  %v9248_v20 = vpack.c.b16 %v1522_v37, %v1522_v37  ;;  %v9261_v37 = vpack.c.b16 %v2362_v35, %v2362_v35 }
 0x2bb   :  { %v9235_v21 = vpack.c.bf16 %v7218_v47, %v7218_v47  ;;  %12710 = vst [vmem:[#allocation66_spill] sm:$0xff] %v9248_v20 }
 0x2bc   :  { %2028 = vrot.lane.b32.xlu2 %v9233_v17, %s7845_s25  ;;  %12712 = vst [vmem:[#allocation68_spill] sm:$0xff] %v9261_v37  ;;  %v9263_v17 = vpack.c.bf16 %v7223_v18, %v7223_v18 }
 0x2bd   :  { %12708 = vst [vmem:[#allocation64_spill] sm:$0xff] %v9235_v21  ;;  %v9237_v23 = vpop.permute.xlu1 %7236  ;;  %2340 = vrot.lane.b32.xlu0 %v9239_v57, %s7845_s25  ;;  %v2482_v47 = vunpack.c.l.b16 %v9235_v21  ;;  %v9259_v57 = vpack.c.bf16 %v7219_v50, %v7219_v50  ;;  %v7224_v50 = vunpack.i.h.bf16 %v9008_v32 }
 0x2be   :  { %12713 = vst [vmem:[#allocation69_spill] sm:$0xff] %v9263_v17  ;;  %v2818_v35 = vunpack.c.l.b16 %v9263_v17 }
 0x2bf   :  { %v1765_v54 = vpop.permute.xlu0 %1764  ;;  %12711 = vst [vmem:[#allocation67_spill] sm:$0xff] %v9259_v57  ;;  %v9265_v38 = vpack.c.b16 %v2482_v47, %v2482_v47  ;;  %v9280_v47 = vpack.c.bf16 %v7224_v50, %v7224_v50  ;;  %v7268_v50 = vunpack.i.l.bf16 %v9146_v29 }
 0x2c0   :  { %6896 = vmatmul.msk.bf16.vlgmr.msrb.gmra.mxu3 %vm949_vm2, %v8705_v33  ;;  %v1770_v48 = vsel %vm949_vm2, %v1765_v54, 0 }
 0x2c1   :  { %1524 = vrot.lane.b32.xlu1 %v9248_v20, %s7845_s25  ;;  %1443 = vmatpush.bf16.xpose.msrb.mxu3 %v1434_v4  ;;  %12714 = vst [vmem:[#allocation70_spill] sm:$0xff] %v9265_v38  ;;  %v2506_v4 = vunpack.c.l.b16 %v9259_v57 }
 0x2c2   :  { %1779 = vmatpush.bf16.xpose.msrb.mxu0 %v1770_v48  ;;  %12715 = vst [vmem:[#allocation71_spill] sm:$0xff] %v9280_v47  ;;  %v9286_v48 = vpack.c.bf16 %v7199_v30, %v7199_v30  ;;  %v2842_v30 = vunpack.c.l.b16 %v9280_v47 }
 0x2c3   :  { %v9284_v54 = vpack.c.b16 %v2506_v4, %v2506_v4 }
 0x2c4   :  { %2364 = vrot.lane.b32.xlu2 %v9261_v37, %s7845_s25 }
 0x2c5   :  { %v1117_v21 = vpop.permute.xlu1 %1116  ;;  %2484 = vrot.lane.b32.xlu0 %v9265_v38, %s7845_s25  ;;  %12716 = vst [vmem:[#allocation72_spill] sm:$0xff] %v9284_v54  ;;  %v1546_v38 = vunpack.c.l.b16 %v9286_v48 }
 0x2c6   :  { %v1122_v33 = vsel %vm949_vm2, %v1117_v21, 0  ;;  %v9282_v21 = vpop.permute.xlu2 %1932 }
 0x2c7   :  { %1131 = vmatpush.bf16.xpose.msra.mxu2 %v1122_v33  ;;  %v9276_v18 = vpop.permute.xlu0 %1908  ;;  %v9290_v33 = vpack.c.b16 %v2818_v35, %v2818_v35  ;;  %v7233_v35 = vunpack.i.l.bf16 %v9210_v45  ;;  %v9323_v53 = vpack.c.b16 %v1546_v38, %v1546_v38 }
 0x2c9   :  { %6916 = vmatmul.msk.bf16.vlgmr.msrb.gmra.mxu0 %vm949_vm2, %v8883_v59  ;;  %12717 = vst [vmem:[#allocation73_spill] sm:$0xff] %v9290_v33  ;;  %v7228_v59 = vunpack.i.l.bf16 %v9046_v10  ;;  %v9319_v47 = vpack.c.bf16 %v7233_v35, %v7233_v35  ;;  %v7229_v35 = vunpack.i.h.bf16 %v9046_v10 }
 0x2ca   :  { %12720 = vst [vmem:[#allocation76_spill] sm:$0xff] %v9323_v53 }
 0x2cb   :  { %v9351_v3 = vpack.c.bf16 %v7229_v35, %v7229_v35 }
 0x2cc   :  { %2508 = vrot.lane.b32.xlu2 %v9284_v54, %s7845_s25  ;;  %v9313_v54 = vpack.c.bf16 %v7268_v50, %v7268_v50  ;;  %v7238_v50 = vunpack.i.l.bf16 %v9237_v23 }
 0x2cd   :  { %v9288_v32 = vpop.permute.xlu1 %7241  ;;  %2820 = vrot.lane.b32.xlu0 %v9290_v33, %s7845_s25  ;;  %v9311_v33 = vpack.c.bf16 %v7228_v59, %v7228_v59  ;;  %v7273_v59 = vunpack.i.l.bf16 %v9182_v0  ;;  %v1594_v35 = vunpack.c.l.b16 %v9351_v3 }
 0x2ce   :  { %v7243_v19 = vunpack.i.l.bf16 %v9288_v32  ;;  %6889 = vmatmul.msk.bf16.vlgmr.msra.gmra.mxu2 %vm949_vm2, %v8822_v63  ;;  %v9325_v17 = vpop.permute.xlu2 %2268  ;;  %v1666_v38 = vunpack.c.l.b16 %v9313_v54  ;;  %v9345_v49 = vpack.c.bf16 %v7238_v50, %v7238_v50 }
 0x2cf   :  { %v9306_v37 = vpop.permute.xlu0 %2244  ;;  %12721 = vst [vmem:[#allocation77_spill] sm:$0xff] %v9325_v17 }
 0x2d0   :  { %v9301_v4 = vpack.c.bf16 %v7243_v19, %v7243_v19  ;;  %6899 = vmatmul.msk.bf16.vlgmr.msra.gmra.mxu3 %vm949_vm2, %v8732_v1  ;;  %v9317_v19 = vpack.c.b16 %v2842_v30, %v2842_v30  ;;  %v1570_v30 = vunpack.c.l.b16 %v9311_v33  ;;  %12723 = vst [vmem:[#allocation79_spill] sm:$0xff] %v9345_v49  ;;  %v9347_v28 = vpack.c.b16 %v1666_v38, %v1666_v38 }
 0x2d2   :  { %v1618_v63 = vunpack.c.l.b16 %v9301_v4  ;;  %12719 = vst [vmem:[#allocation75_spill] sm:$0xff] %v9317_v19 }
 0x2d3   :  { %12724 = vst [vmem:[#allocation80_spill] sm:$0xff] %v9347_v28 }
 0x2d4   :  { %v9315_v20 = vpack.c.b16 %v1618_v63, %v1618_v63  ;;  %2844 = vrot.lane.b32.xlu2 %v9317_v19, %s7845_s25  ;;  %v2050_v63 = vunpack.c.l.b16 %v9319_v47  ;;  %v9343_v19 = vpack.c.bf16 %v7273_v59, %v7273_v59  ;;  %v7234_v59 = vunpack.i.h.bf16 %v9210_v45 }
 0x2d5   :  { %v9321_v57 = vpop.permute.xlu1 %7246  ;;  %v9331_v1 = vpop.f32.mrf.mxu1  ;;  %1548 = vrot.lane.b32.xlu0 %v9323_v53, %s7845_s25  ;;  %v9349_v53 = vpack.c.b16 %v1570_v30, %v1570_v30  ;;  %v2530_v30 = vunpack.c.l.b16 %v9345_v49 }
 0x2d6   :  { %12718 = vst [vmem:[#allocation74_spill] sm:$0xff] %v9315_v20  ;;  %1620 = vrot.lane.b32.xlu1 %v9315_v20, %s7845_s25  ;;  %v9355_v58 = vpack.c.b16 %v2050_v63, %v2050_v63  ;;  %v9364_v50 = vpop.permute.xlu2 %2412  ;;  %v1738_v38 = vunpack.c.l.b16 %v9343_v19  ;;  %v7248_v63 = vunpack.i.l.bf16 %v9321_v57 }
 0x2d7   :  { %v9341_v20 = vpop.permute.xlu0 %2388  ;;  %12725 = vst [vmem:[#allocation81_spill] sm:$0xff] %v9349_v53  ;;  %v9378_v45 = vpack.c.b16 %v2530_v30, %v2530_v30  ;;  %v7244_v30 = vunpack.i.h.bf16 %v9288_v32  ;;  %v1266_v32 = vsel %vm949_vm2, %v9227_v62, 0 }
 0x2d8   :  { %12722 = vst [vmem:[#allocation78_spill] sm:$0xff] %v9341_v20  ;;  %v9382_v20 = vpack.c.bf16 %v7248_v63, %v7248_v63 }
 0x2d9   :  { %12726 = vst [vmem:[#allocation82_spill] sm:$0xff] %v9355_v58 }
 0x2da   :  { %12727 = vst [vmem:[#allocation83_spill] sm:$0xff] %v9364_v50 }
 0x2db   :  { %12730 = vst [vmem:[#allocation86_spill] sm:$0xff] %v9378_v45 }
 0x2dc   :  { %1572 = vrot.lane.b32.xlu2 %v9349_v53, %s7845_s25  ;;  %v9380_v53 = vpack.c.b16 %v1594_v35, %v1594_v35  ;;  %12732 = vst [vmem:[#allocation88_spill] sm:$0xff] %v9382_v20  ;;  %v2098_v35 = vunpack.c.l.b16 %v9382_v20 }
 0x2dd   :  { %v9353_v8 = vpop.permute.xlu1 %7251  ;;  %v991_v10 = vpop.f32.mrf.mxu1  ;;  %2052 = vrot.lane.b32.xlu0 %v9355_v58, %s7845_s25  ;;  %v9376_v58 = vpack.c.b16 %v1738_v38, %v1738_v38 }
 0x2de   :  { %1668 = vrot.lane.b32.xlu1 %v9347_v28, %s7845_s25  ;;  %v9374_v10 = vpack.c.bf16 %v7234_v59, %v7234_v59  ;;  %12731 = vst [vmem:[#allocation87_spill] sm:$0xff] %v9380_v53  ;;  %v9408_v27 = vpack.c.b16 %v2098_v35, %v2098_v35 }
 0x2df   :  { %v9370_v28 = vpop.permute.xlu0 %1452  ;;  %12729 = vst [vmem:[#allocation85_spill] sm:$0xff] %v9376_v58 }
 0x2e0   :  { %6902 = vmatmul.msk.bf16.vlgmr.msrb.gmra.mxu3 %vm949_vm2, %v8899_v22  ;;  %12728 = vst [vmem:[#allocation84_spill] sm:$0xff] %v9374_v10  ;;  %v7239_v22 = vunpack.i.h.bf16 %v9237_v23  ;;  %v2074_v38 = vunpack.c.l.b16 %v9374_v10 }
 0x2e1   :  { %12738 = vst [vmem:[#allocation94_spill] sm:$0xff] %v9408_v27 }
 0x2e4   :  { %2532 = vrot.lane.b32.xlu2 %v9378_v45, %s7845_s25  ;;  %v9404_v45 = vpack.c.b16 %v2074_v38, %v2074_v38  ;;  %v7253_v38 = vunpack.i.l.bf16 %v9353_v8 }
 0x2e5   :  { %v9384_v50 = vpop.permute.xlu1 %4097  ;;  %v9390_v17 = vpop.f32.mrf.mxu1  ;;  %1596 = vrot.lane.b32.xlu0 %v9380_v53, %s7845_s25 }
 0x2e6   :  { %12733 = vst [vmem:[#allocation89_spill] sm:$0xff] %v9384_v50  ;;  %1740 = vrot.lane.b32.xlu1 %v9376_v58, %s7845_s25  ;;  %v9395_v59 = vpop.permute.xlu2 %2772  ;;  %v9402_v58 = vpack.c.bf16 %v7239_v22, %v7239_v22  ;;  %v9406_v50 = vpack.c.bf16 %v7244_v30, %v7244_v30 }
 0x2e7   :  { %12734 = vst [vmem:[#allocation90_spill] sm:$0xff] %v9395_v59  ;;  %v9400_v63 = vpop.permute.xlu0 %2748 }
 0x2e8   :  { %12735 = vst [vmem:[#allocation91_spill] sm:$0xff] %v9400_v63  ;;  %v2554_v22 = vunpack.c.l.b16 %v9402_v58  ;;  %v1642_v35 = vunpack.c.l.b16 %v9406_v50  ;;  %v9426_v63 = vpack.c.bf16 %v7253_v38, %v7253_v38 }
 0x2e9   :  { %12736 = vst [vmem:[#allocation92_spill] sm:$0xff] %v9402_v58 }
 0x2ea   :  { %12737 = vst [vmem:[#allocation93_spill] sm:$0xff] %v9404_v45  ;;  %v9428_v62 = vpack.c.b16 %v1642_v35, %v1642_v35  ;;  %v2578_v38 = vunpack.c.l.b16 %v9426_v63 }
 0x2eb   :  { %12740 = vst [vmem:[#allocation96_spill] sm:$0xff] %v9426_v63 }
 0x2ec   :  { %2076 = vrot.lane.b32.xlu2 %v9404_v45, %s7845_s25  ;;  %12741 = vst [vmem:[#allocation97_spill] sm:$0xff] %v9428_v62 }
 0x2ed   :  { %v1189_v53 = vpop.permute.xlu1 %1188  ;;  %v1015_v59 = vpop.f32.mrf.mxu1  ;;  %2100 = vrot.lane.b32.xlu0 %v9408_v27, %s7845_s25 }
 0x2ee   :  { %v1194_v23 = vsel %vm949_vm2, %v1189_v53, 0  ;;  %v9419_v30 = vpop.permute.xlu2 %1836  ;;  %v9424_v53 = vpack.c.b16 %v2554_v22, %v2554_v22  ;;  %v7249_v22 = vunpack.i.h.bf16 %v9321_v57 }
 0x2ef   :  { %1203 = vmatpush.bf16.xpose.msrb.mxu2 %v1194_v23  ;;  %v9422_v45 = vpop.permute.xlu0 %1812  ;;  %v1338_v23 = vsel %vm949_vm2, %v8924_v11, 0 }
 0x2f0   :  { %12739 = vst [vmem:[#allocation95_spill] sm:$0xff] %v9424_v53  ;;  %v9452_v20 = vpack.c.bf16 %v7249_v22, %v7249_v22 }
 0x2f2   :  { %12742 = vst [vmem:[#allocation98_spill] sm:$0xff] %v9452_v20  ;;  %v2122_v22 = vunpack.c.l.b16 %v9452_v20  ;;  %v1410_v20 = vsel %vm949_vm2, %v9028_v61, 0 }
 0x2f4   :  { %2556 = vrot.lane.b32.xlu2 %v9424_v53, %s7845_s25  ;;  %v9454_v53 = vpack.c.b16 %v2578_v38, %v2578_v38  ;;  %v7254_v38 = vunpack.i.h.bf16 %v9353_v8  ;;  %v9476_v24 = vpack.c.b16 %v2122_v22, %v2122_v22 }
 0x2f5   :  { %v9430_v59 = vpop.permute.xlu1 %7256  ;;  %1644 = vrot.lane.b32.xlu0 %v9428_v62, %s7845_s25 }
 0x2f6   :  { %v7258_v27 = vunpack.i.l.bf16 %v9430_v59  ;;  %6892 = vmatmul.msk.bf16.vlgmr.msrb.gmra.mxu2 %vm949_vm2, %v8820_v44  ;;  %v9447_v11 = vpop.permute.xlu2 %1980  ;;  %12743 = vst [vmem:[#allocation99_spill] sm:$0xff] %v9454_v53  ;;  %v9478_v6 = vpack.c.bf16 %v7254_v38, %v7254_v38 }
 0x2f7   :  { %1275 = vmatpush.bf16.xpose.msra.mxu2 %v1266_v32  ;;  %v9439_v32 = vpop.f32.mrf.mxu1  ;;  %v9450_v44 = vpop.permute.xlu0 %1956  ;;  %12745 = vst [vmem:[#allocation101_spill] sm:$0xff] %v9476_v24 }
 0x2f8   :  { %v9445_v35 = vpack.c.bf16 %v7258_v27, %v7258_v27  ;;  %12746 = vst [vmem:[#allocation102_spill] sm:$0xff] %v9478_v6 }
 0x2fa   :  { %v2146_v58 = vunpack.c.l.b16 %v9445_v35 }
 0x2fb   :  { %v9460_v62 = vpop.f32.mrf.mxu3 }
 0x2fc   :  { %2580 = vrot.lane.b32.xlu2 %v9454_v53, %s7845_s25 }
 0x2fd   :  { %v9458_v10 = vpop.permute.xlu1 %7261 }
 0x2fe   :  { %v7263_v57 = vunpack.i.l.bf16 %v9458_v10 }
 0x2ff   :  { %1347 = vmatpush.bf16.xpose.msrb.mxu2 %v1338_v23  ;;  %v9456_v23 = vpack.c.b16 %v2146_v58, %v2146_v58  ;;  %v1039_v27 = vpop.f32.mrf.mxu1  ;;  %v9471_v58 = vpop.permute.xlu2 %2316 }
 0x300   :  { %v9469_v63 = vpack.c.bf16 %v7263_v57, %v7263_v57  ;;  %v9474_v46 = vpop.permute.xlu0 %2292  ;;  %v1314_v57 = vsel %vm949_vm2, %v8879_v5, 0  ;;  %v1386_v5 = vsel %vm949_vm2, %v9098_v14, 0 }
 0x301   :  { %12744 = vst [vmem:[#allocation100_spill] sm:$0xff] %v9456_v23  ;;  %2148 = vrot.lane.b32.xlu0 %v9456_v23, %s7845_s25 }
 0x302   :  { %v2626_v49 = vunpack.c.l.b16 %v9469_v63 }
 0x303   :  { %v1087_v23 = vpop.f32.mrf.mxu3 }
 0x304   :  { %v9480_v27 = vpack.c.b16 %v2626_v49, %v2626_v49  ;;  %2124 = vrot.lane.b32.xlu2 %v9476_v24, %s7845_s25  ;;  %v7274_v49 = vunpack.i.h.bf16 %v9182_v0  ;;  %v2602_v23 = vunpack.c.l.b16 %v9478_v6 }
 0x305   :  { %v1237_v53 = vpop.permute.xlu1 %1236 }
 0x306   :  { %12747 = vst [vmem:[#allocation103_spill] sm:$0xff] %v9480_v27  ;;  %v1242_v8 = vsel %vm949_vm2, %v1237_v53, 0  ;;  %6895 = vmatmul.msk.bf16.vlgmr.msra.gmra.mxu2 %vm949_vm2, %v8874_v40  ;;  %v9499_v40 = vpack.c.bf16 %v7274_v49, %v7274_v49  ;;  %v9501_v22 = vpack.c.b16 %v2602_v23, %v2602_v23  ;;  %v7259_v49 = vunpack.i.h.bf16 %v9430_v59 }
 0x307   :  { %1419 = vmatpush.bf16.xpose.msra.mxu2 %v1410_v20  ;;  %1251 = vmatpush.bf16.xpose.msra.mxu1 %v1242_v8  ;;  %v9495_v61 = vpop.permute.xlu2 %2460 }
 0x308   :  { %12748 = vst [vmem:[#allocation104_spill] sm:$0xff] %v9495_v61  ;;  %v9497_v53 = vpop.permute.xlu0 %2436  ;;  %v1690_v20 = vunpack.c.l.b16 %v9499_v40 }
 0x309   :  { %2628 = vrot.lane.b32.xlu0 %v9480_v27, %s7845_s25  ;;  %12749 = vst [vmem:[#allocation105_spill] sm:$0xff] %v9501_v22 }
 0x30c   :  { %2604 = vrot.lane.b32.xlu2 %v9501_v22, %s7845_s25 }
 0x30d   :  { %v9503_v38 = vpop.permute.xlu1 %7276 }
 0x30e   :  { %v7278_v0 = vunpack.i.l.bf16 %v9503_v38  ;;  %6894 = vmatmul.msk.bf16.vlgmr.msra.gmra.mxu1 %vm949_vm2, %v8856_v34  ;;  %v9522_v34 = vpack.c.b16 %v1690_v20, %v1690_v20 }
 0x30f   :  { %1323 = vmatpush.bf16.xpose.msrb.mxu1 %v1314_v57  ;;  %v9515_v57 = vpop.permute.xlu2 %1884 }
 0x310   :  { %v9513_v8 = vpack.c.bf16 %v7278_v0, %v7278_v0  ;;  %v1501_v14 = vpop.permute.xlu0 %1500  ;;  %12751 = vst [vmem:[#allocation107_spill] sm:$0xff] %v9522_v34 }
 0x311   :  { %v1506_v27 = vsel %vm949_vm2, %v1501_v14, 0  ;;  %v9520_v24 = vpop.f32.mrf.mxu1 }
 0x312   :  { %12750 = vst [vmem:[#allocation106_spill] sm:$0xff] %v9513_v8  ;;  %v2194_v23 = vunpack.c.l.b16 %v9513_v8  ;;  %1515 = vmatpush.bf16.xpose.msra.mxu3 %v1506_v27  ;;  %v7264_v27 = vunpack.i.h.bf16 %v9458_v10  ;;  %v1458_v10 = vsel %vm949_vm2, %v9370_v28, 0 }
 0x314   :  { %v9524_v6 = vpack.c.b16 %v2194_v23, %v2194_v23  ;;  %1692 = vrot.lane.b32.xlu2 %v9522_v34, %s7845_s25 }
 0x315   :  { %v7282_v0 = vpop.permute.xlu1 %7281 }
 0x316   :  { %12752 = vst [vmem:[#allocation108_spill] sm:$0xff] %v9524_v6  ;;  %v7284_v22 = vunpack.i.h.bf16 %v7282_v0  ;;  %6898 = vmatmul.msk.bf16.vlgmr.msrb.gmra.mxu2 %vm949_vm2, %v8730_v52  ;;  %2196 = vrot.lane.b32.xlu0 %v9524_v6, %s7845_s25 }
 0x317   :  { %1395 = vmatpush.bf16.xpose.msra.mxu1 %v1386_v5  ;;  %v9526_v5 = vpack.c.bf16 %v7259_v49, %v7259_v49  ;;  %v9536_v20 = vpop.permute.xlu2 %2028 }
 0x318   :  { %v9534_v59 = vpack.c.bf16 %v7284_v22, %v7284_v22  ;;  %v9541_v14 = vpop.permute.xlu0 %2796  ;;  %v9549_v22 = vpack.c.bf16 %v7264_v27, %v7264_v27 }
 0x319   :  { %v2170_v23 = vunpack.c.l.b16 %v9526_v5  ;;  %12754 = vst [vmem:[#allocation110_spill] sm:$0xff] %v9541_v14  ;;  %6905 = vmatmul.msk.bf16.vlgmr.msra.gmra.mxu3 %vm949_vm2, %v9096_v26  ;;  %v1063_v52 = vpop.f32.mrf.mxu1 }
 0x31a   :  { %12753 = vst [vmem:[#allocation109_spill] sm:$0xff] %v9534_v59  ;;  %v2698_v49 = vunpack.c.l.b16 %v9534_v59  ;;  %v2650_v27 = vunpack.c.l.b16 %v9549_v22 }
 0x31b   :  { %v9547_v61 = vpack.c.b16 %v2170_v23, %v2170_v23  ;;  %12757 = vst [vmem:[#allocation113_spill] sm:$0xff] %v9549_v22  ;;  %v9553_v8 = vpop.f32.mrf.mxu3  ;;  %v7269_v23 = vunpack.i.h.bf16 %v9146_v29 }
 0x31c   :  { %v9545_v34 = vpack.c.b16 %v2698_v49, %v2698_v49 }
 0x31d   :  { %12756 = vst [vmem:[#allocation112_spill] sm:$0xff] %v9547_v61  ;;  %v9551_v6 = vpop.permute.xlu1 %4181  ;;  %2172 = vrot.lane.b32.xlu2 %v9547_v61, %s7845_s25 }
 0x31e   :  { %12755 = vst [vmem:[#allocation111_spill] sm:$0xff] %v9545_v34  ;;  %2700 = vrot.lane.b32.xlu1 %v9545_v34, %s7845_s25  ;;  %6897 = vmatmul.msk.bf16.vlgmr.msrb.gmra.mxu1 %vm949_vm2, %v8712_v60  ;;  %v1962_v34 = vsel %vm949_vm2, %v9450_v44, 0  ;;  %v9572_v60 = vpack.c.bf16 %v7269_v23, %v7269_v23  ;;  %v7283_v44 = vunpack.i.l.bf16 %v7282_v0 }
 0x31f   :  { %12758 = vst [vmem:[#allocation114_spill] sm:$0xff] %v9551_v6  ;;  %1467 = vmatpush.bf16.xpose.msrb.mxu1 %v1458_v10  ;;  %v9563_v26 = vpop.permute.xlu2 %2364  ;;  %v9574_v10 = vpack.c.b16 %v2650_v27, %v2650_v27 }
 0x320   :  { %v1861_v49 = vpop.permute.xlu0 %1860 }
 0x321   :  { %v1866_v52 = vsel %vm949_vm2, %v1861_v49, 0  ;;  %v9568_v28 = vpop.f32.mrf.mxu1  ;;  %12759 = vst [vmem:[#allocation115_spill] sm:$0xff] %v9574_v10  ;;  %v1714_v49 = vunpack.c.l.b16 %v9572_v60 }
 0x322   :  { %1875 = vmatpush.bf16.xpose.msra.mxu0 %v1866_v52 }
 0x323   :  { %v1159_v6 = vpop.f32.mrf.mxu3  ;;  %v9589_v23 = vpack.c.b16 %v1714_v49, %v1714_v49 }
 0x324   :  { %v9591_v6 = vpack.c.bf16 %v7283_v44, %v7283_v44 }
 0x325   :  { %v9576_v61 = vpop.permute.xlu1 %2724  ;;  %2652 = vrot.lane.b32.xlu2 %v9574_v10, %s7845_s25  ;;  %12760 = vst [vmem:[#allocation116_spill] sm:$0xff] %v9589_v23  ;;  %v7279_v10 = vunpack.i.h.bf16 %v9503_v38 }
 0x326   :  { %6901 = vmatmul.msk.bf16.vlgmr.msra.gmra.mxu2 %vm949_vm2, %v8767_v2  ;;  %12761 = vst [vmem:[#allocation117_spill] sm:$0xff] %v9591_v6 }
 0x327   :  { %v9582_v29 = vpop.permute.xlu2 %2508  ;;  %v9606_v59 = vpack.c.bf16 %v7279_v10, %v7279_v10 }
 0x328   :  { %v9585_v52 = vpop.permute.xlu0 %2004 }
 0x329   :  { %6920 = vmatmul.msk.bf16.vlgmr.msra.gmra.mxu0 %vm949_vm2, %v9151_v13  ;;  %v2674_v13 = vunpack.c.l.b16 %v9591_v6 }
 0x32a   :  { %1971 = vmatpush.bf16.xpose.msrb.mxu0 %v1962_v34  ;;  %v1111_v34 = vpop.f32.mrf.mxu1 }
 0x32b   :  { %v939_v34 = vlaneseq }
 0x32d   :  { %v1477_v27 = vpop.permute.xlu1 %1476  ;;  %1716 = vrot.lane.b32.xlu2 %v9589_v23, %s7845_s25  ;;  %v940_v38 = vshrl.u32 %v939_v34, 7 }
 0x32e   :  { %v1482_v2 = vsel %vm949_vm2, %v1477_v27, 0  ;;  %6900 = vmatmul.msk.bf16.vlgmr.msra.gmra.mxu1 %vm949_vm2, %v8801_v25  ;;  %v9608_v27 = vpack.c.b16 %v2674_v13, %v2674_v13 }
 0x32f   :  { %1491 = vmatpush.bf16.xpose.msrb.mxu2 %v1482_v2  ;;  %v9598_v0 = vpop.permute.xlu2 %2844  ;;  %v942_v2 = vand.u32 127, %v939_v34 }
 0x330   :  { %12762 = vst [vmem:[#allocation118_spill] sm:$0xff] %v9598_v0  ;;  %v9602_v49 = vpop.permute.xlu0 %2340  ;;  %v2218_v0 = vunpack.c.l.b16 %v9606_v59 }
 0x331   :  { %12763 = vst [vmem:[#allocation119_spill] sm:$0xff] %v9608_v27  ;;  %vm9621_vm15 = vcmp.le.s32.totalorder %v942_v2, %v940_v38 }
 0x332   :  { %v9604_v44 = vpop.f32.mrf.mxu1  ;;  %v9630_v34 = vpack.c.b16 %v2218_v0, %v2218_v0  ;;  %v9647_v0 = vsel %vm9621_vm15, %v9111_v16, -1e+30 }
 0x333   :  { %v1229_v23 = vpop.f32.mrf.mxu3  ;;  %v2947_v38 = vsel %vm949_vm2, %v9647_v0, -inf }
 0x334   :  { %12766 = vst [vmem:[#allocation120_spill] sm:$0xff] %v9630_v34 }
 0x335   :  { %v1525_v25 = vpop.permute.xlu1 %1524  ;;  %2676 = vrot.lane.b32.xlu2 %v9608_v27, %s7845_s25 }
 0x336   :  { %v1530_v22 = vsel %vm949_vm2, %v1525_v25, 0  ;;  %6904 = vmatmul.msk.bf16.vlgmr.msrb.gmra.mxu2 %vm949_vm2, %v9190_v43 }
 0x337   :  { %1539 = vmatpush.bf16.xpose.msra.mxu1 %v1530_v22  ;;  %v1573_v6 = vpop.permute.xlu2 %1572  ;;  %v9628_v22 = vsel %vm9621_vm15, %v9331_v1, -1e+30 }
 0x338   :  { %v1578_v10 = vsel %vm949_vm2, %v1573_v6, 0  ;;  %v9617_v13 = vpop.permute.xlu0 %2484 }
 0x339   :  { %1587 = vmatpush.bf16.xpose.msrb.mxu3 %v1578_v10  ;;  %6924 = vmatmul.msk.bf16.vlgmr.msrb.gmra.mxu0 %vm949_vm2, %v9037_v7  ;;  %v2950_v7 = vsel %vm949_vm2, %v9628_v22, -inf }
 0x33a   :  { %v1183_v25 = vpop.f32.mrf.mxu1 }
 0x33b   :  { %v1231_v27 = vpop.f32.mrf.mxu3 }
 0x33d   :  { %2220 = vrot.lane.b32.xlu2 %v9630_v34, %s7845_s25 }
 0x33e   :  { %6903 = vmatmul.msk.bf16.vlgmr.msrb.gmra.mxu1 %vm949_vm2, %v8968_v9  ;;  %v9652_v9 = vsel %vm9621_vm15, %v9460_v62, -1e+30  ;;  %v9668_v62 = vsel %vm9621_vm15, %v9390_v17, -1e+30 }
 0x33f   :  { %v9638_v6 = vpop.permute.xlu2 %2532 }
 0x340   :  { %2951 = vmax.xlane.f32.xlu0 %v2950_v7  ;;  %6908 = vmatmul.msk.bf16.vlgmr.msrb.gmra.mxu3 %vm949_vm2, %v9311_v33  ;;  %v9642_v1 = vpop.permute.xlu0 %2820  ;;  %v2962_v33 = vsel %vm949_vm2, %v9652_v9, -inf }
 0x343   :  { %v9654_v27 = vpop.f32.mrf.mxu3 }
 0x346   :  { %v9660_v2 = vpop.f32.mrf.mxu0 }
 0x347   :  { %12767 = vst [vmem:[#allocation121_spill] sm:$0xff] %v9660_v2  ;;  %v9662_v25 = vpop.permute.xlu2 %2076  ;;  %v9674_v2 = vsel %vm9621_vm15, %v9439_v32, -1e+30 }
 0x348   :  { %2948 = vmax.xlane.f32.xlu1 %v2947_v38  ;;  %v1621_v10 = vpop.permute.xlu1 %1620  ;;  %2963 = vmax.xlane.f32.xlu0 %v2962_v33  ;;  %v1549_v16 = vpop.permute.xlu0 %1548  ;;  %v2953_v33 = vsel %vm949_vm2, %v9668_v62, -inf  ;;  %v2956_v17 = vsel %vm949_vm2, %v9674_v2, -inf }
 0x349   :  { %v1554_v7 = vsel %vm949_vm2, %v1549_v16, 0  ;;  %v1626_v34 = vsel %vm949_vm2, %v1621_v10, 0 }
 0x34a   :  { %1563 = vmatpush.bf16.xpose.msra.mxu2 %v1554_v7 }
 0x34b   :  { %v1303_v38 = vpop.f32.mrf.mxu3 }
 0x34e   :  { %6906 = vmatmul.msk.bf16.vlgmr.msra.gmra.mxu1 %vm949_vm2, %v9222_v55  ;;  %v1783_v16 = vpop.f32.mrf.mxu0  ;;  %v9690_v55 = vsel %vm9621_vm15, %v9520_v24, -1e+30 }
 0x34f   :  { %v9682_v10 = vpop.permute.xlu2 %2556 }
 0x350   :  { %2954 = vmax.xlane.f32.xlu1 %v2953_v33  ;;  %12768 = vst [vmem:[#allocation122_spill] sm:$0xff] %v9682_v10  ;;  %2957 = vmax.xlane.f32.xlu0 %v2956_v17  ;;  %v2053_v14 = vpop.permute.xlu0 %2052  ;;  %v2959_v33 = vsel %vm949_vm2, %v9690_v55, -inf  ;;  %v1669_v17 = vpop.permute.xlu1 %1668 }
 0x351   :  { %v1133_v7 = vpop.f32.mrf.mxu2  ;;  %v2058_v32 = vsel %vm949_vm2, %v2053_v14, 0  ;;  %6907 = vmatmul.msk.bf16.vlgmr.msra.gmra.mxu2 %vm949_vm2, %v9286_v48  ;;  %v1674_v10 = vsel %vm949_vm2, %v1669_v17, 0 }
 0x352   :  { %1635 = vmatpush.bf16.xpose.msrb.mxu2 %v1626_v34  ;;  %2067 = vmatpush.bf16.xpose.msra.mxu0 %v2058_v32  ;;  %v9694_v34 = vsel %vm9621_vm15, %v1229_v23, -1e+30  ;;  %v9710_v23 = vsel %vm9621_vm15, %v9568_v28, -1e+30 }
 0x353   :  { %12769 = vst [vmem:[#allocation123_spill] sm:$0xff] %v9694_v34  ;;  %v9696_v38 = vpop.f32.mrf.mxu3  ;;  %v2980_v14 = vsel %vm949_vm2, %v9694_v34, -inf }
 0x354   :  { %12771 = vst [vmem:[#allocation125_spill] sm:$0xff] %v9710_v23 }
 0x357   :  { %v9702_v48 = vpop.permute.xlu2 %2580 }
 0x358   :  { %2960 = vmax.xlane.f32.xlu1 %v2959_v33  ;;  %12770 = vst [vmem:[#allocation124_spill] sm:$0xff] %v9702_v48  ;;  %2981 = vmax.xlane.f32.xlu0 %v2980_v14  ;;  %v1597_v16 = vpop.permute.xlu0 %1596  ;;  %v9716_v33 = vsel %vm9621_vm15, %v9604_v44, -1e+30  ;;  %v9732_v44 = vsel %vm9621_vm15, %v1133_v7, -1e+30 }
 0x359   :  { %v1135_v24 = vpop.f32.mrf.mxu2  ;;  %v1602_v32 = vsel %vm949_vm2, %v1597_v16, 0  ;;  %6928 = vmatmul.msk.bf16.vlgmr.msra.gmra.mxu0 %vm949_vm2, %v9319_v47  ;;  %12772 = vst [vmem:[#allocation126_spill] sm:$0xff] %v9716_v33  ;;  %v2974_v47 = vsel %vm949_vm2, %v9716_v33, -inf  ;;  %v2968_v17 = vsel %vm949_vm2, %v9732_v44, -inf }
 0x35a   :  { %1611 = vmatpush.bf16.xpose.msrb.mxu1 %v1602_v32  ;;  %v2965_v24 = vsel %vm949_vm2, %v9710_v23, -inf  ;;  %v1741_v32 = vpop.permute.xlu1 %1740 }
 0x35b   :  { %v1375_v14 = vpop.f32.mrf.mxu3 }
 0x35f   :  { %v9722_v16 = vpop.permute.xlu2 %2124 }
 0x360   :  { %2966 = vmax.xlane.f32.xlu1 %v2965_v24  ;;  %2975 = vmax.xlane.f32.xlu0 %v2974_v47  ;;  %v9724_v28 = vpop.permute.xlu0 %2100 }
 0x361   :  { %6909 = vmatmul.msk.bf16.vlgmr.msrb.gmra.mxu1 %vm949_vm2, %v9351_v3  ;;  %6910 = vmatmul.msk.bf16.vlgmr.msrb.gmra.mxu2 %vm949_vm2, %v9301_v4  ;;  %v9744_v3 = vsel %vm9621_vm15, %v9553_v8, -1e+30  ;;  %v1746_v4 = vsel %vm949_vm2, %v1741_v32, 0  ;;  %v1794_v8 = vsel %vm949_vm2, %v9251_v51, 0  ;;  %v1938_v32 = vsel %vm949_vm2, %v9282_v21, 0 }
 0x362   :  { %1683 = vmatpush.bf16.xpose.msra.mxu1 %v1674_v10  ;;  %v2971_v34 = vsel %vm949_vm2, %v9744_v3, -inf }
 0x363   :  { %v9734_v10 = vpop.f32.mrf.mxu3 }
 0x366   :  { %2969 = vmax.xlane.f32.xlu2 %v2968_v17 }
 0x367   :  { %v9738_v14 = vpop.permute.xlu2 %2604 }
 0x368   :  { %v1645_v24 = vpop.permute.xlu0 %1644 }
 0x369   :  { %v1650_v47 = vsel %vm949_vm2, %v1645_v24, 0  ;;  %v1842_v24 = vsel %vm949_vm2, %v9419_v30, 0  ;;  %v2250_v30 = vsel %vm949_vm2, %v9306_v37, 0  ;;  %v2346_v37 = vsel %vm949_vm2, %v9602_v49, 0 }
 0x36a   :  { %1659 = vmatpush.bf16.xpose.msra.mxu3 %v1650_v47  ;;  %v1890_v47 = vsel %vm949_vm2, %v9515_v57, 0 }
 0x36b   :  { %v1447_v7 = vpop.f32.mrf.mxu3 }
 0x36c   :  { %v1818_v7 = vsel %vm949_vm2, %v9422_v45, 0 }
 0x36e   :  { %2972 = vmax.xlane.f32.xlu2 %v2971_v34  ;;  %v9762_v34 = vsel %vm9621_vm15, %v9654_v27, -1e+30 }
 0x36f   :  { %v1693_v17 = vpop.permute.xlu2 %1692 }
 0x370   :  { %v1698_v33 = vsel %vm949_vm2, %v1693_v17, 0 }
 0x371   :  { %6911 = vmatmul.msk.bf16.vlgmr.msra.gmra.mxu3 %vm949_vm2, %v9406_v50  ;;  %6912 = vmatmul.msk.bf16.vlgmr.msra.gmra.mxu1 %vm949_vm2, %v9313_v54  ;;  %v2989_v50 = vsel %vm949_vm2, %v9762_v34, -inf }
 0x372   :  { %1755 = vmatpush.bf16.xpose.msrb.mxu3 %v1746_v4  ;;  %1707 = vmatpush.bf16.xpose.msrb.mxu1 %v1698_v33 }
 0x373   :  { %v2149_v23 = vpop.permute.xlu0 %2148 }
 0x374   :  { %v2154_v48 = vsel %vm949_vm2, %v2149_v23, 0 }
 0x375   :  { %2163 = vmatpush.bf16.xpose.msrb.mxu0 %v2154_v48 }
 0x376   :  { %2990 = vmax.xlane.f32.xlu2 %v2989_v50 }
 0x377   :  { %v9768_v54 = vpop.permute.xlu2 %2172 }
 0x379   :  { %v1205_v51 = vpop.f32.mrf.mxu2 }
 0x37a   :  { %1851 = vmatpush.bf16.xpose.msra.mxu3 %v1842_v24  ;;  %1803 = vmatpush.bf16.xpose.msra.mxu1 %v1794_v8  ;;  %v9772_v23 = vsel %vm9621_vm15, %v1205_v51, -1e+30  ;;  %v1914_v8 = vsel %vm949_vm2, %v9276_v18, 0 }
 0x37b   :  { %v2977_v27 = vsel %vm949_vm2, %v9772_v23, -inf }
 0x37c   :  { %6932 = vmatmul.msk.bf16.vlgmr.msrb.gmra.mxu0 %vm949_vm2, %v9445_v35  ;;  %2978 = vmax.xlane.f32.xlu1 %v2977_v27 }
 0x37d   :  { %2259 = vmatpush.bf16.xpose.msra.mxu0 %v2250_v30  ;;  %v1986_v30 = vsel %vm949_vm2, %v9447_v11, 0 }
 0x37f   :  { %v9780_v48 = vpop.permute.xlu2 %2652 }
 0x381   :  { %v1207_v33 = vpop.f32.mrf.mxu2  ;;  %6913 = vmatmul.msk.bf16.vlgmr.msrb.gmra.mxu1 %vm949_vm2, %v9499_v40  ;;  %6915 = vmatmul.msk.bf16.vlgmr.msrb.gmra.mxu3 %vm949_vm2, %v9343_v19  ;;  %v2442_v40 = vsel %vm949_vm2, %v9497_v53, 0  ;;  %v9812_v53 = vsel %vm9621_vm15, %v9696_v38, -1e+30 }
 0x382   :  { %1899 = vmatpush.bf16.xpose.msrb.mxu1 %v1890_v47  ;;  %1947 = vmatpush.bf16.xpose.msrb.mxu3 %v1938_v32  ;;  %v2998_v50 = vsel %vm949_vm2, %v9812_v53, -inf  ;;  %v2130_v47 = vsel %vm949_vm2, %v9722_v16, 0 }
 0x385   :  { %2355 = vmatpush.bf16.xpose.msrb.mxu0 %v2346_v37 }
 0x387   :  { %v1717_v35 = vpop.permute.xlu2 %1716 }
 0x388   :  { %v1722_v49 = vsel %vm949_vm2, %v1717_v35, 0  ;;  %v2629_v35 = vpop.permute.xlu0 %2628 }
 0x389   :  { %v1277_v4 = vpop.f32.mrf.mxu2  ;;  %1731 = vmatpush.bf16.xpose.msra.mxu2 %v1722_v49 }
 0x38a   :  { %v9795_v21 = vsel %vm9621_vm15, %v1277_v4, -1e+30 }
 0x38b   :  { %v1253_v57 = vpop.f32.mrf.mxu1  ;;  %v2986_v19 = vsel %vm949_vm2, %v9795_v21, -inf }
 0x38c   :  { %6936 = vmatmul.msk.bf16.vlgmr.msra.gmra.mxu0 %vm949_vm2, %v8922_v56  ;;  %v9805_v17 = vsel %vm9621_vm15, %v1253_v57, -1e+30  ;;  %2987 = vmax.xlane.f32.xlu1 %v2986_v19  ;;  %v9817_v56 = vsel %vm9621_vm15, %v9734_v10, -1e+30  ;;  %v2034_v10 = vsel %vm949_vm2, %v9536_v20, 0  ;;  %v2538_v20 = vsel %vm949_vm2, %v9638_v6, 0 }
 0x38d   :  { %2451 = vmatpush.bf16.xpose.msra.mxu0 %v2442_v40  ;;  %v2983_v45 = vsel %vm949_vm2, %v9805_v17, -inf  ;;  %v3007_v18 = vsel %vm949_vm2, %v9817_v56, -inf  ;;  %v2010_v6 = vsel %vm949_vm2, %v9585_v52, 0 }
 0x38e   :  { %2984 = vmax.xlane.f32.xlu2 %v2983_v45  ;;  %v2106_v45 = vsel %vm949_vm2, %v9724_v28, 0  ;;  %v12775_v28 = vld [vmem:[#allocation58_spill] sm:$0xff] }
 0x38f   :  { %v9863_v49 = vpop.permute.xlu2 %2676 }
 0x390   :  { %6914 = vmatmul.msk.bf16.vlgmr.msra.gmra.mxu2 %vm949_vm2, %v9572_v60  ;;  %v2197_v16 = vpop.permute.xlu0 %2196 }
 0x391   :  { %1827 = vmatpush.bf16.xpose.msrb.mxu2 %v1818_v7  ;;  %v1279_v24 = vpop.f32.mrf.mxu2  ;;  %6917 = vmatmul.msk.bf16.vlgmr.msra.gmra.mxu1 %vm949_vm2, %v8920_v36  ;;  %v2634_v7 = vsel %vm949_vm2, %v2629_v35, 0 }
 0x392   :  { %6919 = vmatmul.msk.bf16.vlgmr.msra.gmra.mxu3 %vm949_vm2, %v9071_v41  ;;  %1995 = vmatpush.bf16.xpose.msra.mxu1 %v1986_v30  ;;  %v2178_v30 = vsel %vm949_vm2, %v9768_v54, 0 }
 0x393   :  { %v1255_v38 = vpop.f32.mrf.mxu1  ;;  %2043 = vmatpush.bf16.xpose.msra.mxu3 %v2034_v10 }
 0x394   :  { %2999 = vmax.xlane.f32.xlu1 %v2998_v50  ;;  %v9886_v38 = vpop.permute.xlu1 %2700 }
 0x396   :  { %3008 = vmax.xlane.f32.xlu2 %v3007_v18 }
 0x397   :  { %v2221_v40 = vpop.permute.xlu2 %2220 }
 0x398   :  { %v2226_v50 = vsel %vm949_vm2, %v2221_v40, 0 }
 0x399   :  { %1923 = vmatpush.bf16.xpose.msra.mxu2 %v1914_v8  ;;  %v1349_v11 = vpop.f32.mrf.mxu2  ;;  %v12773_v8 = vld [vmem:[#allocation10_spill] sm:$0xff] }
 0x39a   :  { %v9837_v36 = vsel %vm9621_vm15, %v1349_v11, -1e+30 }
 0x39b   :  { %v1325_v41 = vpop.f32.mrf.mxu1  ;;  %v2995_v60 = vsel %vm949_vm2, %v9837_v36, -inf }
 0x39c   :  { %6940 = vmatmul.msk.bf16.vlgmr.msrb.gmra.mxu0 %vm949_vm2, %v9208_v39  ;;  %v9847_v51 = vsel %vm9621_vm15, %v1325_v41, -1e+30  ;;  %2996 = vmax.xlane.f32.xlu0 %v2995_v60  ;;  %v1517_v37 = vpop.f32.mrf.mxu3  ;;  %v2082_v39 = vsel %vm949_vm2, %v9662_v25, 0 }
 0x39d   :  { %2547 = vmatpush.bf16.xpose.msrb.mxu0 %v2538_v20  ;;  %v2992_v27 = vsel %vm949_vm2, %v9847_v51, -inf  ;;  %v9878_v19 = vsel %vm9621_vm15, %v1517_v37, -1e+30 }
 0x39e   :  { %2993 = vmax.xlane.f32.xlu1 %v2992_v27  ;;  %v3016_v18 = vsel %vm949_vm2, %v9878_v19, -inf }
 0x3a0   :  { %6918 = vmatmul.msk.bf16.vlgmr.msrb.gmra.mxu2 %vm949_vm2, %v9015_v31 }
 0x3a1   :  { %v1351_v33 = vpop.f32.mrf.mxu2  ;;  %2019 = vmatpush.bf16.xpose.msrb.mxu2 %v2010_v6  ;;  %6921 = vmatmul.msk.bf16.vlgmr.msrb.gmra.mxu1 %vm949_vm2, %v9172_v42  ;;  %v2730_v6 = vsel %vm949_vm2, %v9576_v61, 0  ;;  %v12777_v61 = vld [vmem:[#allocation54_spill] sm:$0xff] }
 0x3a2   :  { %6923 = vmatmul.msk.bf16.vlgmr.msrb.gmra.mxu3 %vm949_vm2, %v8946_v15  ;;  %2091 = vmatpush.bf16.xpose.msrb.mxu1 %v2082_v39  ;;  %v12776_v33 = vld [vmem:[#allocation79_spill] sm:$0xff] }
 0x3a3   :  { %v1327_v32 = vpop.f32.mrf.mxu1  ;;  %2139 = vmatpush.bf16.xpose.msrb.mxu3 %v2130_v47 }
 0x3a4   :  { %v1519_v52 = vpop.f32.mrf.mxu3 }
 0x3a5   :  { %v2202_v52 = vsel %vm949_vm2, %v2197_v16, 0 }
 0x3a6   :  { %v9865_v31 = vpop.f32.mrf.mxu0 }
 0x3a9   :  { %v1421_v25 = vpop.f32.mrf.mxu2 }
 0x3aa   :  { %v9869_v4 = vsel %vm9621_vm15, %v1421_v25, -1e+30 }
 0x3ab   :  { %v1397_v42 = vpop.f32.mrf.mxu1  ;;  %v3004_v57 = vsel %vm949_vm2, %v9869_v4, -inf }
 0x3ac   :  { %6944 = vmatmul.msk.bf16.vlgmr.msra.gmra.mxu0 %vm949_vm2, %v9075_v12  ;;  %3005 = vmax.xlane.f32.xlu1 %v3004_v57  ;;  %v12774_v12 = vld [vmem:[#allocation38_spill] sm:$0xff]  ;;  %v12778_v57 = vld [vmem:[#allocation77_spill] sm:$0xff] }
 0x3ad   :  { %2643 = vmatpush.bf16.xpose.msra.mxu0 %v2634_v7 }
 0x3ae   :  { %v1879_v15 = vpop.f32.mrf.mxu0 }
 0x3af   :  { %v12779_v15 = vld [vmem:[#allocation84_spill] sm:$0xff] }
 0x3b0   :  { %6922 = vmatmul.msk.bf16.vlgmr.msra.gmra.mxu2 %vm949_vm2, %v12773_v8  ;;  %v12780_v8 = vld [vmem:[#allocation98_spill] sm:$0xff] }
 0x3b1   :  { %v1423_v24 = vpop.f32.mrf.mxu2  ;;  %2115 = vmatpush.bf16.xpose.msra.mxu2 %v2106_v45  ;;  %6925 = vmatmul.msk.bf16.vlgmr.msra.gmra.mxu1 %vm949_vm2, %v12774_v12  ;;  %v9923_v12 = vsel %vm9621_vm15, %v1397_v42, -1e+30  ;;  %v2826_v42 = vsel %vm949_vm2, %v9642_v1, 0  ;;  %v12781_v1 = vld [vmem:[#allocation88_spill] sm:$0xff] }
 0x3b2   :  { %6927 = vmatmul.msk.bf16.vlgmr.msra.gmra.mxu3 %vm949_vm2, %v12775_v28  ;;  %2187 = vmatpush.bf16.xpose.msra.mxu1 %v2178_v30  ;;  %v2322_v24 = vsel %vm949_vm2, %v9471_v58, 0  ;;  %v3001_v28 = vsel %vm949_vm2, %v9923_v12, -inf }
 0x3b3   :  { %v1399_v10 = vpop.f32.mrf.mxu1  ;;  %v2952_v11 = vpop.xlane.xlu0 %2951  ;;  %2235 = vmatpush.bf16.xpose.msra.mxu3 %v2226_v50 }
 0x3b4   :  { %v3188_v54 = vsub.f32 %v9628_v22, %v2952_v11  ;;  %3017 = vmax.xlane.f32.xlu1 %v3016_v18 }
 0x3b6   :  { %v3269_v41 = vmul.f32 1.442695, %v3188_v54  ;;  %v9896_v20 = vpop.f32.mrf.mxu0 }
 0x3b8   :  { %7484 = vpow2.f32 %v3269_v41 }
 0x3b9   :  { %v1493_v60 = vpop.f32.mrf.mxu2 }
 0x3ba   :  { %v9940_v54 = vsel %vm9621_vm15, %v1493_v60, -1e+30  ;;  %v2370_v60 = vsel %vm949_vm2, %v9563_v26, 0 }
 0x3bb   :  { %v2949_v27 = vpop.xlane.xlu1 %2948  ;;  %v1469_v37 = vpop.f32.mrf.mxu1 }
 0x3bc   :  { %6948 = vmatmul.msk.bf16.vlgmr.msrb.gmra.mxu0 %vm949_vm2, %v12776_v33  ;;  %v3187_v39 = vsub.f32 %v9647_v0, %v2949_v27  ;;  %v2964_v25 = vpop.xlane.xlu0 %2963  ;;  %v2274_v0 = vsel %vm949_vm2, %v12778_v57, 0  ;;  %v12784_v57 = vld [vmem:[#allocation15_spill] sm:$0xff] }
 0x3bd   :  { %2739 = vmatpush.bf16.xpose.msrb.mxu0 %v2730_v6  ;;  %v3192_v50 = vsub.f32 %v9652_v9, %v2964_v25  ;;  %v3013_v6 = vsel %vm949_vm2, %v9940_v54, -inf }
 0x3be   :  { %v3267_v32 = vmul.f32 1.442695, %v3187_v39  ;;  %v9903_v47 = vpop.eup %7484  ;;  %v1975_v22 = vpop.f32.mrf.mxu0 }
 0x3bf   :  { %v3430_v35 = vsel %vm949_vm2, %v9903_v47, 0.0 }
 0x3c0   :  { %7486 = vpow2.f32 %v3267_v32  ;;  %3431 = vadd.xlane.f32.xlu2 %v3430_v35  ;;  %6926 = vmatmul.msk.bf16.vlgmr.msrb.gmra.mxu2 %vm949_vm2, %v12777_v61  ;;  %v12782_v32 = vld [vmem:[#allocation83_spill] sm:$0xff] }
 0x3c1   :  { %v1495_v7 = vpop.f32.mrf.mxu2  ;;  %2211 = vmatpush.bf16.xpose.msrb.mxu2 %v2202_v52  ;;  %6929 = vmatmul.msk.bf16.vlgmr.msrb.gmra.mxu1 %vm949_vm2, %v12779_v15  ;;  %v2418_v22 = vsel %vm949_vm2, %v12782_v32, 0  ;;  %v12785_v15 = vld [vmem:[#allocation52_spill] sm:$0xff] }
 0x3c2   :  { %6931 = vmatmul.msk.bf16.vlgmr.msrb.gmra.mxu3 %vm949_vm2, %v12780_v8  ;;  %2283 = vmatpush.bf16.xpose.msrb.mxu1 %v2274_v0 }
 0x3c3   :  { %v2955_v40 = vpop.xlane.xlu1 %2954  ;;  %v1471_v45 = vpop.f32.mrf.mxu1  ;;  %2331 = vmatpush.bf16.xpose.msrb.mxu3 %v2322_v24 }
 0x3c4   :  { %v3189_v16 = vsub.f32 %v9668_v62, %v2955_v40  ;;  %v9919_v30 = vpop.f32.mrf.mxu3  ;;  %v3277_v62 = vmul.f32 1.442695, %v3192_v50  ;;  %v2958_v35 = vpop.xlane.xlu0 %2957  ;;  %v12786_v50 = vld [vmem:[#allocation78_spill] sm:$0xff] }
 0x3c5   :  { %v3190_v52 = vsub.f32 %v9674_v2, %v2958_v35 }
 0x3c6   :  { %v9925_v10 = vpop.eup %7486  ;;  %v3271_v18 = vmul.f32 1.442695, %v3189_v16 }
 0x3c7   :  { %v3427_v58 = vsel %vm949_vm2, %v9925_v10, 0.0 }
 0x3c8   :  { %7488 = vpow2.f32 %v3271_v18  ;;  %3428 = vadd.xlane.f32.xlu0 %v3427_v58  ;;  %3002 = vmax.xlane.f32.xlu2 %v3001_v28  ;;  %v2394_v18 = vsel %vm949_vm2, %v12786_v50, 0  ;;  %v12787_v28 = vld [vmem:[#allocation106_spill] sm:$0xff] }
 0x3c9   :  { %7490 = vpow2.f32 %v3277_v62  ;;  %v12788_v62 = vld [vmem:[#allocation104_spill] sm:$0xff] }
 0x3cb   :  { %v9932_v11 = vpop.f32.mrf.mxu1 }
 0x3cc   :  { %6952 = vmatmul.msk.bf16.vlgmr.msra.gmra.mxu0 %vm949_vm2, %v9469_v63  ;;  %v1591_v9 = vpop.f32.mrf.mxu3  ;;  %v2298_v63 = vsel %vm949_vm2, %v9474_v46, 0  ;;  %v9964_v46 = vsel %vm9621_vm15, %v1469_v37, -1e+30  ;;  %v3956_v37 = vsel %vm3912_vm9, %v12784_v57, 0 }
 0x3cd   :  { %2835 = vmatpush.bf16.xpose.msra.mxu0 %v2826_v42  ;;  %v3010_v25 = vsel %vm949_vm2, %v9964_v46, -inf  ;;  %v2466_v42 = vsel %vm949_vm2, %v12788_v62, 0  ;;  %v12789_v9 = vld [vmem:[#allocation20_spill] sm:$0xff] }
 0x3ce   :  { %v9942_v41 = vpop.eup %7488 }
 0x3cf   :  { %v3433_v27 = vsel %vm949_vm2, %v9942_v41, 0.0  ;;  %v9956_v39 = vpop.eup %7490 }
 0x3d0   :  { %3434 = vadd.xlane.f32.xlu0 %v3433_v27  ;;  %3014 = vmax.xlane.f32.xlu2 %v3013_v6  ;;  %v2514_v27 = vsel %vm949_vm2, %v9582_v29, 0  ;;  %v12790_v6 = vld [vmem:[#allocation43_spill] sm:$0xff] }
 0x3d1   :  { %6930 = vmatmul.msk.bf16.vlgmr.msra.gmra.mxu2 %vm949_vm2, %v12781_v1  ;;  %6933 = vmatmul.msk.bf16.vlgmr.msra.gmra.mxu1 %vm949_vm2, %v9526_v5  ;;  %v3442_v5 = vsel %vm949_vm2, %v9956_v39, 0.0  ;;  %v12791_v29 = vld [vmem:[#allocation35_spill] sm:$0xff] }
 0x3d2   :  { %2307 = vmatpush.bf16.xpose.msra.mxu2 %v2298_v63  ;;  %6935 = vmatmul.msk.bf16.vlgmr.msra.gmra.mxu3 %vm949_vm2, %v9606_v59  ;;  %v3273_v59 = vmul.f32 1.442695, %v3190_v52  ;;  %v4040_v35 = vsel %vm3912_vm9, %v12791_v29, 0  ;;  %v12792_v52 = vld [vmem:[#allocation69_spill] sm:$0xff]  ;;  %v2658_v29 = vsel %vm949_vm2, %v9780_v48, 0 }
 0x3d3   :  { %v1543_v33 = vpop.f32.mrf.mxu1  ;;  %2379 = vmatpush.bf16.xpose.msra.mxu1 %v2370_v60  ;;  %2427 = vmatpush.bf16.xpose.msra.mxu3 %v2418_v22 }
 0x3d4   :  { %v1565_v26 = vpop.f32.mrf.mxu2  ;;  %7492 = vpow2.f32 %v3273_v59 }
 0x3d5   :  { %v9980_v2 = vsel %vm9621_vm15, %v1565_v26, -1e+30  ;;  %v2961_v26 = vpop.xlane.xlu1 %2960 }
 0x3d6   :  { %v9971_v7 = vpop.f32.mrf.mxu0  ;;  %v3022_v24 = vsel %vm949_vm2, %v9980_v2, -inf  ;;  %v3191_v59 = vsub.f32 %v9690_v55, %v2961_v26  ;;  %v2610_v55 = vsel %vm949_vm2, %v9738_v14, 0  ;;  %v2706_v26 = vsel %vm949_vm2, %v9886_v38, 0 }
 0x3d7   :  { %12783 = vst [vmem:[#allocation10_spill] sm:$0xff] %v9971_v7  ;;  %v10083_v38 = vsel %vm9621_vm15, %v9919_v30, -1e+30 }
 0x3d8   :  { %3443 = vadd.xlane.f32.xlu0 %v3442_v5  ;;  %3011 = vmax.xlane.f32.xlu2 %v3010_v25  ;;  %v10017_v5 = vsel %vm9621_vm15, %v9932_v11, -1e+30 }
 0x3d9   :  { %v2970_v61 = vpop.xlane.xlu2 %2969 }
 0x3da   :  { %v3194_v0 = vsub.f32 %v9732_v44, %v2970_v61  ;;  %v10002_v63 = vpop.eup %7492  ;;  %v3019_v61 = vsel %vm949_vm2, %v10017_v5, -inf }
 0x3db   :  { %v3436_v22 = vsel %vm949_vm2, %v10002_v63, 0.0 }
 0x3dc   :  { %6956 = vmatmul.msk.bf16.vlgmr.msrb.gmra.mxu0 %vm949_vm2, %v12785_v15  ;;  %v3281_v40 = vmul.f32 1.442695, %v3194_v0  ;;  %v1567_v45 = vpop.f32.mrf.mxu2  ;;  %v12793_v0 = vld [vmem:[#allocation31_spill] sm:$0xff]  ;;  %v12794_v15 = vld [vmem:[#allocation122_spill] sm:$0xff] }
 0x3dd   :  { %3965 = vmatpush.bf16.msrb.mxu0 %v3956_v37  ;;  %v2490_v37 = vsel %vm949_vm2, %v9617_v13, 0  ;;  %v2562_v11 = vsel %vm949_vm2, %v12794_v15, 0  ;;  %v12795_v45 = vld [vmem:[#allocation62_spill] sm:$0xff]  ;;  %v2967_v15 = vpop.xlane.xlu1 %2966 }
 0x3de   :  { %7494 = vpow2.f32 %v3281_v40  ;;  %v1613_v8 = vpop.f32.mrf.mxu1  ;;  %v2071_v16 = vpop.f32.mrf.mxu0  ;;  %v3275_v40 = vmul.f32 1.442695, %v3191_v59 }
 0x3df   :  { %v9986_v44 = vsel %vm9621_vm15, %v1613_v8, -1e+30 }
 0x3e0   :  { %3023 = vmax.xlane.f32.xlu2 %v3022_v24  ;;  %v3028_v58 = vsel %vm949_vm2, %v9986_v44, -inf  ;;  %v12796_v24 = vld [vmem:[#allocation23_spill] sm:$0xff]  ;;  %7496 = vpow2.f32 %v3275_v40  ;;  %v3025_v40 = vsel %vm949_vm2, %v10083_v38, -inf }
 0x3e1   :  { %6934 = vmatmul.msk.bf16.vlgmr.msrb.gmra.mxu2 %vm949_vm2, %v12787_v28  ;;  %6937 = vmatmul.msk.bf16.vlgmr.msrb.gmra.mxu1 %vm949_vm2, %v12789_v9  ;;  %v10040_v16 = vpop.xlane.xlu2 %2972 }
 0x3e2   :  { %2403 = vmatpush.bf16.xpose.msrb.mxu2 %v2394_v18  ;;  %6939 = vmatmul.msk.bf16.vlgmr.msrb.gmra.mxu3 %vm949_vm2, %v12790_v6  ;;  %v12799_v6 = vld [vmem:[#allocation6_spill] sm:$0xff] }
 0x3e3   :  { %2475 = vmatpush.bf16.xpose.msrb.mxu1 %v2466_v42  ;;  %2523 = vmatpush.bf16.xpose.msrb.mxu3 %v2514_v27 }
 0x3e4   :  { %3029 = vmax.xlane.f32.xlu0 %v3028_v58  ;;  %v10004_v1 = vpop.eup %7494  ;;  %v1637_v60 = vpop.f32.mrf.mxu2  ;;  %v12797_v58 = vld [vmem:[#allocation5_spill] sm:$0xff] }
 0x3e5   :  { %v3448_v33 = vsel %vm949_vm2, %v10004_v1, 0.0  ;;  %v10038_v13 = vsel %vm9621_vm15, %v1637_v60, -1e+30  ;;  %v12800_v60 = vld [vmem:[#allocation124_spill] sm:$0xff] }
 0x3e6   :  { %3449 = vadd.xlane.f32.xlu1 %v3448_v33  ;;  %v1615_v32 = vpop.f32.mrf.mxu1  ;;  %v3031_v50 = vsel %vm949_vm2, %v10038_v13, -inf  ;;  %v10048_v28 = vpop.eup %7496  ;;  %v2586_v33 = vsel %vm949_vm2, %v12800_v60, 0 }
 0x3e7   :  { %v3439_v9 = vsel %vm949_vm2, %v10048_v28, 0.0 }
 0x3e8   :  { %3437 = vadd.xlane.f32.xlu2 %v3436_v22  ;;  %v12801_v22 = vld [vmem:[#allocation17_spill] sm:$0xff] }
 0x3e9   :  { %v10058_v32 = vpop.xlane.xlu2 %2990 }
 0x3ec   :  { %6960 = vmatmul.msk.bf16.vlgmr.msra.gmra.mxu0 %vm949_vm2, %v12792_v52  ;;  %v1639_v25 = vpop.f32.mrf.mxu2  ;;  %v12803_v52 = vld [vmem:[#allocation67_spill] sm:$0xff] }
 0x3ed   :  { %4049 = vmatpush.bf16.msra.mxu0 %v4040_v35  ;;  %v12802_v35 = vld [vmem:[#allocation49_spill] sm:$0xff] }
 0x3ee   :  { %v10022_v57 = vpop.f32.mrf.mxu1 }
 0x3f0   :  { %3020 = vmax.xlane.f32.xlu2 %v3019_v61 }
 0x3f1   :  { %6938 = vmatmul.msk.bf16.vlgmr.msra.gmra.mxu2 %vm949_vm2, %v12793_v0  ;;  %6941 = vmatmul.msk.bf16.vlgmr.msra.gmra.mxu1 %vm949_vm2, %v12795_v45 }
 0x3f2   :  { %2499 = vmatpush.bf16.xpose.msra.mxu2 %v2490_v37  ;;  %6943 = vmatmul.msk.bf16.vlgmr.msra.gmra.mxu3 %vm949_vm2, %v12796_v24 }
 0x3f3   :  { %2571 = vmatpush.bf16.xpose.msra.mxu1 %v2562_v11  ;;  %2619 = vmatpush.bf16.xpose.msra.mxu3 %v2610_v55  ;;  %v12805_v55 = vld [vmem:[#allocation125_spill] sm:$0xff] }
 0x3f4   :  { %v1661_v8 = vpop.f32.mrf.mxu3  ;;  %v3193_v24 = vsub.f32 %v12805_v55, %v2967_v15 }
 0x3f5   :  { %v10072_v25 = vsel %vm9621_vm15, %v1661_v8, -1e+30 }
 0x3f6   :  { %v1687_v18 = vpop.f32.mrf.mxu1  ;;  %v3034_v48 = vsel %vm949_vm2, %v10072_v25, -inf }
 0x3f7   :  { %v12806_v18 = vld [vmem:[#allocation64_spill] sm:$0xff] }
 0x3f8   :  { %4265 = vrot.lane.b32.xlu0 %v12797_v58, %s7847_s27  ;;  %3032 = vmax.xlane.f32.xlu2 %v3031_v50  ;;  %v2682_v50 = vsel %vm949_vm2, %v9863_v49, 0  ;;  %v12807_v58 = vld [vmem:[#allocation91_spill] sm:$0xff]  ;;  %v3279_v49 = vmul.f32 1.442695, %v3193_v24 }
 0x3f9   :  { %v10046_v14 = vpop.f32.mrf.mxu0  ;;  %v2754_v30 = vsel %vm949_vm2, %v12807_v58, 0 }
 0x3fa   :  { %12798 = vst [vmem:[#allocation38_spill] sm:$0xff] %v10046_v14  ;;  %7498 = vpow2.f32 %v3279_v49  ;;  %v12814_v49 = vld [vmem:[#allocation96_spill] sm:$0xff]  ;;  %v12829_v14 = vld [vmem:[#allocation46_spill] sm:$0xff] }
 0x3fb   :  { %v3998_v7 = vsel %vm3912_vm9, %v12829_v14, 0 }
 0x3fc   :  { %v1663_v62 = vpop.f32.mrf.mxu3 }
 0x3fd   :  { %v12808_v62 = vld [vmem:[#allocation92_spill] sm:$0xff] }
 0x3fe   :  { %v10050_v42 = vpop.f32.mrf.mxu1 }
 0x3ff   :  { %4244 = vrot.lane.b32.xlu1 %v12799_v6, %s7847_s27  ;;  %v2982_v6 = vpop.xlane.xlu0 %2981 }
 0x400   :  { %3440 = vadd.xlane.f32.xlu2 %v3439_v9  ;;  %v12809_v9 = vld [vmem:[#allocation110_spill] sm:$0xff] }
 0x401   :  { %v2167_v27 = vpop.f32.mrf.mxu0  ;;  %6942 = vmatmul.msk.bf16.vlgmr.msrb.gmra.mxu2 %vm949_vm2, %v12801_v22  ;;  %6945 = vmatmul.msk.bf16.vlgmr.msrb.gmra.mxu1 %vm949_vm2, %v12802_v35  ;;  %v10078_v0 = vpop.xlane.xlu2 %2984 }
 0x402   :  { %2595 = vmatpush.bf16.xpose.msrb.mxu2 %v2586_v33  ;;  %6947 = vmatmul.msk.bf16.vlgmr.msrb.gmra.mxu3 %vm949_vm2, %v12803_v52  ;;  %v2802_v27 = vsel %vm949_vm2, %v12809_v9, 0  ;;  %v12810_v33 = vld [vmem:[#allocation102_spill] sm:$0xff] }
 0x403   :  { %2667 = vmatpush.bf16.xpose.msrb.mxu1 %v2658_v29  ;;  %2715 = vmatpush.bf16.xpose.msrb.mxu3 %v2706_v26  ;;  %v2979_v29 = vpop.xlane.xlu1 %2978 }
 0x404   :  { %v1757_v59 = vpop.f32.mrf.mxu3 }
 0x406   :  { %v1711_v61 = vpop.f32.mrf.mxu1 }
 0x407   :  { %v3195_v61 = vsub.f32 %v9744_v3, %v10040_v16  ;;  %v12812_v16 = vld [vmem:[#allocation126_spill] sm:$0xff] }
 0x408   :  { %3035 = vmax.xlane.f32.xlu2 %v3034_v48 }
 0x409   :  { %v10076_v37 = vpop.f32.mrf.mxu0  ;;  %v3009_v60 = vpop.xlane.xlu2 %3008  ;;  %v3283_v24 = vmul.f32 1.442695, %v3195_v61  ;;  %v12817_v61 = vld [vmem:[#allocation123_spill] sm:$0xff] }
 0x40a   :  { %12804 = vst [vmem:[#allocation58_spill] sm:$0xff] %v10076_v37  ;;  %v3207_v52 = vsub.f32 %v9817_v56, %v3009_v60 }
 0x40b   :  { %v10129_v60 = vpop.xlane.xlu1 %2987 }
 0x40c   :  { %v1759_v11 = vpop.f32.mrf.mxu3  ;;  %v3307_v55 = vmul.f32 1.442695, %v3207_v52  ;;  %v12816_v52 = vld [vmem:[#allocation118_spill] sm:$0xff] }
 0x40d   :  { %v3197_v11 = vsub.f32 %v9772_v23, %v2979_v29 }
 0x40e   :  { %v10087_v45 = vpop.f32.mrf.mxu1  ;;  %7500 = vpow2.f32 %v3307_v55  ;;  %v12819_v55 = vld [vmem:[#allocation109_spill] sm:$0xff] }
 0x40f   :  { %7502 = vpow2.f32 %v3283_v24 }
 0x410   :  { %3026 = vmax.xlane.f32.xlu2 %v3025_v40 }
 0x411   :  { %v2263_v8 = vpop.f32.mrf.mxu0  ;;  %6946 = vmatmul.msk.bf16.vlgmr.msra.gmra.mxu2 %vm949_vm2, %v12806_v18  ;;  %6949 = vmatmul.msk.bf16.vlgmr.msra.gmra.mxu1 %vm949_vm2, %v12808_v62  ;;  %v2976_v18 = vpop.xlane.xlu0 %2975 }
 0x412   :  { %2691 = vmatpush.bf16.xpose.msra.mxu2 %v2682_v50  ;;  %6951 = vmatmul.msk.bf16.vlgmr.msra.gmra.mxu3 %vm949_vm2, %v12810_v33  ;;  %v3287_v8 = vmul.f32 1.442695, %v3197_v11  ;;  %v10118_v50 = vsel %vm9621_vm15, %v1757_v59, -1e+30  ;;  %v3196_v62 = vsub.f32 %v12812_v16, %v2976_v18  ;;  %v12818_v11 = vld [vmem:[#allocation113_spill] sm:$0xff] }
 0x413   :  { %2763 = vmatpush.bf16.xpose.msra.mxu1 %v2754_v30  ;;  %2811 = vmatpush.bf16.xpose.msra.mxu3 %v2802_v27  ;;  %v1733_v22 = vpop.f32.mrf.mxu2  ;;  %v10120_v30 = vpop.eup %7498  ;;  %v3046_v3 = vsel %vm949_vm2, %v10118_v50, -inf  ;;  %v12813_v27 = vld [vmem:[#allocation90_spill] sm:$0xff] }
 0x414   :  { %v10104_v35 = vsel %vm9621_vm15, %v1733_v22, -1e+30  ;;  %7504 = vpow2.f32 %v3287_v8  ;;  %v2778_v59 = vsel %vm949_vm2, %v12813_v27, 0  ;;  %v3445_v33 = vsel %vm949_vm2, %v10120_v30, 0.0  ;;  %v12815_v22 = vld [vmem:[#allocation11_spill] sm:$0xff]  ;;  %v10144_v24 = vpop.eup %7500 }
 0x415   :  { %v10106_v26 = vpop.f32.mrf.mxu3  ;;  %v3043_v48 = vsel %vm949_vm2, %v10104_v35, -inf  ;;  %v3935_v29 = vsel %vm3912_vm9, %v12815_v22, 0  ;;  %v3285_v8 = vmul.f32 1.442695, %v3196_v62  ;;  %v10148_v18 = vpop.eup %7502  ;;  %v10167_v22 = vsel %vm9621_vm15, %v10050_v42, -1e+30 }
 0x416   :  { %v1807_v15 = vpop.f32.mrf.mxu1 }
 0x417   :  { %v3198_v15 = vsub.f32 %v12817_v61, %v2982_v6  ;;  %7506 = vpow2.f32 %v3285_v8 }
 0x418   :  { %3044 = vmax.xlane.f32.xlu2 %v3043_v48  ;;  %v2850_v48 = vsel %vm949_vm2, %v12816_v52, 0 }
 0x419   :  { %v10114_v40 = vpop.f32.mrf.mxu0  ;;  %v3289_v6 = vmul.f32 1.442695, %v3198_v15  ;;  %v3040_v15 = vsel %vm949_vm2, %v10167_v22, -inf }
 0x41a   :  { %12811 = vst [vmem:[#allocation79_spill] sm:$0xff] %v10114_v40 }
 0x41b   :  { %v1735_v56 = vpop.f32.mrf.mxu2  ;;  %7508 = vpow2.f32 %v3289_v6  ;;  %v12822_v6 = vld [vmem:[#allocation117_spill] sm:$0xff] }
 0x41d   :  { %v1855_v58 = vpop.f32.mrf.mxu3 }
 0x41e   :  { %v10124_v23 = vpop.f32.mrf.mxu1  ;;  %v10150_v58 = vpop.eup %7504 }
 0x41f   :  { %v3457_v62 = vsel %vm949_vm2, %v10150_v58, 0.0  ;;  %v10169_v52 = vpop.eup %7506 }
 0x420   :  { %3047 = vmax.xlane.f32.xlu2 %v3046_v3  ;;  %v3454_v42 = vsel %vm949_vm2, %v10169_v52, 0.0 }
 0x421   :  { %v2359_v9 = vpop.f32.mrf.mxu0  ;;  %6950 = vmatmul.msk.bf16.vlgmr.msrb.gmra.mxu2 %vm949_vm2, %v12814_v49  ;;  %6953 = vmatmul.msk.bf16.vlgmr.msrb.gmra.mxu1 %vm949_vm2, %v12818_v11  ;;  %v3000_v49 = vpop.xlane.xlu1 %2999 }
 0x422   :  { %3446 = vadd.xlane.f32.xlu0 %v3445_v33  ;;  %2787 = vmatpush.bf16.xpose.msrb.mxu2 %v2778_v59  ;;  %v3487_v9 = vsel %vm949_vm2, %v10144_v24, 0.0  ;;  %v3451_v59 = vsel %vm949_vm2, %v10148_v18, 0.0  ;;  %v3201_v33 = vsub.f32 %v9762_v34, %v10058_v32  ;;  %v10175_v8 = vpop.eup %7508  ;;  %v12821_v34 = vld [vmem:[#allocation9_spill] sm:$0xff] }
 0x423   :  { %6955 = vmatmul.msk.bf16.vlgmr.msrb.gmra.mxu3 %vm949_vm2, %v12819_v55  ;;  %2859 = vmatpush.bf16.xpose.msrb.mxu1 %v2850_v48  ;;  %v10146_v56 = vpop.f32.mrf.mxu2  ;;  %v3914_v32 = vsel %vm3912_vm9, %v12821_v34, 0 }
 0x424   :  { %3944 = vmatpush.bf16.msrb.mxu3 %v3935_v29  ;;  %v3295_v61 = vmul.f32 1.442695, %v3201_v33 }
 0x425   :  { %v10152_v3 = vpop.f32.mrf.mxu3 }
 0x426   :  { %v1903_v16 = vpop.f32.mrf.mxu1  ;;  %7510 = vpow2.f32 %v3295_v61 }
 0x427   :  { %v10183_v16 = vpop.xlane.xlu0 %2996 }
 0x428   :  { %3488 = vadd.xlane.f32.xlu2 %v3487_v9  ;;  %v12823_v9 = vld [vmem:[#allocation16_spill] sm:$0xff] }
 0x429   :  { %v10156_v27 = vpop.f32.mrf.mxu0  ;;  %3452 = vadd.xlane.f32.xlu1 %v3451_v59  ;;  %v12824_v59 = vld [vmem:[#allocation30_spill] sm:$0xff] }
 0x42a   :  { %12820 = vst [vmem:[#allocation54_spill] sm:$0xff] %v10156_v27  ;;  %3458 = vadd.xlane.f32.xlu0 %v3457_v62  ;;  %v3977_v62 = vsel %vm3912_vm9, %v12823_v9, 0  ;;  %v4019_v33 = vsel %vm3912_vm9, %v12824_v59, 0  ;;  %v3204_v59 = vsub.f32 %v9812_v53, %v3000_v49 }
 0x42b   :  { %v1831_v29 = vpop.f32.mrf.mxu2 }
 0x42c   :  { %v3199_v29 = vsub.f32 %v9805_v17, %v10078_v0  ;;  %v10205_v9 = vpop.eup %7510  ;;  %v3301_v40 = vmul.f32 1.442695, %v3204_v59  ;;  %v12831_v59 = vld [vmem:[#allocation34_spill] sm:$0xff] }
 0x42d   :  { %v1951_v48 = vpop.f32.mrf.mxu3 }
 0x42e   :  { %v10173_v11 = vpop.f32.mrf.mxu1  ;;  %v10191_v48 = vpop.xlane.xlu1 %2993  ;;  %v3291_v17 = vmul.f32 1.442695, %v3199_v29 }
 0x430   :  { %3041 = vmax.xlane.f32.xlu2 %v3040_v15  ;;  %v12825_v15 = vld [vmem:[#allocation24_spill] sm:$0xff] }
 0x431   :  { %v2455_v55 = vpop.f32.mrf.mxu0  ;;  %6954 = vmatmul.msk.bf16.vlgmr.msra.gmra.mxu2 %vm949_vm2, %v12822_v6  ;;  %6957 = vmatmul.msk.bf16.vlgmr.msra.gmra.mxu1 %vm949_vm2, %v12825_v15 }
 0x432   :  { %3455 = vadd.xlane.f32.xlu0 %v3454_v42  ;;  %3923 = vmatpush.bf16.msra.mxu2 %v3914_v32  ;;  %v12826_v55 = vld [vmem:[#allocation45_spill] sm:$0xff]  ;;  %v3460_v32 = vsel %vm949_vm2, %v10175_v8, 0.0 }
 0x433   :  { %6959 = vmatmul.msk.bf16.vlgmr.msra.gmra.mxu3 %vm949_vm2, %v12826_v55  ;;  %v3432_v34 = vpop.xlane.xlu2 %3431  ;;  %3986 = vmatpush.bf16.msra.mxu1 %v3977_v62  ;;  %v10199_v42 = vpop.f32.mrf.mxu2 }
 0x434   :  { %4028 = vmatpush.bf16.msra.mxu3 %v4019_v33  ;;  %7512 = vrcp.f32 %v3432_v34  ;;  %3461 = vadd.xlane.f32.xlu1 %v3460_v32  ;;  %v3469_v34 = vsel %vm949_vm2, %v10205_v9, 0.0 }
 0x435   :  { %v10201_v61 = vpop.f32.mrf.mxu3  ;;  %7514 = vpow2.f32 %v3291_v17 }
 0x436   :  { %v1999_v0 = vpop.f32.mrf.mxu1  ;;  %v3006_v33 = vpop.xlane.xlu1 %3005 }
 0x437   :  { %v3206_v0 = vsub.f32 %v9869_v4, %v3006_v33  ;;  %v12833_v33 = vld [vmem:[#allocation71_spill] sm:$0xff] }
 0x439   :  { %v10203_v6 = vpop.f32.mrf.mxu0 }
 0x43a   :  { %12827 = vst [vmem:[#allocation77_spill] sm:$0xff] %v10203_v6  ;;  %v7513_v15 = vpop.eup %7512 }
 0x43b   :  { %v3429_v62 = vpop.xlane.xlu0 %3428  ;;  %v3003_v55 = vpop.xlane.xlu2 %3002  ;;  %v3748_v29 = vmul.f32 %v7513_v15, %v9903_v47  ;;  %v3305_v47 = vmul.f32 1.442695, %v3206_v0  ;;  %v12832_v15 = vld [vmem:[#allocation89_spill] sm:$0xff] }
 0x43c   :  { %v3205_v32 = vsub.f32 %v9923_v12, %v3003_v55  ;;  %v1927_v27 = vpop.f32.mrf.mxu2  ;;  %3470 = vadd.xlane.f32.xlu1 %v3469_v34  ;;  %v10215_v17 = vpop.eup %7514  ;;  %v12834_v55 = vld [vmem:[#allocation3_spill] sm:$0xff] }
 0x43d   :  { %v2047_v37 = vpop.f32.mrf.mxu3  ;;  %v3828_v12 = vpack.c.bf16 %v3748_v29, %v3748_v29  ;;  %v12830_v27 = vld [vmem:[#allocation33_spill] sm:$0xff] }
 0x43e   :  { %v3303_v6 = vmul.f32 1.442695, %v3205_v32  ;;  %v10213_v53 = vpop.f32.mrf.mxu1  ;;  %v4061_v37 = vsel %vm3912_vm9, %v12831_v59, 0 }
 0x43f   :  { %12828 = vst [vmem:[#allocation84_spill] sm:$0xff] %v10213_v53 }
 0x440   :  { %7516 = vpow2.f32 %v3303_v6  ;;  %v4103_v6 = vsel %vm3912_vm9, %v12832_v15, 0 }
 0x441   :  { %v2551_v49 = vpop.f32.mrf.mxu0  ;;  %7518 = vpow2.f32 %v3301_v40  ;;  %6958 = vmatmul.msk.bf16.vlgmr.msrb.gmra.mxu2 %vm949_vm2, %v12830_v27  ;;  %6961 = vmatmul.msk.bf16.vlgmr.msrb.gmra.mxu1 %vm949_vm2, %v12833_v33 }
 0x442   :  { %7520 = vrcp.f32 %v3429_v62  ;;  %4007 = vmatpush.bf16.msrb.mxu2 %v3998_v7  ;;  %4070 = vmatpush.bf16.msrb.mxu1 %v4061_v37  ;;  %v3463_v7 = vsel %vm949_vm2, %v10215_v17, 0.0 }
 0x443   :  { %v3435_v4 = vpop.xlane.xlu0 %3434  ;;  %6963 = vmatmul.msk.bf16.vlgmr.msrb.gmra.mxu3 %vm949_vm2, %v3828_v12  ;;  %v10228_v14 = vpop.xlane.xlu2 %3014 }
 0x444   :  { %7522 = vrcp.f32 %v3435_v4  ;;  %4112 = vmatpush.bf16.msrb.mxu3 %v4103_v6  ;;  %v10232_v40 = vpop.f32.mrf.mxu2  ;;  %3464 = vadd.xlane.f32.xlu1 %v3463_v7 }
 0x445   :  { %7524 = vpow2.f32 %v3305_v47  ;;  %v10238_v34 = vpop.f32.mrf.mxu3 }
 0x446   :  { %v10234_v62 = vpop.eup %7516  ;;  %4202 = vrot.lane.b32.xlu0 %v12834_v55, %s7847_s27  ;;  %12835 = vst [vmem:[#allocation98_spill] sm:$0xff] %v10238_v34  ;;  %v2095_v29 = vpop.f32.mrf.mxu1  ;;  %v12837_v55 = vld [vmem:[#allocation48_spill] sm:$0xff] }
 0x447   :  { %v10240_v32 = vpop.eup %7518  ;;  %v3481_v0 = vsel %vm949_vm2, %v10234_v62, 0.0  ;;  %v4124_v29 = vsel %vm3912_vm9, %v12837_v55, 0 }
 0x448   :  { %v7521_v49 = vpop.eup %7520  ;;  %3482 = vadd.xlane.f32.xlu2 %v3481_v0  ;;  %v3478_v33 = vsel %vm949_vm2, %v10240_v32, 0.0 }
 0x449   :  { %v10244_v12 = vpop.f32.mrf.mxu0  ;;  %v3747_v47 = vmul.f32 %v7521_v49, %v9925_v10 }
 0x44a   :  { %12836 = vst [vmem:[#allocation88_spill] sm:$0xff] %v10244_v12  ;;  %v7523_v27 = vpop.eup %7522 }
 0x44b   :  { %v3749_v4 = vmul.f32 %v7523_v27, %v9942_v41  ;;  %v3444_v59 = vpop.xlane.xlu0 %3443  ;;  %v10248_v37 = vpop.xlane.xlu2 %3011  ;;  %v3827_v41 = vpack.c.bf16 %v3747_v47, %v3747_v47 }
 0x44c   :  { %7526 = vrcp.f32 %v3444_v59  ;;  %v10250_v15 = vpop.eup %7524  ;;  %v2023_v7 = vpop.f32.mrf.mxu2  ;;  %3479 = vadd.xlane.f32.xlu1 %v3478_v33  ;;  %v12839_v59 = vld [vmem:[#allocation42_spill] sm:$0xff] }
 0x44d   :  { %v3829_v6 = vpack.c.bf16 %v3749_v4, %v3749_v4  ;;  %v2143_v0 = vpop.f32.mrf.mxu3  ;;  %v3484_v10 = vsel %vm949_vm2, %v10250_v15, 0.0  ;;  %v4082_v7 = vsel %vm3912_vm9, %v12839_v59, 0 }
 0x44e   :  { %v10257_v27 = vpop.f32.mrf.mxu1 }
 0x44f   :  { %6964 = vmatmul.msk.bf16.vlgmr.msrb.gmra.mxu0 %vm949_vm2, %v3829_v6  ;;  %12838 = vst [vmem:[#allocation83_spill] sm:$0xff] %v10257_v27 }
 0x450   :  { %4133 = vmatpush.bf16.msrb.mxu0 %v4124_v29  ;;  %3485 = vadd.xlane.f32.xlu2 %v3484_v10  ;;  %v12840_v29 = vld [vmem:[#allocation114_spill] sm:$0xff] }
 0x451   :  { %v2647_v49 = vpop.f32.mrf.mxu0  ;;  %6962 = vmatmul.msk.bf16.vlgmr.msra.gmra.mxu2 %vm949_vm2, %v3827_v41  ;;  %v4187_v0 = vsel %vm3912_vm9, %v12840_v29, 0 }
 0x452   :  { %v7527_v4 = vpop.eup %7526  ;;  %4091 = vmatpush.bf16.msra.mxu2 %v4082_v7 }
 0x453   :  { %v3752_v33 = vmul.f32 %v7527_v4, %v9956_v39  ;;  %v10265_v55 = vpop.xlane.xlu2 %3023  ;;  %v3200_v39 = vsub.f32 %v9795_v21, %v10129_v60  ;;  %v10278_v4 = vpop.xlane.xlu1 %3017  ;;  %v12845_v60 = vld [vmem:[#allocation4_spill] sm:$0xff] }
 0x454   :  { %v10267_v6 = vpop.f32.mrf.mxu2 }
 0x455   :  { %v3832_v47 = vpack.c.bf16 %v3752_v33, %v3752_v33  ;;  %v10271_v12 = vpop.f32.mrf.mxu3  ;;  %v3293_v27 = vmul.f32 1.442695, %v3200_v39  ;;  %v12847_v39 = vld [vmem:[#allocation41_spill] sm:$0xff] }
 0x456   :  { %12841 = vst [vmem:[#allocation15_spill] sm:$0xff] %v10271_v12  ;;  %v2191_v10 = vpop.f32.mrf.mxu1 }
 0x457   :  { %6967 = vmatmul.msk.bf16.vlgmr.msra.gmra.mxu3 %vm949_vm2, %v3832_v47  ;;  %v3203_v10 = vsub.f32 %v9837_v36, %v10183_v16 }
 0x458   :  { %4196 = vmatpush.bf16.msra.mxu3 %v4187_v0 }
 0x459   :  { %v10274_v49 = vpop.f32.mrf.mxu0  ;;  %v3299_v36 = vmul.f32 1.442695, %v3203_v10 }
 0x45a   :  { %12842 = vst [vmem:[#allocation52_spill] sm:$0xff] %v10274_v49 }
 0x45b   :  { %v3438_v41 = vpop.xlane.xlu2 %3437 }
 0x45c   :  { %v2119_v59 = vpop.f32.mrf.mxu2  ;;  %7528 = vrcp.f32 %v3438_v41  ;;  %v3450_v41 = vpop.xlane.xlu1 %3449 }
 0x45d   :  { %v2239_v7 = vpop.f32.mrf.mxu3  ;;  %7530 = vpow2.f32 %v3293_v27 }
 0x45e   :  { %v10280_v33 = vpop.f32.mrf.mxu1  ;;  %7532 = vrcp.f32 %v3450_v41 }
 0x45f   :  { %12843 = vst [vmem:[#allocation78_spill] sm:$0xff] %v10280_v33  ;;  %7534 = vpow2.f32 %v3299_v36 }
 0x461   :  { %v2743_v29 = vpop.f32.mrf.mxu0 }
 0x462   :  { %v7529_v12 = vpop.eup %7528  ;;  %v4145_v29 = vsel %vm3912_vm9, %v12847_v39, 0 }
 0x463   :  { %v10282_v53 = vpop.xlane.xlu2 %3020  ;;  %v3750_v47 = vmul.f32 %v7529_v12, %v10002_v63  ;;  %v12849_v63 = vld [vmem:[#allocation13_spill] sm:$0xff]  ;;  %v10302_v12 = vpop.eup %7530 }
 0x464   :  { %v10285_v0 = vpop.f32.mrf.mxu2 }
 0x465   :  { %12844 = vst [vmem:[#allocation106_spill] sm:$0xff] %v10285_v0  ;;  %v3830_v21 = vpack.c.bf16 %v3750_v47, %v3750_v47  ;;  %4223 = vrot.lane.b32.xlu1 %v12845_v60, %s7847_s27  ;;  %v10291_v59 = vpop.f32.mrf.mxu3  ;;  %v3202_v47 = vsub.f32 %v9847_v51, %v10191_v48  ;;  %v3208_v51 = vsub.f32 %v9964_v46, %v10248_v37  ;;  %v12853_v37 = vld [vmem:[#allocation57_spill] sm:$0xff] }
 0x466   :  { %12846 = vst [vmem:[#allocation104_spill] sm:$0xff] %v10291_v59  ;;  %v2287_v7 = vpop.f32.mrf.mxu1  ;;  %v12863_v59 = vld [vmem:[#allocation26_spill] sm:$0xff] }
 0x467   :  { %6965 = vmatmul.msk.bf16.vlgmr.msra.gmra.mxu1 %vm949_vm2, %v3830_v21  ;;  %v7533_v7 = vpop.eup %7532  ;;  %v3466_v21 = vsel %vm949_vm2, %v10302_v12, 0.0 }
 0x468   :  { %4328 = vrot.lane.b32.xlu2 %v12849_v63, %s7847_s27  ;;  %4154 = vmatpush.bf16.msra.mxu1 %v4145_v29  ;;  %v3297_v29 = vmul.f32 1.442695, %v3202_v47  ;;  %v3754_v10 = vmul.f32 %v7533_v7, %v10004_v1  ;;  %v3309_v47 = vmul.f32 1.442695, %v3208_v51 }
 0x469   :  { %v10295_v49 = vpop.f32.mrf.mxu0 }
 0x46a   :  { %12848 = vst [vmem:[#allocation20_spill] sm:$0xff] %v10295_v49  ;;  %v10311_v49 = vpop.eup %7534  ;;  %v3834_v48 = vpack.c.bf16 %v3754_v10, %v3754_v10  ;;  %v4166_v10 = vsel %vm3912_vm9, %v12853_v37, 0 }
 0x46b   :  { %v10300_v16 = vpop.xlane.xlu2 %3032 }
 0x46c   :  { %v2215_v27 = vpop.f32.mrf.mxu2 }
 0x46d   :  { %v2335_v60 = vpop.f32.mrf.mxu3 }
 0x46e   :  { %v10308_v39 = vpop.f32.mrf.mxu1  ;;  %v3475_v60 = vsel %vm949_vm2, %v10311_v49, 0.0 }
 0x46f   :  { %12850 = vst [vmem:[#allocation43_spill] sm:$0xff] %v10308_v39 }
 0x470   :  { %3467 = vadd.xlane.f32.xlu0 %v3466_v21 }
 0x471   :  { %v2839_v41 = vpop.f32.mrf.mxu0 }
 0x473   :  { %v3441_v63 = vpop.xlane.xlu2 %3440 }
 0x474   :  { %7536 = vrcp.f32 %v3441_v63  ;;  %v10313_v36 = vpop.f32.mrf.mxu2 }
 0x475   :  { %12851 = vst [vmem:[#allocation35_spill] sm:$0xff] %v10313_v36  ;;  %7538 = vpow2.f32 %v3297_v29  ;;  %v10317_v27 = vpop.f32.mrf.mxu3 }
 0x476   :  { %12852 = vst [vmem:[#allocation69_spill] sm:$0xff] %v10317_v27  ;;  %v2383_v21 = vpop.f32.mrf.mxu1  ;;  %7540 = vpow2.f32 %v3309_v47 }
 0x477   :  { %6969 = vmatmul.msk.bf16.vlgmr.msrb.gmra.mxu1 %vm949_vm2, %v3834_v48 }
 0x478   :  { %3476 = vadd.xlane.f32.xlu0 %v3475_v60  ;;  %v10338_v60 = vpop.xlane.xlu0 %3029 }
 0x47a   :  { %v7537_v1 = vpop.eup %7536 }
 0x47b   :  { %v3751_v7 = vmul.f32 %v7537_v1, %v10048_v28  ;;  %v10323_v41 = vpop.eup %7538  ;;  %v10332_v51 = vpop.xlane.xlu2 %3035 }
 0x47c   :  { %v2311_v29 = vpop.f32.mrf.mxu2  ;;  %v3472_v39 = vsel %vm949_vm2, %v10323_v41, 0.0  ;;  %v10334_v28 = vpop.eup %7540 }
 0x47d   :  { %v3831_v63 = vpack.c.bf16 %v3751_v7, %v3751_v7  ;;  %v2431_v46 = vpop.f32.mrf.mxu3  ;;  %v3490_v47 = vsel %vm949_vm2, %v10334_v28, 0.0 }
 0x47e   :  { %v10329_v21 = vpop.f32.mrf.mxu1  ;;  %v10354_v46 = vsel %vm9621_vm15, %v10106_v26, -1e+30  ;;  %v4245_v26 = vpop.permute.xlu1 %4244 }
 0x47f   :  { %12854 = vst [vmem:[#allocation31_spill] sm:$0xff] %v10329_v21  ;;  %6966 = vmatmul.msk.bf16.vlgmr.msrb.gmra.mxu2 %vm949_vm2, %v3831_v63  ;;  %v12860_v21 = vld [vmem:[#allocation121_spill] sm:$0xff] }
 0x480   :  { %3473 = vadd.xlane.f32.xlu0 %v3472_v39  ;;  %4175 = vmatpush.bf16.msrb.mxu2 %v4166_v10  ;;  %v10349_v39 = vsel %vm9621_vm15, %v10022_v57, -1e+30  ;;  %12857 = vst [vmem:[#allocation23_spill] sm:$0xff] %v10354_v46  ;;  %v10356_v37 = vpop.permute.xlu0 %4265  ;;  %v10367_v57 = vsel %vm9621_vm15, %v10146_v56, -1e+30 }
 0x481   :  { %v3055_v56 = vsel %vm949_vm2, %v10367_v57, -inf }
 0x483   :  { %v10344_v29 = vpop.xlane.xlu2 %3026 }
 0x484   :  { %v10336_v48 = vpop.f32.mrf.mxu2 }
 0x485   :  { %12855 = vst [vmem:[#allocation122_spill] sm:$0xff] %v10336_v48  ;;  %v10340_v1 = vpop.f32.mrf.mxu3 }
 0x486   :  { %12856 = vst [vmem:[#allocation62_spill] sm:$0xff] %v10340_v1  ;;  %v2479_v7 = vpop.f32.mrf.mxu1  ;;  %v3058_v1 = vsel %vm949_vm2, %v10354_v46, -inf }
 0x487   :  { %v3037_v7 = vsel %vm949_vm2, %v10349_v39, -inf }
 0x488   :  { %3491 = vadd.xlane.f32.xlu0 %v3490_v47 }
 0x48b   :  { %v10376_v27 = vpop.xlane.xlu2 %3044 }
 0x48c   :  { %v2407_v63 = vpop.f32.mrf.mxu2 }
 0x48d   :  { %v2527_v10 = vpop.f32.mrf.mxu3 }
 0x48e   :  { %v10360_v47 = vpop.f32.mrf.mxu1  ;;  %v10374_v10 = vsel %vm9621_vm15, %v12860_v21, -1e+30 }
 0x48f   :  { %12858 = vst [vmem:[#allocation5_spill] sm:$0xff] %v10360_v47  ;;  %3038 = vmax.xlane.f32.xlu1 %v3037_v7  ;;  %v3209_v7 = vsub.f32 %v9940_v54, %v10228_v14  ;;  %v10391_v54 = vsel %vm9621_vm15, %v10087_v45, -1e+30 }
 0x490   :  { %12861 = vst [vmem:[#allocation124_spill] sm:$0xff] %v10374_v10 }
 0x491   :  { %3059 = vmax.xlane.f32.xlu2 %v3058_v1  ;;  %v3311_v21 = vmul.f32 1.442695, %v3209_v7  ;;  %v3052_v7 = vsel %vm949_vm2, %v10391_v54, -inf }
 0x493   :  { %v10394_v0 = vpop.xlane.xlu2 %3047 }
 0x494   :  { %v10369_v63 = vpop.f32.mrf.mxu2 }
 0x495   :  { %12859 = vst [vmem:[#allocation6_spill] sm:$0xff] %v10369_v63  ;;  %v3447_v47 = vpop.xlane.xlu0 %3446  ;;  %v10380_v1 = vpop.f32.mrf.mxu3  ;;  %v3049_v63 = vsel %vm949_vm2, %v10374_v10, -inf }
 0x496   :  { %7542 = vrcp.f32 %v3447_v47  ;;  %12862 = vst [vmem:[#allocation17_spill] sm:$0xff] %v10380_v1  ;;  %v2575_v48 = vpop.f32.mrf.mxu1 }
 0x497   :  { %3056 = vmax.xlane.f32.xlu1 %v3055_v56  ;;  %7544 = vpow2.f32 %v3311_v21 }
 0x499   :  { %3050 = vmax.xlane.f32.xlu2 %v3049_v63 }
 0x49c   :  { %v7543_v33 = vpop.eup %7542  ;;  %4349 = vrot.lane.b32.xlu0 %v12863_v59, %s7847_s27  ;;  %v2503_v36 = vpop.f32.mrf.mxu2 }
 0x49d   :  { %v3753_v14 = vmul.f32 %v7543_v33, %v10120_v30  ;;  %v3459_v47 = vpop.xlane.xlu0 %3458  ;;  %v3453_v48 = vpop.xlane.xlu1 %3452  ;;  %v12865_v30 = vld [vmem:[#allocation7_spill] sm:$0xff] }
 0x49e   :  { %v2623_v1 = vpop.f32.mrf.mxu3  ;;  %7546 = vrcp.f32 %v3453_v48  ;;  %v10398_v59 = vpop.f32.mrf.mxu1 }
 0x49f   :  { %v3833_v63 = vpack.c.bf16 %v3753_v14, %v3753_v14  ;;  %12864 = vst [vmem:[#allocation49_spill] sm:$0xff] %v10398_v59  ;;  %7548 = vrcp.f32 %v3459_v47  ;;  %v10401_v45 = vpop.eup %7544 }
 0x4a0   :  { %v3493_v47 = vsel %vm949_vm2, %v10401_v45, 0.0 }
 0x4a1   :  { %6968 = vmatmul.msk.bf16.vlgmr.msra.gmra.mxu0 %vm949_vm2, %v3833_v63  ;;  %3053 = vmax.xlane.f32.xlu2 %v3052_v7  ;;  %v10412_v7 = vpop.xlane.xlu2 %3488 }
 0x4a4   :  { %4307 = vrot.lane.b32.xlu0 %v12865_v30, %s7847_s27  ;;  %v10405_v33 = vpop.f32.mrf.mxu2  ;;  %v7547_v36 = vpop.eup %7546  ;;  %v4250_v30 = vsel %vm3912_vm9, %v4245_v26, 0  ;;  %v4271_v26 = vsel %vm3912_vm9, %v10356_v37, 0 }
 0x4a5   :  { %12866 = vst [vmem:[#allocation67_spill] sm:$0xff] %v10405_v33  ;;  %v3456_v1 = vpop.xlane.xlu0 %3455  ;;  %v3755_v56 = vmul.f32 %v7547_v36, %v10148_v18  ;;  %v7549_v63 = vpop.eup %7548 }
 0x4a6   :  { %7550 = vrcp.f32 %v3456_v1  ;;  %v10408_v21 = vpop.f32.mrf.mxu3  ;;  %v2671_v59 = vpop.f32.mrf.mxu1  ;;  %v3757_v36 = vmul.f32 %v7549_v63, %v10150_v58 }
 0x4a7   :  { %12867 = vst [vmem:[#allocation125_spill] sm:$0xff] %v10408_v21  ;;  %v3835_v14 = vpack.c.bf16 %v3755_v56, %v3755_v56  ;;  %v3462_v48 = vpop.xlane.xlu1 %3461 }
 0x4a8   :  { %7552 = vrcp.f32 %v3462_v48  ;;  %v3837_v10 = vpack.c.bf16 %v3757_v36, %v3757_v36 }
 0x4a9   :  { %3494 = vadd.xlane.f32.xlu2 %v3493_v47  ;;  %6970 = vmatmul.msk.bf16.vlgmr.msra.gmra.mxu2 %vm949_vm2, %v3835_v14  ;;  %v12868_v14 = vld [vmem:[#allocation8_spill] sm:$0xff] }
 0x4aa   :  { %4259 = vmatpush.bf16.msra.mxu2 %v4250_v30 }
 0x4ac   :  { %v7551_v18 = vpop.eup %7550  ;;  %v2599_v1 = vpop.f32.mrf.mxu2 }
 0x4ad   :  { %v3756_v56 = vmul.f32 %v7551_v18, %v10169_v52  ;;  %v10427_v52 = vpop.xlane.xlu2 %3041 }
 0x4ae   :  { %v2719_v59 = vpop.f32.mrf.mxu3  ;;  %v7553_v21 = vpop.eup %7552 }
 0x4af   :  { %v3836_v33 = vpack.c.bf16 %v3756_v56, %v3756_v56  ;;  %v3758_v46 = vmul.f32 %v7553_v21, %v10175_v8  ;;  %v3471_v34 = vpop.xlane.xlu1 %3470  ;;  %v10419_v48 = vpop.f32.mrf.mxu1 }
 0x4b0   :  { %4286 = vrot.lane.b32.xlu1 %v12868_v14, %s7847_s27  ;;  %7554 = vrcp.f32 %v3471_v34 }
 0x4b1   :  { %6971 = vmatmul.msk.bf16.vlgmr.msrb.gmra.mxu3 %vm949_vm2, %v3836_v33  ;;  %v3838_v58 = vpack.c.bf16 %v3758_v46, %v3758_v46  ;;  %6972 = vmatmul.msk.bf16.vlgmr.msrb.gmra.mxu0 %vm949_vm2, %v3837_v10  ;;  %v3211_v10 = vsub.f32 %v10017_v5, %v10282_v53  ;;  %v3210_v5 = vsub.f32 %v9878_v19, %v10278_v4 }
 0x4b2   :  { %4280 = vmatpush.bf16.msrb.mxu3 %v4271_v26 }
 0x4b3   :  { %6973 = vmatmul.msk.bf16.vlgmr.msra.gmra.mxu1 %vm949_vm2, %v3838_v58  ;;  %v3315_v56 = vmul.f32 1.442695, %v3211_v10  ;;  %v12869_v58 = vld [vmem:[#allocation66_spill] sm:$0xff] }
 0x4b4   :  { %v10430_v8 = vpop.f32.mrf.mxu2 }
 0x4b6   :  { %v10432_v21 = vpop.f32.mrf.mxu3  ;;  %v7555_v63 = vpop.eup %7554 }
 0x4b7   :  { %v3465_v47 = vpop.xlane.xlu1 %3464  ;;  %v2767_v33 = vpop.f32.mrf.mxu1  ;;  %v3761_v34 = vmul.f32 %v7555_v63, %v10205_v9  ;;  %v3212_v63 = vsub.f32 %v9980_v2, %v10265_v55 }
 0x4b8   :  { %v4203_v37 = vpop.permute.xlu0 %4202  ;;  %7556 = vrcp.f32 %v3465_v47  ;;  %v12871_v33 = vld [vmem:[#allocation47_spill] sm:$0xff] }
 0x4b9   :  { %v4208_v30 = vsel %vm3912_vm9, %v4203_v37, 0  ;;  %v3841_v59 = vpack.c.bf16 %v3761_v34, %v3761_v34  ;;  %7558 = vpow2.f32 %v3315_v56 }
 0x4ba   :  { %4217 = vmatpush.bf16.msra.mxu0 %v4208_v30 }
 0x4bb   :  { %v10435_v46 = vpop.xlane.xlu2 %3482 }
 0x4bc   :  { %v2695_v18 = vpop.f32.mrf.mxu2 }
 0x4be   :  { %v2815_v36 = vpop.f32.mrf.mxu3  ;;  %v7557_v1 = vpop.eup %7556 }
 0x4bf   :  { %v3759_v26 = vmul.f32 %v7557_v1, %v10215_v17  ;;  %v10441_v14 = vpop.f32.mrf.mxu1  ;;  %v3313_v17 = vmul.f32 1.442695, %v3210_v5  ;;  %v10459_v10 = vpop.eup %7558  ;;  %v3317_v36 = vmul.f32 1.442695, %v3212_v63 }
 0x4c0   :  { %v3499_v1 = vsel %vm949_vm2, %v10459_v10, 0.0  ;;  %v3480_v55 = vpop.xlane.xlu1 %3479 }
 0x4c1   :  { %4412 = vrot.lane.b32.xlu2 %v12869_v58, %s7847_s27  ;;  %v3839_v47 = vpack.c.bf16 %v3759_v26, %v3759_v26  ;;  %6976 = vmatmul.msk.bf16.vlgmr.msra.gmra.mxu0 %vm949_vm2, %v3841_v59  ;;  %7560 = vpow2.f32 %v3313_v17 }
 0x4c2   :  { %7562 = vpow2.f32 %v3317_v36 }
 0x4c3   :  { %v10446_v37 = vpop.xlane.xlu2 %3485  ;;  %6974 = vmatmul.msk.bf16.vlgmr.msrb.gmra.mxu2 %vm949_vm2, %v3839_v47 }
 0x4c4   :  { %v10451_v9 = vpop.f32.mrf.mxu2 }
 0x4c6   :  { %v10453_v53 = vpop.f32.mrf.mxu3 }
 0x4c7   :  { %12870 = vst [vmem:[#allocation64_spill] sm:$0xff] %v10453_v53  ;;  %v2863_v30 = vpop.f32.mrf.mxu1  ;;  %v10466_v56 = vpop.eup %7560 }
 0x4c8   :  { %v3496_v58 = vsel %vm949_vm2, %v10466_v56, 0.0  ;;  %v10472_v47 = vpop.eup %7562  ;;  %v10480_v30 = vsel %vm9621_vm15, %v10199_v42, -1e+30 }
 0x4c9   :  { %4391 = vrot.lane.b32.xlu2 %v12871_v33, %s7847_s27  ;;  %v3502_v33 = vsel %vm949_vm2, %v10472_v47, 0.0 }
 0x4cb   :  { %v4329_v34 = vpop.permute.xlu2 %4328 }
 0x4cc   :  { %v10461_v18 = vpop.f32.mrf.mxu0  ;;  %v4334_v19 = vsel %vm3912_vm9, %v4329_v34, 0  ;;  %v2791_v4 = vpop.f32.mrf.mxu2 }
 0x4cd   :  { %12872 = vst [vmem:[#allocation91_spill] sm:$0xff] %v10461_v18  ;;  %4343 = vmatpush.bf16.msrb.mxu2 %v4334_v19  ;;  %v3067_v19 = vsel %vm949_vm2, %v10480_v30, -inf  ;;  %v3216_v4 = vsub.f32 %v10072_v25, %v10332_v51 }
 0x4ce   :  { %3500 = vadd.xlane.f32.xlu0 %v3499_v1  ;;  %v3948_v2 = vpop.f32.mrf.mxu3  ;;  %v10491_v1 = vsel %vm9621_vm15, %v10152_v3, -1e+30 }
 0x4cf   :  { %v3325_v2 = vmul.f32 1.442695, %v3216_v4 }
 0x4d4   :  { %v3969_v59 = vpop.f32.mrf.mxu0  ;;  %v10468_v26 = vpop.f32.mrf.mxu2 }
 0x4d5   :  { %12873 = vst [vmem:[#allocation92_spill] sm:$0xff] %v10468_v26  ;;  %v3070_v59 = vsel %vm949_vm2, %v10491_v1, -inf }
 0x4d6   :  { %3497 = vadd.xlane.f32.xlu0 %v3496_v58 }
 0x4d7   :  { %v4224_v5 = vpop.permute.xlu1 %4223 }
 0x4d8   :  { %v4229_v17 = vsel %vm3912_vm9, %v4224_v5, 0  ;;  %v3213_v5 = vsub.f32 %v10083_v38, %v10344_v29 }
 0x4d9   :  { %4238 = vmatpush.bf16.msrb.mxu1 %v4229_v17 }
 0x4da   :  { %v10475_v63 = vpop.f32.mrf.mxu3  ;;  %3503 = vadd.xlane.f32.xlu1 %v3502_v33  ;;  %v3319_v51 = vmul.f32 1.442695, %v3213_v5 }
 0x4db   :  { %12874 = vst [vmem:[#allocation110_spill] sm:$0xff] %v10475_v63 }
 0x4dc   :  { %v3927_v34 = vpop.f32.mrf.mxu2 }
 0x4de   :  { %3068 = vmax.xlane.f32.xlu0 %v3067_v19 }
 0x4e2   :  { %v4032_v36 = vpop.f32.mrf.mxu3 }
 0x4e3   :  { %v3468_v42 = vpop.xlane.xlu0 %3467 }
 0x4e4   :  { %7564 = vrcp.f32 %v3468_v42  ;;  %v10495_v58 = vpop.f32.mrf.mxu1 }
 0x4e5   :  { %12875 = vst [vmem:[#allocation102_spill] sm:$0xff] %v10495_v58  ;;  %7566 = vpow2.f32 %v3325_v2 }
 0x4e6   :  { %3071 = vmax.xlane.f32.xlu0 %v3070_v59 }
 0x4ea   :  { %v7565_v25 = vpop.eup %7564 }
 0x4eb   :  { %v3760_v17 = vmul.f32 %v7565_v25, %v10302_v12  ;;  %v3477_v33 = vpop.xlane.xlu0 %3476  ;;  %v10500_v19 = vpop.eup %7566  ;;  %v12876_v12 = vld [vmem:[#allocation76_spill] sm:$0xff] }
 0x4ec   :  { %7568 = vrcp.f32 %v3477_v33  ;;  %v3990_v34 = vpop.f32.mrf.mxu1  ;;  %v3514_v4 = vsel %vm949_vm2, %v10500_v19, 0.0 }
 0x4ed   :  { %v3840_v3 = vpack.c.bf16 %v3760_v17, %v3760_v17  ;;  %7570 = vpow2.f32 %v3319_v51  ;;  %v12878_v51 = vld [vmem:[#allocation61_spill] sm:$0xff] }
 0x4ee   :  { %7572 = vrcp.f32 %v3480_v55 }
 0x4ef   :  { %6975 = vmatmul.msk.bf16.vlgmr.msra.gmra.mxu3 %vm949_vm2, %v3840_v3 }
 0x4f2   :  { %v7569_v36 = vpop.eup %7568  ;;  %3515 = vadd.xlane.f32.xlu2 %v3514_v4 }
 0x4f3   :  { %v3763_v38 = vmul.f32 %v7569_v36, %v10311_v49  ;;  %v3474_v29 = vpop.xlane.xlu0 %3473  ;;  %4433 = vrot.lane.b32.xlu1 %v12876_v12, %s7847_s27  ;;  %v10508_v42 = vpop.eup %7570 }
 0x4f4   :  { %7574 = vrcp.f32 %v3474_v29  ;;  %v10510_v59 = vpop.f32.mrf.mxu1  ;;  %v7573_v5 = vpop.eup %7572  ;;  %v3505_v49 = vsel %vm949_vm2, %v10508_v42, 0.0 }
 0x4f5   :  { %v3843_v2 = vpack.c.bf16 %v3763_v38, %v3763_v38  ;;  %12877 = vst [vmem:[#allocation126_spill] sm:$0xff] %v10510_v59  ;;  %7576 = vrcp.f32 %v10412_v7  ;;  %v3764_v55 = vmul.f32 %v7573_v5, %v10240_v32 }
 0x4f7   :  { %6978 = vmatmul.msk.bf16.vlgmr.msra.gmra.mxu2 %vm949_vm2, %v3843_v2  ;;  %v3844_v33 = vpack.c.bf16 %v3764_v55, %v3764_v55  ;;  %v3215_v2 = vsub.f32 %v10038_v13, %v10300_v16 }
 0x4fa   :  { %v7575_v25 = vpop.eup %7574  ;;  %4370 = vrot.lane.b32.xlu0 %v12878_v51, %s7847_s27  ;;  %3506 = vadd.xlane.f32.xlu2 %v3505_v49 }
 0x4fb   :  { %v3762_v17 = vmul.f32 %v7575_v25, %v10323_v41  ;;  %v7577_v4 = vpop.eup %7576  ;;  %v3492_v7 = vpop.xlane.xlu0 %3491  ;;  %v3323_v25 = vmul.f32 1.442695, %v3215_v2 }
 0x4fc   :  { %v4074_v34 = vpop.f32.mrf.mxu1  ;;  %v3767_v32 = vmul.f32 %v7577_v4, %v10144_v24  ;;  %7578 = vrcp.f32 %v3492_v7  ;;  %v3214_v7 = vsub.f32 %v9986_v44, %v10338_v60 }
 0x4fd   :  { %v3842_v3 = vpack.c.bf16 %v3762_v17, %v3762_v17  ;;  %7580 = vrcp.f32 %v10446_v37 }
 0x4fe   :  { %v3847_v29 = vpack.c.bf16 %v3767_v32, %v3767_v32  ;;  %7582 = vpow2.f32 %v3323_v25  ;;  %v3321_v2 = vmul.f32 1.442695, %v3214_v7 }
 0x4ff   :  { %6977 = vmatmul.msk.bf16.vlgmr.msrb.gmra.mxu1 %vm949_vm2, %v3842_v3  ;;  %6979 = vmatmul.msk.bf16.vlgmr.msrb.gmra.mxu3 %vm949_vm2, %v3844_v33  ;;  %v12880_v3 = vld [vmem:[#allocation74_spill] sm:$0xff]  ;;  %7584 = vrcp.f32 %v10435_v46  ;;  %v10561_v46 = vsel %vm9621_vm15, %v9865_v31, -1e+30 }
 0x500   :  { %v3061_v60 = vsel %vm949_vm2, %v10561_v46, -inf  ;;  %7586 = vpow2.f32 %v3321_v2 }
 0x502   :  { %v10523_v36 = vpop.f32.mrf.mxu2  ;;  %v7579_v41 = vpop.eup %7578 }
 0x503   :  { %12879 = vst [vmem:[#allocation90_spill] sm:$0xff] %v10523_v36  ;;  %v3768_v24 = vmul.f32 %v7579_v41, %v10334_v28  ;;  %v10535_v17 = vpop.xlane.xlu1 %3038  ;;  %v7581_v33 = vpop.eup %7580 }
 0x504   :  { %v10525_v38 = vpop.xlane.xlu2 %3059  ;;  %v3766_v16 = vmul.f32 %v7581_v33, %v10250_v15  ;;  %v10545_v4 = vpop.eup %7582 }
 0x505   :  { %v3848_v51 = vpack.c.bf16 %v3768_v24, %v3768_v24  ;;  %v3511_v15 = vsel %vm949_vm2, %v10545_v4, 0.0  ;;  %v10566_v24 = vsel %vm9621_vm15, %v10124_v23, -1e+30 }
 0x506   :  { %v3846_v34 = vpack.c.bf16 %v3766_v16, %v3766_v16  ;;  %v3064_v31 = vsel %vm949_vm2, %v10566_v24, -inf }
 0x507   :  { %6982 = vmatmul.msk.bf16.vlgmr.msrb.gmra.mxu2 %vm949_vm2, %v3847_v29 }
 0x50a   :  { %v4011_v12 = vpop.f32.mrf.mxu2 }
 0x50b   :  { %v10547_v32 = vpop.xlane.xlu1 %3056  ;;  %v7585_v12 = vpop.eup %7584 }
 0x50c   :  { %v10531_v5 = vpop.xlane.xlu2 %3050  ;;  %v3765_v44 = vmul.f32 %v7585_v12, %v10234_v62  ;;  %v3219_v62 = vsub.f32 %v10104_v35, %v10376_v27  ;;  %v10592_v35 = vsel %vm9621_vm15, %v10232_v40, -1e+30  ;;  %v10607_v40 = vsel %vm9621_vm15, %v10201_v61, -1e+30  ;;  %v12888_v61 = vld [vmem:[#allocation87_spill] sm:$0xff] }
 0x50d   :  { %v3079_v2 = vsel %vm949_vm2, %v10592_v35, -inf }
 0x50e   :  { %v4350_v55 = vpop.permute.xlu0 %4349  ;;  %v3845_v33 = vpack.c.bf16 %v3765_v44, %v3765_v44 }
 0x50f   :  { %v4355_v49 = vsel %vm3912_vm9, %v4350_v55, 0 }
 0x510   :  { %4364 = vmatpush.bf16.msra.mxu3 %v4355_v49 }
 0x512   :  { %4496 = vrot.lane.b32.xlu2 %v12880_v3, %s7847_s27  ;;  %v10578_v3 = vpop.eup %7586 }
 0x513   :  { %6983 = vmatmul.msk.bf16.vlgmr.msra.gmra.mxu3 %vm949_vm2, %v3848_v51 }
 0x514   :  { %v10540_v13 = vpop.xlane.xlu2 %3053 }
 0x516   :  { %v4308_v28 = vpop.permute.xlu0 %4307 }
 0x517   :  { %v4313_v37 = vsel %vm3912_vm9, %v4308_v28, 0  ;;  %v3331_v28 = vmul.f32 1.442695, %v3219_v62 }
 0x518   :  { %4322 = vmatpush.bf16.msra.mxu1 %v4313_v37  ;;  %v3508_v37 = vsel %vm949_vm2, %v10578_v3, 0.0 }
 0x519   :  { %7588 = vpow2.f32 %v3331_v28 }
 0x51b   :  { %6981 = vmatmul.msk.bf16.vlgmr.msra.gmra.mxu1 %vm949_vm2, %v3846_v34 }
 0x51c   :  { %v10552_v29 = vpop.xlane.xlu2 %3494 }
 0x51d   :  { %3512 = vadd.xlane.f32.xlu1 %v3511_v15 }
 0x51e   :  { %v10556_v41 = vpop.f32.mrf.mxu0 }
 0x51f   :  { %12881 = vst [vmem:[#allocation96_spill] sm:$0xff] %v10556_v41 }
 0x522   :  { %v4287_v55 = vpop.permute.xlu1 %4286 }
 0x523   :  { %v4292_v49 = vsel %vm3912_vm9, %v4287_v55, 0 }
 0x524   :  { %3062 = vmax.xlane.f32.xlu0 %v3061_v60  ;;  %v4413_v25 = vpop.permute.xlu2 %4412  ;;  %4301 = vmatpush.bf16.msrb.mxu0 %v4292_v49  ;;  %v10598_v60 = vpop.eup %7588  ;;  %v12886_v49 = vld [vmem:[#allocation97_spill] sm:$0xff] }
 0x525   :  { %v4418_v51 = vsel %vm3912_vm9, %v4413_v25, 0  ;;  %3065 = vmax.xlane.f32.xlu1 %v3064_v31  ;;  %v3217_v25 = vsub.f32 %v10349_v39, %v10535_v17  ;;  %v10616_v39 = vsel %vm9621_vm15, %v10173_v11, -1e+30 }
 0x526   :  { %v4053_v23 = vpop.f32.mrf.mxu0  ;;  %4427 = vmatpush.bf16.msra.mxu2 %v4418_v51  ;;  %v3523_v51 = vsel %vm949_vm2, %v10598_v60, 0.0  ;;  %v3076_v28 = vsel %vm949_vm2, %v10616_v39, -inf }
 0x527   :  { %6980 = vmatmul.msk.bf16.vlgmr.msrb.gmra.mxu0 %vm949_vm2, %v3845_v33  ;;  %v3082_v23 = vsel %vm949_vm2, %v10607_v40, -inf  ;;  %v3327_v62 = vmul.f32 1.442695, %v3217_v25 }
 0x529   :  { %7590 = vpow2.f32 %v3327_v62  ;;  %v12890_v62 = vld [vmem:[#allocation81_spill] sm:$0xff] }
 0x52c   :  { %v4392_v16 = vpop.permute.xlu2 %4391  ;;  %v10583_v7 = vpop.f32.mrf.mxu2 }
 0x52d   :  { %v4397_v34 = vsel %vm3912_vm9, %v4392_v16, 0  ;;  %12882 = vst [vmem:[#allocation11_spill] sm:$0xff] %v10583_v7  ;;  %3509 = vadd.xlane.f32.xlu1 %v3508_v37 }
 0x52e   :  { %4406 = vmatpush.bf16.msrb.mxu1 %v4397_v34  ;;  %v10585_v15 = vpop.f32.mrf.mxu0 }
 0x52f   :  { %12883 = vst [vmem:[#allocation118_spill] sm:$0xff] %v10585_v15  ;;  %v10624_v37 = vpop.eup %7590 }
 0x530   :  { %v10587_v12 = vpop.f32.mrf.mxu1 }
 0x531   :  { %12884 = vst [vmem:[#allocation123_spill] sm:$0xff] %v10587_v12 }
 0x534   :  { %v10594_v27 = vpop.f32.mrf.mxu3  ;;  %v4095_v44 = vpop.f32.mrf.mxu2 }
 0x535   :  { %12885 = vst [vmem:[#allocation113_spill] sm:$0xff] %v10594_v27  ;;  %3080 = vmax.xlane.f32.xlu1 %v3079_v2 }
 0x536   :  { %v4137_v55 = vpop.f32.mrf.mxu0 }
 0x538   :  { %4517 = vrot.lane.b32.xlu0 %v12886_v49, %s7847_s27  ;;  %v4158_v31 = vpop.f32.mrf.mxu1  ;;  %v3517_v49 = vsel %vm949_vm2, %v10624_v37, 0.0 }
 0x53b   :  { %3524 = vadd.xlane.f32.xlu2 %v3523_v51 }
 0x53c   :  { %v4116_v33 = vpop.f32.mrf.mxu3 }
 0x53d   :  { %3083 = vmax.xlane.f32.xlu1 %v3082_v23 }
 0x53e   :  { %v10618_v17 = vpop.f32.mrf.mxu0 }
 0x53f   :  { %12887 = vst [vmem:[#allocation109_spill] sm:$0xff] %v10618_v17 }
 0x540   :  { %4475 = vrot.lane.b32.xlu0 %v12888_v61, %s7847_s27 }
 0x541   :  { %v3501_v16 = vpop.xlane.xlu0 %3500 }
 0x542   :  { %7592 = vrcp.f32 %v3501_v16 }
 0x543   :  { %3077 = vmax.xlane.f32.xlu2 %v3076_v28 }
 0x546   :  { %v10626_v34 = vpop.f32.mrf.mxu2  ;;  %v4221_v2 = vpop.f32.mrf.mxu0 }
 0x547   :  { %12889 = vst [vmem:[#allocation9_spill] sm:$0xff] %v10626_v34  ;;  %v3218_v2 = vsub.f32 %v10167_v22, %v10427_v52 }
 0x548   :  { %v7593_v44 = vpop.eup %7592 }
 0x549   :  { %v3771_v11 = vmul.f32 %v7593_v44, %v10459_v10  ;;  %v3498_v55 = vpop.xlane.xlu0 %3497  ;;  %v3220_v10 = vsub.f32 %v10118_v50, %v10394_v0 }
 0x54a   :  { %7594 = vrcp.f32 %v3498_v55 }
 0x54b   :  { %v3851_v25 = vpack.c.bf16 %v3771_v11, %v3771_v11  ;;  %3518 = vadd.xlane.f32.xlu2 %v3517_v49  ;;  %v3333_v28 = vmul.f32 1.442695, %v3220_v10  ;;  %v3329_v11 = vmul.f32 1.442695, %v3218_v2 }
 0x54d   :  { %6986 = vmatmul.msk.bf16.vlgmr.msra.gmra.mxu2 %vm949_vm2, %v3851_v25  ;;  %v3504_v61 = vpop.xlane.xlu1 %3503 }
 0x54e   :  { %v4179_v31 = vpop.f32.mrf.mxu2  ;;  %7596 = vrcp.f32 %v3504_v61 }
 0x54f   :  { %7598 = vpow2.f32 %v3333_v28 }
 0x550   :  { %v7595_v51 = vpop.eup %7594  ;;  %7600 = vrcp.f32 %v10552_v29 }
 0x551   :  { %v3770_v33 = vmul.f32 %v7595_v51, %v10466_v56  ;;  %v10638_v16 = vpop.xlane.xlu0 %3068  ;;  %v12891_v56 = vld [vmem:[#allocation116_spill] sm:$0xff]  ;;  %7602 = vpow2.f32 %v3329_v11 }
 0x553   :  { %v3850_v23 = vpack.c.bf16 %v3770_v33, %v3770_v33 }
 0x554   :  { %v7597_v44 = vpop.eup %7596 }
 0x555   :  { %6985 = vmatmul.msk.bf16.vlgmr.msrb.gmra.mxu1 %vm949_vm2, %v3850_v23  ;;  %v3772_v50 = vmul.f32 %v7597_v44, %v10472_v47  ;;  %v10650_v49 = vpop.eup %7598  ;;  %v3223_v44 = vsub.f32 %v10367_v57, %v10547_v32  ;;  %v10686_v32 = vsel %vm9621_vm15, %v10267_v6, -1e+30  ;;  %v12897_v6 = vld [vmem:[#allocation98_spill] sm:$0xff] }
 0x556   :  { %4454 = vrot.lane.b32.xlu1 %v12890_v62, %s7847_s27  ;;  %v7601_v51 = vpop.eup %7600  ;;  %v3526_v52 = vsel %vm949_vm2, %v10650_v49, 0.0 }
 0x557   :  { %v3852_v22 = vpack.c.bf16 %v3772_v50, %v3772_v50  ;;  %v3769_v29 = vmul.f32 %v7601_v51, %v10401_v45  ;;  %v10660_v62 = vpop.eup %7602 }
 0x558   :  { %v3520_v61 = vsel %vm949_vm2, %v10660_v62, 0.0 }
 0x559   :  { %v10645_v55 = vpop.xlane.xlu0 %3071  ;;  %v3849_v10 = vpack.c.bf16 %v3769_v29, %v3769_v29  ;;  %v12896_v29 = vld [vmem:[#allocation85_spill] sm:$0xff] }
 0x563   :  { %4580 = vrot.lane.b32.xlu2 %v12891_v56, %s7847_s27 }
 0x565   :  { %v10648_v0 = vpop.xlane.xlu2 %3515  ;;  %v4434_v25 = vpop.permute.xlu1 %4433 }
 0x566   :  { %v4439_v31 = vsel %vm3912_vm9, %v4434_v25, 0  ;;  %v10677_v25 = vsel %vm9621_vm15, %v9896_v20, -1e+30 }
 0x567   :  { %4448 = vmatpush.bf16.msrb.mxu3 %v4439_v31  ;;  %v3339_v31 = vmul.f32 1.442695, %v3223_v44  ;;  %v3073_v51 = vsel %vm949_vm2, %v10677_v25, -inf }
 0x569   :  { %7604 = vpow2.f32 %v3339_v31  ;;  %v12899_v31 = vld [vmem:[#allocation84_spill] sm:$0xff] }
 0x56a   :  { %3527 = vadd.xlane.f32.xlu0 %v3526_v52  ;;  %6987 = vmatmul.msk.bf16.vlgmr.msrb.gmra.mxu3 %vm949_vm2, %v3852_v22 }
 0x56c   :  { %v4371_v47 = vpop.permute.xlu0 %4370 }
 0x56d   :  { %v4376_v33 = vsel %vm3912_vm9, %v4371_v47, 0  ;;  %v10658_v23 = vpop.xlane.xlu2 %3506  ;;  %v3091_v47 = vsel %vm949_vm2, %v10686_v32, -inf }
 0x56e   :  { %4385 = vmatpush.bf16.msra.mxu0 %v4376_v33  ;;  %v3222_v33 = vsub.f32 %v10391_v54, %v10540_v13  ;;  %v10710_v54 = vsel %vm9621_vm15, %v12899_v31, -1e+30 }
 0x56f   :  { %v10690_v20 = vpop.eup %7604 }
 0x570   :  { %v3337_v44 = vmul.f32 1.442695, %v3222_v33 }
 0x571   :  { %6984 = vmatmul.msk.bf16.vlgmr.msra.gmra.mxu0 %vm949_vm2, %v3849_v10 }
 0x572   :  { %3521 = vadd.xlane.f32.xlu0 %v3520_v61  ;;  %v10665_v28 = vpop.f32.mrf.mxu3  ;;  %7606 = vpow2.f32 %v3337_v44 }
 0x573   :  { %12892 = vst [vmem:[#allocation117_spill] sm:$0xff] %v10665_v28 }
 0x575   :  { %v4497_v45 = vpop.permute.xlu2 %4496 }
 0x576   :  { %v4502_v2 = vsel %vm3912_vm9, %v4497_v45, 0  ;;  %v3535_v45 = vsel %vm949_vm2, %v10690_v20, 0.0 }
 0x577   :  { %4511 = vmatpush.bf16.msrb.mxu2 %v4502_v2  ;;  %v10703_v2 = vsel %vm9621_vm15, %v12897_v6, -1e+30 }
 0x578   :  { %v3094_v13 = vsel %vm949_vm2, %v10703_v2, -inf }
 0x57a   :  { %v4200_v56 = vpop.f32.mrf.mxu3  ;;  %v10670_v11 = vpop.f32.mrf.mxu2 }
 0x57b   :  { %12893 = vst [vmem:[#allocation16_spill] sm:$0xff] %v10670_v11  ;;  %v12898_v56 = vld [vmem:[#allocation80_spill] sm:$0xff] }
 0x57c   :  { %v10672_v50 = vpop.f32.mrf.mxu1 }
 0x57d   :  { %12894 = vst [vmem:[#allocation30_spill] sm:$0xff] %v10672_v50 }
 0x580   :  { %3074 = vmax.xlane.f32.xlu1 %v3073_v51 }
 0x582   :  { %v4263_v22 = vpop.f32.mrf.mxu2  ;;  %v10681_v52 = vpop.f32.mrf.mxu3 }
 0x583   :  { %12895 = vst [vmem:[#allocation24_spill] sm:$0xff] %v10681_v52 }
 0x584   :  { %v4242_v57 = vpop.f32.mrf.mxu1 }
 0x585   :  { %v3088_v57 = vsel %vm949_vm2, %v10710_v54, -inf }
 0x586   :  { %4601 = vrot.lane.b32.xlu0 %v12896_v29, %s7847_s27 }
 0x588   :  { %3092 = vmax.xlane.f32.xlu1 %v3091_v47  ;;  %v10718_v47 = vpop.eup %7606 }
 0x589   :  { %v3532_v31 = vsel %vm949_vm2, %v10718_v47, 0.0 }
 0x58a   :  { %v4284_v10 = vpop.f32.mrf.mxu3  ;;  %v10696_v61 = vpop.f32.mrf.mxu2 }
 0x58c   :  { %3536 = vadd.xlane.f32.xlu2 %v3535_v45 }
 0x58e   :  { %4538 = vrot.lane.b32.xlu0 %v12898_v56, %s7847_s27 }
 0x590   :  { %v3513_v51 = vpop.xlane.xlu1 %3512  ;;  %3095 = vmax.xlane.f32.xlu1 %v3094_v13 }
 0x591   :  { %7608 = vrcp.f32 %v3513_v51 }
 0x592   :  { %v4347_v22 = vpop.f32.mrf.mxu2  ;;  %7610 = vrcp.f32 %v10648_v0 }
 0x594   :  { %3089 = vmax.xlane.f32.xlu2 %v3088_v57 }
 0x596   :  { %v10716_v29 = vpop.f32.mrf.mxu3 }
 0x597   :  { %v7609_v10 = vpop.eup %7608  ;;  %v10731_v22 = vpop.xlane.xlu0 %3062 }
 0x598   :  { %v10722_v45 = vpop.f32.mrf.mxu1  ;;  %v3775_v6 = vmul.f32 %v7609_v10, %v10545_v4  ;;  %v10725_v56 = vpop.xlane.xlu1 %3065  ;;  %v12902_v4 = vld [vmem:[#allocation23_spill] sm:$0xff] }
 0x599   :  { %12900 = vst [vmem:[#allocation45_spill] sm:$0xff] %v10722_v45  ;;  %v7611_v45 = vpop.eup %7610  ;;  %v3224_v10 = vsub.f32 %v12902_v4, %v10525_v38 }
 0x59a   :  { %v3855_v44 = vpack.c.bf16 %v3775_v6, %v3775_v6  ;;  %v3776_v6 = vmul.f32 %v7611_v45, %v10500_v19 }
 0x59b   :  { %v3341_v11 = vmul.f32 1.442695, %v3224_v10  ;;  %v12905_v10 = vld [vmem:[#allocation39_spill] sm:$0xff] }
 0x59c   :  { %3533 = vadd.xlane.f32.xlu2 %v3532_v31  ;;  %6990 = vmatmul.msk.bf16.vlgmr.msrb.gmra.mxu2 %vm949_vm2, %v3855_v44  ;;  %v12903_v31 = vld [vmem:[#allocation107_spill] sm:$0xff] }
 0x59e   :  { %v4368_v13 = vpop.f32.mrf.mxu3 }
 0x59f   :  { %v3856_v13 = vpack.c.bf16 %v3776_v6, %v3776_v6 }
 0x5a0   :  { %v4326_v51 = vpop.f32.mrf.mxu1  ;;  %v3510_v57 = vpop.xlane.xlu1 %3509 }
 0x5a1   :  { %7612 = vrcp.f32 %v3510_v57 }
 0x5a2   :  { %7614 = vpow2.f32 %v3341_v11 }
 0x5a4   :  { %v10733_v33 = vpop.f32.mrf.mxu0 }
 0x5a5   :  { %12901 = vst [vmem:[#allocation46_spill] sm:$0xff] %v10733_v33  ;;  %v12904_v33 = vld [vmem:[#allocation124_spill] sm:$0xff] }
 0x5a6   :  { %v3221_v17 = vsub.f32 %v12904_v33, %v10531_v5 }
 0x5a7   :  { %v7613_v52 = vpop.eup %7612 }
 0x5a8   :  { %v3774_v19 = vmul.f32 %v7613_v52, %v10578_v3  ;;  %v3335_v38 = vmul.f32 1.442695, %v3221_v17  ;;  %v10746_v4 = vpop.eup %7614  ;;  %v10752_v5 = vpop.xlane.xlu1 %3080  ;;  %v12906_v52 = vld [vmem:[#allocation18_spill] sm:$0xff] }
 0x5a9   :  { %4559 = vrot.lane.b32.xlu1 %v12903_v31, %s7847_s27  ;;  %v3538_v3 = vsel %vm949_vm2, %v10746_v4, 0.0 }
 0x5aa   :  { %v4518_v44 = vpop.permute.xlu0 %4517  ;;  %v3854_v6 = vpack.c.bf16 %v3774_v19, %v3774_v19  ;;  %7616 = vpow2.f32 %v3335_v38 }
 0x5ab   :  { %v4523_v0 = vsel %vm3912_vm9, %v4518_v44, 0 }
 0x5ac   :  { %4532 = vmatpush.bf16.msra.mxu3 %v4523_v0  ;;  %v4305_v51 = vpop.f32.mrf.mxu0 }
 0x5ae   :  { %v3525_v50 = vpop.xlane.xlu2 %3524 }
 0x5af   :  { %6991 = vmatmul.msk.bf16.vlgmr.msra.gmra.mxu3 %vm949_vm2, %v3856_v13  ;;  %7618 = vrcp.f32 %v3525_v50 }
 0x5b0   :  { %v10757_v17 = vpop.eup %7616  ;;  %7620 = vrcp.f32 %v10658_v23  ;;  %v10764_v44 = vpop.xlane.xlu1 %3083 }
 0x5b1   :  { %v3529_v31 = vsel %vm949_vm2, %v10757_v17, 0.0 }
 0x5b2   :  { %v4476_v45 = vpop.permute.xlu0 %4475 }
 0x5b3   :  { %v4481_v57 = vsel %vm3912_vm9, %v4476_v45, 0 }
 0x5b4   :  { %4490 = vmatpush.bf16.msra.mxu1 %v4481_v57  ;;  %4685 = vrot.lane.b32.xlu2 %v12905_v10, %s7847_s27 }
 0x5b5   :  { %v7619_v0 = vpop.eup %7618 }
 0x5b6   :  { %v10750_v11 = vpop.xlane.xlu2 %3077  ;;  %v7621_v13 = vpop.eup %7620  ;;  %v3779_v51 = vmul.f32 %v7619_v0, %v10598_v60  ;;  %v12908_v0 = vld [vmem:[#allocation29_spill] sm:$0xff] }
 0x5b7   :  { %6989 = vmatmul.msk.bf16.vlgmr.msra.gmra.mxu1 %vm949_vm2, %v3854_v6  ;;  %v3773_v50 = vmul.f32 %v7621_v13, %v10508_v42  ;;  %v12907_v6 = vld [vmem:[#allocation10_spill] sm:$0xff] }
 0x5b8   :  { %3539 = vadd.xlane.f32.xlu0 %v3538_v3  ;;  %v3859_v45 = vpack.c.bf16 %v3779_v51, %v3779_v51  ;;  %v10775_v60 = vsel %vm9621_vm15, %v12907_v6, -1e+30  ;;  %v12909_v51 = vld [vmem:[#allocation106_spill] sm:$0xff] }
 0x5b9   :  { %v3853_v10 = vpack.c.bf16 %v3773_v50, %v3773_v50  ;;  %v3085_v42 = vsel %vm949_vm2, %v10775_v60, -inf }
 0x5bc   :  { %4643 = vrot.lane.b32.xlu2 %v12906_v52, %s7847_s27 }
 0x5be   :  { %v3519_v33 = vpop.xlane.xlu2 %3518 }
 0x5c0   :  { %3530 = vadd.xlane.f32.xlu0 %v3529_v31  ;;  %v3227_v31 = vsub.f32 %v10480_v30, %v10638_v16 }
 0x5c2   :  { %v3347_v13 = vmul.f32 1.442695, %v3227_v31 }
 0x5c4   :  { %7622 = vpow2.f32 %v3347_v13 }
 0x5c6   :  { %v4581_v19 = vpop.permute.xlu2 %4580 }
 0x5c7   :  { %v4586_v38 = vsel %vm3912_vm9, %v4581_v19, 0  ;;  %v10790_v19 = vsel %vm9621_vm15, %v12909_v51, -1e+30 }
 0x5c8   :  { %4595 = vmatpush.bf16.msra.mxu2 %v4586_v38  ;;  %v4455_v57 = vpop.permute.xlu1 %4454 }
 0x5c9   :  { %v4460_v23 = vsel %vm3912_vm9, %v4455_v57, 0  ;;  %v3225_v57 = vsub.f32 %v10561_v46, %v10731_v22 }
 0x5ca   :  { %4469 = vmatpush.bf16.msrb.mxu0 %v4460_v23  ;;  %v10796_v16 = vpop.eup %7622 }
 0x5cb   :  { %6994 = vmatmul.msk.bf16.vlgmr.msra.gmra.mxu2 %vm949_vm2, %v3859_v45  ;;  %v3103_v45 = vsel %vm949_vm2, %v10790_v19, -inf  ;;  %v3343_v30 = vmul.f32 1.442695, %v3225_v57  ;;  %v3547_v23 = vsel %vm949_vm2, %v10796_v16, 0.0 }
 0x5cd   :  { %6988 = vmatmul.msk.bf16.vlgmr.msrb.gmra.mxu0 %vm949_vm2, %v3853_v10  ;;  %7624 = vpow2.f32 %v3343_v30 }
 0x5d0   :  { %v10777_v3 = vpop.f32.mrf.mxu2 }
 0x5d2   :  { %v10779_v52 = vpop.f32.mrf.mxu1 }
 0x5d3   :  { %3086 = vmax.xlane.f32.xlu1 %v3085_v42  ;;  %v10800_v6 = vpop.eup %7624 }
 0x5d4   :  { %4664 = vrot.lane.b32.xlu0 %v12908_v0, %s7847_s27  ;;  %v3541_v42 = vsel %vm949_vm2, %v10800_v6, 0.0 }
 0x5d8   :  { %v4431_v38 = vpop.f32.mrf.mxu2 }
 0x5d9   :  { %v12910_v38 = vld [vmem:[#allocation12_spill] sm:$0xff] }
 0x5da   :  { %v4410_v50 = vpop.f32.mrf.mxu1 }
 0x5db   :  { %3104 = vmax.xlane.f32.xlu1 %v3103_v45 }
 0x5dd   :  { %v3528_v10 = vpop.xlane.xlu0 %3527 }
 0x5de   :  { %7626 = vrcp.f32 %v3528_v10  ;;  %v12911_v10 = vld [vmem:[#allocation15_spill] sm:$0xff] }
 0x5df   :  { %7628 = vrcp.f32 %v3519_v33 }
 0x5e4   :  { %v7627_v51 = vpop.eup %7626 }
 0x5e5   :  { %3548 = vadd.xlane.f32.xlu2 %v3547_v23  ;;  %v3522_v13 = vpop.xlane.xlu0 %3521  ;;  %v3780_v57 = vmul.f32 %v7627_v51, %v10650_v49  ;;  %v7629_v0 = vpop.eup %7628 }
 0x5e6   :  { %v3777_v33 = vmul.f32 %v7629_v0, %v10624_v37 }
 0x5e7   :  { %v3860_v22 = vpack.c.bf16 %v3780_v57, %v3780_v57 }
 0x5ed   :  { %3542 = vadd.xlane.f32.xlu2 %v3541_v42  ;;  %v10804_v31 = vpop.f32.mrf.mxu3  ;;  %v10819_v42 = vsel %vm9621_vm15, %v12911_v10, -1e+30  ;;  %v12914_v10 = vld [vmem:[#allocation83_spill] sm:$0xff] }
 0x5ee   :  { %v10806_v46 = vpop.f32.mrf.mxu0  ;;  %v3106_v34 = vsel %vm949_vm2, %v10819_v42, -inf }
 0x5f3   :  { %v10827_v51 = vpop.xlane.xlu1 %3074 }
 0x5f4   :  { %4622 = vrot.lane.b32.xlu1 %v12910_v38, %s7847_s27 }
 0x5f5   :  { %v4452_v50 = vpop.f32.mrf.mxu3 }
 0x5f6   :  { %v4389_v45 = vpop.f32.mrf.mxu0 }
 0x5f7   :  { %v12912_v45 = vld [vmem:[#allocation38_spill] sm:$0xff] }
 0x5f8   :  { %v4602_v30 = vpop.permute.xlu0 %4601  ;;  %v10833_v57 = vsel %vm9621_vm15, %v12912_v45, -1e+30 }
 0x5f9   :  { %v4607_v23 = vsel %vm3912_vm9, %v4602_v30, 0  ;;  %v3857_v30 = vpack.c.bf16 %v3777_v33, %v3777_v33  ;;  %v3097_v37 = vsel %vm949_vm2, %v10833_v57, -inf }
 0x5fa   :  { %4616 = vmatpush.bf16.msrb.mxu3 %v4607_v23 }
 0x5fb   :  { %v10849_v33 = vpop.xlane.xlu1 %3092 }
 0x5fc   :  { %v3235_v7 = vsub.f32 %v10686_v32, %v10849_v33 }
 0x5fd   :  { %6995 = vmatmul.msk.bf16.vlgmr.msrb.gmra.mxu3 %vm949_vm2, %v3860_v22  ;;  %v3226_v22 = vsub.f32 %v10566_v24, %v10725_v56  ;;  %v3228_v56 = vsub.f32 %v10491_v1, %v10645_v55  ;;  %v3231_v55 = vsub.f32 %v10592_v35, %v10752_v5  ;;  %v12915_v35 = vld [vmem:[#allocation35_spill] sm:$0xff] }
 0x5fe   :  { %3107 = vmax.xlane.f32.xlu0 %v3106_v34  ;;  %v12913_v34 = vld [vmem:[#allocation14_spill] sm:$0xff] }
 0x5ff   :  { %v10825_v49 = vpop.xlane.xlu2 %3536  ;;  %v3345_v23 = vmul.f32 1.442695, %v3226_v22  ;;  %v3349_v45 = vmul.f32 1.442695, %v3228_v56  ;;  %v3355_v15 = vmul.f32 1.442695, %v3231_v55 }
 0x600   :  { %v4539_v38 = vpop.permute.xlu0 %4538 }
 0x601   :  { %v4544_v50 = vsel %vm3912_vm9, %v4539_v38, 0  ;;  %v10847_v38 = vsel %vm9621_vm15, %v12914_v10, -1e+30  ;;  %7630 = vpow2.f32 %v3345_v23 }
 0x602   :  { %4553 = vmatpush.bf16.msra.mxu0 %v4544_v50  ;;  %v3100_v24 = vsel %vm949_vm2, %v10847_v38, -inf  ;;  %7632 = vrcp.f32 %v3522_v13 }
 0x603   :  { %v10857_v22 = vpop.xlane.xlu1 %3095  ;;  %7634 = vpow2.f32 %v3349_v45 }
 0x605   :  { %6992 = vmatmul.msk.bf16.vlgmr.msra.gmra.mxu0 %vm949_vm2, %v3857_v30  ;;  %4748 = vrot.lane.b32.xlu2 %v12913_v34, %s7847_s27 }
 0x606   :  { %3098 = vmax.xlane.f32.xlu0 %v3097_v37 }
 0x607   :  { %v10842_v0 = vpop.xlane.xlu2 %3089  ;;  %v10855_v30 = vpop.eup %7630 }
 0x608   :  { %v3544_v37 = vsel %vm949_vm2, %v10855_v30, 0.0  ;;  %v7633_v23 = vpop.eup %7632 }
 0x609   :  { %v10862_v28 = vpop.eup %7634  ;;  %v3778_v1 = vmul.f32 %v7633_v23, %v10660_v62  ;;  %v10877_v62 = vsel %vm9621_vm15, %v12915_v35, -1e+30 }
 0x60a   :  { %v3550_v56 = vsel %vm949_vm2, %v10862_v28, 0.0  ;;  %v3115_v5 = vsel %vm949_vm2, %v10877_v62, -inf }
 0x60b   :  { %v3858_v45 = vpack.c.bf16 %v3778_v1, %v3778_v1 }
 0x60e   :  { %3101 = vmax.xlane.f32.xlu0 %v3100_v24 }
 0x60f   :  { %v3534_v50 = vpop.xlane.xlu2 %3533 }
 0x610   :  { %7636 = vrcp.f32 %v3534_v50 }
 0x611   :  { %7638 = vpow2.f32 %v3355_v15  ;;  %v3230_v15 = vsub.f32 %v10616_v39, %v10750_v11  ;;  %v12919_v39 = vld [vmem:[#allocation59_spill] sm:$0xff] }
 0x616   :  { %3545 = vadd.xlane.f32.xlu0 %v3544_v37  ;;  %v7637_v23 = vpop.eup %7636 }
 0x617   :  { %v4686_v34 = vpop.permute.xlu2 %4685  ;;  %v10881_v55 = vpop.eup %7638 }
 0x618   :  { %v4691_v10 = vsel %vm3912_vm9, %v4686_v34, 0 }
 0x619   :  { %4700 = vmatpush.bf16.msra.mxu3 %v4691_v10 }
 0x61b   :  { %v4560_v13 = vpop.permute.xlu1 %4559 }
 0x61c   :  { %v4565_v24 = vsel %vm3912_vm9, %v4560_v13, 0  ;;  %v12916_v13 = vld [vmem:[#allocation21_spill] sm:$0xff] }
 0x61d   :  { %4574 = vmatpush.bf16.msrb.mxu1 %v4565_v24  ;;  %v12917_v24 = vld [vmem:[#allocation104_spill] sm:$0xff] }
 0x61e   :  { %3551 = vadd.xlane.f32.xlu1 %v3550_v56  ;;  %v10888_v50 = vsel %vm9621_vm15, %v12917_v24, -1e+30  ;;  %v3782_v56 = vmul.f32 %v7637_v23, %v10718_v47 }
 0x61f   :  { %v4644_v37 = vpop.permute.xlu2 %4643  ;;  %v10870_v34 = vpop.f32.mrf.mxu2 }
 0x620   :  { %v4649_v10 = vsel %vm3912_vm9, %v4644_v37, 0  ;;  %6993 = vmatmul.msk.bf16.vlgmr.msrb.gmra.mxu1 %vm949_vm2, %v3858_v45  ;;  %v3559_v37 = vsel %vm949_vm2, %v10881_v55, 0.0  ;;  %v3862_v35 = vpack.c.bf16 %v3782_v56, %v3782_v56 }
 0x621   :  { %4658 = vmatpush.bf16.msra.mxu1 %v4649_v10  ;;  %v3118_v10 = vsel %vm949_vm2, %v10888_v50, -inf }
 0x626   :  { %3116 = vmax.xlane.f32.xlu1 %v3115_v5  ;;  %v3353_v5 = vmul.f32 1.442695, %v3230_v15 }
 0x627   :  { %v4515_v1 = vpop.f32.mrf.mxu2 }
 0x62a   :  { %4769 = vrot.lane.b32.xlu0 %v12916_v13, %s7847_s27  ;;  %v12918_v13 = vld [vmem:[#allocation78_spill] sm:$0xff] }
 0x62b   :  { %v3540_v45 = vpop.xlane.xlu0 %3539  ;;  %v10901_v47 = vsel %vm9621_vm15, %v12918_v13, -1e+30 }
 0x62c   :  { %7640 = vrcp.f32 %v3540_v45  ;;  %v3112_v45 = vsel %vm949_vm2, %v10901_v47, -inf }
 0x62d   :  { %7642 = vpow2.f32 %v3353_v5 }
 0x62e   :  { %3560 = vadd.xlane.f32.xlu2 %v3559_v37  ;;  %3119 = vmax.xlane.f32.xlu1 %v3118_v10  ;;  %7644 = vrcp.f32 %v10825_v49  ;;  %v3232_v49 = vsub.f32 %v10607_v40, %v10764_v44  ;;  %v12921_v40 = vld [vmem:[#allocation63_spill] sm:$0xff] }
 0x630   :  { %6997 = vmatmul.msk.bf16.vlgmr.msra.gmra.mxu1 %vm949_vm2, %v3862_v35 }
 0x632   :  { %v7641_v1 = vpop.eup %7640  ;;  %4727 = vrot.lane.b32.xlu0 %v12919_v39, %s7847_s27  ;;  %v10905_v11 = vpop.f32.mrf.mxu3 }
 0x633   :  { %v3784_v23 = vmul.f32 %v7641_v1, %v10746_v4  ;;  %v10915_v37 = vpop.eup %7642  ;;  %v3531_v1 = vpop.xlane.xlu0 %3530 }
 0x634   :  { %v10910_v56 = vpop.f32.mrf.mxu1  ;;  %v3556_v4 = vsel %vm949_vm2, %v10915_v37, 0.0  ;;  %v7645_v5 = vpop.eup %7644 }
 0x635   :  { %v3864_v15 = vpack.c.bf16 %v3784_v23, %v3784_v23  ;;  %v3783_v13 = vmul.f32 %v7645_v5, %v10690_v20  ;;  %v3229_v5 = vsub.f32 %v10677_v25, %v10827_v51 }
 0x636   :  { %3113 = vmax.xlane.f32.xlu2 %v3112_v45  ;;  %v12920_v45 = vld [vmem:[#allocation55_spill] sm:$0xff] }
 0x637   :  { %6999 = vmatmul.msk.bf16.vlgmr.msra.gmra.mxu3 %vm949_vm2, %v3864_v15  ;;  %v3863_v15 = vpack.c.bf16 %v3783_v13, %v3783_v13  ;;  %v3351_v13 = vmul.f32 1.442695, %v3229_v5 }
 0x63a   :  { %v4536_v10 = vpop.f32.mrf.mxu3 }
 0x63c   :  { %v4494_v35 = vpop.f32.mrf.mxu1 }
 0x63e   :  { %3557 = vadd.xlane.f32.xlu2 %v3556_v4  ;;  %v3357_v4 = vmul.f32 1.442695, %v3232_v49 }
 0x640   :  { %7646 = vpow2.f32 %v3357_v4 }
 0x641   :  { %7648 = vpow2.f32 %v3351_v13 }
 0x642   :  { %7650 = vrcp.f32 %v3531_v1 }
 0x646   :  { %v4665_v39 = vpop.permute.xlu0 %4664  ;;  %v10939_v44 = vpop.eup %7646 }
 0x647   :  { %v4670_v23 = vsel %vm3912_vm9, %v4665_v39, 0  ;;  %4706 = vrot.lane.b32.xlu1 %v12920_v45, %s7847_s27  ;;  %v3562_v49 = vsel %vm949_vm2, %v10939_v44, 0.0  ;;  %v10945_v25 = vpop.eup %7648 }
 0x648   :  { %4679 = vmatpush.bf16.msrb.mxu2 %v4670_v23  ;;  %v10935_v23 = vpop.xlane.xlu1 %3086  ;;  %v7651_v5 = vpop.eup %7650 }
 0x649   :  { %v3781_v13 = vmul.f32 %v7651_v5, %v10757_v17  ;;  %v12922_v17 = vld [vmem:[#allocation58_spill] sm:$0xff]  ;;  %v3363_v5 = vmul.f32 1.442695, %v3235_v7  ;;  %v3234_v7 = vsub.f32 %v10710_v54, %v10842_v0 }
 0x64a   :  { %v10926_v10 = vpop.f32.mrf.mxu0 }
 0x64b   :  { %6998 = vmatmul.msk.bf16.vlgmr.msrb.gmra.mxu2 %vm949_vm2, %v3863_v15  ;;  %v3861_v35 = vpack.c.bf16 %v3781_v13, %v3781_v13  ;;  %v12925_v13 = vld [vmem:[#allocation69_spill] sm:$0xff]  ;;  %v3361_v54 = vmul.f32 1.442695, %v3234_v7 }
 0x64e   :  { %v10931_v20 = vpop.f32.mrf.mxu2 }
 0x650   :  { %v10943_v4 = vpop.xlane.xlu1 %3104 }
 0x651   :  { %v3239_v18 = vsub.f32 %v10790_v19, %v10943_v4  ;;  %v12934_v4 = vld [vmem:[#allocation93_spill] sm:$0xff] }
 0x652   :  { %v4473_v39 = vpop.f32.mrf.mxu0 }
 0x653   :  { %v3553_v39 = vsel %vm949_vm2, %v10945_v25, 0.0 }
 0x656   :  { %v4599_v45 = vpop.f32.mrf.mxu2  ;;  %4853 = vrot.lane.b32.xlu2 %v12921_v40, %s7847_s27 }
 0x658   :  { %v3549_v15 = vpop.xlane.xlu2 %3548 }
 0x659   :  { %7652 = vrcp.f32 %v3549_v15 }
 0x65a   :  { %7654 = vpow2.f32 %v3363_v5 }
 0x65b   :  { %7656 = vpow2.f32 %v3361_v54  ;;  %v3236_v54 = vsub.f32 %v10703_v2, %v10857_v22 }
 0x65c   :  { %3563 = vadd.xlane.f32.xlu0 %v3562_v49 }
 0x65f   :  { %v7653_v45 = vpop.eup %7652 }
 0x660   :  { %v10947_v51 = vpop.xlane.xlu2 %3542  ;;  %v3787_v40 = vmul.f32 %v7653_v45, %v10796_v16  ;;  %v10962_v16 = vsel %vm9621_vm15, %v12922_v17, -1e+30  ;;  %v10977_v33 = vpop.eup %7654 }
 0x662   :  { %v3867_v12 = vpack.c.bf16 %v3787_v40, %v3787_v40  ;;  %v10984_v40 = vsel %vm9621_vm15, %v12925_v13, -1e+30 }
 0x664   :  { %3554 = vadd.xlane.f32.xlu0 %v3553_v39  ;;  %v12923_v39 = vld [vmem:[#allocation122_spill] sm:$0xff] }
 0x666   :  { %v4623_v24 = vpop.permute.xlu1 %4622 }
 0x667   :  { %v4628_v1 = vsel %vm3912_vm9, %v4623_v24, 0  ;;  %v3109_v24 = vsel %vm949_vm2, %v10962_v16, -inf }
 0x668   :  { %v4749_v15 = vpop.permute.xlu2 %4748  ;;  %4637 = vmatpush.bf16.msrb.mxu0 %v4628_v1  ;;  %v3571_v1 = vsel %vm949_vm2, %v10977_v33, 0.0 }
 0x669   :  { %v4754_v49 = vsel %vm3912_vm9, %v4749_v15, 0 }
 0x66a   :  { %4763 = vmatpush.bf16.msra.mxu2 %v4754_v49  ;;  %v12926_v49 = vld [vmem:[#allocation32_spill] sm:$0xff] }
 0x66b   :  { %6996 = vmatmul.msk.bf16.vlgmr.msrb.gmra.mxu0 %vm949_vm2, %v3861_v35  ;;  %v10969_v35 = vsel %vm9621_vm15, %v12923_v39, -1e+30  ;;  %v12927_v39 = vld [vmem:[#allocation43_spill] sm:$0xff] }
 0x66c   :  { %v3127_v32 = vsel %vm949_vm2, %v10969_v35, -inf }
 0x66d   :  { %7002 = vmatmul.msk.bf16.vlgmr.msra.gmra.mxu2 %vm949_vm2, %v3867_v12  ;;  %v12924_v12 = vld [vmem:[#allocation60_spill] sm:$0xff] }
 0x671   :  { %3110 = vmax.xlane.f32.xlu1 %v3109_v24  ;;  %v10971_v45 = vpop.xlane.xlu0 %3107  ;;  %v3130_v24 = vsel %vm949_vm2, %v10984_v40, -inf }
 0x678   :  { %4832 = vrot.lane.b32.xlu0 %v12924_v12, %s7847_s27  ;;  %v11003_v12 = vsel %vm9621_vm15, %v12927_v39, -1e+30 }
 0x679   :  { %3128 = vmax.xlane.f32.xlu1 %v3127_v32  ;;  %v10988_v15 = vpop.xlane.xlu0 %3098  ;;  %v3124_v32 = vsel %vm949_vm2, %v11003_v12, -inf }
 0x67f   :  { %3572 = vadd.xlane.f32.xlu2 %v3571_v1 }
 0x680   :  { %4790 = vrot.lane.b32.xlu0 %v12926_v49, %s7847_s27  ;;  %v10992_v17 = vpop.f32.mrf.mxu3  ;;  %v11009_v49 = vpop.eup %7656 }
 0x681   :  { %3131 = vmax.xlane.f32.xlu1 %v3130_v24  ;;  %v11007_v1 = vpop.xlane.xlu0 %3101  ;;  %v3568_v24 = vsel %vm949_vm2, %v11009_v49, 0.0 }
 0x682   :  { %v10998_v5 = vpop.f32.mrf.mxu0  ;;  %v3238_v19 = vsub.f32 %v10847_v38, %v11007_v1 }
 0x687   :  { %3125 = vmax.xlane.f32.xlu2 %v3124_v32 }
 0x688   :  { %v4620_v13 = vpop.f32.mrf.mxu3 }
 0x689   :  { %v3546_v27 = vpop.xlane.xlu0 %3545  ;;  %v12928_v13 = vld [vmem:[#allocation44_spill] sm:$0xff] }
 0x68a   :  { %v4557_v7 = vpop.f32.mrf.mxu0 }
 0x68b   :  { %v3365_v7 = vmul.f32 1.442695, %v3236_v54 }
 0x68f   :  { %3569 = vadd.xlane.f32.xlu2 %v3568_v24 }
 0x691   :  { %v3552_v0 = vpop.xlane.xlu1 %3551 }
 0x692   :  { %7658 = vrcp.f32 %v3552_v0 }
 0x693   :  { %7660 = vrcp.f32 %v3546_v27  ;;  %v3233_v27 = vsub.f32 %v10775_v60, %v10935_v23 }
 0x694   :  { %7662 = vpow2.f32 %v3365_v7 }
 0x695   :  { %v3359_v22 = vmul.f32 1.442695, %v3233_v27 }
 0x697   :  { %7664 = vpow2.f32 %v3359_v22 }
 0x698   :  { %v7659_v39 = vpop.eup %7658  ;;  %7666 = vrcp.f32 %v10947_v51 }
 0x699   :  { %v3788_v32 = vmul.f32 %v7659_v39, %v10862_v28  ;;  %v7661_v63 = vpop.eup %7660  ;;  %v11034_v60 = vpop.xlane.xlu1 %3116 }
 0x69a   :  { %4811 = vrot.lane.b32.xlu1 %v12928_v13, %s7847_s27  ;;  %v3786_v2 = vmul.f32 %v7661_v63, %v10855_v30  ;;  %v12929_v13 = vld [vmem:[#allocation101_spill] sm:$0xff] }
 0x69b   :  { %v3868_v24 = vpack.c.bf16 %v3788_v32, %v3788_v32 }
 0x69c   :  { %v4770_v41 = vpop.permute.xlu0 %4769  ;;  %v3866_v32 = vpack.c.bf16 %v3786_v2, %v3786_v2 }
 0x69d   :  { %v4775_v59 = vsel %vm3912_vm9, %v4770_v41, 0  ;;  %v11019_v36 = vpop.f32.mrf.mxu1 }
 0x69e   :  { %4784 = vmatpush.bf16.msrb.mxu3 %v4775_v59  ;;  %v11030_v59 = vpop.eup %7662 }
 0x69f   :  { %v3574_v63 = vsel %vm949_vm2, %v11030_v59, 0.0  ;;  %v11041_v23 = vpop.eup %7664 }
 0x6a0   :  { %v7667_v22 = vpop.eup %7666 }
 0x6a1   :  { %7003 = vmatmul.msk.bf16.vlgmr.msrb.gmra.mxu3 %vm949_vm2, %v3868_v24  ;;  %v11026_v28 = vpop.xlane.xlu2 %3560  ;;  %v3565_v24 = vsel %vm949_vm2, %v11041_v23, 0.0  ;;  %v11050_v2 = vpop.xlane.xlu1 %3119 }
 0x6a4   :  { %v4728_v41 = vpop.permute.xlu0 %4727 }
 0x6a5   :  { %v4733_v54 = vsel %vm3912_vm9, %v4728_v41, 0  ;;  %v4578_v39 = vpop.f32.mrf.mxu1 }
 0x6a6   :  { %4742 = vmatpush.bf16.msrb.mxu1 %v4733_v54  ;;  %v3785_v54 = vmul.f32 %v7667_v22, %v10800_v6  ;;  %v3371_v22 = vmul.f32 1.442695, %v3239_v18  ;;  %v12940_v18 = vld [vmem:[#allocation62_spill] sm:$0xff] }
 0x6a7   :  { %4937 = vrot.lane.b32.xlu2 %v12929_v13, %s7847_s27 }
 0x6a8   :  { %v3865_v0 = vpack.c.bf16 %v3785_v54, %v3785_v54  ;;  %7668 = vpow2.f32 %v3371_v22  ;;  %v12936_v22 = vld [vmem:[#allocation31_spill] sm:$0xff] }
 0x6a9   :  { %7001 = vmatmul.msk.bf16.vlgmr.msrb.gmra.mxu1 %vm949_vm2, %v3866_v32  ;;  %v11039_v30 = vpop.xlane.xlu2 %3113 }
 0x6aa   :  { %3575 = vadd.xlane.f32.xlu0 %v3574_v63 }
 0x6ad   :  { %v11043_v7 = vpop.f32.mrf.mxu1 }
 0x6ae   :  { %12930 = vst [vmem:[#allocation33_spill] sm:$0xff] %v11043_v7  ;;  %v11069_v54 = vpop.eup %7668 }
 0x6b1   :  { %v11048_v27 = vpop.xlane.xlu2 %3557 }
 0x6b2   :  { %3566 = vadd.xlane.f32.xlu0 %v3565_v24  ;;  %v12932_v24 = vld [vmem:[#allocation79_spill] sm:$0xff] }
 0x6b3   :  { %v11063_v6 = vsel %vm9621_vm15, %v12932_v24, -1e+30  ;;  %v3369_v24 = vmul.f32 1.442695, %v3238_v19  ;;  %v12937_v19 = vld [vmem:[#allocation82_spill] sm:$0xff] }
 0x6b5   :  { %v4662_v41 = vpop.f32.mrf.mxu1 }
 0x6b9   :  { %v4854_v39 = vpop.permute.xlu2 %4853  ;;  %v4707_v32 = vpop.permute.xlu1 %4706 }
 0x6ba   :  { %v11053_v13 = vpop.f32.mrf.mxu3  ;;  %v4859_v63 = vsel %vm3912_vm9, %v4854_v39, 0  ;;  %v4712_v51 = vsel %vm3912_vm9, %v4707_v32, 0  ;;  %v3121_v39 = vsel %vm949_vm2, %v11063_v6, -inf  ;;  %v12933_v32 = vld [vmem:[#allocation94_spill] sm:$0xff] }
 0x6bb   :  { %12931 = vst [vmem:[#allocation34_spill] sm:$0xff] %v11053_v13  ;;  %4868 = vmatpush.bf16.msra.mxu3 %v4859_v63  ;;  %4721 = vmatpush.bf16.msra.mxu0 %v4712_v51  ;;  %v3583_v51 = vsel %vm949_vm2, %v11069_v54, 0.0 }
 0x6be   :  { %7000 = vmatmul.msk.bf16.vlgmr.msra.gmra.mxu0 %vm949_vm2, %v3865_v0 }
 0x6c2   :  { %v4704_v41 = vpop.f32.mrf.mxu3 }
 0x6c3   :  { %v11084_v41 = vsel %vm9621_vm15, %v12936_v22, -1e+30  ;;  %v12938_v22 = vld [vmem:[#allocation6_spill] sm:$0xff] }
 0x6c4   :  { %3122 = vmax.xlane.f32.xlu1 %v3121_v39  ;;  %v3136_v39 = vsel %vm949_vm2, %v11084_v41, -inf }
 0x6c6   :  { %4916 = vrot.lane.b32.xlu0 %v12933_v32, %s7847_s27 }
 0x6ce   :  { %4895 = vrot.lane.b32.xlu0 %v12934_v4, %s7847_s27  ;;  %v11075_v0 = vpop.f32.mrf.mxu2 }
 0x6cf   :  { %12935 = vst [vmem:[#allocation89_spill] sm:$0xff] %v11075_v0  ;;  %v3564_v63 = vpop.xlane.xlu0 %3563  ;;  %v12943_v0 = vld [vmem:[#allocation108_spill] sm:$0xff] }
 0x6d0   :  { %7670 = vrcp.f32 %v3564_v63  ;;  %3584 = vadd.xlane.f32.xlu2 %v3583_v51 }
 0x6d1   :  { %7672 = vpow2.f32 %v3369_v24 }
 0x6d2   :  { %7674 = vrcp.f32 %v11026_v28 }
 0x6d6   :  { %v7671_v38 = vpop.eup %7670  ;;  %v4683_v1 = vpop.f32.mrf.mxu2 }
 0x6d7   :  { %v3792_v32 = vmul.f32 %v7671_v38, %v10939_v44  ;;  %v11090_v63 = vpop.eup %7672  ;;  %v3555_v24 = vpop.xlane.xlu0 %3554  ;;  %v11100_v44 = vsel %vm9621_vm15, %v12938_v22, -1e+30  ;;  %v3240_v1 = vsub.f32 %v10819_v42, %v10971_v45  ;;  %v11115_v42 = vsel %vm9621_vm15, %v12940_v18, -1e+30 }
 0x6d8   :  { %3137 = vmax.xlane.f32.xlu2 %v3136_v39  ;;  %v3580_v51 = vsel %vm949_vm2, %v11090_v63, 0.0  ;;  %v7675_v38 = vpop.eup %7674  ;;  %v3139_v39 = vsel %vm949_vm2, %v11100_v44, -inf  ;;  %7676 = vrcp.f32 %v3555_v24 }
 0x6d9   :  { %v3872_v4 = vpack.c.bf16 %v3792_v32, %v3792_v32  ;;  %v3791_v32 = vmul.f32 %v7675_v38, %v10881_v55  ;;  %v3373_v28 = vmul.f32 1.442695, %v3240_v1  ;;  %v3237_v55 = vsub.f32 %v10833_v57, %v10988_v15 }
 0x6da   :  { %v3142_v38 = vsel %vm949_vm2, %v11115_v42, -inf }
 0x6db   :  { %7007 = vmatmul.msk.bf16.vlgmr.msra.gmra.mxu3 %vm949_vm2, %v3872_v4  ;;  %v3871_v45 = vpack.c.bf16 %v3791_v32, %v3791_v32  ;;  %7678 = vpow2.f32 %v3373_v28 }
 0x6dd   :  { %4874 = vrot.lane.b32.xlu1 %v12937_v19, %s7847_s27  ;;  %v3367_v19 = vmul.f32 1.442695, %v3237_v55 }
 0x6de   :  { %v7677_v24 = vpop.eup %7676 }
 0x6df   :  { %7680 = vpow2.f32 %v3367_v19  ;;  %v12941_v19 = vld [vmem:[#allocation54_spill] sm:$0xff] }
 0x6e0   :  { %3581 = vadd.xlane.f32.xlu2 %v3580_v51  ;;  %7682 = vrcp.f32 %v11048_v27 }
 0x6e1   :  { %v11126_v58 = vpop.eup %7678 }
 0x6e2   :  { %v3586_v15 = vsel %vm949_vm2, %v11126_v58, 0.0 }
 0x6e5   :  { %v11135_v55 = vpop.eup %7680 }
 0x6e8   :  { %3140 = vmax.xlane.f32.xlu2 %v3139_v39  ;;  %v11107_v4 = vpop.f32.mrf.mxu0  ;;  %v3789_v39 = vmul.f32 %v7677_v24, %v10945_v25 }
 0x6e9   :  { %12939 = vst [vmem:[#allocation71_spill] sm:$0xff] %v11107_v4  ;;  %v12968_v4 = vld [vmem:[#allocation95_spill] sm:$0xff] }
 0x6ea   :  { %v4833_v51 = vpop.permute.xlu0 %4832  ;;  %v3869_v57 = vpack.c.bf16 %v3789_v39, %v3789_v39  ;;  %v11143_v39 = vsel %vm9621_vm15, %v12941_v19, -1e+30 }
 0x6eb   :  { %v4838_v22 = vsel %vm3912_vm9, %v4833_v51, 0  ;;  %v3111_v51 = vpop.xlane.xlu1 %3110 }
 0x6ec   :  { %4847 = vmatpush.bf16.msrb.mxu2 %v4838_v22 }
 0x6ef   :  { %7006 = vmatmul.msk.bf16.vlgmr.msrb.gmra.mxu2 %vm949_vm2, %v3871_v45 }
 0x6f0   :  { %v11122_v1 = vpop.f32.mrf.mxu2  ;;  %3143 = vmax.xlane.f32.xlu2 %v3142_v38  ;;  %v4641_v18 = vpop.f32.mrf.mxu0  ;;  %v3577_v38 = vsel %vm949_vm2, %v11135_v55, 0.0 }
 0x6f2   :  { %v4791_v22 = vpop.permute.xlu0 %4790  ;;  %v3573_v32 = vpop.xlane.xlu2 %3572 }
 0x6f3   :  { %v4796_v28 = vsel %vm3912_vm9, %v4791_v22, 0  ;;  %v11133_v24 = vpop.xlane.xlu1 %3128 }
 0x6f4   :  { %4805 = vmatpush.bf16.msrb.mxu0 %v4796_v28  ;;  %v3133_v28 = vsel %vm949_vm2, %v11143_v39, -inf }
 0x6f7   :  { %7004 = vmatmul.msk.bf16.vlgmr.msrb.gmra.mxu0 %vm949_vm2, %v3869_v57  ;;  %v12942_v57 = vld [vmem:[#allocation112_spill] sm:$0xff] }
 0x6f8   :  { %3587 = vadd.xlane.f32.xlu0 %v3586_v15  ;;  %v4767_v45 = vpop.f32.mrf.mxu2  ;;  %v7683_v15 = vpop.eup %7682 }
 0x6f9   :  { %v3790_v27 = vmul.f32 %v7683_v15, %v10915_v37  ;;  %v12945_v37 = vld [vmem:[#allocation120_spill] sm:$0xff] }
 0x6fa   :  { %v11131_v25 = vpop.xlane.xlu2 %3125 }
 0x6fb   :  { %v11145_v22 = vpop.xlane.xlu1 %3131  ;;  %v3870_v53 = vpack.c.bf16 %v3790_v27, %v3790_v27 }
 0x700   :  { %3578 = vadd.xlane.f32.xlu0 %v3577_v38 }
 0x702   :  { %v3570_v18 = vpop.xlane.xlu2 %3569 }
 0x707   :  { %3134 = vmax.xlane.f32.xlu1 %v3133_v28  ;;  %v12944_v28 = vld [vmem:[#allocation100_spill] sm:$0xff] }
 0x708   :  { %4979 = vrot.lane.b32.xlu2 %v12942_v57, %s7847_s27 }
 0x70a   :  { %v4938_v45 = vpop.permute.xlu2 %4937 }
 0x70b   :  { %v4943_v38 = vsel %vm3912_vm9, %v4938_v45, 0  ;;  %v3241_v45 = vsub.f32 %v10962_v16, %v3111_v51 }
 0x70c   :  { %4952 = vmatpush.bf16.msrb.mxu3 %v4943_v38  ;;  %v4812_v26 = vpop.permute.xlu1 %4811 }
 0x70d   :  { %v4817_v19 = vsel %vm3912_vm9, %v4812_v26, 0  ;;  %v3375_v15 = vmul.f32 1.442695, %v3241_v45 }
 0x70e   :  { %4826 = vmatpush.bf16.msra.mxu1 %v4817_v19 }
 0x711   :  { %7005 = vmatmul.msk.bf16.vlgmr.msra.gmra.mxu1 %vm949_vm2, %v3870_v53 }
 0x714   :  { %5000 = vrot.lane.b32.xlu0 %v12943_v0, %s7847_s27 }
 0x71c   :  { %4958 = vrot.lane.b32.xlu0 %v12944_v28, %s7847_s27 }
 0x71d   :  { %v3576_v57 = vpop.xlane.xlu0 %3575 }
 0x71e   :  { %7684 = vrcp.f32 %v3576_v57 }
 0x71f   :  { %7686 = vpow2.f32 %v3375_v15 }
 0x720   :  { %5021 = vrot.lane.b32.xlu1 %v12945_v37, %s7847_s27  ;;  %7688 = vrcp.f32 %v3573_v32  ;;  %v3244_v37 = vsub.f32 %v10888_v50, %v11050_v2  ;;  %v3248_v50 = vsub.f32 %v10984_v40, %v11145_v22 }
 0x721   :  { %7690 = vrcp.f32 %v3570_v18 }
 0x722   :  { %v3389_v13 = vmul.f32 1.442695, %v3248_v50 }
 0x724   :  { %v7685_v38 = vpop.eup %7684  ;;  %v11162_v26 = vpop.f32.mrf.mxu3 }
 0x725   :  { %v3796_v27 = vmul.f32 %v7685_v38, %v11030_v59  ;;  %v11170_v16 = vpop.eup %7686  ;;  %v3567_v57 = vpop.xlane.xlu0 %3566  ;;  %v3381_v38 = vmul.f32 1.442695, %v3244_v37 }
 0x726   :  { %v11167_v0 = vpop.f32.mrf.mxu1  ;;  %v3589_v45 = vsel %vm949_vm2, %v11170_v16, 0.0  ;;  %v7689_v59 = vpop.eup %7688 }
 0x727   :  { %12946 = vst [vmem:[#allocation3_spill] sm:$0xff] %v11167_v0  ;;  %v3876_v19 = vpack.c.bf16 %v3796_v27, %v3796_v27  ;;  %v3795_v15 = vmul.f32 %v7689_v59, %v10977_v33  ;;  %7692 = vpow2.f32 %v3381_v38 }
 0x729   :  { %7011 = vmatmul.msk.bf16.vlgmr.msrb.gmra.mxu3 %vm949_vm2, %v3876_v19  ;;  %v3243_v19 = vsub.f32 %v10877_v62, %v11034_v60  ;;  %v3242_v62 = vsub.f32 %v10901_v47, %v11039_v30  ;;  %v12948_v47 = vld [vmem:[#allocation19_spill] sm:$0xff] }
 0x72b   :  { %v3377_v38 = vmul.f32 1.442695, %v3242_v62 }
 0x72c   :  { %v4788_v28 = vpop.f32.mrf.mxu3 }
 0x72d   :  { %v3875_v28 = vpack.c.bf16 %v3795_v15, %v3795_v15 }
 0x72e   :  { %v4746_v51 = vpop.f32.mrf.mxu1 }
 0x72f   :  { %v7691_v51 = vpop.eup %7690 }
 0x730   :  { %v3794_v33 = vmul.f32 %v7691_v51, %v11009_v49  ;;  %v11189_v18 = vpop.eup %7692 }
 0x731   :  { %3590 = vadd.xlane.f32.xlu2 %v3589_v45  ;;  %v3379_v45 = vmul.f32 1.442695, %v3243_v19 }
 0x732   :  { %v3874_v59 = vpack.c.bf16 %v3794_v33, %v3794_v33 }
 0x733   :  { %7694 = vpow2.f32 %v3379_v45 }
 0x734   :  { %7696 = vrcp.f32 %v3567_v57 }
 0x735   :  { %7698 = vpow2.f32 %v3377_v38 }
 0x737   :  { %v11196_v19 = vpop.xlane.xlu1 %3122 }
 0x738   :  { %v4917_v27 = vpop.permute.xlu0 %4916  ;;  %v3245_v22 = vsub.f32 %v11063_v6, %v11196_v19 }
 0x739   :  { %v4922_v32 = vsel %vm3912_vm9, %v4917_v27, 0  ;;  %v3598_v27 = vsel %vm949_vm2, %v11189_v18, 0.0  ;;  %v11194_v49 = vpop.eup %7694 }
 0x73a   :  { %4931 = vmatpush.bf16.msra.mxu2 %v4922_v32  ;;  %v3595_v30 = vsel %vm949_vm2, %v11194_v49, 0.0 }
 0x73b   :  { %v11180_v53 = vpop.f32.mrf.mxu0 }
 0x73c   :  { %12947 = vst [vmem:[#allocation48_spill] sm:$0xff] %v11180_v53 }
 0x73d   :  { %7010 = vmatmul.msk.bf16.vlgmr.msra.gmra.mxu2 %vm949_vm2, %v3875_v28  ;;  %v7697_v28 = vpop.eup %7696 }
 0x73e   :  { %v11204_v51 = vpop.eup %7698  ;;  %v3793_v57 = vmul.f32 %v7697_v28, %v11041_v23  ;;  %v12950_v23 = vld [vmem:[#allocation25_spill] sm:$0xff] }
 0x740   :  { %v4896_v2 = vpop.permute.xlu0 %4895  ;;  %v3873_v62 = vpack.c.bf16 %v3793_v57, %v3793_v57 }
 0x741   :  { %v4901_v60 = vsel %vm3912_vm9, %v4896_v2, 0  ;;  %v3592_v2 = vsel %vm949_vm2, %v11204_v51, 0.0 }
 0x742   :  { %4910 = vmatpush.bf16.msrb.mxu1 %v4901_v60 }
 0x743   :  { %v3585_v37 = vpop.xlane.xlu2 %3584  ;;  %v4725_v15 = vpop.f32.mrf.mxu0 }
 0x745   :  { %7009 = vmatmul.msk.bf16.vlgmr.msrb.gmra.mxu1 %vm949_vm2, %v3874_v59  ;;  %v12949_v59 = vld [vmem:[#allocation37_spill] sm:$0xff] }
 0x746   :  { %3599 = vadd.xlane.f32.xlu0 %v3598_v27 }
 0x749   :  { %5042 = vrot.lane.b32.xlu2 %v12948_v47, %s7847_s27 }
 0x74a   :  { %3596 = vadd.xlane.f32.xlu1 %v3595_v30 }
 0x74b   :  { %v11202_v32 = vpop.xlane.xlu2 %3137 }
 0x74f   :  { %v4875_v45 = vpop.permute.xlu1 %4874 }
 0x750   :  { %v4880_v33 = vsel %vm3912_vm9, %v4875_v45, 0  ;;  %v12951_v45 = vld [vmem:[#allocation50_spill] sm:$0xff] }
 0x751   :  { %4889 = vmatpush.bf16.msra.mxu0 %v4880_v33 }
 0x752   :  { %3593 = vadd.xlane.f32.xlu1 %v3592_v2  ;;  %v12952_v2 = vld [vmem:[#allocation77_spill] sm:$0xff] }
 0x753   :  { %v3582_v60 = vpop.xlane.xlu2 %3581 }
 0x754   :  { %7008 = vmatmul.msk.bf16.vlgmr.msra.gmra.mxu0 %vm949_vm2, %v3873_v62  ;;  %7700 = vrcp.f32 %v3582_v60  ;;  %v11228_v62 = vsel %vm9621_vm15, %v12952_v2, -1e+30 }
 0x755   :  { %7702 = vrcp.f32 %v3585_v37  ;;  %v3246_v37 = vsub.f32 %v11003_v12, %v11131_v25 }
 0x757   :  { %v3385_v50 = vmul.f32 1.442695, %v3246_v37 }
 0x75a   :  { %5084 = vrot.lane.b32.xlu0 %v12949_v59, %s7847_s27  ;;  %v7701_v30 = vpop.eup %7700  ;;  %v3145_v59 = vsel %vm949_vm2, %v11228_v62, -inf }
 0x75b   :  { %v11213_v15 = vpop.xlane.xlu2 %3140  ;;  %v3798_v28 = vmul.f32 %v7701_v30, %v11090_v63 }
 0x75d   :  { %v3878_v60 = vpack.c.bf16 %v3798_v28, %v3798_v28 }
 0x75e   :  { %v11215_v38 = vpop.f32.mrf.mxu3 }
 0x762   :  { %5063 = vrot.lane.b32.xlu0 %v12950_v23, %s7847_s27 }
 0x763   :  { %v11219_v27 = vpop.xlane.xlu2 %3143 }
 0x766   :  { %v4872_v47 = vpop.f32.mrf.mxu3 }
 0x76b   :  { %v4980_v57 = vpop.permute.xlu2 %4979  ;;  %5105 = vrot.lane.b32.xlu1 %v12951_v45, %s7847_s27  ;;  %v3588_v47 = vpop.xlane.xlu0 %3587 }
 0x76c   :  { %v4985_v33 = vsel %vm3912_vm9, %v4980_v57, 0  ;;  %v3247_v57 = vsub.f32 %v10969_v35, %v11133_v24 }
 0x76d   :  { %4994 = vmatpush.bf16.msra.mxu1 %v4985_v33 }
 0x76e   :  { %v3387_v33 = vmul.f32 1.442695, %v3247_v57  ;;  %v12953_v57 = vld [vmem:[#allocation27_spill] sm:$0xff] }
 0x770   :  { %7013 = vmatmul.msk.bf16.vlgmr.msra.gmra.mxu1 %vm949_vm2, %v3878_v60  ;;  %v7703_v60 = vpop.eup %7702  ;;  %7704 = vpow2.f32 %v3387_v33  ;;  %v3383_v33 = vmul.f32 1.442695, %v3245_v22 }
 0x772   :  { %v11233_v23 = vpop.f32.mrf.mxu2  ;;  %3146 = vmax.xlane.f32.xlu2 %v3145_v59  ;;  %v3799_v59 = vmul.f32 %v7703_v60, %v11069_v54 }
 0x773   :  { %v3579_v2 = vpop.xlane.xlu0 %3578 }
 0x774   :  { %v11237_v30 = vpop.f32.mrf.mxu0  ;;  %7706 = vrcp.f32 %v3579_v2  ;;  %v3879_v35 = vpack.c.bf16 %v3799_v59, %v3799_v59 }
 0x775   :  { %7708 = vrcp.f32 %v3588_v47 }
 0x776   :  { %v11245_v0 = vpop.eup %7704  ;;  %7710 = vpow2.f32 %v3389_v13 }
 0x777   :  { %v3607_v54 = vsel %vm949_vm2, %v11245_v0, 0.0  ;;  %7712 = vpow2.f32 %v3385_v50 }
 0x778   :  { %7714 = vpow2.f32 %v3383_v33  ;;  %v12956_v33 = vld [vmem:[#allocation17_spill] sm:$0xff] }
 0x77a   :  { %v4851_v45 = vpop.f32.mrf.mxu2  ;;  %v7707_v24 = vpop.eup %7706 }
 0x77b   :  { %v3135_v40 = vpop.xlane.xlu1 %3134  ;;  %v7709_v47 = vpop.eup %7708  ;;  %v12954_v45 = vld [vmem:[#allocation5_spill] sm:$0xff] }
 0x77c   :  { %v4809_v28 = vpop.f32.mrf.mxu0  ;;  %v11267_v19 = vpop.eup %7710 }
 0x77d   :  { %v11263_v28 = vsel %vm9621_vm15, %v12954_v45, -1e+30 }
 0x77e   :  { %v3148_v2 = vsel %vm949_vm2, %v11263_v28, -inf }
 0x786   :  { %v5001_v63 = vpop.permute.xlu0 %5000 }
 0x787   :  { %v5006_v53 = vsel %vm3912_vm9, %v5001_v63, 0 }
 0x788   :  { %5015 = vmatpush.bf16.msrb.mxu2 %v5006_v53  ;;  %v3797_v53 = vmul.f32 %v7707_v24, %v11135_v55  ;;  %v3800_v55 = vmul.f32 %v7709_v47, %v11126_v58 }
 0x78a   :  { %5189 = vrot.lane.b32.xlu2 %v12953_v57, %s7847_s27  ;;  %v3877_v6 = vpack.c.bf16 %v3797_v53, %v3797_v53  ;;  %v3880_v24 = vpack.c.bf16 %v3800_v55, %v3800_v55  ;;  %v11276_v57 = vpop.eup %7712  ;;  %v12955_v53 = vld [vmem:[#allocation67_spill] sm:$0xff]  ;;  %v3252_v55 = vsub.f32 %v11115_v42, %v11219_v27 }
 0x78b   :  { %7014 = vmatmul.msk.bf16.vlgmr.msrb.gmra.mxu2 %vm949_vm2, %v3879_v35  ;;  %v3610_v35 = vsel %vm949_vm2, %v11267_v19, 0.0  ;;  %v11279_v58 = vpop.eup %7714  ;;  %v11288_v50 = vsel %vm9621_vm15, %v12955_v53, -1e+30 }
 0x78c   :  { %3608 = vadd.xlane.f32.xlu0 %v3607_v54  ;;  %v3604_v54 = vsel %vm949_vm2, %v11276_v57, 0.0  ;;  %v3601_v22 = vsel %vm949_vm2, %v11279_v58, 0.0  ;;  %v3151_v47 = vsel %vm949_vm2, %v11288_v50, -inf }
 0x78e   :  { %v4959_v63 = vpop.permute.xlu0 %4958  ;;  %v11257_v12 = vpop.f32.mrf.mxu1 }
 0x78f   :  { %v4964_v25 = vsel %vm3912_vm9, %v4959_v63, 0  ;;  %v3249_v63 = vsub.f32 %v11143_v39, %v3135_v40 }
 0x790   :  { %4973 = vmatpush.bf16.msrb.mxu0 %v4964_v25 }
 0x791   :  { %v3391_v45 = vmul.f32 1.442695, %v3249_v63 }
 0x792   :  { %v5022_v60 = vpop.permute.xlu1 %5021 }
 0x793   :  { %7012 = vmatmul.msk.bf16.vlgmr.msrb.gmra.mxu0 %vm949_vm2, %v3877_v6  ;;  %v5027_v59 = vsel %vm3912_vm9, %v5022_v60, 0  ;;  %v11296_v6 = vsel %vm9621_vm15, %v12956_v33, -1e+30  ;;  %v12960_v33 = vld [vmem:[#allocation65_spill] sm:$0xff] }
 0x794   :  { %3149 = vmax.xlane.f32.xlu0 %v3148_v2  ;;  %5036 = vmatpush.bf16.msra.mxu3 %v5027_v59  ;;  %v3154_v39 = vsel %vm949_vm2, %v11296_v6, -inf }
 0x795   :  { %3611 = vadd.xlane.f32.xlu1 %v3610_v35  ;;  %v3397_v35 = vmul.f32 1.442695, %v3252_v55 }
 0x796   :  { %v4830_v37 = vpop.f32.mrf.mxu1 }
 0x797   :  { %7015 = vmatmul.msk.bf16.vlgmr.msra.gmra.mxu3 %vm949_vm2, %v3880_v24 }
 0x79c   :  { %3605 = vadd.xlane.f32.xlu0 %v3604_v54 }
 0x79d   :  { %3602 = vadd.xlane.f32.xlu1 %v3601_v22  ;;  %v12957_v22 = vld [vmem:[#allocation22_spill] sm:$0xff] }
 0x7a4   :  { %3152 = vmax.xlane.f32.xlu0 %v3151_v47  ;;  %v3591_v25 = vpop.xlane.xlu2 %3590  ;;  %v12958_v47 = vld [vmem:[#allocation49_spill] sm:$0xff] }
 0x7a5   :  { %7716 = vrcp.f32 %v3591_v25  ;;  %v11320_v25 = vsel %vm9621_vm15, %v12958_v47, -1e+30 }
 0x7a6   :  { %7718 = vpow2.f32 %v3391_v45  ;;  %v12959_v45 = vld [vmem:[#allocation68_spill] sm:$0xff] }
 0x7a7   :  { %7720 = vpow2.f32 %v3397_v35 }
 0x7ab   :  { %v7717_v2 = vpop.eup %7716 }
 0x7ac   :  { %v3801_v40 = vmul.f32 %v7717_v2, %v11170_v16  ;;  %3155 = vmax.xlane.f32.xlu0 %v3154_v39  ;;  %v11303_v60 = vpop.f32.mrf.mxu3  ;;  %v5043_v59 = vpop.permute.xlu2 %5042  ;;  %v3160_v39 = vsel %vm949_vm2, %v11320_v25, -inf }
 0x7ad   :  { %v5048_v24 = vsel %vm3912_vm9, %v5043_v59, 0  ;;  %v11306_v54 = vpop.eup %7718 }
 0x7ae   :  { %v3881_v37 = vpack.c.bf16 %v3801_v40, %v3801_v40  ;;  %5057 = vmatpush.bf16.msra.mxu0 %v5048_v24  ;;  %v3613_v42 = vsel %vm949_vm2, %v11306_v54, 0.0  ;;  %v11311_v16 = vpop.eup %7720 }
 0x7af   :  { %v3622_v53 = vsel %vm949_vm2, %v11311_v16, 0.0 }
 0x7b1   :  { %7016 = vmatmul.msk.bf16.vlgmr.msra.gmra.mxu0 %vm949_vm2, %v3881_v37  ;;  %v12961_v37 = vld [vmem:[#allocation40_spill] sm:$0xff] }
 0x7b3   :  { %3614 = vadd.xlane.f32.xlu2 %v3613_v42 }
 0x7b4   :  { %v4956_v27 = vpop.f32.mrf.mxu3 }
 0x7b6   :  { %5168 = vrot.lane.b32.xlu1 %v12957_v22, %s7847_s27 }
 0x7b9   :  { %v3600_v59 = vpop.xlane.xlu0 %3599 }
 0x7bb   :  { %3623 = vadd.xlane.f32.xlu2 %v3622_v53 }
 0x7bd   :  { %v3597_v63 = vpop.xlane.xlu1 %3596 }
 0x7be   :  { %5147 = vrot.lane.b32.xlu1 %v12959_v45, %s7847_s27  ;;  %7722 = vrcp.f32 %v3597_v63 }
 0x7c0   :  { %5126 = vrot.lane.b32.xlu0 %v12960_v33, %s7847_s27  ;;  %v11326_v55 = vpop.f32.mrf.mxu2  ;;  %v12962_v33 = vld [vmem:[#allocation53_spill] sm:$0xff] }
 0x7c2   :  { %v11332_v40 = vpop.f32.mrf.mxu1 }
 0x7c3   :  { %3161 = vmax.xlane.f32.xlu2 %v3160_v39 }
 0x7c4   :  { %v7723_v24 = vpop.eup %7722 }
 0x7c5   :  { %v3594_v35 = vpop.xlane.xlu1 %3593  ;;  %v3803_v22 = vmul.f32 %v7723_v24, %v11194_v49 }
 0x7c6   :  { %7724 = vrcp.f32 %v3594_v35  ;;  %v12967_v35 = vld [vmem:[#allocation86_spill] sm:$0xff] }
 0x7c7   :  { %v3883_v45 = vpack.c.bf16 %v3803_v22, %v3803_v22  ;;  %7726 = vrcp.f32 %v3600_v59 }
 0x7c8   :  { %5210 = vrot.lane.b32.xlu0 %v12961_v37, %s7847_s27  ;;  %v4935_v42 = vpop.f32.mrf.mxu2 }
 0x7c9   :  { %v3250_v42 = vsub.f32 %v11084_v41, %v11202_v32 }
 0x7ca   :  { %v4914_v27 = vpop.f32.mrf.mxu1 }
 0x7cc   :  { %v5085_v53 = vpop.permute.xlu0 %5084  ;;  %v7725_v63 = vpop.eup %7724 }
 0x7cd   :  { %v5090_v47 = vsel %vm3912_vm9, %v5085_v53, 0  ;;  %v3802_v37 = vmul.f32 %v7725_v63, %v11204_v51  ;;  %v7727_v22 = vpop.eup %7726 }
 0x7ce   :  { %5099 = vmatpush.bf16.msra.mxu2 %v5090_v47  ;;  %v3393_v47 = vmul.f32 1.442695, %v3250_v42  ;;  %v3804_v51 = vmul.f32 %v7727_v22, %v11189_v18  ;;  %v12964_v18 = vld [vmem:[#allocation88_spill] sm:$0xff] }
 0x7cf   :  { %v3882_v27 = vpack.c.bf16 %v3802_v37, %v3802_v37  ;;  %v3251_v37 = vsub.f32 %v11100_v44, %v11213_v15  ;;  %v11364_v42 = vsel %vm9621_vm15, %v12964_v18, -1e+30 }
 0x7d0   :  { %5231 = vrot.lane.b32.xlu0 %v12962_v33, %s7847_s27  ;;  %7728 = vpow2.f32 %v3393_v47  ;;  %v3884_v33 = vpack.c.bf16 %v3804_v51, %v3804_v51  ;;  %v3157_v47 = vsel %vm949_vm2, %v11364_v42, -inf }
 0x7d1   :  { %7018 = vmatmul.msk.bf16.vlgmr.msra.gmra.mxu2 %vm949_vm2, %v3883_v45  ;;  %v11341_v39 = vpop.f32.mrf.mxu0  ;;  %v12963_v45 = vld [vmem:[#allocation72_spill] sm:$0xff] }
 0x7d4   :  { %v5064_v49 = vpop.permute.xlu0 %5063 }
 0x7d5   :  { %v5069_v24 = vsel %vm3912_vm9, %v5064_v49, 0 }
 0x7d6   :  { %5078 = vmatpush.bf16.msrb.mxu1 %v5069_v24  ;;  %v11355_v41 = vpop.eup %7728  ;;  %v3395_v24 = vmul.f32 1.442695, %v3251_v37  ;;  %v12965_v37 = vld [vmem:[#allocation125_spill] sm:$0xff] }
 0x7d7   :  { %v3616_v49 = vsel %vm949_vm2, %v11355_v41, 0.0 }
 0x7d8   :  { %7730 = vpow2.f32 %v3395_v24 }
 0x7d9   :  { %7017 = vmatmul.msk.bf16.vlgmr.msrb.gmra.mxu1 %vm949_vm2, %v3882_v27  ;;  %v4893_v53 = vpop.f32.mrf.mxu0 }
 0x7db   :  { %5273 = vrot.lane.b32.xlu2 %v12963_v45, %s7847_s27 }
 0x7dd   :  { %v5106_v63 = vpop.permute.xlu1 %5105 }
 0x7de   :  { %v5111_v59 = vsel %vm3912_vm9, %v5106_v63, 0  ;;  %v11371_v15 = vpop.eup %7730 }
 0x7df   :  { %5120 = vmatpush.bf16.msrb.mxu3 %v5111_v59  ;;  %v3619_v51 = vsel %vm949_vm2, %v11371_v15, 0.0  ;;  %v11379_v59 = vsel %vm9621_vm15, %v10430_v8, -1e+30 }
 0x7e2   :  { %7019 = vmatmul.msk.bf16.vlgmr.msrb.gmra.mxu3 %vm949_vm2, %v3884_v33 }
 0x7e5   :  { %v3147_v32 = vpop.xlane.xlu2 %3146 }
 0x7e6   :  { %v3253_v45 = vsub.f32 %v11228_v62, %v3147_v32  ;;  %v3163_v62 = vsel %vm949_vm2, %v11379_v59, -inf }
 0x7e8   :  { %3617 = vadd.xlane.f32.xlu1 %v3616_v49  ;;  %v3399_v63 = vmul.f32 1.442695, %v3253_v45  ;;  %v11384_v49 = vsel %vm9621_vm15, %v12965_v37, -1e+30 }
 0x7e9   :  { %v3166_v32 = vsel %vm949_vm2, %v11384_v49, -inf }
 0x7ea   :  { %7732 = vpow2.f32 %v3399_v63 }
 0x7ed   :  { %v5190_v27 = vpop.permute.xlu2 %5189  ;;  %v11366_v22 = vpop.f32.mrf.mxu1 }
 0x7ee   :  { %v5195_v53 = vsel %vm3912_vm9, %v5190_v27, 0 }
 0x7ef   :  { %5204 = vmatpush.bf16.msra.mxu3 %v5195_v53  ;;  %v12966_v53 = vld [vmem:[#allocation70_spill] sm:$0xff] }
 0x7f0   :  { %3158 = vmax.xlane.f32.xlu1 %v3157_v47  ;;  %v11390_v24 = vpop.eup %7732 }
 0x7f1   :  { %v3625_v27 = vsel %vm949_vm2, %v11390_v24, 0.0 }
 0x7f5   :  { %v4998_v44 = vpop.f32.mrf.mxu1 }
 0x7fa   :  { %3620 = vadd.xlane.f32.xlu0 %v3619_v51 }
 0x7ff   :  { %v3609_v33 = vpop.xlane.xlu0 %3608 }
 0x802   :  { %3164 = vmax.xlane.f32.xlu0 %v3163_v62 }
 0x804   :  { %3167 = vmax.xlane.f32.xlu2 %v3166_v32 }
 0x807   :  { %v3150_v18 = vpop.xlane.xlu0 %3149 }
 0x808   :  { %v3612_v8 = vpop.xlane.xlu1 %3611 }
 0x809   :  { %7734 = vrcp.f32 %v3612_v8  ;;  %5252 = vrot.lane.b32.xlu1 %v12966_v53, %s7847_s27 }
 0x80a   :  { %3626 = vadd.xlane.f32.xlu0 %v3625_v27  ;;  %7736 = vrcp.f32 %v3609_v33 }
 0x80e   :  { %v11396_v47 = vpop.f32.mrf.mxu2 }
 0x80f   :  { %v3606_v44 = vpop.xlane.xlu0 %3605  ;;  %v7735_v45 = vpop.eup %7734 }
 0x810   :  { %v11398_v51 = vpop.f32.mrf.mxu0  ;;  %v3808_v63 = vmul.f32 %v7735_v45, %v11267_v19  ;;  %v3603_v37 = vpop.xlane.xlu1 %3602 }
 0x811   :  { %v7737_v13 = vpop.eup %7736 }
 0x812   :  { %v3888_v62 = vpack.c.bf16 %v3808_v63, %v3808_v63  ;;  %v3254_v63 = vsub.f32 %v11263_v28, %v3150_v18  ;;  %v3807_v27 = vmul.f32 %v7737_v13, %v11245_v0 }
 0x814   :  { %7023 = vmatmul.msk.bf16.vlgmr.msra.gmra.mxu3 %vm949_vm2, %v3888_v62  ;;  %v3887_v18 = vpack.c.bf16 %v3807_v27, %v3807_v27 }
 0x816   :  { %v5019_v32 = vpop.f32.mrf.mxu2 }
 0x817   :  { %v11404_v8 = vpop.xlane.xlu0 %3152 }
 0x818   :  { %v4977_v2 = vpop.f32.mrf.mxu0 }
 0x819   :  { %v3401_v2 = vmul.f32 1.442695, %v3254_v63 }
 0x81a   :  { %v11406_v53 = vpop.f32.mrf.mxu3 }
 0x81e   :  { %5294 = vrot.lane.b32.xlu0 %v12967_v35, %s7847_s27 }
 0x81f   :  { %v3156_v19 = vpop.xlane.xlu0 %3155 }
 0x820   :  { %v3256_v45 = vsub.f32 %v11296_v6, %v3156_v19 }
 0x822   :  { %v3405_v62 = vmul.f32 1.442695, %v3256_v45  ;;  %v5040_v32 = vpop.f32.mrf.mxu3 }
 0x824   :  { %7738 = vpow2.f32 %v3405_v62 }
 0x825   :  { %7740 = vrcp.f32 %v3606_v44 }
 0x826   :  { %5315 = vrot.lane.b32.xlu0 %v12968_v4, %s7847_s27  ;;  %v3615_v7 = vpop.xlane.xlu2 %3614  ;;  %7742 = vrcp.f32 %v3603_v37  ;;  %v11430_v37 = vsel %vm9621_vm15, %v10419_v48, -1e+30 }
 0x827   :  { %7744 = vpow2.f32 %v3401_v2  ;;  %v3172_v2 = vsel %vm949_vm2, %v11430_v37, -inf }
 0x828   :  { %v5169_v35 = vpop.permute.xlu1 %5168 }
 0x829   :  { %v5174_v6 = vsel %vm3912_vm9, %v5169_v35, 0 }
 0x82a   :  { %v11417_v33 = vpop.eup %7738  ;;  %5183 = vmatpush.bf16.msrb.mxu2 %v5174_v6 }
 0x82b   :  { %v3634_v28 = vsel %vm949_vm2, %v11417_v33, 0.0  ;;  %v7741_v19 = vpop.eup %7740 }
 0x82c   :  { %3635 = vadd.xlane.f32.xlu2 %v3634_v28  ;;  %v7743_v0 = vpop.eup %7742  ;;  %v3806_v45 = vmul.f32 %v7741_v19, %v11276_v57 }
 0x82d   :  { %7022 = vmatmul.msk.bf16.vlgmr.msrb.gmra.mxu2 %vm949_vm2, %v3887_v18  ;;  %v11425_v13 = vpop.eup %7744  ;;  %v3805_v27 = vmul.f32 %v7743_v0, %v11279_v58  ;;  %v12969_v18 = vld [vmem:[#allocation52_spill] sm:$0xff] }
 0x82e   :  { %v3624_v4 = vpop.xlane.xlu2 %3623  ;;  %v11423_v44 = vpop.f32.mrf.mxu0  ;;  %v3628_v6 = vsel %vm949_vm2, %v11425_v13, 0.0  ;;  %v3886_v28 = vpack.c.bf16 %v3806_v45, %v3806_v45  ;;  %v11444_v19 = vsel %vm9621_vm15, %v12969_v18, -1e+30 }
 0x82f   :  { %7746 = vrcp.f32 %v3624_v4  ;;  %v3885_v48 = vpack.c.bf16 %v3805_v27, %v3805_v27  ;;  %v3169_v4 = vsel %vm949_vm2, %v11444_v19, -inf }
 0x830   :  { %v5148_v63 = vpop.permute.xlu1 %5147  ;;  %7748 = vrcp.f32 %v3615_v7 }
 0x831   :  { %v5153_v62 = vsel %vm3912_vm9, %v5148_v63, 0 }
 0x832   :  { %v5127_v32 = vpop.permute.xlu0 %5126  ;;  %5162 = vmatpush.bf16.msra.mxu1 %v5153_v62  ;;  %v3255_v62 = vsub.f32 %v11288_v50, %v11404_v8  ;;  %v12970_v8 = vld [vmem:[#allocation105_spill] sm:$0xff] }
 0x833   :  { %v5132_v35 = vsel %vm3912_vm9, %v5127_v32, 0  ;;  %3629 = vadd.xlane.f32.xlu1 %v3628_v6 }
 0x834   :  { %3173 = vmax.xlane.f32.xlu2 %v3172_v2  ;;  %5141 = vmatpush.bf16.msrb.mxu0 %v5132_v35  ;;  %v3403_v6 = vmul.f32 1.442695, %v3255_v62 }
 0x835   :  { %7021 = vmatmul.msk.bf16.vlgmr.msra.gmra.mxu1 %vm949_vm2, %v3886_v28  ;;  %v7747_v0 = vpop.eup %7746 }
 0x836   :  { %v3162_v57 = vpop.xlane.xlu2 %3161  ;;  %v5061_v58 = vpop.f32.mrf.mxu0  ;;  %v3812_v27 = vmul.f32 %v7747_v0, %v11311_v16  ;;  %7750 = vpow2.f32 %v3403_v6 }
 0x837   :  { %7020 = vmatmul.msk.bf16.vlgmr.msrb.gmra.mxu0 %vm949_vm2, %v3885_v48  ;;  %v7749_v2 = vpop.eup %7748  ;;  %v3258_v18 = vsub.f32 %v11320_v25, %v3162_v57 }
 0x838   :  { %v3892_v7 = vpack.c.bf16 %v3812_v27, %v3812_v27  ;;  %v3809_v28 = vmul.f32 %v7749_v2, %v11306_v54 }
 0x839   :  { %v3409_v0 = vmul.f32 1.442695, %v3258_v18  ;;  %v12980_v18 = vld [vmem:[#allocation51_spill] sm:$0xff] }
 0x83a   :  { %v5211_v63 = vpop.permute.xlu0 %5210  ;;  %v3889_v16 = vpack.c.bf16 %v3809_v28, %v3809_v28 }
 0x83b   :  { %v5216_v45 = vsel %vm3912_vm9, %v5211_v63, 0  ;;  %3170 = vmax.xlane.f32.xlu1 %v3169_v4  ;;  %v11468_v63 = vsel %vm9621_vm15, %v10432_v21, -1e+30  ;;  %7752 = vpow2.f32 %v3409_v0 }
 0x83c   :  { %5225 = vmatpush.bf16.msra.mxu0 %v5216_v45  ;;  %v11458_v50 = vpop.eup %7750  ;;  %v12971_v45 = vld [vmem:[#allocation99_spill] sm:$0xff]  ;;  %v3178_v25 = vsel %vm949_vm2, %v11468_v63, -inf }
 0x83d   :  { %v3631_v54 = vsel %vm949_vm2, %v11458_v50, 0.0 }
 0x83e   :  { %v5274_v32 = vpop.permute.xlu2 %5273 }
 0x83f   :  { %v5279_v35 = vsel %vm3912_vm9, %v5274_v32, 0 }
 0x840   :  { %5288 = vmatpush.bf16.msrb.mxu3 %v5279_v35 }
 0x841   :  { %v11480_v62 = vpop.eup %7752 }
 0x842   :  { %v5232_v48 = vpop.permute.xlu0 %5231  ;;  %v3640_v35 = vsel %vm949_vm2, %v11480_v62, 0.0 }
 0x843   :  { %v5237_v58 = vsel %vm3912_vm9, %v5232_v48, 0  ;;  %7027 = vmatmul.msk.bf16.vlgmr.msrb.gmra.mxu3 %vm949_vm2, %v3892_v7 }
 0x844   :  { %5246 = vmatpush.bf16.msrb.mxu1 %v5237_v58 }
 0x847   :  { %7024 = vmatmul.msk.bf16.vlgmr.msra.gmra.mxu0 %vm949_vm2, %v3889_v16 }
 0x84c   :  { %5357 = vrot.lane.b32.xlu2 %v12970_v8, %s7847_s27 }
 0x850   :  { %3632 = vadd.xlane.f32.xlu0 %v3631_v54 }
 0x854   :  { %v11470_v4 = vpop.f32.mrf.mxu2  ;;  %5336 = vrot.lane.b32.xlu1 %v12971_v45, %s7847_s27 }
 0x856   :  { %v11474_v27 = vpop.f32.mrf.mxu1 }
 0x858   :  { %3179 = vmax.xlane.f32.xlu0 %v3178_v25 }
 0x85b   :  { %v3618_v32 = vpop.xlane.xlu1 %3617 }
 0x85c   :  { %v5103_v21 = vpop.f32.mrf.mxu2  ;;  %7754 = vrcp.f32 %v3618_v32 }
 0x85e   :  { %v5082_v2 = vpop.f32.mrf.mxu1 }
 0x860   :  { %3641 = vadd.xlane.f32.xlu0 %v3640_v35 }
 0x862   :  { %v7755_v7 = vpop.eup %7754 }
 0x863   :  { %v3810_v6 = vmul.f32 %v7755_v7, %v11355_v41  ;;  %v3159_v28 = vpop.xlane.xlu1 %3158  ;;  %v12972_v41 = vld [vmem:[#allocation103_spill] sm:$0xff] }
 0x864   :  { %v3257_v48 = vsub.f32 %v11364_v42, %v3159_v28  ;;  %v11502_v28 = vsel %vm9621_vm15, %v10451_v9, -1e+30 }
 0x865   :  { %v3890_v58 = vpack.c.bf16 %v3810_v6, %v3810_v6  ;;  %v11486_v16 = vpop.f32.mrf.mxu3 }
 0x866   :  { %v3407_v8 = vmul.f32 1.442695, %v3257_v48 }
 0x867   :  { %7025 = vmatmul.msk.bf16.vlgmr.msrb.gmra.mxu1 %vm949_vm2, %v3890_v58 }
 0x868   :  { %7756 = vpow2.f32 %v3407_v8  ;;  %v12973_v8 = vld [vmem:[#allocation115_spill] sm:$0xff] }
 0x86d   :  { %v3621_v54 = vpop.xlane.xlu0 %3620  ;;  %v5124_v0 = vpop.f32.mrf.mxu3 }
 0x86e   :  { %v11491_v45 = vpop.eup %7756  ;;  %7758 = vrcp.f32 %v3621_v54 }
 0x86f   :  { %v3637_v42 = vsel %vm949_vm2, %v11491_v45, 0.0 }
 0x874   :  { %5378 = vrot.lane.b32.xlu0 %v12972_v41, %s7847_s27  ;;  %v7759_v2 = vpop.eup %7758 }
 0x875   :  { %3638 = vadd.xlane.f32.xlu2 %v3637_v42  ;;  %v3165_v25 = vpop.xlane.xlu0 %3164  ;;  %v3811_v48 = vmul.f32 %v7759_v2, %v11371_v15 }
 0x876   :  { %v3259_v32 = vsub.f32 %v11379_v59, %v3165_v25  ;;  %v11522_v25 = vsel %vm9621_vm15, %v10441_v14, -1e+30 }
 0x877   :  { %v3168_v21 = vpop.xlane.xlu2 %3167  ;;  %v3891_v54 = vpack.c.bf16 %v3811_v48, %v3811_v48 }
 0x878   :  { %v3260_v35 = vsub.f32 %v11384_v49, %v3168_v21  ;;  %v3411_v7 = vmul.f32 1.442695, %v3259_v32  ;;  %v3175_v49 = vsel %vm949_vm2, %v11502_v28, -inf  ;;  %v3184_v21 = vsel %vm949_vm2, %v11522_v25, -inf }
 0x87a   :  { %v3413_v6 = vmul.f32 1.442695, %v3260_v35 }
 0x87b   :  { %v5253_v58 = vpop.permute.xlu1 %5252 }
 0x87c   :  { %7760 = vpow2.f32 %v3413_v6  ;;  %5399 = vrot.lane.b32.xlu0 %v12973_v8, %s7847_s27  ;;  %v5258_v59 = vsel %vm3912_vm9, %v5253_v58, 0  ;;  %v12974_v8 = vld [vmem:[#allocation119_spill] sm:$0xff] }
 0x87d   :  { %7762 = vpow2.f32 %v3411_v7  ;;  %5267 = vmatpush.bf16.msra.mxu2 %v5258_v59  ;;  %v3627_v15 = vpop.xlane.xlu0 %3626 }
 0x87e   :  { %3176 = vmax.xlane.f32.xlu1 %v3175_v49  ;;  %7764 = vrcp.f32 %v3627_v15 }
 0x880   :  { %7026 = vmatmul.msk.bf16.vlgmr.msra.gmra.mxu2 %vm949_vm2, %v3891_v54 }
 0x882   :  { %v11511_v9 = vpop.eup %7760 }
 0x883   :  { %v11513_v0 = vpop.eup %7762  ;;  %v3646_v41 = vsel %vm949_vm2, %v11511_v9, 0.0 }
 0x884   :  { %3647 = vadd.xlane.f32.xlu2 %v3646_v41  ;;  %v3643_v42 = vsel %vm949_vm2, %v11513_v0, 0.0  ;;  %v7765_v32 = vpop.eup %7764 }
 0x885   :  { %v3813_v2 = vmul.f32 %v7765_v32, %v11390_v24  ;;  %v12975_v24 = vld [vmem:[#allocation20_spill] sm:$0xff]  ;;  %v12976_v32 = vld [vmem:[#allocation111_spill] sm:$0xff] }
 0x886   :  { %3644 = vadd.xlane.f32.xlu1 %v3643_v42  ;;  %v11537_v54 = vsel %vm9621_vm15, %v12975_v24, -1e+30  ;;  %vm13035_vm15 = vmmov %vm12641_vm0 }
 0x887   :  { %v3893_v6 = vpack.c.bf16 %v3813_v2, %v3813_v2  ;;  %v3181_v15 = vsel %vm949_vm2, %v11537_v54, -inf }
 0x88e   :  { %3185 = vmax.xlane.f32.xlu1 %v3184_v21 }
 0x890   :  { %v5295_v35 = vpop.permute.xlu0 %5294 }
 0x891   :  { %v5300_v7 = vsel %vm3912_vm9, %v5295_v35, 0 }
 0x892   :  { %5309 = vmatpush.bf16.msrb.mxu0 %v5300_v7 }
 0x895   :  { %7028 = vmatmul.msk.bf16.vlgmr.msrb.gmra.mxu0 %vm949_vm2, %v3893_v6 }
 0x897   :  { %v11529_v48 = vpop.f32.mrf.mxu3 }
 0x898   :  { %v5316_v58 = vpop.permute.xlu0 %5315 }
 0x899   :  { %v5321_v14 = vsel %vm3912_vm9, %v5316_v58, 0 }
 0x89a   :  { %5330 = vmatpush.bf16.msra.mxu1 %v5321_v14 }
 0x89c   :  { %5420 = vrot.lane.b32.xlu2 %v12974_v8, %s7847_s27 }
 0x89f   :  { %v3636_v59 = vpop.xlane.xlu2 %3635  ;;  %v5208_v49 = vpop.f32.mrf.mxu3 }
 0x8a0   :  { %7766 = vrcp.f32 %v3636_v59 }
 0x8a6   :  { %3182 = vmax.xlane.f32.xlu0 %v3181_v15  ;;  %v3630_v41 = vpop.xlane.xlu1 %3629  ;;  %v7767_v21 = vpop.eup %7766 }
 0x8a7   :  { %v3174_v42 = vpop.xlane.xlu2 %3173  ;;  %7768 = vrcp.f32 %v3630_v41  ;;  %5441 = vrot.lane.b32.xlu1 %v12976_v32, %s7847_s27  ;;  %v3816_v35 = vmul.f32 %v7767_v21, %v11417_v33  ;;  %v12977_v21 = vld [vmem:[#allocation56_spill] sm:$0xff] }
 0x8a9   :  { %v3896_v59 = vpack.c.bf16 %v3816_v35, %v3816_v35 }
 0x8ad   :  { %v7769_v2 = vpop.eup %7768 }
 0x8ae   :  { %v3814_v7 = vmul.f32 %v7769_v2, %v11425_v13  ;;  %v3171_v6 = vpop.xlane.xlu1 %3170 }
 0x8af   :  { %v5358_v43 = vpop.permute.xlu2 %5357  ;;  %v3261_v24 = vsub.f32 %v11444_v19, %v3171_v6  ;;  %v3262_v19 = vsub.f32 %v11430_v37, %v3174_v42 }
 0x8b0   :  { %v5363_v58 = vsel %vm3912_vm9, %v5358_v43, 0  ;;  %v3894_v14 = vpack.c.bf16 %v3814_v7, %v3814_v7  ;;  %v11546_v8 = vpop.f32.mrf.mxu2  ;;  %v12978_v43 = vld [vmem:[#allocation28_spill] sm:$0xff] }
 0x8b1   :  { %5372 = vmatpush.bf16.msra.mxu3 %v5363_v58  ;;  %v7295_v49 = vpack.i.bf16 %v11529_v48, %v11546_v8  ;;  %v3415_v41 = vmul.f32 1.442695, %v3261_v24  ;;  %v3417_v58 = vmul.f32 1.442695, %v3262_v19  ;;  %v12987_v48 = vpack.i.bf16 %v11162_v26, %v11122_v1 }
 0x8b2   :  { %v11551_v15 = vpop.f32.mrf.mxu1  ;;  %7029 = vmatmul.msk.bf16.vlgmr.msra.gmra.mxu1 %vm949_vm2, %v3894_v14  ;;  %v12989_v1 = vpack.i.bf16 %v11215_v38, %v11233_v23 }
 0x8b3   :  { %7770 = vpow2.f32 %v3415_v41 }
 0x8b4   :  { %7031 = vmatmul.msk.bf16.vlgmr.msra.gmra.mxu3 %vm949_vm2, %v3896_v59  ;;  %v11555_v33 = vpop.f32.mrf.mxu0 }
 0x8b8   :  { %v5187_v32 = vpop.f32.mrf.mxu2 }
 0x8b9   :  { %v11562_v7 = vpop.eup %7770 }
 0x8ba   :  { %5462 = vrot.lane.b32.xlu0 %v12977_v21, %s7847_s27  ;;  %v5166_v2 = vpop.f32.mrf.mxu1  ;;  %v3649_v14 = vsel %vm949_vm2, %v11562_v7, 0.0 }
 0x8bc   :  { %v5145_v35 = vpop.f32.mrf.mxu0 }
 0x8c2   :  { %5483 = vrot.lane.b32.xlu0 %v12978_v43, %s7847_s27 }
 0x8c3   :  { %v3633_v6 = vpop.xlane.xlu0 %3632 }
 0x8c4   :  { %7772 = vrcp.f32 %v3633_v6  ;;  %v11568_v59 = vpop.f32.mrf.mxu0 }
 0x8c5   :  { %3650 = vadd.xlane.f32.xlu2 %v3649_v14  ;;  %7774 = vpow2.f32 %v3417_v58 }
 0x8c6   :  { %v11570_v24 = vpop.f32.mrf.mxu3  ;;  %v5337_v41 = vpop.permute.xlu1 %5336 }
 0x8c7   :  { %v5342_v37 = vsel %vm3912_vm9, %v5337_v41, 0 }
 0x8c8   :  { %5351 = vmatpush.bf16.msrb.mxu2 %v5342_v37 }
 0x8ca   :  { %v7773_v42 = vpop.eup %7772 }
 0x8cb   :  { %v3815_v32 = vmul.f32 %v7773_v42, %v11458_v50  ;;  %v3180_v21 = vpop.xlane.xlu0 %3179  ;;  %v11575_v43 = vpop.eup %7774 }
 0x8cc   :  { %v3264_v2 = vsub.f32 %v11468_v63, %v3180_v21  ;;  %v5229_v19 = vpop.f32.mrf.mxu0  ;;  %v3652_v58 = vsel %vm949_vm2, %v11575_v43, 0.0 }
 0x8cd   :  { %v3895_v35 = vpack.c.bf16 %v3815_v32, %v3815_v32 }
 0x8ce   :  { %v3421_v6 = vmul.f32 1.442695, %v3264_v2  ;;  %v5292_v13 = vpop.f32.mrf.mxu3  ;;  %v12979_v2 = vld [vmem:[#allocation36_spill] sm:$0xff] }
 0x8cf   :  { %7030 = vmatmul.msk.bf16.vlgmr.msrb.gmra.mxu2 %vm949_vm2, %v3895_v35 }
 0x8d0   :  { %7776 = vpow2.f32 %v3421_v6 }
 0x8d1   :  { %3653 = vadd.xlane.f32.xlu1 %v3652_v58 }
 0x8d3   :  { %v3642_v63 = vpop.xlane.xlu0 %3641 }
 0x8d4   :  { %7778 = vrcp.f32 %v3642_v63 }
 0x8d6   :  { %v11580_v14 = vpop.eup %7776 }
 0x8d7   :  { %v3658_v50 = vsel %vm949_vm2, %v11580_v14, 0.0 }
 0x8d8   :  { %3659 = vadd.xlane.f32.xlu2 %v3658_v50 }
 0x8da   :  { %v7779_v21 = vpop.eup %7778 }
 0x8db   :  { %v3818_v35 = vmul.f32 %v7779_v21, %v11480_v62 }
 0x8e4   :  { %v11584_v41 = vpop.f32.mrf.mxu1 }
 0x8e5   :  { %v7310_v13 = vpack.i.bf16 %v11584_v41, %v11568_v59 }
 0x8e6   :  { %v5379_v37 = vpop.permute.xlu0 %5378 }
 0x8e7   :  { %v5384_v42 = vsel %vm3912_vm9, %v5379_v37, 0  ;;  %v3898_v37 = vpack.c.bf16 %v3818_v35, %v3818_v35 }
 0x8e8   :  { %v3639_v32 = vpop.xlane.xlu2 %3638  ;;  %5393 = vmatpush.bf16.msra.mxu0 %v5384_v42 }
 0x8e9   :  { %7780 = vrcp.f32 %v3639_v32 }
 0x8ea   :  { %5504 = vrot.lane.b32.xlu1 %v12979_v2, %s7847_s27 }
 0x8ec   :  { %v5250_v19 = vpop.f32.mrf.mxu1 }
 0x8ee   :  { %v5400_v6 = vpop.permute.xlu0 %5399 }
 0x8ef   :  { %v7781_v58 = vpop.eup %7780  ;;  %v5405_v50 = vsel %vm3912_vm9, %v5400_v6, 0 }
 0x8f0   :  { %v3817_v63 = vmul.f32 %v7781_v58, %v11491_v45  ;;  %5525 = vrot.lane.b32.xlu2 %v12980_v18, %s7847_s27  ;;  %5414 = vmatpush.bf16.msrb.mxu1 %v5405_v50 }
 0x8f1   :  { %v3177_v32 = vpop.xlane.xlu1 %3176 }
 0x8f2   :  { %v3897_v42 = vpack.c.bf16 %v3817_v63, %v3817_v63  ;;  %v3263_v57 = vsub.f32 %v11502_v28, %v3177_v32 }
 0x8f3   :  { %7033 = vmatmul.msk.bf16.vlgmr.msrb.gmra.mxu1 %vm949_vm2, %v3898_v37 }
 0x8f4   :  { %7032 = vmatmul.msk.bf16.vlgmr.msra.gmra.mxu0 %vm949_vm2, %v3897_v42  ;;  %v3419_v62 = vmul.f32 1.442695, %v3263_v57 }
 0x8f6   :  { %7782 = vpow2.f32 %v3419_v62  ;;  %v12981_v62 = vld [vmem:[#allocation73_spill] sm:$0xff] }
 0x8f7   :  { %v3648_v21 = vpop.xlane.xlu2 %3647 }
 0x8f9   :  { %v3645_v2 = vpop.xlane.xlu1 %3644 }
 0x8fa   :  { %7784 = vrcp.f32 %v3645_v2 }
 0x8fc   :  { %v11599_v19 = vpop.eup %7782 }
 0x8fd   :  { %v3655_v18 = vsel %vm949_vm2, %v11599_v19, 0.0 }
 0x8fe   :  { %3656 = vadd.xlane.f32.xlu0 %v3655_v18 }
 0x8ff   :  { %v5421_v45 = vpop.permute.xlu2 %5420 }
 0x900   :  { %v5426_v35 = vsel %vm3912_vm9, %v5421_v45, 0  ;;  %v7785_v6 = vpop.eup %7784 }
 0x901   :  { %5435 = vmatpush.bf16.msra.mxu2 %v5426_v35  ;;  %v3819_v28 = vmul.f32 %v7785_v6, %v11513_v0  ;;  %v3186_v50 = vpop.xlane.xlu1 %3185 }
 0x902   :  { %v3266_v63 = vsub.f32 %v11522_v25, %v3186_v50 }
 0x903   :  { %v3899_v58 = vpack.c.bf16 %v3819_v28, %v3819_v28  ;;  %v5269_v57 = vpop.f32.mrf.mxu2 }
 0x904   :  { %v3425_v37 = vmul.f32 1.442695, %v3266_v63 }
 0x905   :  { %7034 = vmatmul.msk.bf16.vlgmr.msra.gmra.mxu2 %vm949_vm2, %v3899_v58  ;;  %v12982_v58 = vld [vmem:[#allocation75_spill] sm:$0xff] }
 0x906   :  { %7786 = vpow2.f32 %v3425_v37 }
 0x907   :  { %7788 = vrcp.f32 %v3648_v21 }
 0x90b   :  { %v5271_v42 = vpop.f32.mrf.mxu2 }
 0x90c   :  { %v11609_v2 = vpop.eup %7786  ;;  %v12984_v42 = vpack.i.bf16 %v10779_v52, %v10806_v46 }
 0x90d   :  { %v7789_v18 = vpop.eup %7788  ;;  %v3664_v0 = vsel %vm949_vm2, %v11609_v2, 0.0 }
 0x90e   :  { %v3820_v45 = vmul.f32 %v7789_v18, %v11511_v9  ;;  %v12983_v9 = vpack.i.bf16 %v10716_v29, %v10696_v61  ;;  %v12985_v61 = vpack.i.bf16 %v11257_v12, %v11237_v30 }
 0x910   :  { %v3900_v63 = vpack.c.bf16 %v3820_v45, %v3820_v45 }
 0x912   :  { %v5311_v32 = vpop.f32.mrf.mxu0  ;;  %5546 = vrot.lane.b32.xlu0 %v12981_v62, %s7847_s27 }
 0x919   :  { %3665 = vadd.xlane.f32.xlu2 %v3664_v0  ;;  %v3183_v35 = vpop.xlane.xlu0 %3182  ;;  %v5442_v6 = vpop.permute.xlu1 %5441 }
 0x91a   :  { %v3265_v25 = vsub.f32 %v11537_v54, %v3183_v35  ;;  %v5313_v28 = vpop.f32.mrf.mxu0  ;;  %v5447_v21 = vsel %vm3912_vm9, %v5442_v6, 0  ;;  %5567 = vrot.lane.b32.xlu0 %v12982_v58, %s7847_s27  ;;  %v12986_v6 = vpack.i.bf16 %v10804_v31, %v10777_v3  ;;  %v12988_v3 = vpack.i.bf16 %v10910_v56, %v10926_v10  ;;  %v13001_v58 = vld [vmem:[#allocation89_spill] sm:$0xff] }
 0x91b   :  { %5456 = vmatpush.bf16.msrb.mxu3 %v5447_v21  ;;  %v12995_v28 = vpack.i.bf16 %v11366_v22, %v11398_v51  ;;  %v13003_v22 = vpack.i.bf16 %v11474_v27, %v11423_v44 }
 0x91c   :  { %v3423_v50 = vmul.f32 1.442695, %v3265_v25 }
 0x91e   :  { %7790 = vpow2.f32 %v3423_v50  ;;  %7035 = vmatmul.msk.bf16.vlgmr.msrb.gmra.mxu3 %vm949_vm2, %v3900_v63  ;;  %v13004_v63 = vld [vmem:[#allocation3_spill] sm:$0xff] }
 0x922   :  { %7286 = vrot.lane.b32.xlu0 %v12983_v9, %s7850_s30  ;;  %v13005_v9 = vld [vmem:[#allocation48_spill] sm:$0xff] }
 0x924   :  { %v11623_v37 = vpop.eup %7790 }
 0x925   :  { %v3661_v54 = vsel %vm949_vm2, %v11623_v37, 0.0 }
 0x926   :  { %3662 = vadd.xlane.f32.xlu1 %v3661_v54  ;;  %v13006_v54 = vpack.i.bf16 %v13004_v63, %v13005_v9 }
 0x92a   :  { %7301 = vrot.lane.b32.xlu0 %v12984_v42, %s7850_s30 }
 0x92c   :  { %v5463_v62 = vpop.permute.xlu0 %5462 }
 0x92d   :  { %v5468_v18 = vsel %vm3912_vm9, %v5463_v62, 0 }
 0x92e   :  { %5477 = vmatpush.bf16.msrb.mxu0 %v5468_v18 }
 0x92f   :  { %v5332_v0 = vpop.f32.mrf.mxu1 }
 0x930   :  { %v7340_v26 = vpack.i.bf16 %v5332_v0, %v5311_v32 }
 0x931   :  { %7296 = vrot.lane.b32.xlu2 %v7295_v49, %s7851_s8  ;;  %v7325_v49 = vpack.i.bf16 %v11570_v24, %v5269_v57 }
 0x932   :  { %7306 = vrot.lane.b32.xlu0 %v12985_v61, %s7852_s9 }
 0x934   :  { %v5484_v29 = vpop.permute.xlu0 %5483 }
 0x935   :  { %v5489_v52 = vsel %vm3912_vm9, %v5484_v29, 0  ;;  %v13008_v29 = vpack.i.bf16 %v11551_v15, %v11555_v33 }
 0x936   :  { %5498 = vmatpush.bf16.msra.mxu1 %v5489_v52 }
 0x937   :  { %v5374_v46 = vpop.f32.mrf.mxu3  ;;  %v5334_v45 = vpop.f32.mrf.mxu1 }
 0x938   :  { %v3651_v35 = vpop.xlane.xlu2 %3650 }
 0x939   :  { %7316 = vrot.lane.b32.xlu2 %v12986_v6, %s7850_s30  ;;  %7792 = vrcp.f32 %v3651_v35  ;;  %v7113_v6 = vld [vmem:[%s12478_s2 + $0x8] sm:$0xff] }
 0x93a   :  { %7311 = vrot.lane.b32.xlu0 %v7310_v13, %s7851_s8  ;;  %v12991_v13 = vpack.i.bf16 %v11332_v40, %v11341_v39  ;;  %v12993_v40 = vpack.i.bf16 %v11303_v60, %v11326_v55  ;;  %v12996_v60 = vld [vmem:[#allocation33_spill] sm:$0xff]  ;;  %v12997_v55 = vld [vmem:[#allocation71_spill] sm:$0xff] }
 0x93b   :  { %v12998_v21 = vpack.i.bf16 %v12996_v60, %v12997_v55 }
 0x93f   :  { %v7793_v30 = vpop.eup %7792  ;;  %v5376_v12 = vpop.f32.mrf.mxu3  ;;  %7291 = vrot.lane.b32.xlu1 %v12987_v48, %s7852_s9 }
 0x940   :  { %v3821_v8 = vmul.f32 %v7793_v30, %v11562_v7  ;;  %v12990_v7 = vpack.i.bf16 %v10905_v11, %v10870_v34  ;;  %v12992_v34 = vpack.i.bf16 %v11019_v36, %v10998_v5  ;;  %v12994_v36 = vpack.i.bf16 %v10992_v17, %v10931_v20  ;;  %v13000_v17 = vld [vmem:[#allocation34_spill] sm:$0xff] }
 0x941   :  { %7331 = vrot.lane.b32.xlu2 %v12988_v3, %s7850_s30  ;;  %v12999_v20 = vpack.i.bf16 %v11406_v53, %v11396_v47  ;;  %v13002_v50 = vpack.i.bf16 %v13000_v17, %v13001_v58  ;;  %v13007_v53 = vpack.i.bf16 %v11486_v16, %v11470_v4  ;;  %v7112_v12 = vld [vmem:[%s12478_s2] sm:$0xff] }
 0x942   :  { %v3901_v31 = vpack.c.bf16 %v3821_v8, %v3821_v8  ;;  %7326 = vrot.lane.b32.xlu0 %v7325_v49, %s7851_s8  ;;  %v13012_v17 = vld [vmem:[#allocation102_spill] sm:$0xff] }
 0x944   :  { %7036 = vmatmul.msk.bf16.vlgmr.msrb.gmra.mxu0 %vm949_vm2, %v3901_v31  ;;  %v3654_v59 = vpop.xlane.xlu1 %3653 }
 0x945   :  { %7794 = vrcp.f32 %v3654_v59 }
 0x947   :  { %7321 = vrot.lane.b32.xlu1 %v12989_v1, %s7852_s9 }
 0x949   :  { %7346 = vrot.lane.b32.xlu2 %v12990_v7, %s7850_s30 }
 0x94a   :  { %7341 = vrot.lane.b32.xlu0 %v7340_v26, %s7851_s8 }
 0x94b   :  { %v3660_v56 = vpop.xlane.xlu2 %3659  ;;  %v7795_v10 = vpop.eup %7794 }
 0x94c   :  { %7796 = vrcp.f32 %v3660_v56  ;;  %v3822_v24 = vmul.f32 %v7795_v10, %v11575_v43 }
 0x94e   :  { %v3902_v41 = vpack.c.bf16 %v3822_v24, %v3822_v24 }
 0x94f   :  { %7336 = vrot.lane.b32.xlu1 %v12991_v13, %s7852_s9 }
 0x950   :  { %7037 = vmatmul.msk.bf16.vlgmr.msra.gmra.mxu1 %vm949_vm2, %v3902_v41 }
 0x951   :  { %7361 = vrot.lane.b32.xlu2 %v12992_v34, %s7850_s30 }
 0x952   :  { %v7797_v11 = vpop.eup %7796  ;;  %v5353_v38 = vpop.f32.mrf.mxu2 }
 0x953   :  { %v3824_v23 = vmul.f32 %v7797_v11, %v11580_v14  ;;  %v7355_v57 = vpack.i.bf16 %v5374_v46, %v5353_v38  ;;  %v5526_v32 = vpop.permute.xlu2 %5525 }
 0x954   :  { %v5531_v43 = vsel %vm3912_vm9, %v5526_v32, 0 }
 0x955   :  { %v3904_v25 = vpack.c.bf16 %v3824_v23, %v3824_v23  ;;  %7356 = vrot.lane.b32.xlu0 %v7355_v57, %s7851_s8  ;;  %5540 = vmatpush.bf16.msra.mxu3 %v5531_v43  ;;  %v13010_v57 = vld [vmem:[#allocation92_spill] sm:$0xff] }
 0x957   :  { %7351 = vrot.lane.b32.xlu1 %v12993_v40, %s7852_s9 }
 0x958   :  { %7039 = vmatmul.msk.bf16.vlgmr.msra.gmra.mxu3 %vm949_vm2, %v3904_v25 }
 0x959   :  { %7376 = vrot.lane.b32.xlu2 %v12994_v36, %s7850_s30 }
 0x95a   :  { %v5355_v5 = vpop.f32.mrf.mxu2 }
 0x95c   :  { %v5505_v39 = vpop.permute.xlu1 %5504 }
 0x95d   :  { %v5510_v14 = vsel %vm3912_vm9, %v5505_v39, 0 }
 0x95e   :  { %5519 = vmatpush.bf16.msrb.mxu2 %v5510_v14 }
 0x95f   :  { %7366 = vrot.lane.b32.xlu1 %v12995_v28, %s7852_s9 }
 0x961   :  { %7391 = vrot.lane.b32.xlu2 %v12998_v21, %s7850_s30 }
 0x962   :  { %5952 = vmatpush.bf16.msra.mxu2 %v7113_v6 }
 0x966   :  { %5953 = vmatpush.bf16.msra.mxu2 %v7112_v12 }
 0x967   :  { %7381 = vrot.lane.b32.xlu1 %v12999_v20, %s7852_s9 }
 0x969   :  { %7406 = vrot.lane.b32.xlu2 %v13002_v50, %s7850_s30  ;;  %v13013_v50 = vld [vmem:[#allocation91_spill] sm:$0xff] }
 0x96f   :  { %7396 = vrot.lane.b32.xlu1 %v13003_v22, %s7852_s9 }
 0x970   :  { %v5416_v51 = vpop.f32.mrf.mxu1 }
 0x971   :  { %7421 = vrot.lane.b32.xlu2 %v13006_v54, %s7850_s30  ;;  %v5395_v42 = vpop.f32.mrf.mxu0  ;;  %v3657_v47 = vpop.xlane.xlu0 %3656 }
 0x972   :  { %v7370_v62 = vpack.i.bf16 %v5416_v51, %v5395_v42  ;;  %7798 = vrcp.f32 %v3657_v47 }
 0x974   :  { %7371 = vrot.lane.b32.xlu0 %v7370_v62, %s7851_s8 }
 0x977   :  { %7411 = vrot.lane.b32.xlu1 %v13007_v53, %s7852_s9 }
 0x978   :  { %v5418_v18 = vpop.f32.mrf.mxu1  ;;  %v7799_v44 = vpop.eup %7798 }
 0x979   :  { %v5397_v27 = vpop.f32.mrf.mxu0  ;;  %v3823_v0 = vmul.f32 %v7799_v44, %v11599_v19 }
 0x97b   :  { %v3903_v61 = vpack.c.bf16 %v3823_v0, %v3823_v0 }
 0x97d   :  { %7038 = vmatmul.msk.bf16.vlgmr.msrb.gmra.mxu2 %vm949_vm2, %v3903_v61 }
 0x97f   :  { %7426 = vrot.lane.b32.xlu1 %v13008_v29, %s7852_s9 }
 0x984   :  { %v5547_v52 = vpop.permute.xlu0 %5546 }
 0x985   :  { %v5552_v46 = vsel %vm3912_vm9, %v5547_v52, 0 }
 0x986   :  { %5561 = vmatpush.bf16.msra.mxu0 %v5552_v46  ;;  %v13015_v46 = vld [vmem:[#allocation110_spill] sm:$0xff] }
 0x988   :  { %v5437_v45 = vpop.f32.mrf.mxu2 }
 0x98c   :  { %v3666_v4 = vpop.xlane.xlu2 %3665  ;;  %v5568_v16 = vpop.permute.xlu0 %5567 }
 0x98d   :  { %7800 = vrcp.f32 %v3666_v4  ;;  %v5573_v35 = vsel %vm3912_vm9, %v5568_v16, 0  ;;  %v13016_v4 = vld [vmem:[#allocation90_spill] sm:$0xff]  ;;  %vm13036_vm9 = vmmov %vm12641_vm0 }
 0x98e   :  { %5582 = vmatpush.bf16.msrb.mxu1 %v5573_v35 }
 0x990   :  { %v5439_v19 = vpop.f32.mrf.mxu2 }
 0x993   :  { %v7801_v30 = vpop.eup %7800 }
 0x994   :  { %v3826_v15 = vmul.f32 %v7801_v30, %v11609_v2  ;;  %v7287_v8 = vpop.permute.xlu0 %7286  ;;  %v7297_v10 = vpop.permute.xlu2 %7296 }
 0x995   :  { %v7289_v7 = vunpack.i.h.bf16 %v7287_v8  ;;  %v7288_v56 = vunpack.i.l.bf16 %v7287_v8  ;;  %v7299_v11 = vunpack.i.h.bf16 %v7297_v10  ;;  %v7298_v38 = vunpack.i.l.bf16 %v7297_v10 }
 0x996   :  { %v3906_v33 = vpack.c.bf16 %v3826_v15, %v3826_v15 }
 0x997   :  { %v5828_v32 = vsel %vm949_vm2, %v13010_v57, %v7288_v56  ;;  %v13018_v56 = vld [vmem:[#allocation126_spill] sm:$0xff] }
 0x998   :  { %7041 = vmatmul.msk.bf16.vlgmr.msrb.gmra.mxu1 %vm949_vm2, %v3906_v33 }
 0x999   :  { %v3663_v48 = vpop.xlane.xlu1 %3662 }
 0x99a   :  { %7802 = vrcp.f32 %v3663_v48 }
 0x99c   :  { %v7302_v2 = vpop.permute.xlu0 %7301  ;;  %v7317_v47 = vpop.permute.xlu2 %7316 }
 0x99d   :  { %v7304_v14 = vunpack.i.h.bf16 %v7302_v2  ;;  %v7303_v28 = vunpack.i.l.bf16 %v7302_v2  ;;  %v7319_v44 = vunpack.i.h.bf16 %v7317_v47  ;;  %v7318_v27 = vunpack.i.l.bf16 %v7317_v47 }
 0x99f   :  { %v5831_v58 = vsel %vm949_vm2, %v13012_v17, %v7304_v14  ;;  %v5830_v22 = vsel %vm949_vm2, %v13013_v50, %v7303_v28  ;;  %v5832_v16 = vsel %vm949_vm2, %v13016_v4, %v7318_v27  ;;  %v13021_v28 = vld [vmem:[#allocation113_spill] sm:$0xff] }
 0x9a0   :  { %v7803_v49 = vpop.eup %7802 }
 0x9a1   :  { %v3825_v3 = vmul.f32 %v7803_v49, %v11623_v37  ;;  %v5458_v31 = vpop.f32.mrf.mxu3  ;;  %v13009_v37 = vld [vmem:[#allocation64_spill] sm:$0xff] }
 0x9a2   :  { %v7385_v1 = vpack.i.bf16 %v5458_v31, %v5437_v45  ;;  %v5829_v23 = vsel %vm949_vm2, %v13009_v37, %v7289_v7  ;;  %v5833_v45 = vsel %vm949_vm2, %v13015_v46, %v7319_v44 }
 0x9a3   :  { %v3905_v59 = vpack.c.bf16 %v3825_v3, %v3825_v3 }
 0x9a4   :  { %7386 = vrot.lane.b32.xlu0 %v7385_v1, %s7851_s8  ;;  %v7307_v41 = vpop.permute.xlu0 %7306  ;;  %v7332_v49 = vpop.permute.xlu2 %7331 }
 0x9a5   :  { %7040 = vmatmul.msk.bf16.vlgmr.msra.gmra.mxu0 %vm949_vm2, %v3905_v59  ;;  %v7309_v60 = vunpack.i.h.bf16 %v7307_v41  ;;  %v7308_v55 = vunpack.i.l.bf16 %v7307_v41  ;;  %v7334_v31 = vunpack.i.h.bf16 %v7332_v49  ;;  %v7333_v59 = vunpack.i.l.bf16 %v7332_v49 }
 0x9a7   :  { %v5851_v63 = vsel %vm5848_vm14, %v5830_v22, %v7308_v55  ;;  %v5852_v9 = vsel %vm5848_vm14, %v5831_v58, %v7309_v60  ;;  %v5835_v10 = vsel %vm949_vm2, %v13018_v56, %v7334_v31  ;;  %v13022_v55 = vld [vmem:[#allocation11_spill] sm:$0xff] }
 0x9a9   :  { %v5460_v26 = vpop.f32.mrf.mxu3 }
 0x9ac   :  { %v7312_v39 = vpop.permute.xlu0 %7311 }
 0x9ad   :  { %v7314_v21 = vunpack.i.h.bf16 %v7312_v39  ;;  %v7313_v20 = vunpack.i.l.bf16 %v7312_v39 }
 0x9af   :  { %v5872_v54 = vsel %vm5869_vm12, %v5851_v63, %v7313_v20  ;;  %v5873_v42 = vsel %vm5869_vm12, %v5852_v9, %v7314_v21 }
 0x9b0   :  { %v5891_v62 = vpack.c.bf16 %v5873_v42, %v5872_v54 }
 0x9b1   :  { %v7292_v24 = vpop.permute.xlu1 %7291 }
 0x9b2   :  { %v7294_v13 = vunpack.i.h.bf16 %v7292_v24  ;;  %v7293_v34 = vunpack.i.l.bf16 %v7292_v24  ;;  %v13019_v24 = vld [vmem:[#allocation96_spill] sm:$0xff] }
 0x9b3   :  { %v5834_v41 = vsel %vm949_vm2, %v13019_v24, %v7333_v59  ;;  %v13026_v59 = vld [vmem:[#allocation117_spill] sm:$0xff] }
 0x9b4   :  { %v5849_v43 = vsel %vm5848_vm14, %v5828_v32, %v7293_v34  ;;  %v5850_v25 = vsel %vm5848_vm14, %v5829_v23, %v7294_v13  ;;  %v7327_v29 = vpop.permute.xlu0 %7326 }
 0x9b5   :  { %v5870_v40 = vsel %vm5869_vm12, %v5849_v43, %v7298_v38  ;;  %v5871_v36 = vsel %vm5869_vm12, %v5850_v25, %v7299_v11  ;;  %v7329_v30 = vunpack.i.h.bf16 %v7327_v29  ;;  %v7328_v15 = vunpack.i.l.bf16 %v7327_v29  ;;  %v7347_v43 = vpop.permute.xlu2 %7346  ;;  %v13025_v29 = vld [vmem:[#allocation118_spill] sm:$0xff] }
 0x9b6   :  { %v5890_v5 = vpack.c.bf16 %v5871_v36, %v5870_v40  ;;  %v7349_v40 = vunpack.i.h.bf16 %v7347_v43  ;;  %v7348_v36 = vunpack.i.l.bf16 %v7347_v43 }
 0x9b8   :  { %7050 = vmatmul.msk.bf16.vlgmr.msra.gmra.mxu2 %vm13011_vm4, %v5890_v5  ;;  %v5837_v60 = vsel %vm949_vm2, %v13021_v28, %v7349_v40  ;;  %v5836_v21 = vsel %vm949_vm2, %v13022_v55, %v7348_v36  ;;  %vm13037_vm4 = vmmov %vm12641_vm0 }
 0x9b9   :  { %v7322_v53 = vpop.permute.xlu1 %7321 }
 0x9ba   :  { %v7324_v0 = vunpack.i.h.bf16 %v7322_v53  ;;  %v7323_v61 = vunpack.i.l.bf16 %v7322_v53 }
 0x9bc   :  { %v5854_v19 = vsel %vm5848_vm14, %v5833_v45, %v7324_v0  ;;  %v5853_v6 = vsel %vm5848_vm14, %v5832_v16, %v7323_v61  ;;  %v7342_v7 = vpop.permute.xlu0 %7341  ;;  %v13024_v0 = vld [vmem:[#allocation123_spill] sm:$0xff] }
 0x9bd   :  { %v5874_v33 = vsel %vm5869_vm12, %v5853_v6, %v7328_v15  ;;  %v5875_v12 = vsel %vm5869_vm12, %v5854_v19, %v7329_v30  ;;  %v7344_v11 = vunpack.i.h.bf16 %v7342_v7  ;;  %v7343_v38 = vunpack.i.l.bf16 %v7342_v7  ;;  %v7362_v9 = vpop.permute.xlu2 %7361 }
 0x9be   :  { %v5892_v8 = vpack.c.bf16 %v5875_v12, %v5874_v33  ;;  %v7363_v47 = vunpack.i.l.bf16 %v7362_v9 }
 0x9c1   :  { %v5479_v51 = vpop.f32.mrf.mxu0  ;;  %v7337_v3 = vpop.permute.xlu1 %7336 }
 0x9c2   :  { %v7339_v2 = vunpack.i.h.bf16 %v7337_v3  ;;  %v7338_v26 = vunpack.i.l.bf16 %v7337_v3 }
 0x9c4   :  { %v5856_v13 = vsel %vm5848_vm14, %v5835_v10, %v7339_v2  ;;  %v5855_v34 = vsel %vm5848_vm14, %v5834_v41, %v7338_v26  ;;  %v13027_v2 = vld [vmem:[#allocation9_spill] sm:$0xff] }
 0x9c5   :  { %v5876_v23 = vsel %vm5869_vm12, %v5855_v34, %v7343_v38  ;;  %v5877_v57 = vsel %vm5869_vm12, %v5856_v13, %v7344_v11  ;;  %v7377_v15 = vpop.permute.xlu2 %7376 }
 0x9c6   :  { %v5893_v32 = vpack.c.bf16 %v5877_v57, %v5876_v23  ;;  %v7379_v12 = vunpack.i.h.bf16 %v7377_v15  ;;  %v6005_v57 = vld [vmem:[%s12475_s0] sm:$0xff] }
 0x9c7   :  { %v7357_v14 = vpop.permute.xlu0 %7356 }
 0x9c8   :  { %7051 = vmatmul.msk.bf16.gmra.mxu2 %vm13014_vm6, %v5891_v62  ;;  %v7359_v58 = vunpack.i.h.bf16 %v7357_v14  ;;  %v7358_v50 = vunpack.i.l.bf16 %v7357_v14  ;;  %v7364_v62 = vunpack.i.h.bf16 %v7362_v9  ;;  %vm13038_vm6 = vmmov %vm12641_vm0 }
 0x9c9   :  { %v5481_v18 = vpop.f32.mrf.mxu0  ;;  %v7352_v25 = vpop.permute.xlu1 %7351 }
 0x9ca   :  { %v7354_v5 = vunpack.i.h.bf16 %v7352_v25  ;;  %v7353_v39 = vunpack.i.l.bf16 %v7352_v25  ;;  %v5839_v61 = vsel %vm949_vm2, %v13024_v0, %v7364_v62  ;;  %v6007_v0 = vld [vmem:[%s12475_s0 + $0x10] sm:$0xff] }
 0x9cc   :  { %v5858_v20 = vsel %vm5848_vm14, %v5837_v60, %v7354_v5  ;;  %v5857_v17 = vsel %vm5848_vm14, %v5836_v21, %v7353_v39  ;;  %v6006_v21 = vld [vmem:[%s12475_s0 + $0x8] sm:$0xff] }
 0x9cd   :  { %v5500_v52 = vpop.f32.mrf.mxu1  ;;  %v5878_v22 = vsel %vm5869_vm12, %v5857_v17, %v7358_v50  ;;  %v7392_v25 = vpop.permute.xlu2 %7391 }
 0x9ce   :  { %v7400_v35 = vpack.i.bf16 %v5500_v52, %v5479_v51  ;;  %v5879_v51 = vsel %vm5869_vm12, %v5858_v20, %v7359_v58  ;;  %v5838_v52 = vsel %vm949_vm2, %v13025_v29, %v7363_v47  ;;  %v7394_v39 = vunpack.i.h.bf16 %v7392_v25  ;;  %v13030_v20 = vld [vmem:[#allocation30_spill] sm:$0xff] }
 0x9cf   :  { %v5894_v63 = vpack.c.bf16 %v5879_v51, %v5878_v22  ;;  %v7393_v14 = vunpack.i.l.bf16 %v7392_v25  ;;  %v13031_v22 = vld [vmem:[#allocation109_spill] sm:$0xff] }
 0x9d0   :  { %7401 = vrot.lane.b32.xlu0 %v7400_v35, %s7851_s8  ;;  %v5843_v17 = vsel %vm949_vm2, %v13030_v20, %v7394_v39 }
 0x9d1   :  { %v7367_v54 = vpop.permute.xlu1 %7366  ;;  %v5842_v51 = vsel %vm949_vm2, %v13031_v22, %v7393_v14  ;;  %v13042_v22 = vld [vmem:[#allocation45_spill] sm:$0xff] }
 0x9d2   :  { %v7369_v53 = vunpack.i.h.bf16 %v7367_v54  ;;  %v7368_v18 = vunpack.i.l.bf16 %v7367_v54 }
 0x9d4   :  { %v5860_v45 = vsel %vm5848_vm14, %v5839_v61, %v7369_v53  ;;  %v5859_v4 = vsel %vm5848_vm14, %v5838_v52, %v7368_v18 }
 0x9d5   :  { %v5502_v48 = vpop.f32.mrf.mxu1 }
 0x9d6   :  { %v7378_v48 = vunpack.i.l.bf16 %v7377_v15 }
 0x9d8   :  { %7052 = vmatmul.msk.bf16.gmra.mxu2 %vm13017_vm7, %v5892_v8  ;;  %v5840_v26 = vsel %vm949_vm2, %v13027_v2, %v7378_v48  ;;  %v6010_v48 = vld [vmem:[%s12475_s0 + $0x28] sm:$0xff]  ;;  %vm13041_vm7 = vmmov %vm12641_vm0 }
 0x9d9   :  { %v7382_v33 = vpop.permute.xlu1 %7381 }
 0x9da   :  { %v7384_v8 = vunpack.i.h.bf16 %v7382_v33  ;;  %v7383_v49 = vunpack.i.l.bf16 %v7382_v33 }
 0x9db   :  { %v5542_v1 = vpop.f32.mrf.mxu3 }
 0x9dc   :  { %v5861_v24 = vsel %vm5848_vm14, %v5840_v26, %v7383_v49 }
 0x9e1   :  { %v7397_v36 = vpop.permute.xlu1 %7396 }
 0x9e2   :  { %v7399_v60 = vunpack.i.h.bf16 %v7397_v36  ;;  %v7398_v55 = vunpack.i.l.bf16 %v7397_v36 }
 0x9e3   :  { %v5544_v37 = vpop.f32.mrf.mxu3 }
 0x9e4   :  { %v5863_v62 = vsel %vm5848_vm14, %v5842_v51, %v7398_v55 }
 0x9e6   :  { %v7372_v42 = vpop.permute.xlu0 %7371 }
 0x9e7   :  { %v7374_v44 = vunpack.i.h.bf16 %v7372_v42  ;;  %v7373_v27 = vunpack.i.l.bf16 %v7372_v42  ;;  %v5864_v42 = vsel %vm5848_vm14, %v5843_v17, %v7399_v60 }
 0x9e8   :  { %7053 = vmatmul.msk.bf16.gmra.mxu2 %vm13020_vm10, %v5893_v32  ;;  %v11813_v32 = vld [vmem:[%s12476_s5] ss:$0 sm:$0xff]  ;;  %vm13044_vm10 = vmmov %vm12641_vm0 }
 0x9e9   :  { %v5881_v35 = vsel %vm5869_vm12, %v5860_v45, %v7374_v44  ;;  %v5880_v19 = vsel %vm5869_vm12, %v5859_v4, %v7373_v27  ;;  %v6008_v45 = vld [vmem:[%s12475_s0 + $0x18] sm:$0xff] }
 0x9ea   :  { %v5895_v6 = vpack.c.bf16 %v5881_v35, %v5880_v19 }
 0x9f8   :  { %7054 = vmatmul.msk.bf16.gmra.mxu2 %vm13023_vm11, %v5894_v63  ;;  %vm13049_vm11 = vmmov %vm12641_vm0 }
 0xa00   :  { %v5521_v46 = vpop.f32.mrf.mxu2 }
 0xa01   :  { %v7415_v16 = vpack.i.bf16 %v5542_v1, %v5521_v46  ;;  %v5841_v1 = vsel %vm949_vm2, %v13026_v59, %v7379_v12  ;;  %v6011_v59 = vld [vmem:[%s12475_s0 + $0x30] sm:$0xff] }
 0xa02   :  { %v5862_v10 = vsel %vm5848_vm14, %v5841_v1, %v7384_v8 }
 0xa03   :  { %7416 = vrot.lane.b32.xlu0 %v7415_v16, %s7851_s8 }
 0xa08   :  { %7055 = vmatmul.msk.bf16.gmra.mxu2 %vm12641_vm0, %v5895_v6  ;;  %v5523_v30 = vpop.f32.mrf.mxu2  ;;  %v6009_v6 = vld [vmem:[%s12475_s0 + $0x20] sm:$0xff] }
 0xa15   :  { %v5584_v3 = vpop.f32.mrf.mxu1 }
 0xa16   :  { %v7387_v31 = vpop.permute.xlu0 %7386 }
 0xa17   :  { %v7389_v7 = vunpack.i.h.bf16 %v7387_v31  ;;  %v7388_v56 = vunpack.i.l.bf16 %v7387_v31 }
 0xa19   :  { %v5883_v41 = vsel %vm5869_vm12, %v5862_v10, %v7389_v7  ;;  %v5882_v13 = vsel %vm5869_vm12, %v5861_v24, %v7388_v56  ;;  %v7407_v7 = vpop.permute.xlu2 %7406  ;;  %v7412_v10 = vpop.permute.xlu1 %7411 }
 0xa1a   :  { %v5896_v34 = vpack.c.bf16 %v5883_v41, %v5882_v13  ;;  %v7409_v24 = vunpack.i.h.bf16 %v7407_v7  ;;  %v7408_v41 = vunpack.i.l.bf16 %v7407_v7  ;;  %v7414_v13 = vunpack.i.h.bf16 %v7412_v10 }
 0xa1c   :  { %7056 = vmatmul.msk.bf16.gmra.mxu2 %vm13028_vm3, %v5896_v34  ;;  %v7413_v34 = vunpack.i.l.bf16 %v7412_v10  ;;  %vm13050_vm3 = vmmov %vm12641_vm0 }
 0xa1d   :  { %v5586_v11 = vpop.f32.mrf.mxu1 }
 0xa21   :  { %v7422_v60 = vpop.permute.xlu2 %7421  ;;  %v7427_v55 = vpop.permute.xlu1 %7426 }
 0xa22   :  { %v5563_v38 = vpop.f32.mrf.mxu0  ;;  %v7423_v20 = vunpack.i.l.bf16 %v7422_v60  ;;  %v7429_v17 = vunpack.i.h.bf16 %v7427_v55 }
 0xa23   :  { %v7430_v37 = vpack.i.bf16 %v5584_v3, %v5563_v38  ;;  %v13039_v38 = vld [vmem:[#allocation24_spill] sm:$0xff] }
 0xa25   :  { %7431 = vrot.lane.b32.xlu0 %v7430_v37, %s7851_s8  ;;  %v5845_v37 = vsel %vm949_vm2, %v13039_v38, %v7409_v24 }
 0xa2a   :  { %v5565_v23 = vpop.f32.mrf.mxu0 }
 0xa2b   :  { %v13040_v23 = vld [vmem:[#allocation16_spill] sm:$0xff] }
 0xa3b   :  { %v5955_v43 = vpop.f32.mrf.mxu2 }
 0xa3c   :  { %v6025_v40 = vadd.f32 %v6005_v57, %v5955_v43  ;;  %v5844_v57 = vsel %vm949_vm2, %v13040_v23, %v7408_v41 }
 0xa3d   :  { %v5865_v36 = vsel %vm5848_vm14, %v5844_v57, %v7413_v34 }
 0xa3e   :  { %v11816_v5 = vadd.f32 %v11813_v32, %v6025_v40  ;;  %v5866_v40 = vsel %vm5848_vm14, %v5845_v37, %v7414_v13  ;;  %v6014_v13 = vld [vmem:[%s12475_s0 + $0x48] sm:$0xff] }
 0xa40   :  { %v6066_v28 = vsel %vm13029_vm1, %v11816_v5, 0.0  ;;  %vm13051_vm1 = vmmov %vm12641_vm0 }
 0xa41   :  { %6067 = vadd.xlane.f32.xlu2 %v6066_v28 }
 0xa42   :  { %v7402_v58 = vpop.permute.xlu0 %7401 }
 0xa43   :  { %v5957_v50 = vpop.f32.mrf.mxu2  ;;  %v7404_v63 = vunpack.i.h.bf16 %v7402_v58  ;;  %v7403_v9 = vunpack.i.l.bf16 %v7402_v58  ;;  %v7428_v58 = vunpack.i.l.bf16 %v7427_v55 }
 0xa44   :  { %v6026_v54 = vadd.f32 %v6006_v21, %v5957_v50  ;;  %v7424_v21 = vunpack.i.h.bf16 %v7422_v60 }
 0xa45   :  { %v5885_v47 = vsel %vm5869_vm12, %v5864_v42, %v7404_v63  ;;  %v5884_v53 = vsel %vm5869_vm12, %v5863_v62, %v7403_v9  ;;  %v13043_v63 = vld [vmem:[#allocation46_spill] sm:$0xff] }
 0xa46   :  { %v11832_v18 = vadd.f32 %v11813_v32, %v6026_v54  ;;  %v5897_v44 = vpack.c.bf16 %v5885_v47, %v5884_v53  ;;  %v5847_v51 = vsel %vm949_vm2, %v13042_v22, %v7424_v21  ;;  %v5846_v9 = vsel %vm949_vm2, %v13043_v63, %v7423_v20  ;;  %vm13046_vm2 = vmmov %vm12641_vm0 }
 0xa47   :  { %v5868_v62 = vsel %vm5848_vm14, %v5847_v51, %v7429_v17  ;;  %v5867_v47 = vsel %vm5848_vm14, %v5846_v9, %v7428_v58  ;;  %vm13047_vm14 = vmmov %vm12641_vm0 }
 0xa48   :  { %v6069_v27 = vsel %vm13032_vm5, %v11832_v18, 0.0  ;;  %7057 = vmatmul.msk.bf16.gmra.mxu2 %vm13033_vm13, %v5897_v44  ;;  %vm13052_vm5 = vmmov %vm12641_vm0 }
 0xa49   :  { %6070 = vadd.xlane.f32.xlu1 %v6069_v27  ;;  %vm13053_vm13 = vmmov %vm12641_vm0 }
 0xa4b   :  { %v5960_v61 = vpop.f32.mrf.mxu2 }
 0xa4c   :  { %v6027_v29 = vadd.f32 %v6007_v0, %v5960_v61 }
 0xa4e   :  { %v11841_v52 = vadd.f32 %v11813_v32, %v6027_v29  ;;  %v13045_v29 = vld [vmem:[#allocation2_spill] sm:$0xff] }
 0xa50   :  { %v6072_v46 = vsel %vm13034_vm8, %v11841_v52, 0.0  ;;  %vm13054_vm8 = vmmov %vm12641_vm0 }
 0xa51   :  { %6073 = vadd.xlane.f32.xlu0 %v6072_v46 }
 0xa53   :  { %v5962_v4 = vpop.f32.mrf.mxu2 }
 0xa54   :  { %v6028_v16 = vadd.f32 %v6008_v45, %v5962_v4  ;;  %v6012_v4 = vld [vmem:[%s12475_s0 + $0x38] sm:$0xff] }
 0xa56   :  { %v11849_v35 = vadd.f32 %v11813_v32, %v6028_v16 }
 0xa58   :  { %v6075_v19 = vsel %vm13035_vm15, %v11849_v35, 0.0  ;;  %vm13055_vm15 = vmmov %vm12641_vm0 }
 0xa59   :  { %6076 = vadd.xlane.f32.xlu2 %v6075_v19 }
 0xa5b   :  { %v5965_v30 = vpop.f32.mrf.mxu2 }
 0xa5c   :  { %v6029_v15 = vadd.f32 %v6009_v6, %v5965_v30 }
 0xa5e   :  { %v11857_v33 = vadd.f32 %v11813_v32, %v6029_v15 }
 0xa60   :  { %v6078_v12 = vsel %vm13036_vm9, %v11857_v33, 0.0  ;;  %vm13056_vm9 = vmmov %vm12641_vm0 }
 0xa61   :  { %6079 = vadd.xlane.f32.xlu1 %v6078_v12 }
 0xa63   :  { %v5967_v8 = vpop.f32.mrf.mxu2 }
 0xa64   :  { %v6030_v49 = vadd.f32 %v6010_v48, %v5967_v8 }
 0xa66   :  { %v11865_v3 = vadd.f32 %v11813_v32, %v6030_v49  ;;  %v6013_v49 = vld [vmem:[%s12475_s0 + $0x40] sm:$0xff] }
 0xa68   :  { %v6081_v31 = vsel %vm13037_vm4, %v11865_v3, 0.0  ;;  %vm13057_vm4 = vmmov %vm12641_vm0 }
 0xa69   :  { %6082 = vadd.xlane.f32.xlu0 %v6081_v31 }
 0xa6b   :  { %v5970_v1 = vpop.f32.mrf.mxu2 }
 0xa6c   :  { %v6031_v2 = vadd.f32 %v6011_v59, %v5970_v1 }
 0xa6e   :  { %v11873_v26 = vadd.f32 %v11813_v32, %v6031_v2 }
 0xa70   :  { %v6084_v56 = vsel %vm13038_vm6, %v11873_v26, 0.0  ;;  %vm13058_vm6 = vmmov %vm12641_vm0 }
 0xa71   :  { %6085 = vadd.xlane.f32.xlu0 %v6084_v56 }
 0xa73   :  { %v5972_v0 = vpop.f32.mrf.mxu2 }
 0xa74   :  { %v6032_v6 = vadd.f32 %v6012_v4, %v5972_v0 }
 0xa75   :  { %v7417_v11 = vpop.permute.xlu0 %7416 }
 0xa76   :  { %v7419_v43 = vunpack.i.h.bf16 %v7417_v11  ;;  %v7418_v25 = vunpack.i.l.bf16 %v7417_v11  ;;  %v11907_v48 = vadd.f32 %v11813_v32, %v6032_v6 }
 0xa78   :  { %v5887_v39 = vsel %vm5869_vm12, %v5866_v40, %v7419_v43  ;;  %v5886_v14 = vsel %vm5869_vm12, %v5865_v36, %v7418_v25  ;;  %v6015_v36 = vld [vmem:[%s12475_s0 + $0x50] sm:$0xff] }
 0xa79   :  { %v5898_v28 = vpack.c.bf16 %v5887_v39, %v5886_v14 }
 0xa7b   :  { %7058 = vmatmul.msk.bf16.gmra.mxu2 %vm13041_vm7, %v5898_v28  ;;  %v5975_v16 = vpop.f32.mrf.mxu2  ;;  %vm13059_vm7 = vmmov %vm12641_vm0 }
 0xa7c   :  { %v6033_v1 = vadd.f32 %v6013_v49, %v5975_v16 }
 0xa7e   :  { %v11922_v24 = vadd.f32 %v11813_v32, %v6033_v1 }
 0xa80   :  { %v6090_v37 = vsel %vm12641_vm0, %v11922_v24, 0.0 }
 0xa83   :  { %v5977_v59 = vpop.f32.mrf.mxu2 }
 0xa84   :  { %v6034_v11 = vadd.f32 %v6014_v13, %v5977_v59 }
 0xa86   :  { %v11937_v25 = vadd.f32 %v11813_v32, %v6034_v11 }
 0xa88   :  { %v6093_v60 = vsel %vm13051_vm1, %v11937_v25, 0.0 }
 0xa8b   :  { %v5980_v23 = vpop.f32.mrf.mxu2 }
 0xa8c   :  { %v6035_v14 = vadd.f32 %v6015_v36, %v5980_v23 }
 0xa8e   :  { %v11952_v17 = vadd.f32 %v11813_v32, %v6035_v14 }
 0xa90   :  { %v6096_v9 = vsel %vm13053_vm13, %v11952_v17, 0.0  ;;  %vm13065_vm13 = vmmov %vm13057_vm4 }
 0xa93   :  { %v5982_v20 = vpop.f32.mrf.mxu2 }
 0xa97   :  { %v7432_v50 = vpop.permute.xlu0 %7431 }
 0xa98   :  { %v7434_v54 = vunpack.i.h.bf16 %v7432_v50  ;;  %v7433_v42 = vunpack.i.l.bf16 %v7432_v50  ;;  %v6016_v50 = vld [vmem:[%s12475_s0 + $0x58] sm:$0xff] }
 0xa99   :  { %v6036_v51 = vadd.f32 %v6016_v50, %v5982_v20 }
 0xa9a   :  { %v5889_v53 = vsel %vm5869_vm12, %v5868_v62, %v7434_v54  ;;  %v5888_v44 = vsel %vm5869_vm12, %v5867_v47, %v7433_v42  ;;  %vm13048_vm12 = vmmov %vm12641_vm0 }
 0xa9b   :  { %v5899_v27 = vpack.c.bf16 %v5889_v53, %v5888_v44  ;;  %v6087_v7 = vsel %vm13048_vm12, %v11907_v48, 0.0  ;;  %v11967_v47 = vadd.f32 %v11813_v32, %v6036_v51  ;;  %v6017_v44 = vld [vmem:[%s12475_s0 + $0x60] sm:$0xff] }
 0xa9d   :  { %7059 = vmatmul.msk.bf16.gmra.mxu2 %vm13044_vm10, %v5899_v27  ;;  %vm13060_vm10 = vmmov %vm12641_vm0 }
 0xa9f   :  { %v5985_v62 = vpop.f32.mrf.mxu2 }
 0xaa0   :  { %v6037_v0 = vadd.f32 %v6017_v44, %v5985_v62 }
 0xab4   :  { %v6068_v61 = vpop.xlane.xlu2 %6067 }
 0xab5   :  { %v6126_v46 = vmul.f32 %v6068_v61, %v13045_v29 }
 0xab7   :  { %v11897_v45 = vsub.f32 %v11816_v5, %v6126_v46  ;;  %v6099_v46 = vsel %vm13055_vm15, %v11967_v47, 0.0 }
 0xab9   :  { %v6166_v19 = vmul.f32 %v11897_v45, %v11897_v45 }
 0xabb   :  { %v6186_v30 = vsel %vm13046_vm2, %v6166_v19, 0.0  ;;  %v11982_v19 = vadd.f32 %v11813_v32, %v6037_v0 }
 0xabc   :  { %v6071_v15 = vpop.xlane.xlu1 %6070  ;;  %6187 = vadd.xlane.f32.xlu2 %v6186_v30  ;;  %v5987_v30 = vpop.f32.mrf.mxu2 }
 0xabd   :  { %v6127_v12 = vmul.f32 %v6071_v15, %v13045_v29  ;;  %v6018_v15 = vld [vmem:[%s12475_s0 + $0x68] sm:$0xff]  ;;  %v6102_v59 = vsel %vm13057_vm4, %v11982_v19, 0.0 }
 0xabe   :  { %v6038_v49 = vadd.f32 %v6018_v15, %v5987_v30 }
 0xabf   :  { %v11910_v8 = vsub.f32 %v11832_v18, %v6127_v12 }
 0xac0   :  { %v11996_v1 = vadd.f32 %v11813_v32, %v6038_v49 }
 0xac1   :  { %v6167_v31 = vmul.f32 %v11910_v8, %v11910_v8 }
 0xac3   :  { %v6189_v2 = vsel %vm13047_vm14, %v6167_v31, 0.0 }
 0xac4   :  { %v6074_v56 = vpop.xlane.xlu0 %6073  ;;  %6190 = vadd.xlane.f32.xlu1 %v6189_v2  ;;  %6088 = vadd.xlane.f32.xlu2 %v6087_v7  ;;  %v6019_v7 = vld [vmem:[%s12475_s0 + $0x70] sm:$0xff] }
 0xac5   :  { %v6128_v10 = vmul.f32 %v6074_v56, %v13045_v29 }
 0xac7   :  { %v11925_v41 = vsub.f32 %v11841_v52, %v6128_v10  ;;  %v6105_v10 = vsel %vm13058_vm6, %v11996_v1, 0.0  ;;  %vm13068_vm6 = vmmov %vm13057_vm4 }
 0xac9   :  { %v6168_v34 = vmul.f32 %v11925_v41, %v11925_v41 }
 0xacb   :  { %v6192_v38 = vsel %vm13049_vm11, %v6168_v34, 0.0  ;;  %v5990_v2 = vpop.f32.mrf.mxu2  ;;  %vm13063_vm11 = vmmov %vm12641_vm0 }
 0xacc   :  { %v6077_v57 = vpop.xlane.xlu2 %6076  ;;  %6193 = vadd.xlane.f32.xlu1 %v6192_v38  ;;  %6091 = vadd.xlane.f32.xlu2 %v6090_v37  ;;  %v6039_v56 = vadd.f32 %v6019_v7, %v5990_v2 }
 0xacd   :  { %v6129_v43 = vmul.f32 %v6077_v57, %v13045_v29 }
 0xace   :  { %v12004_v13 = vadd.f32 %v11813_v32, %v6039_v56 }
 0xacf   :  { %v11940_v40 = vsub.f32 %v11849_v35, %v6129_v43 }
 0xad0   :  { %v6108_v34 = vsel %vm13059_vm7, %v12004_v13, 0.0  ;;  %vm13069_vm7 = vmmov %vm13057_vm4 }
 0xad1   :  { %v6169_v39 = vmul.f32 %v11940_v40, %v11940_v40 }
 0xad3   :  { %v6195_v28 = vsel %vm13050_vm3, %v6169_v39, 0.0  ;;  %v5992_v20 = vpop.f32.mrf.mxu2 }
 0xad4   :  { %v6080_v55 = vpop.xlane.xlu1 %6079  ;;  %6196 = vadd.xlane.f32.xlu0 %v6195_v28  ;;  %6094 = vadd.xlane.f32.xlu1 %v6093_v60 }
 0xad5   :  { %v6130_v21 = vmul.f32 %v6080_v55, %v13045_v29 }
 0xad7   :  { %v11955_v58 = vsub.f32 %v11857_v33, %v6130_v21 }
 0xad9   :  { %v6170_v22 = vmul.f32 %v11955_v58, %v11955_v58 }
 0xadb   :  { %v6198_v63 = vsel %vm13052_vm5, %v6170_v22, 0.0  ;;  %v7115_v22 = vld [vmem:[%s12479_s3 + $0x8] sm:$0xff]  ;;  %vm13064_vm5 = vmmov %vm13057_vm4 }
 0xadc   :  { %v6083_v54 = vpop.xlane.xlu0 %6082  ;;  %6199 = vadd.xlane.f32.xlu0 %v6198_v63  ;;  %6097 = vadd.xlane.f32.xlu1 %v6096_v9 }
 0xadd   :  { %v6131_v42 = vmul.f32 %v6083_v54, %v13045_v29  ;;  %6613 = vmatpush.bf16.msrb.mxu3 %v7115_v22 }
 0xadf   :  { %v11970_v53 = vsub.f32 %v11865_v3, %v6131_v42 }
 0xae1   :  { %v6171_v27 = vmul.f32 %v11970_v53, %v11970_v53 }
 0xae3   :  { %v6201_v61 = vsel %vm13054_vm8, %v6171_v27, 0.0 }
 0xae4   :  { %v6086_v4 = vpop.xlane.xlu0 %6085  ;;  %6202 = vadd.xlane.f32.xlu2 %v6201_v61  ;;  %6100 = vadd.xlane.f32.xlu0 %v6099_v46  ;;  %v6020_v61 = vld [vmem:[%s12475_s0 + $0x78] sm:$0xff] }
 0xae5   :  { %v6132_v16 = vmul.f32 %v6086_v4, %v13045_v29  ;;  %v6040_v15 = vadd.f32 %v6020_v61, %v5992_v20 }
 0xae7   :  { %v11985_v6 = vsub.f32 %v11873_v26, %v6132_v16 }
 0xae9   :  { %v6172_v12 = vmul.f32 %v11985_v6, %v11985_v6 }
 0xaeb   :  { %v6204_v31 = vsel %vm13056_vm9, %v6172_v12, 0.0 }
 0xaec   :  { %6205 = vadd.xlane.f32.xlu2 %v6204_v31  ;;  %6103 = vadd.xlane.f32.xlu0 %v6102_v59  ;;  %v7114_v59 = vld [vmem:[%s12479_s3] sm:$0xff] }
 0xaed   :  { %6614 = vmatpush.bf16.msrb.mxu3 %v7114_v59 }
 0xaf4   :  { %6106 = vadd.xlane.f32.xlu2 %v6105_v10 }
 0xafc   :  { %6109 = vadd.xlane.f32.xlu2 %v6108_v34 }
 0xafe   :  { %v5995_v12 = vpop.f32.mrf.mxu2 }
 0xb2f   :  { %v6188_v11 = vpop.xlane.xlu2 %6187 }
 0xb30   :  { %v6246_v38 = vmul.f32 %v6188_v11, %v13045_v29 }
 0xb32   :  { %v6266_v37 = vadd.f32 1e-05, %v6246_v38 }
 0xb34   :  { %7804 = vrsqrt.f32 %v6266_v37  ;;  %vm6292_vm14 = vweird.f32 %v6266_v37 }
 0xb37   :  { %v6191_v23 = vpop.xlane.xlu1 %6190  ;;  %v6089_v57 = vpop.xlane.xlu2 %6088 }
 0xb38   :  { %v6247_v43 = vmul.f32 %v6191_v23, %v13045_v29  ;;  %v6133_v36 = vmul.f32 %v6089_v57, %v13045_v29  ;;  %v12048_v23 = vadd.f32 %v11813_v32, %v6040_v15  ;;  %v6021_v57 = vld [vmem:[%s12475_s0 + $0x80] sm:$0xff] }
 0xb3a   :  { %v7805_v39 = vpop.eup %7804  ;;  %v6267_v14 = vadd.f32 1e-05, %v6247_v43  ;;  %v12012_v28 = vsub.f32 %v11907_v48, %v6133_v36  ;;  %v12056_v43 = vld [vmem:[%s12476_s5 + $0x3] ss:$0 sm:$0xff] }
 0xb3b   :  { %v6287_v60 = vmul.f32 %v7805_v39, %v6266_v37  ;;  %vm6293_vm2 = vweird.f32 %v7805_v39 }
 0xb3c   :  { %7806 = vrsqrt.f32 %v6267_v14  ;;  %v6173_v55 = vmul.f32 %v12012_v28, %v12012_v28  ;;  %vm12033_vm12 = vmor %vm6292_vm14, %vm6293_vm2  ;;  %vm6302_vm3 = vweird.f32 %v6267_v14 }
 0xb3d   :  { %v6288_v21 = vmul.f32 %v7805_v39, %v6287_v60 }
 0xb3e   :  { %v6207_v50 = vsel %vm13060_vm10, %v6173_v55, 0.0 }
 0xb3f   :  { %v6289_v51 = vmul.f32 0.5, %v6288_v21  ;;  %v6194_v63 = vpop.xlane.xlu1 %6193  ;;  %v6092_v9 = vpop.xlane.xlu2 %6091  ;;  %6208 = vadd.xlane.f32.xlu1 %v6207_v50  ;;  %v6041_v50 = vadd.f32 %v6021_v57, %v5995_v12  ;;  %v6022_v12 = vld [vmem:[%s12475_s0 + $0x88] sm:$0xff] }
 0xb40   :  { %v6248_v54 = vmul.f32 %v6194_v63, %v13045_v29  ;;  %v6134_v42 = vmul.f32 %v6092_v9, %v13045_v29 }
 0xb41   :  { %v6290_v62 = vsub.f32 1.5, %v6289_v51  ;;  %v12073_v51 = vld [vmem:[%s12476_s5 + $0x4] ss:$0 sm:$0xff] }
 0xb42   :  { %v7807_v44 = vpop.eup %7806  ;;  %v12022_v27 = vadd.f32 1e-05, %v6248_v54  ;;  %v12025_v0 = vsub.f32 %v11922_v24, %v6134_v42  ;;  %v6111_v54 = vsel %vm13065_vm13, %v12048_v23, 0.0  ;;  %vm13073_vm13 = vmmov %vm13057_vm4 }
 0xb43   :  { %v6291_v46 = vmul.f32 %v7805_v39, %v6290_v62  ;;  %v6297_v4 = vmul.f32 %v7807_v44, %v6267_v14  ;;  %vm6303_vm0 = vweird.f32 %v7807_v44 }
 0xb44   :  { %7808 = vrsqrt.f32 %v12022_v27  ;;  %v6174_v16 = vmul.f32 %v12025_v0, %v12025_v0  ;;  %vm6304_vm1 = vmor %vm6302_vm3, %vm6303_vm0  ;;  %vm6312_vm15 = vweird.f32 %v12022_v27 }
 0xb45   :  { %v6298_v30 = vmul.f32 %v7807_v44, %v6297_v4  ;;  %v6295_v2 = vsel %vm12033_vm12, %v7805_v39, %v6291_v46  ;;  %vm13070_vm12 = vmmov %vm13057_vm4 }
 0xb46   :  { %v6210_v31 = vsel %vm13063_vm11, %v6174_v16, 0.0  ;;  %v6486_v36 = vmul.f32 %v6295_v2, %v11897_v45  ;;  %v12084_v16 = vadd.f32 %v11813_v32, %v6041_v50  ;;  %vm13071_vm11 = vmmov %vm13057_vm4 }
 0xb47   :  { %v6299_v7 = vmul.f32 0.5, %v6298_v30  ;;  %v6197_v56 = vpop.xlane.xlu0 %6196  ;;  %v6095_v10 = vpop.xlane.xlu1 %6094  ;;  %6211 = vadd.xlane.f32.xlu1 %v6210_v31 }
 0xb48   :  { %v6249_v34 = vmul.f32 %v6197_v56, %v13045_v29  ;;  %v6135_v11 = vmul.f32 %v6095_v10, %v13045_v29  ;;  %v6507_v14 = vmul.f32 %v12056_v43, %v6486_v36 }
 0xb49   :  { %v6300_v38 = vsub.f32 1.5, %v6299_v7 }
 0xb4a   :  { %v12045_v37 = vpop.eup %7808  ;;  %v12059_v39 = vadd.f32 1e-05, %v6249_v34  ;;  %v12062_v60 = vsub.f32 %v11937_v25, %v6135_v11  ;;  %v6528_v49 = vadd.f32 %v12073_v51, %v6507_v14 }
 0xb4b   :  { %v6301_v55 = vmul.f32 %v7807_v44, %v6300_v38  ;;  %v6307_v21 = vmul.f32 %v12045_v37, %v12022_v27  ;;  %vm6313_vm8 = vweird.f32 %v12045_v37 }
 0xb4c   :  { %7810 = vrsqrt.f32 %v12059_v39  ;;  %v6175_v20 = vmul.f32 %v12062_v60, %v12062_v60  ;;  %vm12103_vm9 = vmor %vm6312_vm15, %vm6313_vm8  ;;  %vm6322_vm2 = vweird.f32 %v12059_v39 }
 0xb4d   :  { %v6305_v22 = vsel %vm6304_vm1, %v7807_v44, %v6301_v55  ;;  %v6308_v45 = vmul.f32 %v12045_v37, %v6307_v21  ;;  %v6114_v55 = vsel %vm13069_vm7, %v12084_v16, 0.0  ;;  %vm13074_vm8 = vmmov %vm13057_vm4 }
 0xb4e   :  { %v6487_v63 = vmul.f32 %v6305_v22, %v11910_v8  ;;  %v6213_v9 = vsel %vm13064_vm5, %v6175_v20, 0.0  ;;  %v5997_v8 = vpop.f32.mrf.mxu2  ;;  %vm13072_vm5 = vmmov %vm13057_vm4 }
 0xb4f   :  { %v6309_v42 = vmul.f32 0.5, %v6308_v45  ;;  %v6200_v62 = vpop.xlane.xlu0 %6199  ;;  %v6098_v61 = vpop.xlane.xlu1 %6097  ;;  %6214 = vadd.xlane.f32.xlu0 %v6213_v9  ;;  %6112 = vadd.xlane.f32.xlu1 %v6111_v54  ;;  %v6042_v11 = vadd.f32 %v6022_v12, %v5997_v8  ;;  %vm13076_vm7 = vmmov %vm13072_vm5 }
 0xb50   :  { %v6508_v44 = vmul.f32 %v12056_v43, %v6487_v63  ;;  %v6250_v46 = vmul.f32 %v6200_v62, %v13045_v29  ;;  %v6136_v4 = vmul.f32 %v6098_v61, %v13045_v29  ;;  %v6023_v61 = vld [vmem:[%s12475_s0 + $0x90] sm:$0xff] }
 0xb51   :  { %v6310_v30 = vsub.f32 1.5, %v6309_v42  ;;  %v12117_v14 = vadd.f32 %v11813_v32, %v6042_v11 }
 0xb52   :  { %v7811_v15 = vpop.eup %7810  ;;  %v6529_v31 = vadd.f32 %v12073_v51, %v6508_v44  ;;  %v12091_v59 = vadd.f32 1e-05, %v6250_v46  ;;  %v12094_v2 = vsub.f32 %v11952_v17, %v6136_v4 }
 0xb53   :  { %v6311_v7 = vmul.f32 %v12045_v37, %v6310_v30  ;;  %v6317_v56 = vmul.f32 %v7811_v15, %v12059_v39  ;;  %vm6323_vm10 = vweird.f32 %v7811_v15  ;;  %v6117_v30 = vsel %vm13070_vm12, %v12117_v14, 0.0 }
 0xb54   :  { %v6548_v10 = vpack.c.bf16 %v6529_v31, %v6528_v49  ;;  %7812 = vrsqrt.f32 %v12091_v59  ;;  %v6176_v34 = vmul.f32 %v12094_v2, %v12094_v2  ;;  %vm6324_vm14 = vmor %vm6322_vm2, %vm6323_vm10  ;;  %vm6332_vm3 = vweird.f32 %v12091_v59 }
 0xb55   :  { %v6318_v38 = vmul.f32 %v7811_v15, %v6317_v56  ;;  %v6315_v21 = vsel %vm12103_vm9, %v12045_v37, %v6311_v7  ;;  %vm13077_vm10 = vmmov %vm13072_vm5 }
 0xb56   :  { %7068 = vmatmul.msk.bf16.vlgmr.msrb.gmra.mxu3 %vm13057_vm4, %v6548_v10  ;;  %v6216_v36 = vsel %vm13068_vm6, %v6176_v34, 0.0  ;;  %v6000_v63 = vpop.f32.mrf.mxu2  ;;  %v6488_v42 = vmul.f32 %v6315_v21, %v11925_v41  ;;  %vm13075_vm6 = vmmov %vm13072_vm5 }
 0xb57   :  { %v6319_v20 = vmul.f32 0.5, %v6318_v38  ;;  %v6203_v50 = vpop.xlane.xlu2 %6202  ;;  %v6101_v22 = vpop.xlane.xlu0 %6100  ;;  %6217 = vadd.xlane.f32.xlu0 %v6216_v36  ;;  %6115 = vadd.xlane.f32.xlu1 %v6114_v55  ;;  %v6043_v12 = vadd.f32 %v6023_v61, %v6000_v63  ;;  %vm13078_vm2 = vmmov %vm13072_vm5 }
 0xb58   :  { %v6251_v27 = vmul.f32 %v6203_v50, %v13045_v29  ;;  %v6137_v45 = vmul.f32 %v6101_v22, %v13045_v29  ;;  %v6509_v7 = vmul.f32 %v12056_v43, %v6488_v42 }
 0xb59   :  { %v6320_v9 = vsub.f32 1.5, %v6319_v20  ;;  %v12138_v57 = vadd.f32 %v11813_v32, %v6043_v12  ;;  %v6024_v20 = vld [vmem:[%s12475_s0 + $0x98] sm:$0xff] }
 0xb5a   :  { %v7813_v54 = vpop.eup %7812  ;;  %v6271_v62 = vadd.f32 1e-05, %v6251_v27  ;;  %v12121_v37 = vsub.f32 %v11967_v47, %v6137_v45  ;;  %v6530_v36 = vadd.f32 %v12073_v51, %v6509_v7 }
 0xb5b   :  { %v6321_v44 = vmul.f32 %v7811_v15, %v6320_v9  ;;  %v6327_v46 = vmul.f32 %v7813_v54, %v12091_v59  ;;  %vm6333_vm0 = vweird.f32 %v7813_v54  ;;  %v6120_v61 = vsel %vm13074_vm8, %v12138_v57, 0.0 }
 0xb5c   :  { %7814 = vrsqrt.f32 %v6271_v62  ;;  %v6177_v4 = vmul.f32 %v12121_v37, %v12121_v37  ;;  %vm6334_vm1 = vmor %vm6332_vm3, %vm6333_vm0  ;;  %vm6342_vm9 = vweird.f32 %v6271_v62 }
 0xb5d   :  { %v6325_v8 = vsel %vm6324_vm14, %v7811_v15, %v6321_v44  ;;  %v6328_v41 = vmul.f32 %v7813_v54, %v6327_v46 }
 0xb5e   :  { %v6489_v49 = vmul.f32 %v6325_v8, %v11940_v40  ;;  %v6219_v31 = vsel %vm13071_vm11, %v6177_v4, 0.0  ;;  %v6002_v21 = vpop.f32.mrf.mxu2 }
 0xb5f   :  { %v6329_v39 = vmul.f32 0.5, %v6328_v41  ;;  %v6206_v56 = vpop.xlane.xlu2 %6205  ;;  %v6104_v10 = vpop.xlane.xlu0 %6103  ;;  %6220 = vadd.xlane.f32.xlu2 %v6219_v31  ;;  %6118 = vadd.xlane.f32.xlu0 %v6117_v30  ;;  %v6044_v9 = vadd.f32 %v6024_v20, %v6002_v21 }
 0xb60   :  { %v6138_v34 = vmul.f32 %v6104_v10, %v13045_v29  ;;  %v6510_v15 = vmul.f32 %v12056_v43, %v6489_v49  ;;  %v6252_v21 = vmul.f32 %v6206_v56, %v13045_v29 }
 0xb61   :  { %v6330_v11 = vsub.f32 1.5, %v6329_v39  ;;  %v12157_v59 = vadd.f32 %v11813_v32, %v6044_v9 }
 0xb62   :  { %v7815_v38 = vpop.eup %7814  ;;  %v12141_v40 = vsub.f32 %v11982_v19, %v6138_v34  ;;  %v6531_v55 = vadd.f32 %v12073_v51, %v6510_v15  ;;  %v6272_v20 = vadd.f32 1e-05, %v6252_v21 }
 0xb63   :  { %v6331_v50 = vmul.f32 %v7813_v54, %v6330_v11  ;;  %v6337_v22 = vmul.f32 %v7815_v38, %v6271_v62  ;;  %vm6343_vm15 = vweird.f32 %v7815_v38  ;;  %v6123_v32 = vsel %vm13076_vm7, %v12157_v59, 0.0 }
 0xb64   :  { %v6549_v27 = vpack.c.bf16 %v6531_v55, %v6530_v36  ;;  %v6178_v45 = vmul.f32 %v12141_v40, %v12141_v40  ;;  %vm6344_vm4 = vmor %vm6342_vm9, %vm6343_vm15  ;;  %7816 = vrsqrt.f32 %v6272_v20  ;;  %vm6352_vm12 = vweird.f32 %v6272_v20 }
 0xb65   :  { %v6338_v63 = vmul.f32 %v7815_v38, %v6337_v22  ;;  %v6335_v44 = vsel %vm6334_vm1, %v7813_v54, %v6331_v50  ;;  %vm13082_vm9 = vmmov %vm13078_vm2 }
 0xb66   :  { %7069 = vmatmul.msk.bf16.gmra.mxu3 %vm13072_vm5, %v6549_v27  ;;  %v6222_v42 = vsel %vm13073_vm13, %v6178_v45, 0.0  ;;  %v6490_v30 = vmul.f32 %v6335_v44, %v11955_v58  ;;  %vm13079_vm5 = vmmov %vm13078_vm2 }
 0xb67   :  { %v6339_v46 = vmul.f32 0.5, %v6338_v63  ;;  %v6107_v4 = vpop.xlane.xlu2 %6106  ;;  %6223 = vadd.xlane.f32.xlu2 %v6222_v42  ;;  %6121 = vadd.xlane.f32.xlu0 %v6120_v61  ;;  %v7123_v61 = vld [vmem:[%s12481_s4 + $0x38] sm:$0xff] }
 0xb68   :  { %v6139_v8 = vmul.f32 %v6107_v4, %v13045_v29  ;;  %v6511_v10 = vmul.f32 %v12056_v43, %v6490_v30  ;;  %6761 = vmatpush.bf16.msrb.mxu0 %v7123_v61 }
 0xb69   :  { %v6340_v41 = vsub.f32 1.5, %v6339_v46 }
 0xb6a   :  { %v12161_v12 = vsub.f32 %v11996_v1, %v6139_v8  ;;  %v6532_v11 = vadd.f32 %v12073_v51, %v6511_v10  ;;  %v7817_v50 = vpop.eup %7816 }
 0xb6b   :  { %v6341_v49 = vmul.f32 %v7815_v38, %v6340_v41  ;;  %v6347_v22 = vmul.f32 %v7817_v50, %v6272_v20  ;;  %vm6353_vm14 = vweird.f32 %v7817_v50 }
 0xb6c   :  { %v6179_v54 = vmul.f32 %v12161_v12, %v12161_v12  ;;  %vm6354_vm11 = vmor %vm6352_vm12, %vm6353_vm14 }
 0xb6d   :  { %v6345_v31 = vsel %vm6344_vm4, %v7815_v38, %v6341_v49  ;;  %v6348_v27 = vmul.f32 %v7817_v50, %v6347_v22  ;;  %vm13083_vm4 = vmmov %vm13078_vm2 }
 0xb6e   :  { %v6491_v7 = vmul.f32 %v6345_v31, %v11970_v53  ;;  %v6225_v39 = vsel %vm13075_vm6, %v6179_v54, 0.0  ;;  %v7122_v54 = vld [vmem:[%s12481_s4 + $0x30] sm:$0xff] }
 0xb6f   :  { %v6110_v58 = vpop.xlane.xlu2 %6109  ;;  %6226 = vadd.xlane.f32.xlu1 %v6225_v39  ;;  %6124 = vadd.xlane.f32.xlu2 %v6123_v32  ;;  %v6349_v42 = vmul.f32 0.5, %v6348_v27 }
 0xb70   :  { %v6140_v34 = vmul.f32 %v6110_v58, %v13045_v29  ;;  %v6512_v62 = vmul.f32 %v12056_v43, %v6491_v7  ;;  %6762 = vmatpush.bf16.msrb.mxu0 %v7122_v54 }
 0xb71   :  { %v6350_v44 = vsub.f32 1.5, %v6349_v42 }
 0xb72   :  { %v12173_v15 = vsub.f32 %v12004_v13, %v6140_v34  ;;  %v6533_v53 = vadd.f32 %v12073_v51, %v6512_v62  ;;  %v7121_v34 = vld [vmem:[%s12481_s4 + $0x28] sm:$0xff] }
 0xb73   :  { %v6351_v41 = vmul.f32 %v7817_v50, %v6350_v44 }
 0xb74   :  { %v6550_v38 = vpack.c.bf16 %v6533_v53, %v6532_v11  ;;  %v6180_v36 = vmul.f32 %v12173_v15, %v12173_v15  ;;  %6763 = vmatpush.bf16.msrb.mxu0 %v7121_v34 }
 0xb75   :  { %v6355_v31 = vsel %vm6354_vm11, %v7817_v50, %v6351_v41 }
 0xb76   :  { %7070 = vmatmul.msk.bf16.gmra.mxu3 %vm13077_vm10, %v6550_v38  ;;  %v6228_v55 = vsel %vm13078_vm2, %v6180_v36, 0.0  ;;  %v6492_v53 = vmul.f32 %v6355_v31, %v11985_v6 }
 0xb77   :  { %6229 = vadd.xlane.f32.xlu1 %v6228_v55 }
 0xb78   :  { %v6513_v6 = vmul.f32 %v12056_v43, %v6492_v53  ;;  %v7118_v53 = vld [vmem:[%s12481_s4 + $0x10] sm:$0xff] }
 0xb7a   :  { %v6534_v54 = vadd.f32 %v12073_v51, %v6513_v6 }
 0xbb2   :  { %v6209_v45 = vpop.xlane.xlu1 %6208 }
 0xbb3   :  { %v6253_v63 = vmul.f32 %v6209_v45, %v13045_v29 }
 0xbb5   :  { %v6273_v9 = vadd.f32 1e-05, %v6253_v63  ;;  %v7120_v63 = vld [vmem:[%s12481_s4 + $0x20] sm:$0xff] }
 0xbb6   :  { %6764 = vmatpush.bf16.msrb.mxu0 %v7120_v63 }
 0xbb7   :  { %7818 = vrsqrt.f32 %v6273_v9  ;;  %vm6362_vm3 = vweird.f32 %v6273_v9 }
 0xbba   :  { %v6212_v46 = vpop.xlane.xlu1 %6211 }
 0xbbb   :  { %v6254_v4 = vmul.f32 %v6212_v46, %v13045_v29 }
 0xbbd   :  { %v7819_v56 = vpop.eup %7818  ;;  %v6274_v8 = vadd.f32 1e-05, %v6254_v4 }
 0xbbe   :  { %v6357_v30 = vmul.f32 %v7819_v56, %v6273_v9  ;;  %vm6363_vm0 = vweird.f32 %v7819_v56 }
 0xbbf   :  { %7820 = vrsqrt.f32 %v6274_v8  ;;  %vm6364_vm1 = vmor %vm6362_vm3, %vm6363_vm0  ;;  %vm6372_vm8 = vweird.f32 %v6274_v8 }
 0xbc0   :  { %v6358_v49 = vmul.f32 %v7819_v56, %v6357_v30  ;;  %vm13086_vm0 = vmmov %vm13078_vm2 }
 0xbc1   :  { %vm13087_vm3 = vmmov %vm13086_vm0 }
 0xbc2   :  { %v6359_v7 = vmul.f32 0.5, %v6358_v49  ;;  %v6215_v39 = vpop.xlane.xlu0 %6214  ;;  %v6113_v32 = vpop.xlane.xlu1 %6112 }
 0xbc3   :  { %v6255_v10 = vmul.f32 %v6215_v39, %v13045_v29  ;;  %v6141_v58 = vmul.f32 %v6113_v32, %v13045_v29 }
 0xbc4   :  { %v6360_v62 = vsub.f32 1.5, %v6359_v7 }
 0xbc5   :  { %v7821_v11 = vpop.eup %7820  ;;  %v6275_v38 = vadd.f32 1e-05, %v6255_v10  ;;  %v12197_v36 = vsub.f32 %v12048_v23, %v6141_v58 }
 0xbc6   :  { %v6361_v55 = vmul.f32 %v7819_v56, %v6360_v62  ;;  %v6367_v21 = vmul.f32 %v7821_v11, %v6274_v8  ;;  %vm6373_vm13 = vweird.f32 %v7821_v11 }
 0xbc7   :  { %7822 = vrsqrt.f32 %v6275_v38  ;;  %v6181_v20 = vmul.f32 %v12197_v36, %v12197_v36  ;;  %vm12223_vm15 = vmor %vm6372_vm8, %vm6373_vm13  ;;  %vm6382_vm7 = vweird.f32 %v6275_v38 }
 0xbc8   :  { %v6365_v50 = vsel %vm6364_vm1, %v7819_v56, %v6361_v55  ;;  %v6368_v22 = vmul.f32 %v7821_v11, %v6367_v21  ;;  %vm13088_vm8 = vmmov %vm13086_vm0 }
 0xbc9   :  { %v6493_v27 = vmul.f32 %v6365_v50, %v12012_v28  ;;  %v6231_v45 = vsel %vm13079_vm5, %v6181_v20, 0.0  ;;  %v7119_v28 = vld [vmem:[%s12481_s4 + $0x18] sm:$0xff] }
 0xbca   :  { %v6369_v9 = vmul.f32 0.5, %v6368_v22  ;;  %v6218_v42 = vpop.xlane.xlu0 %6217  ;;  %v6116_v61 = vpop.xlane.xlu1 %6115  ;;  %6232 = vadd.xlane.f32.xlu0 %v6231_v45  ;;  %6765 = vmatpush.bf16.msrb.mxu0 %v7119_v28 }
 0xbcb   :  { %v6256_v44 = vmul.f32 %v6218_v42, %v13045_v29  ;;  %v6142_v46 = vmul.f32 %v6116_v61, %v13045_v29  ;;  %v6514_v4 = vmul.f32 %v12056_v43, %v6493_v27  ;;  %v7117_v27 = vld [vmem:[%s12481_s4 + $0x8] sm:$0xff] }
 0xbcc   :  { %v6370_v56 = vsub.f32 1.5, %v6369_v9 }
 0xbcd   :  { %v7823_v41 = vpop.eup %7822  ;;  %v12213_v30 = vadd.f32 1e-05, %v6256_v44  ;;  %v12216_v49 = vsub.f32 %v12084_v16, %v6142_v46  ;;  %v6535_v31 = vadd.f32 %v12073_v51, %v6514_v4 }
 0xbce   :  { %v6371_v7 = vmul.f32 %v7821_v11, %v6370_v56  ;;  %v6377_v39 = vmul.f32 %v7823_v41, %v6275_v38  ;;  %6766 = vmatpush.bf16.msrb.mxu0 %v7118_v53  ;;  %vm6383_vm6 = vweird.f32 %v7823_v41  ;;  %v7116_v38 = vld [vmem:[%s12481_s4] sm:$0xff] }
 0xbcf   :  { %7824 = vrsqrt.f32 %v12213_v30  ;;  %v6551_v32 = vpack.c.bf16 %v6535_v31, %v6534_v54  ;;  %v6182_v10 = vmul.f32 %v12216_v49, %v12216_v49  ;;  %vm6384_vm10 = vmor %vm6382_vm7, %vm6383_vm6  ;;  %vm6392_vm12 = vweird.f32 %v12213_v30 }
 0xbd0   :  { %v6378_v58 = vmul.f32 %v7823_v41, %v6377_v39  ;;  %v6375_v55 = vsel %vm12223_vm15, %v7821_v11, %v6371_v7  ;;  %vm13089_vm6 = vmmov %vm13086_vm0 }
 0xbd1   :  { %7071 = vmatmul.msk.bf16.gmra.mxu3 %vm13082_vm9, %v6551_v32  ;;  %v6234_v62 = vsel %vm13083_vm4, %v6182_v10, 0.0  ;;  %v6494_v63 = vmul.f32 %v6375_v55, %v12025_v0 }
 0xbd2   :  { %v6379_v21 = vmul.f32 0.5, %v6378_v58  ;;  %v6221_v20 = vpop.xlane.xlu2 %6220  ;;  %v6119_v50 = vpop.xlane.xlu0 %6118  ;;  %6235 = vadd.xlane.f32.xlu2 %v6234_v62  ;;  %6767 = vmatpush.bf16.msrb.mxu0 %v7117_v27  ;;  %v12261_v58 = vld [vmem:[%s12480_s6] ss:$0 sm:$0xff] }
 0xbd3   :  { %v6257_v8 = vmul.f32 %v6221_v20, %v13045_v29  ;;  %v6143_v22 = vmul.f32 %v6119_v50, %v13045_v29  ;;  %v6515_v54 = vmul.f32 %v12056_v43, %v6494_v63 }
 0xbd4   :  { %v6380_v45 = vsub.f32 1.5, %v6379_v21 }
 0xbd5   :  { %v7825_v6 = vpop.eup %7824  ;;  %v12240_v9 = vadd.f32 1e-05, %v6257_v8  ;;  %v12243_v11 = vsub.f32 %v12117_v14, %v6143_v22  ;;  %v6536_v55 = vadd.f32 %v12073_v51, %v6515_v54 }
 0xbd6   :  { %v6381_v42 = vmul.f32 %v7823_v41, %v6380_v45  ;;  %v6387_v61 = vmul.f32 %v7825_v6, %v12213_v30  ;;  %6768 = vmatpush.bf16.msrb.mxu0 %v7116_v38  ;;  %vm6393_vm14 = vweird.f32 %v7825_v6 }
 0xbd7   :  { %7826 = vrsqrt.f32 %v12240_v9  ;;  %v6183_v44 = vmul.f32 %v12243_v11, %v12243_v11  ;;  %vm12273_vm11 = vmor %vm6392_vm12, %vm6393_vm14  ;;  %vm6402_vm5 = vweird.f32 %v12240_v9 }
 0xbd8   :  { %v6385_v46 = vsel %vm6384_vm10, %v7823_v41, %v6381_v42  ;;  %v6388_v4 = vmul.f32 %v7825_v6, %v6387_v61  ;;  %vm13090_vm14 = vmmov %vm13086_vm0 }
 0xbd9   :  { %v6495_v0 = vmul.f32 %v6385_v46, %v12062_v60  ;;  %v6616_v28 = vpop.f32.mrf.mxu3  ;;  %v6237_v56 = vsel %vm13078_vm2, %v6183_v44, 0.0 }
 0xbda   :  { %v6389_v31 = vmul.f32 0.5, %v6388_v4  ;;  %v6224_v7 = vpop.xlane.xlu2 %6223  ;;  %6238 = vadd.xlane.f32.xlu1 %v6237_v56  ;;  %v6122_v39 = vpop.xlane.xlu0 %6121  ;;  %v6617_v45 = vadd.f32 %v12261_v58, %v6616_v28 }
 0xbdb   :  { %v6258_v32 = vmul.f32 %v6224_v7, %v13045_v29  ;;  %v6144_v41 = vmul.f32 %v6122_v39, %v13045_v29  ;;  %v6516_v10 = vmul.f32 %v12056_v43, %v6495_v0 }
 0xbdc   :  { %v6390_v60 = vsub.f32 1.5, %v6389_v31  ;;  %v6666_v38 = vmax.f32 %v6617_v45, 0.0 }
 0xbdd   :  { %v7827_v34 = vpop.eup %7826  ;;  %v6278_v62 = vadd.f32 1e-05, %v6258_v32  ;;  %v12264_v53 = vsub.f32 %v12138_v57, %v6144_v41  ;;  %v6537_v21 = vadd.f32 %v12073_v51, %v6516_v10 }
 0xbde   :  { %v6391_v20 = vmul.f32 %v7825_v6, %v6390_v60  ;;  %v6397_v50 = vmul.f32 %v7827_v34, %v12240_v9  ;;  %vm6403_vm1 = vweird.f32 %v7827_v34 }
 0xbdf   :  { %7828 = vrsqrt.f32 %v6278_v62  ;;  %v6552_v8 = vpack.c.bf16 %v6537_v21, %v6536_v55  ;;  %v6184_v22 = vmul.f32 %v12264_v53, %v12264_v53  ;;  %vm6404_vm13 = vmor %vm6402_vm5, %vm6403_vm1  ;;  %vm6412_vm9 = vweird.f32 %v6278_v62 }
 0xbe0   :  { %v6398_v27 = vmul.f32 %v7827_v34, %v6397_v50  ;;  %v6395_v44 = vsel %vm12273_vm11, %v7825_v6, %v6391_v20 }
 0xbe1   :  { %v6618_v42 = vpop.f32.mrf.mxu3  ;;  %7072 = vmatmul.msk.bf16.gmra.mxu3 %vm13086_vm0, %v6552_v8  ;;  %v6240_v61 = vsel %vm13087_vm3, %v6184_v22, 0.0  ;;  %v6496_v39 = vmul.f32 %v6395_v44, %v12094_v2 }
 0xbe2   :  { %v6399_v46 = vmul.f32 0.5, %v6398_v27  ;;  %v6619_v4 = vadd.f32 %v12261_v58, %v6618_v42  ;;  %v6227_v0 = vpop.xlane.xlu1 %6226  ;;  %6241 = vadd.xlane.f32.xlu0 %v6240_v61  ;;  %v6125_v30 = vpop.xlane.xlu2 %6124 }
 0xbe3   :  { %v6259_v28 = vmul.f32 %v6227_v0, %v13045_v29  ;;  %v6145_v56 = vmul.f32 %v6125_v30, %v13045_v29  ;;  %v6517_v22 = vmul.f32 %v12056_v43, %v6496_v39 }
 0xbe4   :  { %v6400_v54 = vsub.f32 1.5, %v6399_v46  ;;  %v6667_v31 = vmax.f32 %v6619_v4, 0.0 }
 0xbe5   :  { %v7829_v7 = vpop.eup %7828  ;;  %v6279_v32 = vadd.f32 1e-05, %v6259_v28  ;;  %v12286_v6 = vsub.f32 %v12157_v59, %v6145_v56  ;;  %v6538_v42 = vadd.f32 %v12073_v51, %v6517_v22 }
 0xbe6   :  { %v6401_v41 = vmul.f32 %v7827_v34, %v6400_v54  ;;  %v6407_v10 = vmul.f32 %v7829_v7, %v6278_v62  ;;  %v6686_v60 = vpack.c.bf16 %v6667_v31, %v6666_v38  ;;  %vm6413_vm15 = vweird.f32 %v7829_v7 }
 0xbe7   :  { %7830 = vrsqrt.f32 %v6279_v32  ;;  %v6185_v55 = vmul.f32 %v12286_v6, %v12286_v6  ;;  %vm6414_vm4 = vmor %vm6412_vm9, %vm6413_vm15  ;;  %vm6422_vm10 = vweird.f32 %v6279_v32 }
 0xbe8   :  { %v6405_v21 = vsel %vm6404_vm13, %v7827_v34, %v6401_v41  ;;  %v6408_v20 = vmul.f32 %v7829_v7, %v6407_v10  ;;  %6769 = vmatmul.bf16.vlgmr.msrb.gmra.mxu0 %v6686_v60  ;;  %vm13091_vm9 = vmmov %vm13089_vm6 }
 0xbe9   :  { %v6497_v50 = vmul.f32 %v6405_v21, %v12121_v37  ;;  %v6621_v2 = vpop.f32.mrf.mxu3  ;;  %v6243_v8 = vsel %vm13088_vm8, %v6185_v55, 0.0 }
 0xbea   :  { %v6409_v27 = vmul.f32 0.5, %v6408_v20  ;;  %6244 = vadd.xlane.f32.xlu2 %v6243_v8  ;;  %v6622_v4 = vadd.f32 %v12261_v58, %v6621_v2 }
 0xbeb   :  { %v6518_v9 = vmul.f32 %v12056_v43, %v6497_v50 }
 0xbec   :  { %v6410_v45 = vsub.f32 1.5, %v6409_v27  ;;  %v6668_v38 = vmax.f32 %v6622_v4, 0.0 }
 0xbed   :  { %v7831_v63 = vpop.eup %7830  ;;  %v6539_v61 = vadd.f32 %v12073_v51, %v6518_v9  ;;  %v6230_v9 = vpop.xlane.xlu1 %6229 }
 0xbee   :  { %v6411_v34 = vmul.f32 %v7829_v7, %v6410_v45  ;;  %v6417_v44 = vmul.f32 %v7831_v63, %v6279_v32  ;;  %vm6423_vm7 = vweird.f32 %v7831_v63  ;;  %v6260_v45 = vmul.f32 %v6230_v9, %v13045_v29 }
 0xbef   :  { %v6553_v46 = vpack.c.bf16 %v6539_v61, %v6538_v42  ;;  %vm6424_vm2 = vmor %vm6422_vm10, %vm6423_vm7 }
 0xbf0   :  { %v6418_v37 = vmul.f32 %v7831_v63, %v6417_v44  ;;  %v6415_v30 = vsel %vm6414_vm4, %v7829_v7, %v6411_v34 }
 0xbf1   :  { %v6623_v0 = vpop.f32.mrf.mxu3  ;;  %7073 = vmatmul.msk.bf16.gmra.mxu3 %vm13089_vm6, %v6553_v46  ;;  %v6498_v39 = vmul.f32 %v6415_v30, %v12141_v40 }
 0xbf2   :  { %v6419_v28 = vmul.f32 0.5, %v6418_v37  ;;  %v6624_v56 = vadd.f32 %v12261_v58, %v6623_v0 }
 0xbf3   :  { %v6519_v7 = vmul.f32 %v12056_v43, %v6498_v39 }
 0xbf4   :  { %v6420_v54 = vsub.f32 1.5, %v6419_v28  ;;  %v6669_v31 = vmax.f32 %v6624_v56, 0.0 }
 0xbf5   :  { %v6540_v20 = vadd.f32 %v12073_v51, %v6519_v7 }
 0xbf6   :  { %v6421_v41 = vmul.f32 %v7831_v63, %v6420_v54  ;;  %v6687_v62 = vpack.c.bf16 %v6669_v31, %v6668_v38 }
 0xbf8   :  { %v6425_v10 = vsel %vm6424_vm2, %v7831_v63, %v6421_v41  ;;  %6774 = vmatmul.bf16.gmra.mxu0 %v6687_v62  ;;  %v6280_v63 = vadd.f32 1e-05, %v6260_v45  ;;  %vm13092_vm2 = vmmov %vm13091_vm9 }
 0xbf9   :  { %v6499_v60 = vmul.f32 %v6425_v10, %v12161_v12  ;;  %v6626_v55 = vpop.f32.mrf.mxu3 }
 0xbfa   :  { %v6627_v40 = vadd.f32 %v12261_v58, %v6626_v55  ;;  %7832 = vrsqrt.f32 %v6280_v63  ;;  %vm6432_vm11 = vweird.f32 %v6280_v63 }
 0xbfb   :  { %v6520_v21 = vmul.f32 %v12056_v43, %v6499_v60 }
 0xbfc   :  { %v6670_v22 = vmax.f32 %v6627_v40, 0.0 }
 0xbfd   :  { %v6541_v50 = vadd.f32 %v12073_v51, %v6520_v21 }
 0xbff   :  { %v6554_v2 = vpack.c.bf16 %v6541_v50, %v6540_v20 }
 0xc00   :  { %v7833_v42 = vpop.eup %7832 }
 0xc01   :  { %v6628_v8 = vpop.f32.mrf.mxu3  ;;  %7074 = vmatmul.msk.bf16.gmra.mxu3 %vm13090_vm14, %v6554_v2  ;;  %v6427_v61 = vmul.f32 %v7833_v42, %v6280_v63  ;;  %vm6433_vm12 = vweird.f32 %v7833_v42 }
 0xc02   :  { %v6629_v32 = vadd.f32 %v12261_v58, %v6628_v8  ;;  %vm6434_vm0 = vmor %vm6432_vm11, %vm6433_vm12 }
 0xc03   :  { %v6428_v34 = vmul.f32 %v7833_v42, %v6427_v61  ;;  %vm13093_vm11 = vmmov %vm13092_vm2 }
 0xc04   :  { %v6671_v27 = vmax.f32 %v6629_v32, 0.0 }
 0xc05   :  { %v6429_v4 = vmul.f32 0.5, %v6428_v34 }
 0xc06   :  { %v6688_v12 = vpack.c.bf16 %v6671_v27, %v6670_v22 }
 0xc07   :  { %v6430_v0 = vsub.f32 1.5, %v6429_v4 }
 0xc08   :  { %6779 = vmatmul.bf16.gmra.mxu0 %v6688_v12 }
 0xc09   :  { %v6431_v38 = vmul.f32 %v7833_v42, %v6430_v0 }
 0xc0b   :  { %v6435_v41 = vsel %vm6434_vm0, %v7833_v42, %v6431_v38 }
 0xc0c   :  { %v6500_v21 = vmul.f32 %v6435_v41, %v12173_v15 }
 0xc0e   :  { %v6521_v27 = vmul.f32 %v12056_v43, %v6500_v21 }
 0xc10   :  { %v6542_v34 = vadd.f32 %v12073_v51, %v6521_v27 }
 0xc3d   :  { %v6233_v44 = vpop.xlane.xlu0 %6232 }
 0xc3e   :  { %v6261_v46 = vmul.f32 %v6233_v44, %v13045_v29 }
 0xc40   :  { %v6281_v37 = vadd.f32 1e-05, %v6261_v46 }
 0xc42   :  { %7834 = vrsqrt.f32 %v6281_v37  ;;  %vm6442_vm1 = vweird.f32 %v6281_v37 }
 0xc45   :  { %v6236_v30 = vpop.xlane.xlu2 %6235 }
 0xc46   :  { %v6262_v28 = vmul.f32 %v6236_v30, %v13045_v29 }
 0xc48   :  { %v7835_v56 = vpop.eup %7834  ;;  %v6282_v54 = vadd.f32 1e-05, %v6262_v28 }
 0xc49   :  { %v6437_v31 = vmul.f32 %v7835_v56, %v6281_v37  ;;  %vm6443_vm3 = vweird.f32 %v7835_v56 }
 0xc4a   :  { %7836 = vrsqrt.f32 %v6282_v54  ;;  %vm6444_vm5 = vmor %vm6442_vm1, %vm6443_vm3  ;;  %vm6452_vm8 = vweird.f32 %v6282_v54 }
 0xc4b   :  { %v6438_v39 = vmul.f32 %v7835_v56, %v6437_v31 }
 0xc4d   :  { %v6439_v62 = vmul.f32 0.5, %v6438_v39  ;;  %v6239_v10 = vpop.xlane.xlu1 %6238 }
 0xc4e   :  { %v6263_v60 = vmul.f32 %v6239_v10, %v13045_v29 }
 0xc4f   :  { %v6440_v55 = vsub.f32 1.5, %v6439_v62 }
 0xc50   :  { %v7837_v7 = vpop.eup %7836  ;;  %v6283_v20 = vadd.f32 1e-05, %v6263_v60 }
 0xc51   :  { %v6441_v50 = vmul.f32 %v7835_v56, %v6440_v55  ;;  %v6447_v2 = vmul.f32 %v7837_v7, %v6282_v54  ;;  %vm6453_vm13 = vweird.f32 %v7837_v7 }
 0xc52   :  { %7838 = vrsqrt.f32 %v6283_v20  ;;  %vm6454_vm15 = vmor %vm6452_vm8, %vm6453_vm13  ;;  %vm6462_vm6 = vweird.f32 %v6283_v20 }
 0xc53   :  { %v6445_v40 = vsel %vm6444_vm5, %v7835_v56, %v6441_v50  ;;  %v6448_v8 = vmul.f32 %v7837_v7, %v6447_v2  ;;  %vm13094_vm5 = vmmov %vm13092_vm2 }
 0xc54   :  { %v6501_v32 = vmul.f32 %v6445_v40, %v12197_v36  ;;  %v6631_v22 = vpop.f32.mrf.mxu3  ;;  %vm13095_vm13 = vmmov %vm13092_vm2 }
 0xc55   :  { %v6449_v12 = vmul.f32 0.5, %v6448_v8  ;;  %v6242_v9 = vpop.xlane.xlu0 %6241  ;;  %v6632_v0 = vadd.f32 %v12261_v58, %v6631_v22  ;;  %vm13096_vm8 = vmmov %vm13092_vm2 }
 0xc56   :  { %v6264_v45 = vmul.f32 %v6242_v9, %v13045_v29  ;;  %v6522_v63 = vmul.f32 %v12056_v43, %v6501_v32 }
 0xc57   :  { %v6450_v15 = vsub.f32 1.5, %v6449_v12  ;;  %v6672_v62 = vmax.f32 %v6632_v0, 0.0 }
 0xc58   :  { %v7839_v42 = vpop.eup %7838  ;;  %v6284_v61 = vadd.f32 1e-05, %v6264_v45  ;;  %v6543_v44 = vadd.f32 %v12073_v51, %v6522_v63 }
 0xc59   :  { %v6451_v46 = vmul.f32 %v7837_v7, %v6450_v15  ;;  %v6457_v37 = vmul.f32 %v7839_v42, %v6283_v20  ;;  %vm6463_vm4 = vweird.f32 %v7839_v42 }
 0xc5a   :  { %7840 = vrsqrt.f32 %v6284_v61  ;;  %v6555_v36 = vpack.c.bf16 %v6543_v44, %v6542_v34  ;;  %vm6464_vm7 = vmor %vm6462_vm6, %vm6463_vm4  ;;  %vm6472_vm14 = vweird.f32 %v6284_v61 }
 0xc5b   :  { %v6458_v4 = vmul.f32 %v7839_v42, %v6457_v37  ;;  %v6455_v28 = vsel %vm6454_vm15, %v7837_v7, %v6451_v46  ;;  %v12328_v7 = vld [vmem:[%s12476_s5 + $0x5] ss:$0 sm:$0xff]  ;;  %vm13097_vm15 = vmmov %vm13092_vm2 }
 0xc5c   :  { %v6633_v30 = vpop.f32.mrf.mxu3  ;;  %7075 = vmatmul.msk.bf16.gmra.mxu3 %vm13091_vm9, %v6555_v36  ;;  %v6502_v54 = vmul.f32 %v6455_v28, %v12216_v49  ;;  %vm13098_vm9 = vmmov %vm13092_vm2 }
 0xc5d   :  { %v6459_v56 = vmul.f32 0.5, %v6458_v4  ;;  %v6634_v38 = vadd.f32 %v12261_v58, %v6633_v30  ;;  %v6245_v31 = vpop.xlane.xlu2 %6244  ;;  %vm13099_vm4 = vmmov %vm13092_vm2 }
 0xc5e   :  { %v6265_v39 = vmul.f32 %v6245_v31, %v13045_v29  ;;  %v6523_v49 = vmul.f32 %v12056_v43, %v6502_v54  ;;  %vm13100_vm6 = vmmov %vm13092_vm2 }
 0xc5f   :  { %v6460_v41 = vsub.f32 1.5, %v6459_v56  ;;  %v6673_v10 = vmax.f32 %v6634_v38, 0.0 }
 0xc60   :  { %v7841_v60 = vpop.eup %7840  ;;  %v6285_v55 = vadd.f32 1e-05, %v6265_v39  ;;  %v6544_v15 = vadd.f32 %v12073_v51, %v6523_v49 }
 0xc61   :  { %v6461_v21 = vmul.f32 %v7839_v42, %v6460_v41  ;;  %v6467_v50 = vmul.f32 %v7841_v60, %v6284_v61  ;;  %v6689_v2 = vpack.c.bf16 %v6673_v10, %v6672_v62  ;;  %vm6473_vm10 = vweird.f32 %v7841_v60 }
 0xc62   :  { %7842 = vrsqrt.f32 %v6285_v55  ;;  %vm6474_vm12 = vmor %vm6472_vm14, %vm6473_vm10  ;;  %vm6482_vm3 = vweird.f32 %v6285_v55 }
 0xc63   :  { %v6465_v29 = vsel %vm6464_vm7, %v7839_v42, %v6461_v21  ;;  %v6468_v40 = vmul.f32 %v7841_v60, %v6467_v50  ;;  %6784 = vmatmul.bf16.gmra.mxu0 %v6689_v2  ;;  %vm13101_vm7 = vmmov %vm13092_vm2 }
 0xc64   :  { %v6503_v8 = vmul.f32 %v6465_v29, %v12243_v11  ;;  %v6636_v32 = vpop.f32.mrf.mxu3  ;;  %vm13102_vm10 = vmmov %vm13092_vm2 }
 0xc65   :  { %v6469_v22 = vmul.f32 0.5, %v6468_v40  ;;  %v6770_v27 = vpop.f32.mrf.mxu0  ;;  %v6637_v37 = vadd.f32 %v12261_v58, %v6636_v32  ;;  %vm13103_vm14 = vmmov %vm13092_vm2 }
 0xc66   :  { %v6771_v20 = vadd.f32 %v12328_v7, %v6770_v27  ;;  %v6524_v12 = vmul.f32 %v12056_v43, %v6503_v8 }
 0xc67   :  { %v6470_v9 = vsub.f32 1.5, %v6469_v22  ;;  %v6674_v38 = vmax.f32 %v6637_v37, 0.0 }
 0xc68   :  { %v7843_v45 = vpop.eup %7842  ;;  %v6820_v63 = vadd.f32 %v6771_v20, %v11816_v5  ;;  %v6545_v42 = vadd.f32 %v12073_v51, %v6524_v12 }
 0xc69   :  { %v6471_v34 = vmul.f32 %v7841_v60, %v6470_v9  ;;  %v6477_v11 = vmul.f32 %v7843_v45, %v6285_v55  ;;  %vm6483_vm0 = vweird.f32 %v7843_v45 }
 0xc6a   :  { %6840 = vst.msk [vmem:[%s12482_s7] sm:$0xff] %vm13092_vm2, %v6820_v63  ;;  %v6556_v44 = vpack.c.bf16 %v6545_v42, %v6544_v15  ;;  %vm6484_vm1 = vmor %vm6482_vm3, %vm6483_vm0 }
 0xc6b   :  { %v6478_v46 = vmul.f32 %v7843_v45, %v6477_v11  ;;  %v6475_v5 = vsel %vm6474_vm12, %v7841_v60, %v6471_v34  ;;  %vm13104_vm12 = vmmov %vm13092_vm2 }
 0xc6c   :  { %v6638_v36 = vpop.f32.mrf.mxu3  ;;  %7076 = vmatmul.msk.bf16.gmra.mxu3 %vm13093_vm11, %v6556_v44  ;;  %v6504_v61 = vmul.f32 %v6475_v5, %v12264_v53  ;;  %vm13105_vm11 = vmmov %vm13092_vm2 }
 0xc6d   :  { %v6479_v4 = vmul.f32 0.5, %v6478_v46  ;;  %v6639_v0 = vadd.f32 %v12261_v58, %v6638_v36  ;;  %v6772_v30 = vpop.f32.mrf.mxu0  ;;  %vm13106_vm0 = vmmov %vm13092_vm2 }
 0xc6e   :  { %v6773_v28 = vadd.f32 %v12328_v7, %v6772_v30  ;;  %v6525_v21 = vmul.f32 %v12056_v43, %v6504_v61  ;;  %vm13107_vm3 = vmmov %vm13106_vm0 }
 0xc6f   :  { %v6480_v56 = vsub.f32 1.5, %v6479_v4  ;;  %v6675_v31 = vmax.f32 %v6639_v0, 0.0 }
 0xc70   :  { %v6821_v39 = vadd.f32 %v6773_v28, %v11832_v18  ;;  %v6546_v2 = vadd.f32 %v12073_v51, %v6525_v21 }
 0xc71   :  { %v6481_v41 = vmul.f32 %v7843_v45, %v6480_v56  ;;  %v6690_v62 = vpack.c.bf16 %v6675_v31, %v6674_v38 }
 0xc72   :  { %6841 = vst.msk [vmem:[%s12482_s7 + $0x8] sm:$0xff] %vm13094_vm5, %v6821_v39  ;;  %vm13109_vm5 = vmmov %vm13106_vm0 }
 0xc73   :  { %v6485_v10 = vsel %vm6484_vm1, %v7843_v45, %v6481_v41  ;;  %6789 = vmatmul.bf16.gmra.mxu0 %v6690_v62  ;;  %vm13108_vm1 = vmmov %vm13106_vm0 }
 0xc74   :  { %v6505_v60 = vmul.f32 %v6485_v10, %v12286_v6  ;;  %v6641_v54 = vpop.f32.mrf.mxu3 }
 0xc75   :  { %v6775_v50 = vpop.f32.mrf.mxu0  ;;  %v6642_v40 = vadd.f32 %v12261_v58, %v6641_v54 }
 0xc76   :  { %v6776_v53 = vadd.f32 %v12328_v7, %v6775_v50  ;;  %v6526_v18 = vmul.f32 %v12056_v43, %v6505_v60 }
 0xc77   :  { %v6676_v49 = vmax.f32 %v6642_v40, 0.0 }
 0xc78   :  { %v6822_v55 = vadd.f32 %v6776_v53, %v11841_v52  ;;  %v6547_v29 = vadd.f32 %v12073_v51, %v6526_v18 }
 0xc7a   :  { %6842 = vst.msk [vmem:[%s12482_s7 + $0x10] sm:$0xff] %vm13095_vm13, %v6822_v55  ;;  %v6557_v6 = vpack.c.bf16 %v6547_v29, %v6546_v2  ;;  %vm13110_vm13 = vmmov %vm13106_vm0 }
 0xc7c   :  { %v6643_v8 = vpop.f32.mrf.mxu3  ;;  %7077 = vmatmul.msk.bf16.gmra.mxu3 %vm13096_vm8, %v6557_v6  ;;  %vm13111_vm8 = vmmov %vm13106_vm0 }
 0xc7d   :  { %v6644_v32 = vadd.f32 %v12261_v58, %v6643_v8  ;;  %v6777_v43 = vpop.f32.mrf.mxu0 }
 0xc7e   :  { %v6778_v52 = vadd.f32 %v12328_v7, %v6777_v43 }
 0xc7f   :  { %v6677_v22 = vmax.f32 %v6644_v32, 0.0 }
 0xc80   :  { %v6823_v51 = vadd.f32 %v6778_v52, %v11849_v35 }
 0xc81   :  { %v6691_v27 = vpack.c.bf16 %v6677_v22, %v6676_v49 }
 0xc82   :  { %6843 = vst.msk [vmem:[%s12482_s7 + $0x18] sm:$0xff] %vm13097_vm15, %v6823_v51  ;;  %vm13112_vm15 = vmmov %vm13106_vm0 }
 0xc83   :  { %6794 = vmatmul.bf16.gmra.mxu0 %v6691_v27 }
 0xc84   :  { %v6646_v20 = vpop.f32.mrf.mxu3 }
 0xc85   :  { %v6780_v12 = vpop.f32.mrf.mxu0  ;;  %v6647_v35 = vadd.f32 %v12261_v58, %v6646_v20 }
 0xc86   :  { %v6781_v9 = vadd.f32 %v12328_v7, %v6780_v12 }
 0xc87   :  { %v6678_v11 = vmax.f32 %v6647_v35, 0.0 }
 0xc88   :  { %v6824_v45 = vadd.f32 %v6781_v9, %v11857_v33 }
 0xc8a   :  { %6844 = vst.msk [vmem:[%s12482_s7 + $0x20] sm:$0xff] %vm13098_vm9, %v6824_v45 }
 0xc8c   :  { %v6648_v63 = vpop.f32.mrf.mxu3 }
 0xc8d   :  { %v6649_v15 = vadd.f32 %v12261_v58, %v6648_v63  ;;  %v6782_v42 = vpop.f32.mrf.mxu0 }
 0xc8e   :  { %v6783_v34 = vadd.f32 %v12328_v7, %v6782_v42 }
 0xc8f   :  { %v6679_v44 = vmax.f32 %v6649_v15, 0.0 }
 0xc90   :  { %v6825_v46 = vadd.f32 %v6783_v34, %v11865_v3 }
 0xc91   :  { %v6692_v37 = vpack.c.bf16 %v6679_v44, %v6678_v11 }
 0xc92   :  { %6845 = vst.msk [vmem:[%s12482_s7 + $0x28] sm:$0xff] %vm13099_vm4, %v6825_v46 }
 0xc93   :  { %6799 = vmatmul.bf16.gmra.mxu0 %v6692_v37 }
 0xcdf   :  { %v6651_v33 = vpop.f32.mrf.mxu3 }
 0xce0   :  { %v6785_v36 = vpop.f32.mrf.mxu0  ;;  %v6652_v3 = vadd.f32 %v12261_v58, %v6651_v33 }
 0xce1   :  { %v6786_v5 = vadd.f32 %v12328_v7, %v6785_v36 }
 0xce2   :  { %v6680_v38 = vmax.f32 %v6652_v3, 0.0 }
 0xce3   :  { %v6826_v4 = vadd.f32 %v6786_v5, %v11873_v26 }
 0xce5   :  { %6846 = vst.msk [vmem:[%s12482_s7 + $0x30] sm:$0xff] %vm13100_vm6, %v6826_v4 }
 0xce7   :  { %v6653_v0 = vpop.f32.mrf.mxu3 }
 0xce8   :  { %v6654_v30 = vadd.f32 %v12261_v58, %v6653_v0  ;;  %v6787_v28 = vpop.f32.mrf.mxu0 }
 0xce9   :  { %v6788_v56 = vadd.f32 %v12328_v7, %v6787_v28 }
 0xcea   :  { %v6681_v31 = vmax.f32 %v6654_v30, 0.0 }
 0xceb   :  { %v6827_v61 = vadd.f32 %v6788_v56, %v11907_v48 }
 0xcec   :  { %v6693_v39 = vpack.c.bf16 %v6681_v31, %v6680_v38 }
 0xced   :  { %6847 = vst.msk [vmem:[%s12482_s7 + $0x38] sm:$0xff] %vm13101_vm7, %v6827_v61 }
 0xcee   :  { %6804 = vmatmul.bf16.gmra.mxu0 %v6693_v39 }
 0xcef   :  { %v6656_v26 = vpop.f32.mrf.mxu3 }
 0xcf0   :  { %v6790_v41 = vpop.f32.mrf.mxu0  ;;  %v6657_v48 = vadd.f32 %v12261_v58, %v6656_v26 }
 0xcf1   :  { %v6791_v62 = vadd.f32 %v12328_v7, %v6790_v41 }
 0xcf2   :  { %v6682_v53 = vmax.f32 %v6657_v48, 0.0 }
 0xcf3   :  { %v6828_v10 = vadd.f32 %v6791_v62, %v11922_v24 }
 0xcf5   :  { %6848 = vst.msk [vmem:[%s12482_s7 + $0x40] sm:$0xff] %vm13102_vm10, %v6828_v10 }
 0xcf7   :  { %v6658_v60 = vpop.f32.mrf.mxu3 }
 0xcf8   :  { %v6659_v54 = vadd.f32 %v12261_v58, %v6658_v60  ;;  %v6792_v21 = vpop.f32.mrf.mxu0 }
 0xcf9   :  { %v6793_v50 = vadd.f32 %v12328_v7, %v6792_v21 }
 0xcfa   :  { %v6683_v18 = vmax.f32 %v6659_v54, 0.0 }
 0xcfb   :  { %v6829_v55 = vadd.f32 %v6793_v50, %v11937_v25 }
 0xcfc   :  { %v6694_v2 = vpack.c.bf16 %v6683_v18, %v6682_v53 }
 0xcfd   :  { %6849 = vst.msk [vmem:[%s12482_s7 + $0x48] sm:$0xff] %vm13092_vm2, %v6829_v55 }
 0xcfe   :  { %6809 = vmatmul.bf16.gmra.mxu0 %v6694_v2 }
 0xcff   :  { %v6661_v24 = vpop.f32.mrf.mxu3 }
 0xd00   :  { %v6795_v29 = vpop.f32.mrf.mxu0  ;;  %v6662_v25 = vadd.f32 %v12261_v58, %v6661_v24 }
 0xd01   :  { %v6796_v6 = vadd.f32 %v12328_v7, %v6795_v29 }
 0xd02   :  { %v6684_v49 = vmax.f32 %v6662_v25, 0.0 }
 0xd03   :  { %v6830_v40 = vadd.f32 %v6796_v6, %v11952_v17 }
 0xd05   :  { %6850 = vst.msk [vmem:[%s12482_s7 + $0x50] sm:$0xff] %vm13103_vm14, %v6830_v40 }
 0xd07   :  { %v6663_v8 = vpop.f32.mrf.mxu3 }
 0xd08   :  { %v6664_v32 = vadd.f32 %v12261_v58, %v6663_v8  ;;  %v6797_v43 = vpop.f32.mrf.mxu0 }
 0xd09   :  { %v6798_v52 = vadd.f32 %v12328_v7, %v6797_v43 }
 0xd0a   :  { %v6685_v22 = vmax.f32 %v6664_v32, 0.0 }
 0xd0b   :  { %v6831_v51 = vadd.f32 %v6798_v52, %v11967_v47 }
 0xd0c   :  { %v6695_v27 = vpack.c.bf16 %v6685_v22, %v6684_v49 }
 0xd0d   :  { %6851 = vst.msk [vmem:[%s12482_s7 + $0x58] sm:$0xff] %vm13104_vm12, %v6831_v51 }
 0xd0e   :  { %6814 = vmatmul.bf16.gmra.mxu0 %v6695_v27 }
 0xd10   :  { %v6800_v17 = vpop.f32.mrf.mxu0 }
 0xd11   :  { %v6801_v20 = vadd.f32 %v12328_v7, %v6800_v17 }
 0xd13   :  { %v6832_v12 = vadd.f32 %v6801_v20, %v11982_v19 }
 0xd15   :  { %6852 = vst.msk [vmem:[%s12482_s7 + $0x60] sm:$0xff] %vm13105_vm11, %v6832_v12 }
 0xd18   :  { %v6802_v58 = vpop.f32.mrf.mxu0 }
 0xd19   :  { %v6803_v47 = vadd.f32 %v12328_v7, %v6802_v58 }
 0xd1b   :  { %v6833_v9 = vadd.f32 %v6803_v47, %v11996_v1 }
 0xd1d   :  { %6853 = vst.msk [vmem:[%s12482_s7 + $0x68] sm:$0xff] %vm13106_vm0, %v6833_v9 }
 0xd6b   :  { %v6805_v45 = vpop.f32.mrf.mxu0 }
 0xd6c   :  { %v6806_v35 = vadd.f32 %v12328_v7, %v6805_v45 }
 0xd6e   :  { %v6834_v19 = vadd.f32 %v6806_v35, %v12004_v13 }
 0xd70   :  { %6854 = vst.msk [vmem:[%s12482_s7 + $0x70] sm:$0xff] %vm13107_vm3, %v6834_v19 }
 0xd73   :  { %v6807_v63 = vpop.f32.mrf.mxu0 }
 0xd74   :  { %v6808_v15 = vadd.f32 %v12328_v7, %v6807_v63 }
 0xd76   :  { %v6835_v1 = vadd.f32 %v6808_v15, %v12048_v23 }
 0xd78   :  { %6855 = vst.msk [vmem:[%s12482_s7 + $0x78] sm:$0xff] %vm13108_vm1, %v6835_v1 }
 0xd7b   :  { %v6810_v42 = vpop.f32.mrf.mxu0 }
 0xd7c   :  { %v6811_v34 = vadd.f32 %v12328_v7, %v6810_v42 }
 0xd7e   :  { %v6836_v13 = vadd.f32 %v6811_v34, %v12084_v16 }
 0xd80   :  { %6856 = vst.msk [vmem:[%s12482_s7 + $0x80] sm:$0xff] %vm13109_vm5, %v6836_v13 }
 0xd83   :  { %v6812_v11 = vpop.f32.mrf.mxu0 }
 0xd84   :  { %v6813_v44 = vadd.f32 %v12328_v7, %v6812_v11 }
 0xd86   :  { %v6837_v23 = vadd.f32 %v6813_v44, %v12117_v14 }
 0xd88   :  { %6857 = vst.msk [vmem:[%s12482_s7 + $0x88] sm:$0xff] %vm13110_vm13, %v6837_v23 }
 0xd8b   :  { %v6815_v46 = vpop.f32.mrf.mxu0 }
 0xd8c   :  { %v6816_v37 = vadd.f32 %v12328_v7, %v6815_v46 }
 0xd8e   :  { %v6838_v16 = vadd.f32 %v6816_v37, %v12138_v57 }
 0xd90   :  { %6858 = vst.msk [vmem:[%s12482_s7 + $0x90] sm:$0xff] %vm13111_vm8, %v6838_v16 }
 0xd93   :  { %v6817_v33 = vpop.f32.mrf.mxu0 }
 0xd94   :  { %v6818_v36 = vadd.f32 %v12328_v7, %v6817_v33 }
 0xd96   :  { %v6839_v14 = vadd.f32 %v6818_v36, %v12157_v59 }
 0xd98   :  { %6859 = vst.msk [vmem:[%s12482_s7 + $0x98] sm:$0xff] %vm13112_vm15, %v6839_v14 }

</bundles_post_ra>
